<compile_context>
chip_gen: v6e
topology: v6e:2x2x1
jax: 0.10.0
libtpu: 0.0.40
codegen_flags: <defaults>
</compile_context>

<pallas_src>
import functools

import jax
import jax.numpy as jnp
from jax.experimental import pallas as pl
from jax.experimental.pallas import tpu as pltpu


_CT = 128            # output-channel tile (lane-dense)
_EPS = 1e-5          # nn.InstanceNorm2d default eps
_SLOPE = 0.2         # LeakyReLU negative slope


def _round_up(x, m):
    return (x + m - 1) // m * m


# ----------------------------------------------------------------------------
# Pallas kernel: 4x4 conv (shift-and-matmul) + bias [+ InstanceNorm] [+ LReLU]
# ----------------------------------------------------------------------------

def _make_conv_kernel(ksize, stride, ho, wo, wps, mode):
    """mode in {"lrelu", "in_lrelu", "none"}."""
    m = ho * wps          # output rows per image; wps - wo garbage cols per row

    def kernel(x_ref, w_ref, b_ref, o_ref, acc_ref):
        # x_ref : (stride*stride, Lp, Cin)  bf16 flattened stride-phase planes
        # w_ref : (ksize*ksize, Cin, CT)    bf16 packed weights (one Cout tile)
        # b_ref : (1, CT)                   f32 bias
        # o_ref : (1, m, CT)                output tile
        # acc_ref: (m, CT)                  f32 VMEM accumulator
        acc_ref[...] = jnp.zeros_like(acc_ref)
        for kh in range(ksize):
            for kw in range(ksize):
                ph = (kh % stride) * stride + (kw % stride)
                shift = (kh // stride) * wps + (kw // stride)
                lhs = x_ref[ph, shift:shift + m, :]           # (m, Cin) bf16
                acc_ref[...] += jnp.dot(lhs, w_ref[kh * ksize + kw],
                                        preferred_element_type=jnp.float32)
        z = acc_ref[...] + b_ref[...]                          # (m, CT) f32

        if mode == "in_lrelu":
            # InstanceNorm2d (affine=False, biased var, eps=1e-5) over the
            # ho*wo valid pixels; mask out the wps-wo padding columns.
            col = jax.lax.broadcasted_iota(jnp.int32, (m, 1), 0) % wps
            valid = col < wo
            inv_cnt = 1.0 / float(ho * wo)
            mean = jnp.sum(jnp.where(valid, z, 0.0), axis=0,
                           keepdims=True) * inv_cnt
            cent = z - mean
            cm = jnp.where(valid, cent, 0.0)
            var = jnp.sum(cm * cm, axis=0, keepdims=True) * inv_cnt
            z = cent * jax.lax.rsqrt(var + _EPS)

        if mode in ("lrelu", "in_lrelu"):
            z = jnp.where(z > 0, z, _SLOPE * z)

        o_ref[0] = z.astype(o_ref.dtype)

    return kernel


# ----------------------------------------------------------------------------
# Wrapper: spatial pad + stride-phase decomposition + pallas_call
# ----------------------------------------------------------------------------

def conv_block(x_nhwc, w_packed, b_packed, *, stride, pad, mode, out_dtype):
    """x: (N,H,W,Cin) NHWC -> (N,Ho,Wo,Cp) with Cp = w_packed.shape[2]."""
    ksize2, cin_w, cp = w_packed.shape
    ksize = int(round(ksize2 ** 0.5))
    n, h, w, cin = x_nhwc.shape
    if cin < cin_w:                                    # zero-pad input channels
        x_nhwc = jnp.pad(x_nhwc, ((0, 0), (0, 0), (0, 0), (0, cin_w - cin)))
    cin = cin_w

    ho = (h + 2 * pad - ksize) // stride + 1
    wo = (w + 2 * pad - ksize) // stride + 1
    ext = -(-ksize // stride)                          # ceil(ksize / stride)
    hps, wps = ho - 1 + ext, wo - 1 + ext
    hp2, wp2 = stride * hps, stride * wps
    m = ho * wps
    lp = hps * wps + wps                               # slack rows for tap shifts

    # Spatial zero-pad, decompose into stride-phases, flatten spatial dims.
    # Pure rearrangement in XLA -- no k*k im2col expansion through HBM.
    xp = jnp.pad(x_nhwc.astype(jnp.bfloat16),
                 ((0, 0), (pad, hp2 - h - pad), (pad, wp2 - w - pad), (0, 0)))
    planes = xp.reshape(n, hps, stride, wps, stride, cin)
    planes = planes.transpose(0, 2, 4, 1, 3, 5)
    planes = planes.reshape(n, stride * stride, hps * wps, cin)
    planes = jnp.pad(planes, ((0, 0), (0, 0), (0, wps), (0, 0)))
    planes = planes.reshape(n * stride * stride, lp, cin)

    out = pl.pallas_call(
        _make_conv_kernel(ksize, stride, ho, wo, wps, mode),
        out_shape=jax.ShapeDtypeStruct((n, m, cp), out_dtype),
        grid=(n, cp // _CT),
        in_specs=[
            pl.BlockSpec((stride * stride, lp, cin), lambda i, j: (i, 0, 0)),
            pl.BlockSpec((ksize2, cin, _CT), lambda i, j: (0, 0, j)),
            pl.BlockSpec((1, _CT), lambda i, j: (0, j)),
        ],
        out_specs=pl.BlockSpec((1, m, _CT), lambda i, j: (i, 0, j)),
        scratch_shapes=[pltpu.VMEM((m, _CT), jnp.float32)],
        compiler_params=pltpu.CompilerParams(
            dimension_semantics=("parallel", "parallel"),
            vmem_limit_bytes=32 * 1024 * 1024,
        ),
    )(planes, w_packed, b_packed)

    # (N, Ho*Wps, Cp) -> (N, Ho, Wo, Cp): drop the Wps-Wo garbage columns.
    return out.reshape(n, ho, wps, cp)[:, :, :wo, :]


# ----------------------------------------------------------------------------
# Parameters: synthetic init (PyTorch layout) + one-time packing
# ----------------------------------------------------------------------------

def init_patch_discriminator_params(key, in_channels=1, base_channels=64,
                                    num_layers=5):
    """Deterministic synthetic init matching the module's conv shapes."""
    specs = [(in_channels, base_channels)]
    c = base_channels
    for i in range(1, num_layers):
        nxt = min(c * 2, 512)
        specs.append((c, nxt))
        c = nxt
    specs.append((c, 1))

    params = []
    for cin, cout in specs:
        key, k_w, k_b = jax.random.split(key, 3)
        fan_out = cout * 4 * 4
        std = (2.0 / (fan_out * (1.0 + _SLOPE ** 2))) ** 0.5   # kaiming, fan_out
        w = std * jax.random.normal(k_w, (cout, cin, 4, 4), jnp.float32)
        b = 0.01 * jax.random.normal(k_b, (cout,), jnp.float32)
        params.append({"w": w, "b": b})
    return params


def pack_params(params, in_channels):
    """(Cout,Cin,4,4) f32 -> (16, Cin_pad, Cout_pad) bf16 + (1, Cout_pad) f32 bias.

    Done once, outside the jitted forward (amortized weight repack)."""
    packed = []
    cin_pad = _round_up(in_channels, 8)
    for p in params:
        w, b = p["w"], p["b"]
        cout, cin, k, _ = w.shape
        cout_pad = _round_up(cout, _CT)
        wp = jnp.transpose(w, (2, 3, 1, 0)).reshape(k * k, cin, cout)
        wp = jnp.pad(wp, ((0, 0), (0, cin_pad - cin), (0, cout_pad - cout)))
        bp = jnp.pad(b, (0, cout_pad - cout)).reshape(1, cout_pad)
        packed.append((wp.astype(jnp.bfloat16), bp.astype(jnp.float32)))
        cin_pad = cout_pad            # next layer consumes the padded activation
    return packed


# ----------------------------------------------------------------------------
# Forward
# ----------------------------------------------------------------------------

@functools.partial(jax.jit, static_argnames=("num_layers",))
def patch_discriminator_forward(x_nchw, packed_params, num_layers=5):
    x = jnp.transpose(x_nchw, (0, 2, 3, 1))            # NCHW -> NHWC

    # layer 0: Conv(s=2) + LeakyReLU(0.2)  (fused epilogue)
    w, b = packed_params[0]
    x = conv_block(x, w, b, stride=2, pad=1, mode="lrelu",
                   out_dtype=jnp.bfloat16)

    # layers 1..num_layers-1: Conv + InstanceNorm + LeakyReLU (fully fused)
    for i in range(1, num_layers):
        stride = 1 if i == num_layers - 1 else 2
        w, b = packed_params[i]
        x = conv_block(x, w, b, stride=stride, pad=1, mode="in_lrelu",
                       out_dtype=jnp.bfloat16)

    # patch head: Conv(s=1) -> 1 channel (channel 0 of the 128-padded tile)
    w, b = packed_params[num_layers]
    x = conv_block(x, w, b, stride=1, pad=1, mode="none",
                   out_dtype=jnp.float32)
    x = x[:, :, :, :1]
    return jnp.transpose(x, (0, 3, 1, 2))              # back to NCHW


# ----------------------------------------------------------------------------
# Main
# ----------------------------------------------------------------------------

if __name__ == "__main__":
    # Small config consistent with the module: PatchDiscriminator(
    #   in_channels=1, base_channels=16, num_layers=3)
    IN_CHANNELS, BASE_CHANNELS, NUM_LAYERS = 1, 16, 3

    key = jax.random.PRNGKey(0)
    key, kx, kp = jax.random.split(key, 3)

    # Input: NCHW, batch=2, spatial=16 (16 -> 8 -> 4 -> 3 -> 2)
    x = jax.random.normal(kx, (2, IN_CHANNELS, 16, 16), jnp.float32)
    params = init_patch_discriminator_params(
        kp, in_channels=IN_CHANNELS, base_channels=BASE_CHANNELS,
        num_layers=NUM_LAYERS)
    packed = pack_params(params, IN_CHANNELS)          # one-time weight repack

    out = patch_discriminator_forward(x, packed, num_layers=NUM_LAYERS)
    out = jax.block_until_ready(out)

    assert out.shape == (2, 1, 2, 2), out.shape
    assert bool(jnp.all(jnp.isfinite(out)))
    print("KERNEL_OK")
</pallas_src>

<mosaic_0001>
module attributes {stable_mosaic.version = 11 : i64} {
  func.func @kernel(%arg0: i32, %arg1: i32, %arg2: memref<4x90x8xbf16, #tpu.memory_space<vmem>>, %arg3: memref<16x8x128xbf16, #tpu.memory_space<vmem>>, %arg4: memref<1x128xf32, #tpu.memory_space<vmem>>, %arg5: memref<1x72x128xbf16, #tpu.memory_space<vmem>>, %arg6: memref<72x128xf32, #tpu.memory_space<vmem>>) attributes {dimension_semantics = [#tpu.dimension_semantics<parallel>, #tpu.dimension_semantics<parallel>], iteration_bounds = array<i64: 2, 1>, scalar_prefetch = 0 : i64, scratch_operands = 1 : i64, tpu.core_type = #tpu.core_type<tc>, window_params = [{transform_indices = @transform_0, window_bounds = array<i64: 4, 90, 8>}, {transform_indices = @transform_1, window_bounds = array<i64: 16, 8, 128>}, {transform_indices = @transform_2, window_bounds = array<i64: 1, 128>}, {transform_indices = @transform_3, window_bounds = array<i64: 1, 72, 128>}]} {
    %cst = arith.constant 0.000000e+00 : f32
    %0 = vector.broadcast %cst : f32 to vector<72x128xf32>
    %c0 = arith.constant 0 : index
    %c0_0 = arith.constant 0 : index
    %1 = vector.load %arg6[%c0, %c0_0] : memref<72x128xf32, #tpu.memory_space<vmem>>, vector<72x128xf32>
    tpu.vector_store %arg6[%c0, %c0_0], %0 {strides = array<i32>} : memref<72x128xf32, #tpu.memory_space<vmem>>, vector<72x128xf32>,
    %c0_1 = arith.constant 0 : index
    %c0_2 = arith.constant 0 : index
    %c0_3 = arith.constant 0 : index
    %2 = vector.load %arg2[%c0_1, %c0_2, %c0_3] : memref<4x90x8xbf16, #tpu.memory_space<vmem>>, vector<1x72x8xbf16>
    %3 = vector.shape_cast %2 : vector<1x72x8xbf16> to vector<72x8xbf16>
    %c0_4 = arith.constant 0 : index
    %c0_5 = arith.constant 0 : index
    %4 = vector.load %arg6[%c0_4, %c0_5] : memref<72x128xf32, #tpu.memory_space<vmem>>, vector<72x128xf32>
    %c0_6 = arith.constant 0 : index
    %c0_7 = arith.constant 0 : index
    %c0_8 = arith.constant 0 : index
    %5 = vector.load %arg3[%c0_6, %c0_7, %c0_8] : memref<16x8x128xbf16, #tpu.memory_space<vmem>>, vector<1x8x128xbf16>
    %6 = vector.shape_cast %5 : vector<1x8x128xbf16> to vector<8x128xbf16>
    %cst_9 = arith.constant dense<0.000000e+00> : vector<72x128xf32>
    %7 = tpu.matmul %3, %6, %cst_9 {dimension_numbers = #tpu.dot_dimension_numbers<[1], [0], [0], [1], [0, 0, 1, 1], [], []>} : vector<72x8xbf16>, vector<8x128xbf16>, vector<72x128xf32> -> vector<72x128xf32>
    %8 = arith.addf %4, %7 : vector<72x128xf32>
    %c0_10 = arith.constant 0 : index
    %c0_11 = arith.constant 0 : index
    %9 = vector.load %arg6[%c0_10, %c0_11] : memref<72x128xf32, #tpu.memory_space<vmem>>, vector<72x128xf32>
    tpu.vector_store %arg6[%c0_10, %c0_11], %8 {strides = array<i32>} : memref<72x128xf32, #tpu.memory_space<vmem>>, vector<72x128xf32>,
    %c1 = arith.constant 1 : index
    %c0_12 = arith.constant 0 : index
    %c0_13 = arith.constant 0 : index
    %10 = vector.load %arg2[%c1, %c0_12, %c0_13] : memref<4x90x8xbf16, #tpu.memory_space<vmem>>, vector<1x72x8xbf16>
    %11 = vector.shape_cast %10 : vector<1x72x8xbf16> to vector<72x8xbf16>
    %c0_14 = arith.constant 0 : index
    %c0_15 = arith.constant 0 : index
    %12 = vector.load %arg6[%c0_14, %c0_15] : memref<72x128xf32, #tpu.memory_space<vmem>>, vector<72x128xf32>
    %c1_16 = arith.constant 1 : index
    %c0_17 = arith.constant 0 : index
    %c0_18 = arith.constant 0 : index
    %13 = vector.load %arg3[%c1_16, %c0_17, %c0_18] : memref<16x8x128xbf16, #tpu.memory_space<vmem>>, vector<1x8x128xbf16>
    %14 = vector.shape_cast %13 : vector<1x8x128xbf16> to vector<8x128xbf16>
    %cst_19 = arith.constant dense<0.000000e+00> : vector<72x128xf32>
    %15 = tpu.matmul %11, %14, %cst_19 {dimension_numbers = #tpu.dot_dimension_numbers<[1], [0], [0], [1], [0, 0, 1, 1], [], []>} : vector<72x8xbf16>, vector<8x128xbf16>, vector<72x128xf32> -> vector<72x128xf32>
    %16 = arith.addf %12, %15 : vector<72x128xf32>
    %c0_20 = arith.constant 0 : index
    %c0_21 = arith.constant 0 : index
    %17 = vector.load %arg6[%c0_20, %c0_21] : memref<72x128xf32, #tpu.memory_space<vmem>>, vector<72x128xf32>
    tpu.vector_store %arg6[%c0_20, %c0_21], %16 {strides = array<i32>} : memref<72x128xf32, #tpu.memory_space<vmem>>, vector<72x128xf32>,
    %c0_22 = arith.constant 0 : index
    %c1_23 = arith.constant 1 : index
    %c0_24 = arith.constant 0 : index
    %18 = vector.load %arg2[%c0_22, %c1_23, %c0_24] : memref<4x90x8xbf16, #tpu.memory_space<vmem>>, vector<1x72x8xbf16>
    %19 = vector.shape_cast %18 : vector<1x72x8xbf16> to vector<72x8xbf16>
    %c0_25 = arith.constant 0 : index
    %c0_26 = arith.constant 0 : index
    %20 = vector.load %arg6[%c0_25, %c0_26] : memref<72x128xf32, #tpu.memory_space<vmem>>, vector<72x128xf32>
    %c2 = arith.constant 2 : index
    %c0_27 = arith.constant 0 : index
    %c0_28 = arith.constant 0 : index
    %21 = vector.load %arg3[%c2, %c0_27, %c0_28] : memref<16x8x128xbf16, #tpu.memory_space<vmem>>, vector<1x8x128xbf16>
    %22 = vector.shape_cast %21 : vector<1x8x128xbf16> to vector<8x128xbf16>
    %cst_29 = arith.constant dense<0.000000e+00> : vector<72x128xf32>
    %23 = tpu.matmul %19, %22, %cst_29 {dimension_numbers = #tpu.dot_dimension_numbers<[1], [0], [0], [1], [0, 0, 1, 1], [], []>} : vector<72x8xbf16>, vector<8x128xbf16>, vector<72x128xf32> -> vector<72x128xf32>
    %24 = arith.addf %20, %23 : vector<72x128xf32>
    %c0_30 = arith.constant 0 : index
    %c0_31 = arith.constant 0 : index
    %25 = vector.load %arg6[%c0_30, %c0_31] : memref<72x128xf32, #tpu.memory_space<vmem>>, vector<72x128xf32>
    tpu.vector_store %arg6[%c0_30, %c0_31], %24 {strides = array<i32>} : memref<72x128xf32, #tpu.memory_space<vmem>>, vector<72x128xf32>,
    %c1_32 = arith.constant 1 : index
    %c1_33 = arith.constant 1 : index
    %c0_34 = arith.constant 0 : index
    %26 = vector.load %arg2[%c1_32, %c1_33, %c0_34] : memref<4x90x8xbf16, #tpu.memory_space<vmem>>, vector<1x72x8xbf16>
    %27 = vector.shape_cast %26 : vector<1x72x8xbf16> to vector<72x8xbf16>
    %c0_35 = arith.constant 0 : index
    %c0_36 = arith.constant 0 : index
    %28 = vector.load %arg6[%c0_35, %c0_36] : memref<72x128xf32, #tpu.memory_space<vmem>>, vector<72x128xf32>
    %c3 = arith.constant 3 : index
    %c0_37 = arith.constant 0 : index
    %c0_38 = arith.constant 0 : index
    %29 = vector.load %arg3[%c3, %c0_37, %c0_38] : memref<16x8x128xbf16, #tpu.memory_space<vmem>>, vector<1x8x128xbf16>
    %30 = vector.shape_cast %29 : vector<1x8x128xbf16> to vector<8x128xbf16>
    %cst_39 = arith.constant dense<0.000000e+00> : vector<72x128xf32>
    %31 = tpu.matmul %27, %30, %cst_39 {dimension_numbers = #tpu.dot_dimension_numbers<[1], [0], [0], [1], [0, 0, 1, 1], [], []>} : vector<72x8xbf16>, vector<8x128xbf16>, vector<72x128xf32> -> vector<72x128xf32>
    %32 = arith.addf %28, %31 : vector<72x128xf32>
    %c0_40 = arith.constant 0 : index
    %c0_41 = arith.constant 0 : index
    %33 = vector.load %arg6[%c0_40, %c0_41] : memref<72x128xf32, #tpu.memory_space<vmem>>, vector<72x128xf32>
    tpu.vector_store %arg6[%c0_40, %c0_41], %32 {strides = array<i32>} : memref<72x128xf32, #tpu.memory_space<vmem>>, vector<72x128xf32>,
    %c2_42 = arith.constant 2 : index
    %c0_43 = arith.constant 0 : index
    %c0_44 = arith.constant 0 : index
    %34 = vector.load %arg2[%c2_42, %c0_43, %c0_44] : memref<4x90x8xbf16, #tpu.memory_space<vmem>>, vector<1x72x8xbf16>
    %35 = vector.shape_cast %34 : vector<1x72x8xbf16> to vector<72x8xbf16>
    %c0_45 = arith.constant 0 : index
    %c0_46 = arith.constant 0 : index
    %36 = vector.load %arg6[%c0_45, %c0_46] : memref<72x128xf32, #tpu.memory_space<vmem>>, vector<72x128xf32>
    %c4 = arith.constant 4 : index
    %c0_47 = arith.constant 0 : index
    %c0_48 = arith.constant 0 : index
    %37 = vector.load %arg3[%c4, %c0_47, %c0_48] : memref<16x8x128xbf16, #tpu.memory_space<vmem>>, vector<1x8x128xbf16>
    %38 = vector.shape_cast %37 : vector<1x8x128xbf16> to vector<8x128xbf16>
    %cst_49 = arith.constant dense<0.000000e+00> : vector<72x128xf32>
    %39 = tpu.matmul %35, %38, %cst_49 {dimension_numbers = #tpu.dot_dimension_numbers<[1], [0], [0], [1], [0, 0, 1, 1], [], []>} : vector<72x8xbf16>, vector<8x128xbf16>, vector<72x128xf32> -> vector<72x128xf32>
    %40 = arith.addf %36, %39 : vector<72x128xf32>
    %c0_50 = arith.constant 0 : index
    %c0_51 = arith.constant 0 : index
    %41 = vector.load %arg6[%c0_50, %c0_51] : memref<72x128xf32, #tpu.memory_space<vmem>>, vector<72x128xf32>
    tpu.vector_store %arg6[%c0_50, %c0_51], %40 {strides = array<i32>} : memref<72x128xf32, #tpu.memory_space<vmem>>, vector<72x128xf32>,
    %c3_52 = arith.constant 3 : index
    %c0_53 = arith.constant 0 : index
    %c0_54 = arith.constant 0 : index
    %42 = vector.load %arg2[%c3_52, %c0_53, %c0_54] : memref<4x90x8xbf16, #tpu.memory_space<vmem>>, vector<1x72x8xbf16>
    %43 = vector.shape_cast %42 : vector<1x72x8xbf16> to vector<72x8xbf16>
    %c0_55 = arith.constant 0 : index
    %c0_56 = arith.constant 0 : index
    %44 = vector.load %arg6[%c0_55, %c0_56] : memref<72x128xf32, #tpu.memory_space<vmem>>, vector<72x128xf32>
    %c5 = arith.constant 5 : index
    %c0_57 = arith.constant 0 : index
    %c0_58 = arith.constant 0 : index
    %45 = vector.load %arg3[%c5, %c0_57, %c0_58] : memref<16x8x128xbf16, #tpu.memory_space<vmem>>, vector<1x8x128xbf16>
    %46 = vector.shape_cast %45 : vector<1x8x128xbf16> to vector<8x128xbf16>
    %cst_59 = arith.constant dense<0.000000e+00> : vector<72x128xf32>
    %47 = tpu.matmul %43, %46, %cst_59 {dimension_numbers = #tpu.dot_dimension_numbers<[1], [0], [0], [1], [0, 0, 1, 1], [], []>} : vector<72x8xbf16>, vector<8x128xbf16>, vector<72x128xf32> -> vector<72x128xf32>
    %48 = arith.addf %44, %47 : vector<72x128xf32>
    %c0_60 = arith.constant 0 : index
    %c0_61 = arith.constant 0 : index
    %49 = vector.load %arg6[%c0_60, %c0_61] : memref<72x128xf32, #tpu.memory_space<vmem>>, vector<72x128xf32>
    tpu.vector_store %arg6[%c0_60, %c0_61], %48 {strides = array<i32>} : memref<72x128xf32, #tpu.memory_space<vmem>>, vector<72x128xf32>,
    %c2_62 = arith.constant 2 : index
    %c1_63 = arith.constant 1 : index
    %c0_64 = arith.constant 0 : index
    %50 = vector.load %arg2[%c2_62, %c1_63, %c0_64] : memref<4x90x8xbf16, #tpu.memory_space<vmem>>, vector<1x72x8xbf16>
    %51 = vector.shape_cast %50 : vector<1x72x8xbf16> to vector<72x8xbf16>
    %c0_65 = arith.constant 0 : index
    %c0_66 = arith.constant 0 : index
    %52 = vector.load %arg6[%c0_65, %c0_66] : memref<72x128xf32, #tpu.memory_space<vmem>>, vector<72x128xf32>
    %c6 = arith.constant 6 : index
    %c0_67 = arith.constant 0 : index
    %c0_68 = arith.constant 0 : index
    %53 = vector.load %arg3[%c6, %c0_67, %c0_68] : memref<16x8x128xbf16, #tpu.memory_space<vmem>>, vector<1x8x128xbf16>
    %54 = vector.shape_cast %53 : vector<1x8x128xbf16> to vector<8x128xbf16>
    %cst_69 = arith.constant dense<0.000000e+00> : vector<72x128xf32>
    %55 = tpu.matmul %51, %54, %cst_69 {dimension_numbers = #tpu.dot_dimension_numbers<[1], [0], [0], [1], [0, 0, 1, 1], [], []>} : vector<72x8xbf16>, vector<8x128xbf16>, vector<72x128xf32> -> vector<72x128xf32>
    %56 = arith.addf %52, %55 : vector<72x128xf32>
    %c0_70 = arith.constant 0 : index
    %c0_71 = arith.constant 0 : index
    %57 = vector.load %arg6[%c0_70, %c0_71] : memref<72x128xf32, #tpu.memory_space<vmem>>, vector<72x128xf32>
    tpu.vector_store %arg6[%c0_70, %c0_71], %56 {strides = array<i32>} : memref<72x128xf32, #tpu.memory_space<vmem>>, vector<72x128xf32>,
    %c3_72 = arith.constant 3 : index
    %c1_73 = arith.constant 1 : index
    %c0_74 = arith.constant 0 : index
    %58 = vector.load %arg2[%c3_72, %c1_73, %c0_74] : memref<4x90x8xbf16, #tpu.memory_space<vmem>>, vector<1x72x8xbf16>
    %59 = vector.shape_cast %58 : vector<1x72x8xbf16> to vector<72x8xbf16>
    %c0_75 = arith.constant 0 : index
    %c0_76 = arith.constant 0 : index
    %60 = vector.load %arg6[%c0_75, %c0_76] : memref<72x128xf32, #tpu.memory_space<vmem>>, vector<72x128xf32>
    %c7 = arith.constant 7 : index
    %c0_77 = arith.constant 0 : index
    %c0_78 = arith.constant 0 : index
    %61 = vector.load %arg3[%c7, %c0_77, %c0_78] : memref<16x8x128xbf16, #tpu.memory_space<vmem>>, vector<1x8x128xbf16>
    %62 = vector.shape_cast %61 : vector<1x8x128xbf16> to vector<8x128xbf16>
    %cst_79 = arith.constant dense<0.000000e+00> : vector<72x128xf32>
    %63 = tpu.matmul %59, %62, %cst_79 {dimension_numbers = #tpu.dot_dimension_numbers<[1], [0], [0], [1], [0, 0, 1, 1], [], []>} : vector<72x8xbf16>, vector<8x128xbf16>, vector<72x128xf32> -> vector<72x128xf32>
    %64 = arith.addf %60, %63 : vector<72x128xf32>
    %c0_80 = arith.constant 0 : index
    %c0_81 = arith.constant 0 : index
    %65 = vector.load %arg6[%c0_80, %c0_81] : memref<72x128xf32, #tpu.memory_space<vmem>>, vector<72x128xf32>
    tpu.vector_store %arg6[%c0_80, %c0_81], %64 {strides = array<i32>} : memref<72x128xf32, #tpu.memory_space<vmem>>, vector<72x128xf32>,
    %c0_82 = arith.constant 0 : index
    %c9 = arith.constant 9 : index
    %c0_83 = arith.constant 0 : index
    %66 = vector.load %arg2[%c0_82, %c9, %c0_83] : memref<4x90x8xbf16, #tpu.memory_space<vmem>>, vector<1x72x8xbf16>
    %67 = vector.shape_cast %66 : vector<1x72x8xbf16> to vector<72x8xbf16>
    %c0_84 = arith.constant 0 : index
    %c0_85 = arith.constant 0 : index
    %68 = vector.load %arg6[%c0_84, %c0_85] : memref<72x128xf32, #tpu.memory_space<vmem>>, vector<72x128xf32>
    %c8 = arith.constant 8 : index
    %c0_86 = arith.constant 0 : index
    %c0_87 = arith.constant 0 : index
    %69 = vector.load %arg3[%c8, %c0_86, %c0_87] : memref<16x8x128xbf16, #tpu.memory_space<vmem>>, vector<1x8x128xbf16>
    %70 = vector.shape_cast %69 : vector<1x8x128xbf16> to vector<8x128xbf16>
    %cst_88 = arith.constant dense<0.000000e+00> : vector<72x128xf32>
    %71 = tpu.matmul %67, %70, %cst_88 {dimension_numbers = #tpu.dot_dimension_numbers<[1], [0], [0], [1], [0, 0, 1, 1], [], []>} : vector<72x8xbf16>, vector<8x128xbf16>, vector<72x128xf32> -> vector<72x128xf32>
    %72 = arith.addf %68, %71 : vector<72x128xf32>
    %c0_89 = arith.constant 0 : index
    %c0_90 = arith.constant 0 : index
    %73 = vector.load %arg6[%c0_89, %c0_90] : memref<72x128xf32, #tpu.memory_space<vmem>>, vector<72x128xf32>
    tpu.vector_store %arg6[%c0_89, %c0_90], %72 {strides = array<i32>} : memref<72x128xf32, #tpu.memory_space<vmem>>, vector<72x128xf32>,
    %c1_91 = arith.constant 1 : index
    %c9_92 = arith.constant 9 : index
    %c0_93 = arith.constant 0 : index
    %74 = vector.load %arg2[%c1_91, %c9_92, %c0_93] : memref<4x90x8xbf16, #tpu.memory_space<vmem>>, vector<1x72x8xbf16>
    %75 = vector.shape_cast %74 : vector<1x72x8xbf16> to vector<72x8xbf16>
    %c0_94 = arith.constant 0 : index
    %c0_95 = arith.constant 0 : index
    %76 = vector.load %arg6[%c0_94, %c0_95] : memref<72x128xf32, #tpu.memory_space<vmem>>, vector<72x128xf32>
    %c9_96 = arith.constant 9 : index
    %c0_97 = arith.constant 0 : index
    %c0_98 = arith.constant 0 : index
    %77 = vector.load %arg3[%c9_96, %c0_97, %c0_98] : memref<16x8x128xbf16, #tpu.memory_space<vmem>>, vector<1x8x128xbf16>
    %78 = vector.shape_cast %77 : vector<1x8x128xbf16> to vector<8x128xbf16>
    %cst_99 = arith.constant dense<0.000000e+00> : vector<72x128xf32>
    %79 = tpu.matmul %75, %78, %cst_99 {dimension_numbers = #tpu.dot_dimension_numbers<[1], [0], [0], [1], [0, 0, 1, 1], [], []>} : vector<72x8xbf16>, vector<8x128xbf16>, vector<72x128xf32> -> vector<72x128xf32>
    %80 = arith.addf %76, %79 : vector<72x128xf32>
    %c0_100 = arith.constant 0 : index
    %c0_101 = arith.constant 0 : index
    %81 = vector.load %arg6[%c0_100, %c0_101] : memref<72x128xf32, #tpu.memory_space<vmem>>, vector<72x128xf32>
    tpu.vector_store %arg6[%c0_100, %c0_101], %80 {strides = array<i32>} : memref<72x128xf32, #tpu.memory_space<vmem>>, vector<72x128xf32>,
    %c0_102 = arith.constant 0 : index
    %c10 = arith.constant 10 : index
    %c0_103 = arith.constant 0 : index
    %82 = vector.load %arg2[%c0_102, %c10, %c0_103] : memref<4x90x8xbf16, #tpu.memory_space<vmem>>, vector<1x72x8xbf16>
    %83 = vector.shape_cast %82 : vector<1x72x8xbf16> to vector<72x8xbf16>
    %c0_104 = arith.constant 0 : index
    %c0_105 = arith.constant 0 : index
    %84 = vector.load %arg6[%c0_104, %c0_105] : memref<72x128xf32, #tpu.memory_space<vmem>>, vector<72x128xf32>
    %c10_106 = arith.constant 10 : index
    %c0_107 = arith.constant 0 : index
    %c0_108 = arith.constant 0 : index
    %85 = vector.load %arg3[%c10_106, %c0_107, %c0_108] : memref<16x8x128xbf16, #tpu.memory_space<vmem>>, vector<1x8x128xbf16>
    %86 = vector.shape_cast %85 : vector<1x8x128xbf16> to vector<8x128xbf16>
    %cst_109 = arith.constant dense<0.000000e+00> : vector<72x128xf32>
    %87 = tpu.matmul %83, %86, %cst_109 {dimension_numbers = #tpu.dot_dimension_numbers<[1], [0], [0], [1], [0, 0, 1, 1], [], []>} : vector<72x8xbf16>, vector<8x128xbf16>, vector<72x128xf32> -> vector<72x128xf32>
    %88 = arith.addf %84, %87 : vector<72x128xf32>
    %c0_110 = arith.constant 0 : index
    %c0_111 = arith.constant 0 : index
    %89 = vector.load %arg6[%c0_110, %c0_111] : memref<72x128xf32, #tpu.memory_space<vmem>>, vector<72x128xf32>
    tpu.vector_store %arg6[%c0_110, %c0_111], %88 {strides = array<i32>} : memref<72x128xf32, #tpu.memory_space<vmem>>, vector<72x128xf32>,
    %c1_112 = arith.constant 1 : index
    %c10_113 = arith.constant 10 : index
    %c0_114 = arith.constant 0 : index
    %90 = vector.load %arg2[%c1_112, %c10_113, %c0_114] : memref<4x90x8xbf16, #tpu.memory_space<vmem>>, vector<1x72x8xbf16>
    %91 = vector.shape_cast %90 : vector<1x72x8xbf16> to vector<72x8xbf16>
    %c0_115 = arith.constant 0 : index
    %c0_116 = arith.constant 0 : index
    %92 = vector.load %arg6[%c0_115, %c0_116] : memref<72x128xf32, #tpu.memory_space<vmem>>, vector<72x128xf32>
    %c11 = arith.constant 11 : index
    %c0_117 = arith.constant 0 : index
    %c0_118 = arith.constant 0 : index
    %93 = vector.load %arg3[%c11, %c0_117, %c0_118] : memref<16x8x128xbf16, #tpu.memory_space<vmem>>, vector<1x8x128xbf16>
    %94 = vector.shape_cast %93 : vector<1x8x128xbf16> to vector<8x128xbf16>
    %cst_119 = arith.constant dense<0.000000e+00> : vector<72x128xf32>
    %95 = tpu.matmul %91, %94, %cst_119 {dimension_numbers = #tpu.dot_dimension_numbers<[1], [0], [0], [1], [0, 0, 1, 1], [], []>} : vector<72x8xbf16>, vector<8x128xbf16>, vector<72x128xf32> -> vector<72x128xf32>
    %96 = arith.addf %92, %95 : vector<72x128xf32>
    %c0_120 = arith.constant 0 : index
    %c0_121 = arith.constant 0 : index
    %97 = vector.load %arg6[%c0_120, %c0_121] : memref<72x128xf32, #tpu.memory_space<vmem>>, vector<72x128xf32>
    tpu.vector_store %arg6[%c0_120, %c0_121], %96 {strides = array<i32>} : memref<72x128xf32, #tpu.memory_space<vmem>>, vector<72x128xf32>,
    %c2_122 = arith.constant 2 : index
    %c9_123 = arith.constant 9 : index
    %c0_124 = arith.constant 0 : index
    %98 = vector.load %arg2[%c2_122, %c9_123, %c0_124] : memref<4x90x8xbf16, #tpu.memory_space<vmem>>, vector<1x72x8xbf16>
    %99 = vector.shape_cast %98 : vector<1x72x8xbf16> to vector<72x8xbf16>
    %c0_125 = arith.constant 0 : index
    %c0_126 = arith.constant 0 : index
    %100 = vector.load %arg6[%c0_125, %c0_126] : memref<72x128xf32, #tpu.memory_space<vmem>>, vector<72x128xf32>
    %c12 = arith.constant 12 : index
    %c0_127 = arith.constant 0 : index
    %c0_128 = arith.constant 0 : index
    %101 = vector.load %arg3[%c12, %c0_127, %c0_128] : memref<16x8x128xbf16, #tpu.memory_space<vmem>>, vector<1x8x128xbf16>
    %102 = vector.shape_cast %101 : vector<1x8x128xbf16> to vector<8x128xbf16>
    %cst_129 = arith.constant dense<0.000000e+00> : vector<72x128xf32>
    %103 = tpu.matmul %99, %102, %cst_129 {dimension_numbers = #tpu.dot_dimension_numbers<[1], [0], [0], [1], [0, 0, 1, 1], [], []>} : vector<72x8xbf16>, vector<8x128xbf16>, vector<72x128xf32> -> vector<72x128xf32>
    %104 = arith.addf %100, %103 : vector<72x128xf32>
    %c0_130 = arith.constant 0 : index
    %c0_131 = arith.constant 0 : index
    %105 = vector.load %arg6[%c0_130, %c0_131] : memref<72x128xf32, #tpu.memory_space<vmem>>, vector<72x128xf32>
    tpu.vector_store %arg6[%c0_130, %c0_131], %104 {strides = array<i32>} : memref<72x128xf32, #tpu.memory_space<vmem>>, vector<72x128xf32>,
    %c3_132 = arith.constant 3 : index
    %c9_133 = arith.constant 9 : index
    %c0_134 = arith.constant 0 : index
    %106 = vector.load %arg2[%c3_132, %c9_133, %c0_134] : memref<4x90x8xbf16, #tpu.memory_space<vmem>>, vector<1x72x8xbf16>
    %107 = vector.shape_cast %106 : vector<1x72x8xbf16> to vector<72x8xbf16>
    %c0_135 = arith.constant 0 : index
    %c0_136 = arith.constant 0 : index
    %108 = vector.load %arg6[%c0_135, %c0_136] : memref<72x128xf32, #tpu.memory_space<vmem>>, vector<72x128xf32>
    %c13 = arith.constant 13 : index
    %c0_137 = arith.constant 0 : index
    %c0_138 = arith.constant 0 : index
    %109 = vector.load %arg3[%c13, %c0_137, %c0_138] : memref<16x8x128xbf16, #tpu.memory_space<vmem>>, vector<1x8x128xbf16>
    %110 = vector.shape_cast %109 : vector<1x8x128xbf16> to vector<8x128xbf16>
    %cst_139 = arith.constant dense<0.000000e+00> : vector<72x128xf32>
    %111 = tpu.matmul %107, %110, %cst_139 {dimension_numbers = #tpu.dot_dimension_numbers<[1], [0], [0], [1], [0, 0, 1, 1], [], []>} : vector<72x8xbf16>, vector<8x128xbf16>, vector<72x128xf32> -> vector<72x128xf32>
    %112 = arith.addf %108, %111 : vector<72x128xf32>
    %c0_140 = arith.constant 0 : index
    %c0_141 = arith.constant 0 : index
    %113 = vector.load %arg6[%c0_140, %c0_141] : memref<72x128xf32, #tpu.memory_space<vmem>>, vector<72x128xf32>
    tpu.vector_store %arg6[%c0_140, %c0_141], %112 {strides = array<i32>} : memref<72x128xf32, #tpu.memory_space<vmem>>, vector<72x128xf32>,
    %c2_142 = arith.constant 2 : index
    %c10_143 = arith.constant 10 : index
    %c0_144 = arith.constant 0 : index
    %114 = vector.load %arg2[%c2_142, %c10_143, %c0_144] : memref<4x90x8xbf16, #tpu.memory_space<vmem>>, vector<1x72x8xbf16>
    %115 = vector.shape_cast %114 : vector<1x72x8xbf16> to vector<72x8xbf16>
    %c0_145 = arith.constant 0 : index
    %c0_146 = arith.constant 0 : index
    %116 = vector.load %arg6[%c0_145, %c0_146] : memref<72x128xf32, #tpu.memory_space<vmem>>, vector<72x128xf32>
    %c14 = arith.constant 14 : index
    %c0_147 = arith.constant 0 : index
    %c0_148 = arith.constant 0 : index
    %117 = vector.load %arg3[%c14, %c0_147, %c0_148] : memref<16x8x128xbf16, #tpu.memory_space<vmem>>, vector<1x8x128xbf16>
    %118 = vector.shape_cast %117 : vector<1x8x128xbf16> to vector<8x128xbf16>
    %cst_149 = arith.constant dense<0.000000e+00> : vector<72x128xf32>
    %119 = tpu.matmul %115, %118, %cst_149 {dimension_numbers = #tpu.dot_dimension_numbers<[1], [0], [0], [1], [0, 0, 1, 1], [], []>} : vector<72x8xbf16>, vector<8x128xbf16>, vector<72x128xf32> -> vector<72x128xf32>
    %120 = arith.addf %116, %119 : vector<72x128xf32>
    %c0_150 = arith.constant 0 : index
    %c0_151 = arith.constant 0 : index
    %121 = vector.load %arg6[%c0_150, %c0_151] : memref<72x128xf32, #tpu.memory_space<vmem>>, vector<72x128xf32>
    tpu.vector_store %arg6[%c0_150, %c0_151], %120 {strides = array<i32>} : memref<72x128xf32, #tpu.memory_space<vmem>>, vector<72x128xf32>,
    %c3_152 = arith.constant 3 : index
    %c10_153 = arith.constant 10 : index
    %c0_154 = arith.constant 0 : index
    %122 = vector.load %arg2[%c3_152, %c10_153, %c0_154] : memref<4x90x8xbf16, #tpu.memory_space<vmem>>, vector<1x72x8xbf16>
    %123 = vector.shape_cast %122 : vector<1x72x8xbf16> to vector<72x8xbf16>
    %c0_155 = arith.constant 0 : index
    %c0_156 = arith.constant 0 : index
    %124 = vector.load %arg6[%c0_155, %c0_156] : memref<72x128xf32, #tpu.memory_space<vmem>>, vector<72x128xf32>
    %c15 = arith.constant 15 : index
    %c0_157 = arith.constant 0 : index
    %c0_158 = arith.constant 0 : index
    %125 = vector.load %arg3[%c15, %c0_157, %c0_158] : memref<16x8x128xbf16, #tpu.memory_space<vmem>>, vector<1x8x128xbf16>
    %126 = vector.shape_cast %125 : vector<1x8x128xbf16> to vector<8x128xbf16>
    %cst_159 = arith.constant dense<0.000000e+00> : vector<72x128xf32>
    %127 = tpu.matmul %123, %126, %cst_159 {dimension_numbers = #tpu.dot_dimension_numbers<[1], [0], [0], [1], [0, 0, 1, 1], [], []>} : vector<72x8xbf16>, vector<8x128xbf16>, vector<72x128xf32> -> vector<72x128xf32>
    %128 = arith.addf %124, %127 : vector<72x128xf32>
    %c0_160 = arith.constant 0 : index
    %c0_161 = arith.constant 0 : index
    %129 = vector.load %arg6[%c0_160, %c0_161] : memref<72x128xf32, #tpu.memory_space<vmem>>, vector<72x128xf32>
    tpu.vector_store %arg6[%c0_160, %c0_161], %128 {strides = array<i32>} : memref<72x128xf32, #tpu.memory_space<vmem>>, vector<72x128xf32>,
    %c0_162 = arith.constant 0 : index
    %c0_163 = arith.constant 0 : index
    %130 = vector.load %arg6[%c0_162, %c0_163] : memref<72x128xf32, #tpu.memory_space<vmem>>, vector<72x128xf32>
    %c0_164 = arith.constant 0 : index
    %c0_165 = arith.constant 0 : index
    %131 = vector.load %arg4[%c0_164, %c0_165] : memref<1x128xf32, #tpu.memory_space<vmem>>, vector<1x128xf32>
    %132 = vector.broadcast %131 : vector<1x128xf32> to vector<72x128xf32>
    %133 = arith.addf %130, %132 : vector<72x128xf32>
    %cst_166 = arith.constant 0.000000e+00 : f32
    %134 = vector.broadcast %cst_166 : f32 to vector<72x128xf32>
    %135 = arith.cmpf ogt, %133, %134 : vector<72x128xf32>
    %cst_167 = arith.constant 2.000000e-01 : f32
    %136 = vector.broadcast %cst_167 : f32 to vector<72x128xf32>
    %137 = arith.mulf %136, %133 : vector<72x128xf32>
    %138 = arith.select %135, %133, %137 : vector<72x128xi1>, vector<72x128xf32>
    %139 = arith.truncf %138 : vector<72x128xf32> to vector<72x128xbf16>
    %c0_168 = arith.constant 0 : index
    %c0_169 = arith.constant 0 : index
    %c0_170 = arith.constant 0 : index
    %140 = vector.load %arg5[%c0_168, %c0_169, %c0_170] : memref<1x72x128xbf16, #tpu.memory_space<vmem>>, vector<1x72x128xbf16>
    %141 = vector.shape_cast %140 : vector<1x72x128xbf16> to vector<72x128xbf16>
    %142 = vector.shape_cast %139 : vector<72x128xbf16> to vector<1x72x128xbf16>
    tpu.vector_store %arg5[%c0_168, %c0_169, %c0_170], %142 {strides = array<i32>} : memref<1x72x128xbf16, #tpu.memory_space<vmem>>, vector<1x72x128xbf16>,
    return
  }
  func.func @transform_0(%arg0: i32, %arg1: i32) -> (i32, i32, i32) {
    %c0_i32 = arith.constant 0 : i32
    %c0_i32_0 = arith.constant 0 : i32
    %c0_i32_1 = arith.constant 0 : i32
    return %arg0, %c0_i32, %c0_i32_0 : i32, i32, i32
  }
  func.func @transform_1(%arg0: i32, %arg1: i32) -> (i32, i32, i32) {
    %c0_i32 = arith.constant 0 : i32
    %c0_i32_0 = arith.constant 0 : i32
    %c0_i32_1 = arith.constant 0 : i32
    return %c0_i32, %c0_i32_0, %arg1 : i32, i32, i32
  }
  func.func @transform_2(%arg0: i32, %arg1: i32) -> (i32, i32) {
    %c0_i32 = arith.constant 0 : i32
    %c0_i32_0 = arith.constant 0 : i32
    return %c0_i32, %arg1 : i32, i32
  }
  func.func @transform_3(%arg0: i32, %arg1: i32) -> (i32, i32, i32) {
    %c0_i32 = arith.constant 0 : i32
    %c0_i32_0 = arith.constant 0 : i32
    return %arg0, %c0_i32, %arg1 : i32, i32, i32
  }
}

module attributes {stable_mosaic.version = 11 : i64} {
  func.func @kernel(%arg0: i32, %arg1: i32, %arg2: memref<4x30x128xbf16, #tpu.memory_space<vmem>>, %arg3: memref<16x128x128xbf16, #tpu.memory_space<vmem>>, %arg4: memref<1x128xf32, #tpu.memory_space<vmem>>, %arg5: memref<1x20x128xbf16, #tpu.memory_space<vmem>>, %arg6: memref<20x128xf32, #tpu.memory_space<vmem>>) attributes {dimension_semantics = [#tpu.dimension_semantics<parallel>, #tpu.dimension_semantics<parallel>], iteration_bounds = array<i64: 2, 1>, scalar_prefetch = 0 : i64, scratch_operands = 1 : i64, tpu.core_type = #tpu.core_type<tc>, window_params = [{transform_indices = @transform_0, window_bounds = array<i64: 4, 30, 128>}, {transform_indices = @transform_1, window_bounds = array<i64: 16, 128, 128>}, {transform_indices = @transform_2, window_bounds = array<i64: 1, 128>}, {transform_indices = @transform_3, window_bounds = array<i64: 1, 20, 128>}]} {
    %cst = arith.constant 0.000000e+00 : f32
    %0 = vector.broadcast %cst : f32 to vector<20x128xf32>
    %c0 = arith.constant 0 : index
    %c0_0 = arith.constant 0 : index
    %1 = vector.load %arg6[%c0, %c0_0] : memref<20x128xf32, #tpu.memory_space<vmem>>, vector<20x128xf32>
    tpu.vector_store %arg6[%c0, %c0_0], %0 {strides = array<i32>} : memref<20x128xf32, #tpu.memory_space<vmem>>, vector<20x128xf32>,
    %c0_1 = arith.constant 0 : index
    %c0_2 = arith.constant 0 : index
    %c0_3 = arith.constant 0 : index
    %2 = vector.load %arg2[%c0_1, %c0_2, %c0_3] : memref<4x30x128xbf16, #tpu.memory_space<vmem>>, vector<1x20x128xbf16>
    %3 = vector.shape_cast %2 : vector<1x20x128xbf16> to vector<20x128xbf16>
    %c0_4 = arith.constant 0 : index
    %c0_5 = arith.constant 0 : index
    %4 = vector.load %arg6[%c0_4, %c0_5] : memref<20x128xf32, #tpu.memory_space<vmem>>, vector<20x128xf32>
    %c0_6 = arith.constant 0 : index
    %c0_7 = arith.constant 0 : index
    %c0_8 = arith.constant 0 : index
    %5 = vector.load %arg3[%c0_6, %c0_7, %c0_8] : memref<16x128x128xbf16, #tpu.memory_space<vmem>>, vector<1x128x128xbf16>
    %6 = vector.shape_cast %5 : vector<1x128x128xbf16> to vector<128x128xbf16>
    %cst_9 = arith.constant dense<0.000000e+00> : vector<20x128xf32>
    %7 = tpu.matmul %3, %6, %cst_9 {dimension_numbers = #tpu.dot_dimension_numbers<[1], [0], [0], [1], [0, 0, 1, 1], [], []>} : vector<20x128xbf16>, vector<128x128xbf16>, vector<20x128xf32> -> vector<20x128xf32>
    %8 = arith.addf %4, %7 : vector<20x128xf32>
    %c0_10 = arith.constant 0 : index
    %c0_11 = arith.constant 0 : index
    %9 = vector.load %arg6[%c0_10, %c0_11] : memref<20x128xf32, #tpu.memory_space<vmem>>, vector<20x128xf32>
    tpu.vector_store %arg6[%c0_10, %c0_11], %8 {strides = array<i32>} : memref<20x128xf32, #tpu.memory_space<vmem>>, vector<20x128xf32>,
    %c1 = arith.constant 1 : index
    %c0_12 = arith.constant 0 : index
    %c0_13 = arith.constant 0 : index
    %10 = vector.load %arg2[%c1, %c0_12, %c0_13] : memref<4x30x128xbf16, #tpu.memory_space<vmem>>, vector<1x20x128xbf16>
    %11 = vector.shape_cast %10 : vector<1x20x128xbf16> to vector<20x128xbf16>
    %c0_14 = arith.constant 0 : index
    %c0_15 = arith.constant 0 : index
    %12 = vector.load %arg6[%c0_14, %c0_15] : memref<20x128xf32, #tpu.memory_space<vmem>>, vector<20x128xf32>
    %c1_16 = arith.constant 1 : index
    %c0_17 = arith.constant 0 : index
    %c0_18 = arith.constant 0 : index
    %13 = vector.load %arg3[%c1_16, %c0_17, %c0_18] : memref<16x128x128xbf16, #tpu.memory_space<vmem>>, vector<1x128x128xbf16>
    %14 = vector.shape_cast %13 : vector<1x128x128xbf16> to vector<128x128xbf16>
    %cst_19 = arith.constant dense<0.000000e+00> : vector<20x128xf32>
    %15 = tpu.matmul %11, %14, %cst_19 {dimension_numbers = #tpu.dot_dimension_numbers<[1], [0], [0], [1], [0, 0, 1, 1], [], []>} : vector<20x128xbf16>, vector<128x128xbf16>, vector<20x128xf32> -> vector<20x128xf32>
    %16 = arith.addf %12, %15 : vector<20x128xf32>
    %c0_20 = arith.constant 0 : index
    %c0_21 = arith.constant 0 : index
    %17 = vector.load %arg6[%c0_20, %c0_21] : memref<20x128xf32, #tpu.memory_space<vmem>>, vector<20x128xf32>
    tpu.vector_store %arg6[%c0_20, %c0_21], %16 {strides = array<i32>} : memref<20x128xf32, #tpu.memory_space<vmem>>, vector<20x128xf32>,
    %c0_22 = arith.constant 0 : index
    %c1_23 = arith.constant 1 : index
    %c0_24 = arith.constant 0 : index
    %18 = vector.load %arg2[%c0_22, %c1_23, %c0_24] : memref<4x30x128xbf16, #tpu.memory_space<vmem>>, vector<1x20x128xbf16>
    %19 = vector.shape_cast %18 : vector<1x20x128xbf16> to vector<20x128xbf16>
    %c0_25 = arith.constant 0 : index
    %c0_26 = arith.constant 0 : index
    %20 = vector.load %arg6[%c0_25, %c0_26] : memref<20x128xf32, #tpu.memory_space<vmem>>, vector<20x128xf32>
    %c2 = arith.constant 2 : index
    %c0_27 = arith.constant 0 : index
    %c0_28 = arith.constant 0 : index
    %21 = vector.load %arg3[%c2, %c0_27, %c0_28] : memref<16x128x128xbf16, #tpu.memory_space<vmem>>, vector<1x128x128xbf16>
    %22 = vector.shape_cast %21 : vector<1x128x128xbf16> to vector<128x128xbf16>
    %cst_29 = arith.constant dense<0.000000e+00> : vector<20x128xf32>
    %23 = tpu.matmul %19, %22, %cst_29 {dimension_numbers = #tpu.dot_dimension_numbers<[1], [0], [0], [1], [0, 0, 1, 1], [], []>} : vector<20x128xbf16>, vector<128x128xbf16>, vector<20x128xf32> -> vector<20x128xf32>
    %24 = arith.addf %20, %23 : vector<20x128xf32>
    %c0_30 = arith.constant 0 : index
    %c0_31 = arith.constant 0 : index
    %25 = vector.load %arg6[%c0_30, %c0_31] : memref<20x128xf32, #tpu.memory_space<vmem>>, vector<20x128xf32>
    tpu.vector_store %arg6[%c0_30, %c0_31], %24 {strides = array<i32>} : memref<20x128xf32, #tpu.memory_space<vmem>>, vector<20x128xf32>,
    %c1_32 = arith.constant 1 : index
    %c1_33 = arith.constant 1 : index
    %c0_34 = arith.constant 0 : index
    %26 = vector.load %arg2[%c1_32, %c1_33, %c0_34] : memref<4x30x128xbf16, #tpu.memory_space<vmem>>, vector<1x20x128xbf16>
    %27 = vector.shape_cast %26 : vector<1x20x128xbf16> to vector<20x128xbf16>
    %c0_35 = arith.constant 0 : index
    %c0_36 = arith.constant 0 : index
    %28 = vector.load %arg6[%c0_35, %c0_36] : memref<20x128xf32, #tpu.memory_space<vmem>>, vector<20x128xf32>
    %c3 = arith.constant 3 : index
    %c0_37 = arith.constant 0 : index
    %c0_38 = arith.constant 0 : index
    %29 = vector.load %arg3[%c3, %c0_37, %c0_38] : memref<16x128x128xbf16, #tpu.memory_space<vmem>>, vector<1x128x128xbf16>
    %30 = vector.shape_cast %29 : vector<1x128x128xbf16> to vector<128x128xbf16>
    %cst_39 = arith.constant dense<0.000000e+00> : vector<20x128xf32>
    %31 = tpu.matmul %27, %30, %cst_39 {dimension_numbers = #tpu.dot_dimension_numbers<[1], [0], [0], [1], [0, 0, 1, 1], [], []>} : vector<20x128xbf16>, vector<128x128xbf16>, vector<20x128xf32> -> vector<20x128xf32>
    %32 = arith.addf %28, %31 : vector<20x128xf32>
    %c0_40 = arith.constant 0 : index
    %c0_41 = arith.constant 0 : index
    %33 = vector.load %arg6[%c0_40, %c0_41] : memref<20x128xf32, #tpu.memory_space<vmem>>, vector<20x128xf32>
    tpu.vector_store %arg6[%c0_40, %c0_41], %32 {strides = array<i32>} : memref<20x128xf32, #tpu.memory_space<vmem>>, vector<20x128xf32>,
    %c2_42 = arith.constant 2 : index
    %c0_43 = arith.constant 0 : index
    %c0_44 = arith.constant 0 : index
    %34 = vector.load %arg2[%c2_42, %c0_43, %c0_44] : memref<4x30x128xbf16, #tpu.memory_space<vmem>>, vector<1x20x128xbf16>
    %35 = vector.shape_cast %34 : vector<1x20x128xbf16> to vector<20x128xbf16>
    %c0_45 = arith.constant 0 : index
    %c0_46 = arith.constant 0 : index
    %36 = vector.load %arg6[%c0_45, %c0_46] : memref<20x128xf32, #tpu.memory_space<vmem>>, vector<20x128xf32>
    %c4 = arith.constant 4 : index
    %c0_47 = arith.constant 0 : index
    %c0_48 = arith.constant 0 : index
    %37 = vector.load %arg3[%c4, %c0_47, %c0_48] : memref<16x128x128xbf16, #tpu.memory_space<vmem>>, vector<1x128x128xbf16>
    %38 = vector.shape_cast %37 : vector<1x128x128xbf16> to vector<128x128xbf16>
    %cst_49 = arith.constant dense<0.000000e+00> : vector<20x128xf32>
    %39 = tpu.matmul %35, %38, %cst_49 {dimension_numbers = #tpu.dot_dimension_numbers<[1], [0], [0], [1], [0, 0, 1, 1], [], []>} : vector<20x128xbf16>, vector<128x128xbf16>, vector<20x128xf32> -> vector<20x128xf32>
    %40 = arith.addf %36, %39 : vector<20x128xf32>
    %c0_50 = arith.constant 0 : index
    %c0_51 = arith.constant 0 : index
    %41 = vector.load %arg6[%c0_50, %c0_51] : memref<20x128xf32, #tpu.memory_space<vmem>>, vector<20x128xf32>
    tpu.vector_store %arg6[%c0_50, %c0_51], %40 {strides = array<i32>} : memref<20x128xf32, #tpu.memory_space<vmem>>, vector<20x128xf32>,
    %c3_52 = arith.constant 3 : index
    %c0_53 = arith.constant 0 : index
    %c0_54 = arith.constant 0 : index
    %42 = vector.load %arg2[%c3_52, %c0_53, %c0_54] : memref<4x30x128xbf16, #tpu.memory_space<vmem>>, vector<1x20x128xbf16>
    %43 = vector.shape_cast %42 : vector<1x20x128xbf16> to vector<20x128xbf16>
    %c0_55 = arith.constant 0 : index
    %c0_56 = arith.constant 0 : index
    %44 = vector.load %arg6[%c0_55, %c0_56] : memref<20x128xf32, #tpu.memory_space<vmem>>, vector<20x128xf32>
    %c5 = arith.constant 5 : index
    %c0_57 = arith.constant 0 : index
    %c0_58 = arith.constant 0 : index
    %45 = vector.load %arg3[%c5, %c0_57, %c0_58] : memref<16x128x128xbf16, #tpu.memory_space<vmem>>, vector<1x128x128xbf16>
    %46 = vector.shape_cast %45 : vector<1x128x128xbf16> to vector<128x128xbf16>
    %cst_59 = arith.constant dense<0.000000e+00> : vector<20x128xf32>
    %47 = tpu.matmul %43, %46, %cst_59 {dimension_numbers = #tpu.dot_dimension_numbers<[1], [0], [0], [1], [0, 0, 1, 1], [], []>} : vector<20x128xbf16>, vector<128x128xbf16>, vector<20x128xf32> -> vector<20x128xf32>
    %48 = arith.addf %44, %47 : vector<20x128xf32>
    %c0_60 = arith.constant 0 : index
    %c0_61 = arith.constant 0 : index
    %49 = vector.load %arg6[%c0_60, %c0_61] : memref<20x128xf32, #tpu.memory_space<vmem>>, vector<20x128xf32>
    tpu.vector_store %arg6[%c0_60, %c0_61], %48 {strides = array<i32>} : memref<20x128xf32, #tpu.memory_space<vmem>>, vector<20x128xf32>,
    %c2_62 = arith.constant 2 : index
    %c1_63 = arith.constant 1 : index
    %c0_64 = arith.constant 0 : index
    %50 = vector.load %arg2[%c2_62, %c1_63, %c0_64] : memref<4x30x128xbf16, #tpu.memory_space<vmem>>, vector<1x20x128xbf16>
    %51 = vector.shape_cast %50 : vector<1x20x128xbf16> to vector<20x128xbf16>
    %c0_65 = arith.constant 0 : index
    %c0_66 = arith.constant 0 : index
    %52 = vector.load %arg6[%c0_65, %c0_66] : memref<20x128xf32, #tpu.memory_space<vmem>>, vector<20x128xf32>
    %c6 = arith.constant 6 : index
    %c0_67 = arith.constant 0 : index
    %c0_68 = arith.constant 0 : index
    %53 = vector.load %arg3[%c6, %c0_67, %c0_68] : memref<16x128x128xbf16, #tpu.memory_space<vmem>>, vector<1x128x128xbf16>
    %54 = vector.shape_cast %53 : vector<1x128x128xbf16> to vector<128x128xbf16>
    %cst_69 = arith.constant dense<0.000000e+00> : vector<20x128xf32>
    %55 = tpu.matmul %51, %54, %cst_69 {dimension_numbers = #tpu.dot_dimension_numbers<[1], [0], [0], [1], [0, 0, 1, 1], [], []>} : vector<20x128xbf16>, vector<128x128xbf16>, vector<20x128xf32> -> vector<20x128xf32>
    %56 = arith.addf %52, %55 : vector<20x128xf32>
    %c0_70 = arith.constant 0 : index
    %c0_71 = arith.constant 0 : index
    %57 = vector.load %arg6[%c0_70, %c0_71] : memref<20x128xf32, #tpu.memory_space<vmem>>, vector<20x128xf32>
    tpu.vector_store %arg6[%c0_70, %c0_71], %56 {strides = array<i32>} : memref<20x128xf32, #tpu.memory_space<vmem>>, vector<20x128xf32>,
    %c3_72 = arith.constant 3 : index
    %c1_73 = arith.constant 1 : index
    %c0_74 = arith.constant 0 : index
    %58 = vector.load %arg2[%c3_72, %c1_73, %c0_74] : memref<4x30x128xbf16, #tpu.memory_space<vmem>>, vector<1x20x128xbf16>
    %59 = vector.shape_cast %58 : vector<1x20x128xbf16> to vector<20x128xbf16>
    %c0_75 = arith.constant 0 : index
    %c0_76 = arith.constant 0 : index
    %60 = vector.load %arg6[%c0_75, %c0_76] : memref<20x128xf32, #tpu.memory_space<vmem>>, vector<20x128xf32>
    %c7 = arith.constant 7 : index
    %c0_77 = arith.constant 0 : index
    %c0_78 = arith.constant 0 : index
    %61 = vector.load %arg3[%c7, %c0_77, %c0_78] : memref<16x128x128xbf16, #tpu.memory_space<vmem>>, vector<1x128x128xbf16>
    %62 = vector.shape_cast %61 : vector<1x128x128xbf16> to vector<128x128xbf16>
    %cst_79 = arith.constant dense<0.000000e+00> : vector<20x128xf32>
    %63 = tpu.matmul %59, %62, %cst_79 {dimension_numbers = #tpu.dot_dimension_numbers<[1], [0], [0], [1], [0, 0, 1, 1], [], []>} : vector<20x128xbf16>, vector<128x128xbf16>, vector<20x128xf32> -> vector<20x128xf32>
    %64 = arith.addf %60, %63 : vector<20x128xf32>
    %c0_80 = arith.constant 0 : index
    %c0_81 = arith.constant 0 : index
    %65 = vector.load %arg6[%c0_80, %c0_81] : memref<20x128xf32, #tpu.memory_space<vmem>>, vector<20x128xf32>
    tpu.vector_store %arg6[%c0_80, %c0_81], %64 {strides = array<i32>} : memref<20x128xf32, #tpu.memory_space<vmem>>, vector<20x128xf32>,
    %c0_82 = arith.constant 0 : index
    %c5_83 = arith.constant 5 : index
    %c0_84 = arith.constant 0 : index
    %66 = vector.load %arg2[%c0_82, %c5_83, %c0_84] : memref<4x30x128xbf16, #tpu.memory_space<vmem>>, vector<1x20x128xbf16>
    %67 = vector.shape_cast %66 : vector<1x20x128xbf16> to vector<20x128xbf16>
    %c0_85 = arith.constant 0 : index
    %c0_86 = arith.constant 0 : index
    %68 = vector.load %arg6[%c0_85, %c0_86] : memref<20x128xf32, #tpu.memory_space<vmem>>, vector<20x128xf32>
    %c8 = arith.constant 8 : index
    %c0_87 = arith.constant 0 : index
    %c0_88 = arith.constant 0 : index
    %69 = vector.load %arg3[%c8, %c0_87, %c0_88] : memref<16x128x128xbf16, #tpu.memory_space<vmem>>, vector<1x128x128xbf16>
    %70 = vector.shape_cast %69 : vector<1x128x128xbf16> to vector<128x128xbf16>
    %cst_89 = arith.constant dense<0.000000e+00> : vector<20x128xf32>
    %71 = tpu.matmul %67, %70, %cst_89 {dimension_numbers = #tpu.dot_dimension_numbers<[1], [0], [0], [1], [0, 0, 1, 1], [], []>} : vector<20x128xbf16>, vector<128x128xbf16>, vector<20x128xf32> -> vector<20x128xf32>
    %72 = arith.addf %68, %71 : vector<20x128xf32>
    %c0_90 = arith.constant 0 : index
    %c0_91 = arith.constant 0 : index
    %73 = vector.load %arg6[%c0_90, %c0_91] : memref<20x128xf32, #tpu.memory_space<vmem>>, vector<20x128xf32>
    tpu.vector_store %arg6[%c0_90, %c0_91], %72 {strides = array<i32>} : memref<20x128xf32, #tpu.memory_space<vmem>>, vector<20x128xf32>,
    %c1_92 = arith.constant 1 : index
    %c5_93 = arith.constant 5 : index
    %c0_94 = arith.constant 0 : index
    %74 = vector.load %arg2[%c1_92, %c5_93, %c0_94] : memref<4x30x128xbf16, #tpu.memory_space<vmem>>, vector<1x20x128xbf16>
    %75 = vector.shape_cast %74 : vector<1x20x128xbf16> to vector<20x128xbf16>
    %c0_95 = arith.constant 0 : index
    %c0_96 = arith.constant 0 : index
    %76 = vector.load %arg6[%c0_95, %c0_96] : memref<20x128xf32, #tpu.memory_space<vmem>>, vector<20x128xf32>
    %c9 = arith.constant 9 : index
    %c0_97 = arith.constant 0 : index
    %c0_98 = arith.constant 0 : index
    %77 = vector.load %arg3[%c9, %c0_97, %c0_98] : memref<16x128x128xbf16, #tpu.memory_space<vmem>>, vector<1x128x128xbf16>
    %78 = vector.shape_cast %77 : vector<1x128x128xbf16> to vector<128x128xbf16>
    %cst_99 = arith.constant dense<0.000000e+00> : vector<20x128xf32>
    %79 = tpu.matmul %75, %78, %cst_99 {dimension_numbers = #tpu.dot_dimension_numbers<[1], [0], [0], [1], [0, 0, 1, 1], [], []>} : vector<20x128xbf16>, vector<128x128xbf16>, vector<20x128xf32> -> vector<20x128xf32>
    %80 = arith.addf %76, %79 : vector<20x128xf32>
    %c0_100 = arith.constant 0 : index
    %c0_101 = arith.constant 0 : index
    %81 = vector.load %arg6[%c0_100, %c0_101] : memref<20x128xf32, #tpu.memory_space<vmem>>, vector<20x128xf32>
    tpu.vector_store %arg6[%c0_100, %c0_101], %80 {strides = array<i32>} : memref<20x128xf32, #tpu.memory_space<vmem>>, vector<20x128xf32>,
    %c0_102 = arith.constant 0 : index
    %c6_103 = arith.constant 6 : index
    %c0_104 = arith.constant 0 : index
    %82 = vector.load %arg2[%c0_102, %c6_103, %c0_104] : memref<4x30x128xbf16, #tpu.memory_space<vmem>>, vector<1x20x128xbf16>
    %83 = vector.shape_cast %82 : vector<1x20x128xbf16> to vector<20x128xbf16>
    %c0_105 = arith.constant 0 : index
    %c0_106 = arith.constant 0 : index
    %84 = vector.load %arg6[%c0_105, %c0_106] : memref<20x128xf32, #tpu.memory_space<vmem>>, vector<20x128xf32>
    %c10 = arith.constant 10 : index
    %c0_107 = arith.constant 0 : index
    %c0_108 = arith.constant 0 : index
    %85 = vector.load %arg3[%c10, %c0_107, %c0_108] : memref<16x128x128xbf16, #tpu.memory_space<vmem>>, vector<1x128x128xbf16>
    %86 = vector.shape_cast %85 : vector<1x128x128xbf16> to vector<128x128xbf16>
    %cst_109 = arith.constant dense<0.000000e+00> : vector<20x128xf32>
    %87 = tpu.matmul %83, %86, %cst_109 {dimension_numbers = #tpu.dot_dimension_numbers<[1], [0], [0], [1], [0, 0, 1, 1], [], []>} : vector<20x128xbf16>, vector<128x128xbf16>, vector<20x128xf32> -> vector<20x128xf32>
    %88 = arith.addf %84, %87 : vector<20x128xf32>
    %c0_110 = arith.constant 0 : index
    %c0_111 = arith.constant 0 : index
    %89 = vector.load %arg6[%c0_110, %c0_111] : memref<20x128xf32, #tpu.memory_space<vmem>>, vector<20x128xf32>
    tpu.vector_store %arg6[%c0_110, %c0_111], %88 {strides = array<i32>} : memref<20x128xf32, #tpu.memory_space<vmem>>, vector<20x128xf32>,
    %c1_112 = arith.constant 1 : index
    %c6_113 = arith.constant 6 : index
    %c0_114 = arith.constant 0 : index
    %90 = vector.load %arg2[%c1_112, %c6_113, %c0_114] : memref<4x30x128xbf16, #tpu.memory_space<vmem>>, vector<1x20x128xbf16>
    %91 = vector.shape_cast %90 : vector<1x20x128xbf16> to vector<20x128xbf16>
    %c0_115 = arith.constant 0 : index
    %c0_116 = arith.constant 0 : index
    %92 = vector.load %arg6[%c0_115, %c0_116] : memref<20x128xf32, #tpu.memory_space<vmem>>, vector<20x128xf32>
    %c11 = arith.constant 11 : index
    %c0_117 = arith.constant 0 : index
    %c0_118 = arith.constant 0 : index
    %93 = vector.load %arg3[%c11, %c0_117, %c0_118] : memref<16x128x128xbf16, #tpu.memory_space<vmem>>, vector<1x128x128xbf16>
    %94 = vector.shape_cast %93 : vector<1x128x128xbf16> to vector<128x128xbf16>
    %cst_119 = arith.constant dense<0.000000e+00> : vector<20x128xf32>
    %95 = tpu.matmul %91, %94, %cst_119 {dimension_numbers = #tpu.dot_dimension_numbers<[1], [0], [0], [1], [0, 0, 1, 1], [], []>} : vector<20x128xbf16>, vector<128x128xbf16>, vector<20x128xf32> -> vector<20x128xf32>
    %96 = arith.addf %92, %95 : vector<20x128xf32>
    %c0_120 = arith.constant 0 : index
    %c0_121 = arith.constant 0 : index
    %97 = vector.load %arg6[%c0_120, %c0_121] : memref<20x128xf32, #tpu.memory_space<vmem>>, vector<20x128xf32>
    tpu.vector_store %arg6[%c0_120, %c0_121], %96 {strides = array<i32>} : memref<20x128xf32, #tpu.memory_space<vmem>>, vector<20x128xf32>,
    %c2_122 = arith.constant 2 : index
    %c5_123 = arith.constant 5 : index
    %c0_124 = arith.constant 0 : index
    %98 = vector.load %arg2[%c2_122, %c5_123, %c0_124] : memref<4x30x128xbf16, #tpu.memory_space<vmem>>, vector<1x20x128xbf16>
    %99 = vector.shape_cast %98 : vector<1x20x128xbf16> to vector<20x128xbf16>
    %c0_125 = arith.constant 0 : index
    %c0_126 = arith.constant 0 : index
    %100 = vector.load %arg6[%c0_125, %c0_126] : memref<20x128xf32, #tpu.memory_space<vmem>>, vector<20x128xf32>
    %c12 = arith.constant 12 : index
    %c0_127 = arith.constant 0 : index
    %c0_128 = arith.constant 0 : index
    %101 = vector.load %arg3[%c12, %c0_127, %c0_128] : memref<16x128x128xbf16, #tpu.memory_space<vmem>>, vector<1x128x128xbf16>
    %102 = vector.shape_cast %101 : vector<1x128x128xbf16> to vector<128x128xbf16>
    %cst_129 = arith.constant dense<0.000000e+00> : vector<20x128xf32>
    %103 = tpu.matmul %99, %102, %cst_129 {dimension_numbers = #tpu.dot_dimension_numbers<[1], [0], [0], [1], [0, 0, 1, 1], [], []>} : vector<20x128xbf16>, vector<128x128xbf16>, vector<20x128xf32> -> vector<20x128xf32>
    %104 = arith.addf %100, %103 : vector<20x128xf32>
    %c0_130 = arith.constant 0 : index
    %c0_131 = arith.constant 0 : index
    %105 = vector.load %arg6[%c0_130, %c0_131] : memref<20x128xf32, #tpu.memory_space<vmem>>, vector<20x128xf32>
    tpu.vector_store %arg6[%c0_130, %c0_131], %104 {strides = array<i32>} : memref<20x128xf32, #tpu.memory_space<vmem>>, vector<20x128xf32>,
    %c3_132 = arith.constant 3 : index
    %c5_133 = arith.constant 5 : index
    %c0_134 = arith.constant 0 : index
    %106 = vector.load %arg2[%c3_132, %c5_133, %c0_134] : memref<4x30x128xbf16, #tpu.memory_space<vmem>>, vector<1x20x128xbf16>
    %107 = vector.shape_cast %106 : vector<1x20x128xbf16> to vector<20x128xbf16>
    %c0_135 = arith.constant 0 : index
    %c0_136 = arith.constant 0 : index
    %108 = vector.load %arg6[%c0_135, %c0_136] : memref<20x128xf32, #tpu.memory_space<vmem>>, vector<20x128xf32>
    %c13 = arith.constant 13 : index
    %c0_137 = arith.constant 0 : index
    %c0_138 = arith.constant 0 : index
    %109 = vector.load %arg3[%c13, %c0_137, %c0_138] : memref<16x128x128xbf16, #tpu.memory_space<vmem>>, vector<1x128x128xbf16>
    %110 = vector.shape_cast %109 : vector<1x128x128xbf16> to vector<128x128xbf16>
    %cst_139 = arith.constant dense<0.000000e+00> : vector<20x128xf32>
    %111 = tpu.matmul %107, %110, %cst_139 {dimension_numbers = #tpu.dot_dimension_numbers<[1], [0], [0], [1], [0, 0, 1, 1], [], []>} : vector<20x128xbf16>, vector<128x128xbf16>, vector<20x128xf32> -> vector<20x128xf32>
    %112 = arith.addf %108, %111 : vector<20x128xf32>
    %c0_140 = arith.constant 0 : index
    %c0_141 = arith.constant 0 : index
    %113 = vector.load %arg6[%c0_140, %c0_141] : memref<20x128xf32, #tpu.memory_space<vmem>>, vector<20x128xf32>
    tpu.vector_store %arg6[%c0_140, %c0_141], %112 {strides = array<i32>} : memref<20x128xf32, #tpu.memory_space<vmem>>, vector<20x128xf32>,
    %c2_142 = arith.constant 2 : index
    %c6_143 = arith.constant 6 : index
    %c0_144 = arith.constant 0 : index
    %114 = vector.load %arg2[%c2_142, %c6_143, %c0_144] : memref<4x30x128xbf16, #tpu.memory_space<vmem>>, vector<1x20x128xbf16>
    %115 = vector.shape_cast %114 : vector<1x20x128xbf16> to vector<20x128xbf16>
    %c0_145 = arith.constant 0 : index
    %c0_146 = arith.constant 0 : index
    %116 = vector.load %arg6[%c0_145, %c0_146] : memref<20x128xf32, #tpu.memory_space<vmem>>, vector<20x128xf32>
    %c14 = arith.constant 14 : index
    %c0_147 = arith.constant 0 : index
    %c0_148 = arith.constant 0 : index
    %117 = vector.load %arg3[%c14, %c0_147, %c0_148] : memref<16x128x128xbf16, #tpu.memory_space<vmem>>, vector<1x128x128xbf16>
    %118 = vector.shape_cast %117 : vector<1x128x128xbf16> to vector<128x128xbf16>
    %cst_149 = arith.constant dense<0.000000e+00> : vector<20x128xf32>
    %119 = tpu.matmul %115, %118, %cst_149 {dimension_numbers = #tpu.dot_dimension_numbers<[1], [0], [0], [1], [0, 0, 1, 1], [], []>} : vector<20x128xbf16>, vector<128x128xbf16>, vector<20x128xf32> -> vector<20x128xf32>
    %120 = arith.addf %116, %119 : vector<20x128xf32>
    %c0_150 = arith.constant 0 : index
    %c0_151 = arith.constant 0 : index
    %121 = vector.load %arg6[%c0_150, %c0_151] : memref<20x128xf32, #tpu.memory_space<vmem>>, vector<20x128xf32>
    tpu.vector_store %arg6[%c0_150, %c0_151], %120 {strides = array<i32>} : memref<20x128xf32, #tpu.memory_space<vmem>>, vector<20x128xf32>,
    %c3_152 = arith.constant 3 : index
    %c6_153 = arith.constant 6 : index
    %c0_154 = arith.constant 0 : index
    %122 = vector.load %arg2[%c3_152, %c6_153, %c0_154] : memref<4x30x128xbf16, #tpu.memory_space<vmem>>, vector<1x20x128xbf16>
    %123 = vector.shape_cast %122 : vector<1x20x128xbf16> to vector<20x128xbf16>
    %c0_155 = arith.constant 0 : index
    %c0_156 = arith.constant 0 : index
    %124 = vector.load %arg6[%c0_155, %c0_156] : memref<20x128xf32, #tpu.memory_space<vmem>>, vector<20x128xf32>
    %c15 = arith.constant 15 : index
    %c0_157 = arith.constant 0 : index
    %c0_158 = arith.constant 0 : index
    %125 = vector.load %arg3[%c15, %c0_157, %c0_158] : memref<16x128x128xbf16, #tpu.memory_space<vmem>>, vector<1x128x128xbf16>
    %126 = vector.shape_cast %125 : vector<1x128x128xbf16> to vector<128x128xbf16>
    %cst_159 = arith.constant dense<0.000000e+00> : vector<20x128xf32>
    %127 = tpu.matmul %123, %126, %cst_159 {dimension_numbers = #tpu.dot_dimension_numbers<[1], [0], [0], [1], [0, 0, 1, 1], [], []>} : vector<20x128xbf16>, vector<128x128xbf16>, vector<20x128xf32> -> vector<20x128xf32>
    %128 = arith.addf %124, %127 : vector<20x128xf32>
    %c0_160 = arith.constant 0 : index
    %c0_161 = arith.constant 0 : index
    %129 = vector.load %arg6[%c0_160, %c0_161] : memref<20x128xf32, #tpu.memory_space<vmem>>, vector<20x128xf32>
    tpu.vector_store %arg6[%c0_160, %c0_161], %128 {strides = array<i32>} : memref<20x128xf32, #tpu.memory_space<vmem>>, vector<20x128xf32>,
    %c0_162 = arith.constant 0 : index
    %c0_163 = arith.constant 0 : index
    %130 = vector.load %arg6[%c0_162, %c0_163] : memref<20x128xf32, #tpu.memory_space<vmem>>, vector<20x128xf32>
    %c0_164 = arith.constant 0 : index
    %c0_165 = arith.constant 0 : index
    %131 = vector.load %arg4[%c0_164, %c0_165] : memref<1x128xf32, #tpu.memory_space<vmem>>, vector<1x128xf32>
    %132 = vector.broadcast %131 : vector<1x128xf32> to vector<20x128xf32>
    %133 = arith.addf %130, %132 : vector<20x128xf32>
    %134 = tpu.iota {dimensions = array<i32: 0>} : vector<20x1xi32>
    %c5_i32 = arith.constant 5 : i32
    %c0_i32 = arith.constant 0 : i32
    %135 = arith.cmpi eq, %c5_i32, %c0_i32 : i32
    %c1_i32 = arith.constant 1 : i32
    %136 = arith.select %135, %c1_i32, %c5_i32 : i32
    %137 = vector.broadcast %136 : i32 to vector<20x1xi32>
    %138 = arith.remsi %134, %137 : vector<20x1xi32>
    %c0_i32_166 = arith.constant 0 : i32
    %139 = vector.broadcast %c0_i32_166 : i32 to vector<20x1xi32>
    %140 = arith.cmpi ne, %138, %139 : vector<20x1xi32>
    %c0_i32_167 = arith.constant 0 : i32
    %141 = vector.broadcast %c0_i32_167 : i32 to vector<20x1xi32>
    %142 = arith.cmpi slt, %138, %141 : vector<20x1xi32>
    %c0_i32_168 = arith.constant 0 : i32
    %143 = arith.cmpi slt, %136, %c0_i32_168 : i32
    %144 = vector.broadcast %143 : i1 to vector<20x1xi1>
    %145 = vector.broadcast %144 : vector<20x1xi1> to vector<20x1xi1>
    %146 = arith.xori %142, %145 : vector<20x1xi1>
    %147 = arith.andi %146, %140 : vector<20x1xi1>
    %148 = vector.broadcast %136 : i32 to vector<20x1xi32>
    %149 = arith.addi %138, %148 : vector<20x1xi32>
    %150 = arith.select %147, %149, %138 : vector<20x1xi1>, vector<20x1xi32>
    %c4_i32 = arith.constant 4 : i32
    %151 = vector.broadcast %c4_i32 : i32 to vector<20x1xi32>
    %152 = arith.cmpi slt, %150, %151 : vector<20x1xi32>
    %cst_169 = arith.constant 0.000000e+00 : f32
    %153 = vector.shape_cast %152 : vector<20x1xi1> to vector<20x1xi1>
    %154 = vector.broadcast %153 : vector<20x1xi1> to vector<20x128xi1>
    %155 = vector.broadcast %cst_169 : f32 to vector<20x128xf32>
    %156 = arith.select %154, %133, %155 : vector<20x128xi1>, vector<20x128xf32>
    %cst_170 = arith.constant dense<0.000000e+00> : vector<128xf32>
    %157 = vector.multi_reduction <add>, %156, %cst_170 [0] : vector<20x128xf32> to vector<128xf32>
    %158 = vector.shape_cast %157 : vector<128xf32> to vector<1x128xf32>
    %cst_171 = arith.constant 6.250000e-02 : f32
    %159 = vector.broadcast %cst_171 : f32 to vector<1x128xf32>
    %160 = arith.mulf %158, %159 : vector<1x128xf32>
    %161 = vector.broadcast %160 : vector<1x128xf32> to vector<20x128xf32>
    %162 = arith.subf %133, %161 : vector<20x128xf32>
    %cst_172 = arith.constant 0.000000e+00 : f32
    %163 = vector.shape_cast %152 : vector<20x1xi1> to vector<20x1xi1>
    %164 = vector.broadcast %163 : vector<20x1xi1> to vector<20x128xi1>
    %165 = vector.broadcast %cst_172 : f32 to vector<20x128xf32>
    %166 = arith.select %164, %162, %165 : vector<20x128xi1>, vector<20x128xf32>
    %167 = arith.mulf %166, %166 : vector<20x128xf32>
    %cst_173 = arith.constant dense<0.000000e+00> : vector<128xf32>
    %168 = vector.multi_reduction <add>, %167, %cst_173 [0] : vector<20x128xf32> to vector<128xf32>
    %169 = vector.shape_cast %168 : vector<128xf32> to vector<1x128xf32>
    %cst_174 = arith.constant 6.250000e-02 : f32
    %170 = vector.broadcast %cst_174 : f32 to vector<1x128xf32>
    %171 = arith.mulf %169, %170 : vector<1x128xf32>
    %cst_175 = arith.constant 9.99999974E-6 : f32
    %172 = vector.broadcast %cst_175 : f32 to vector<1x128xf32>
    %173 = arith.addf %171, %172 : vector<1x128xf32>
    %174 = math.rsqrt %173 : vector<1x128xf32>
    %175 = vector.broadcast %174 : vector<1x128xf32> to vector<20x128xf32>
    %176 = arith.mulf %162, %175 : vector<20x128xf32>
    %cst_176 = arith.constant 0.000000e+00 : f32
    %177 = vector.broadcast %cst_176 : f32 to vector<20x128xf32>
    %178 = arith.cmpf ogt, %176, %177 : vector<20x128xf32>
    %cst_177 = arith.constant 2.000000e-01 : f32
    %179 = vector.broadcast %cst_177 : f32 to vector<20x128xf32>
    %180 = arith.mulf %179, %176 : vector<20x128xf32>
    %181 = arith.select %178, %176, %180 : vector<20x128xi1>, vector<20x128xf32>
    %182 = arith.truncf %181 : vector<20x128xf32> to vector<20x128xbf16>
    %c0_178 = arith.constant 0 : index
    %c0_179 = arith.constant 0 : index
    %c0_180 = arith.constant 0 : index
    %183 = vector.load %arg5[%c0_178, %c0_179, %c0_180] : memref<1x20x128xbf16, #tpu.memory_space<vmem>>, vector<1x20x128xbf16>
    %184 = vector.shape_cast %183 : vector<1x20x128xbf16> to vector<20x128xbf16>
    %185 = vector.shape_cast %182 : vector<20x128xbf16> to vector<1x20x128xbf16>
    tpu.vector_store %arg5[%c0_178, %c0_179, %c0_180], %185 {strides = array<i32>} : memref<1x20x128xbf16, #tpu.memory_space<vmem>>, vector<1x20x128xbf16>,
    return
  }
  func.func @transform_0(%arg0: i32, %arg1: i32) -> (i32, i32, i32) {
    %c0_i32 = arith.constant 0 : i32
    %c0_i32_0 = arith.constant 0 : i32
    %c0_i32_1 = arith.constant 0 : i32
    return %arg0, %c0_i32, %c0_i32_0 : i32, i32, i32
  }
  func.func @transform_1(%arg0: i32, %arg1: i32) -> (i32, i32, i32) {
    %c0_i32 = arith.constant 0 : i32
    %c0_i32_0 = arith.constant 0 : i32
    %c0_i32_1 = arith.constant 0 : i32
    return %c0_i32, %c0_i32_0, %arg1 : i32, i32, i32
  }
  func.func @transform_2(%arg0: i32, %arg1: i32) -> (i32, i32) {
    %c0_i32 = arith.constant 0 : i32
    %c0_i32_0 = arith.constant 0 : i32
    return %c0_i32, %arg1 : i32, i32
  }
  func.func @transform_3(%arg0: i32, %arg1: i32) -> (i32, i32, i32) {
    %c0_i32 = arith.constant 0 : i32
    %c0_i32_0 = arith.constant 0 : i32
    return %arg0, %c0_i32, %arg1 : i32, i32, i32
  }
}

module attributes {stable_mosaic.version = 11 : i64} {
  func.func @kernel(%arg0: i32, %arg1: i32, %arg2: memref<1x42x128xbf16, #tpu.memory_space<vmem>>, %arg3: memref<16x128x128xbf16, #tpu.memory_space<vmem>>, %arg4: memref<1x128xf32, #tpu.memory_space<vmem>>, %arg5: memref<1x18x128xbf16, #tpu.memory_space<vmem>>, %arg6: memref<18x128xf32, #tpu.memory_space<vmem>>) attributes {dimension_semantics = [#tpu.dimension_semantics<parallel>, #tpu.dimension_semantics<parallel>], iteration_bounds = array<i64: 2, 1>, scalar_prefetch = 0 : i64, scratch_operands = 1 : i64, tpu.core_type = #tpu.core_type<tc>, window_params = [{transform_indices = @transform_0, window_bounds = array<i64: 1, 42, 128>}, {transform_indices = @transform_1, window_bounds = array<i64: 16, 128, 128>}, {transform_indices = @transform_2, window_bounds = array<i64: 1, 128>}, {transform_indices = @transform_3, window_bounds = array<i64: 1, 18, 128>}]} {
    %cst = arith.constant 0.000000e+00 : f32
    %0 = vector.broadcast %cst : f32 to vector<18x128xf32>
    %c0 = arith.constant 0 : index
    %c0_0 = arith.constant 0 : index
    %1 = vector.load %arg6[%c0, %c0_0] : memref<18x128xf32, #tpu.memory_space<vmem>>, vector<18x128xf32>
    tpu.vector_store %arg6[%c0, %c0_0], %0 {strides = array<i32>} : memref<18x128xf32, #tpu.memory_space<vmem>>, vector<18x128xf32>,
    %c0_1 = arith.constant 0 : index
    %c0_2 = arith.constant 0 : index
    %c0_3 = arith.constant 0 : index
    %2 = vector.load %arg2[%c0_1, %c0_2, %c0_3] : memref<1x42x128xbf16, #tpu.memory_space<vmem>>, vector<1x18x128xbf16>
    %3 = vector.shape_cast %2 : vector<1x18x128xbf16> to vector<18x128xbf16>
    %c0_4 = arith.constant 0 : index
    %c0_5 = arith.constant 0 : index
    %4 = vector.load %arg6[%c0_4, %c0_5] : memref<18x128xf32, #tpu.memory_space<vmem>>, vector<18x128xf32>
    %c0_6 = arith.constant 0 : index
    %c0_7 = arith.constant 0 : index
    %c0_8 = arith.constant 0 : index
    %5 = vector.load %arg3[%c0_6, %c0_7, %c0_8] : memref<16x128x128xbf16, #tpu.memory_space<vmem>>, vector<1x128x128xbf16>
    %6 = vector.shape_cast %5 : vector<1x128x128xbf16> to vector<128x128xbf16>
    %cst_9 = arith.constant dense<0.000000e+00> : vector<18x128xf32>
    %7 = tpu.matmul %3, %6, %cst_9 {dimension_numbers = #tpu.dot_dimension_numbers<[1], [0], [0], [1], [0, 0, 1, 1], [], []>} : vector<18x128xbf16>, vector<128x128xbf16>, vector<18x128xf32> -> vector<18x128xf32>
    %8 = arith.addf %4, %7 : vector<18x128xf32>
    %c0_10 = arith.constant 0 : index
    %c0_11 = arith.constant 0 : index
    %9 = vector.load %arg6[%c0_10, %c0_11] : memref<18x128xf32, #tpu.memory_space<vmem>>, vector<18x128xf32>
    tpu.vector_store %arg6[%c0_10, %c0_11], %8 {strides = array<i32>} : memref<18x128xf32, #tpu.memory_space<vmem>>, vector<18x128xf32>,
    %c0_12 = arith.constant 0 : index
    %c1 = arith.constant 1 : index
    %c0_13 = arith.constant 0 : index
    %10 = vector.load %arg2[%c0_12, %c1, %c0_13] : memref<1x42x128xbf16, #tpu.memory_space<vmem>>, vector<1x18x128xbf16>
    %11 = vector.shape_cast %10 : vector<1x18x128xbf16> to vector<18x128xbf16>
    %c0_14 = arith.constant 0 : index
    %c0_15 = arith.constant 0 : index
    %12 = vector.load %arg6[%c0_14, %c0_15] : memref<18x128xf32, #tpu.memory_space<vmem>>, vector<18x128xf32>
    %c1_16 = arith.constant 1 : index
    %c0_17 = arith.constant 0 : index
    %c0_18 = arith.constant 0 : index
    %13 = vector.load %arg3[%c1_16, %c0_17, %c0_18] : memref<16x128x128xbf16, #tpu.memory_space<vmem>>, vector<1x128x128xbf16>
    %14 = vector.shape_cast %13 : vector<1x128x128xbf16> to vector<128x128xbf16>
    %cst_19 = arith.constant dense<0.000000e+00> : vector<18x128xf32>
    %15 = tpu.matmul %11, %14, %cst_19 {dimension_numbers = #tpu.dot_dimension_numbers<[1], [0], [0], [1], [0, 0, 1, 1], [], []>} : vector<18x128xbf16>, vector<128x128xbf16>, vector<18x128xf32> -> vector<18x128xf32>
    %16 = arith.addf %12, %15 : vector<18x128xf32>
    %c0_20 = arith.constant 0 : index
    %c0_21 = arith.constant 0 : index
    %17 = vector.load %arg6[%c0_20, %c0_21] : memref<18x128xf32, #tpu.memory_space<vmem>>, vector<18x128xf32>
    tpu.vector_store %arg6[%c0_20, %c0_21], %16 {strides = array<i32>} : memref<18x128xf32, #tpu.memory_space<vmem>>, vector<18x128xf32>,
    %c0_22 = arith.constant 0 : index
    %c2 = arith.constant 2 : index
    %c0_23 = arith.constant 0 : index
    %18 = vector.load %arg2[%c0_22, %c2, %c0_23] : memref<1x42x128xbf16, #tpu.memory_space<vmem>>, vector<1x18x128xbf16>
    %19 = vector.shape_cast %18 : vector<1x18x128xbf16> to vector<18x128xbf16>
    %c0_24 = arith.constant 0 : index
    %c0_25 = arith.constant 0 : index
    %20 = vector.load %arg6[%c0_24, %c0_25] : memref<18x128xf32, #tpu.memory_space<vmem>>, vector<18x128xf32>
    %c2_26 = arith.constant 2 : index
    %c0_27 = arith.constant 0 : index
    %c0_28 = arith.constant 0 : index
    %21 = vector.load %arg3[%c2_26, %c0_27, %c0_28] : memref<16x128x128xbf16, #tpu.memory_space<vmem>>, vector<1x128x128xbf16>
    %22 = vector.shape_cast %21 : vector<1x128x128xbf16> to vector<128x128xbf16>
    %cst_29 = arith.constant dense<0.000000e+00> : vector<18x128xf32>
    %23 = tpu.matmul %19, %22, %cst_29 {dimension_numbers = #tpu.dot_dimension_numbers<[1], [0], [0], [1], [0, 0, 1, 1], [], []>} : vector<18x128xbf16>, vector<128x128xbf16>, vector<18x128xf32> -> vector<18x128xf32>
    %24 = arith.addf %20, %23 : vector<18x128xf32>
    %c0_30 = arith.constant 0 : index
    %c0_31 = arith.constant 0 : index
    %25 = vector.load %arg6[%c0_30, %c0_31] : memref<18x128xf32, #tpu.memory_space<vmem>>, vector<18x128xf32>
    tpu.vector_store %arg6[%c0_30, %c0_31], %24 {strides = array<i32>} : memref<18x128xf32, #tpu.memory_space<vmem>>, vector<18x128xf32>,
    %c0_32 = arith.constant 0 : index
    %c3 = arith.constant 3 : index
    %c0_33 = arith.constant 0 : index
    %26 = vector.load %arg2[%c0_32, %c3, %c0_33] : memref<1x42x128xbf16, #tpu.memory_space<vmem>>, vector<1x18x128xbf16>
    %27 = vector.shape_cast %26 : vector<1x18x128xbf16> to vector<18x128xbf16>
    %c0_34 = arith.constant 0 : index
    %c0_35 = arith.constant 0 : index
    %28 = vector.load %arg6[%c0_34, %c0_35] : memref<18x128xf32, #tpu.memory_space<vmem>>, vector<18x128xf32>
    %c3_36 = arith.constant 3 : index
    %c0_37 = arith.constant 0 : index
    %c0_38 = arith.constant 0 : index
    %29 = vector.load %arg3[%c3_36, %c0_37, %c0_38] : memref<16x128x128xbf16, #tpu.memory_space<vmem>>, vector<1x128x128xbf16>
    %30 = vector.shape_cast %29 : vector<1x128x128xbf16> to vector<128x128xbf16>
    %cst_39 = arith.constant dense<0.000000e+00> : vector<18x128xf32>
    %31 = tpu.matmul %27, %30, %cst_39 {dimension_numbers = #tpu.dot_dimension_numbers<[1], [0], [0], [1], [0, 0, 1, 1], [], []>} : vector<18x128xbf16>, vector<128x128xbf16>, vector<18x128xf32> -> vector<18x128xf32>
    %32 = arith.addf %28, %31 : vector<18x128xf32>
    %c0_40 = arith.constant 0 : index
    %c0_41 = arith.constant 0 : index
    %33 = vector.load %arg6[%c0_40, %c0_41] : memref<18x128xf32, #tpu.memory_space<vmem>>, vector<18x128xf32>
    tpu.vector_store %arg6[%c0_40, %c0_41], %32 {strides = array<i32>} : memref<18x128xf32, #tpu.memory_space<vmem>>, vector<18x128xf32>,
    %c0_42 = arith.constant 0 : index
    %c6 = arith.constant 6 : index
    %c0_43 = arith.constant 0 : index
    %34 = vector.load %arg2[%c0_42, %c6, %c0_43] : memref<1x42x128xbf16, #tpu.memory_space<vmem>>, vector<1x18x128xbf16>
    %35 = vector.shape_cast %34 : vector<1x18x128xbf16> to vector<18x128xbf16>
    %c0_44 = arith.constant 0 : index
    %c0_45 = arith.constant 0 : index
    %36 = vector.load %arg6[%c0_44, %c0_45] : memref<18x128xf32, #tpu.memory_space<vmem>>, vector<18x128xf32>
    %c4 = arith.constant 4 : index
    %c0_46 = arith.constant 0 : index
    %c0_47 = arith.constant 0 : index
    %37 = vector.load %arg3[%c4, %c0_46, %c0_47] : memref<16x128x128xbf16, #tpu.memory_space<vmem>>, vector<1x128x128xbf16>
    %38 = vector.shape_cast %37 : vector<1x128x128xbf16> to vector<128x128xbf16>
    %cst_48 = arith.constant dense<0.000000e+00> : vector<18x128xf32>
    %39 = tpu.matmul %35, %38, %cst_48 {dimension_numbers = #tpu.dot_dimension_numbers<[1], [0], [0], [1], [0, 0, 1, 1], [], []>} : vector<18x128xbf16>, vector<128x128xbf16>, vector<18x128xf32> -> vector<18x128xf32>
    %40 = arith.addf %36, %39 : vector<18x128xf32>
    %c0_49 = arith.constant 0 : index
    %c0_50 = arith.constant 0 : index
    %41 = vector.load %arg6[%c0_49, %c0_50] : memref<18x128xf32, #tpu.memory_space<vmem>>, vector<18x128xf32>
    tpu.vector_store %arg6[%c0_49, %c0_50], %40 {strides = array<i32>} : memref<18x128xf32, #tpu.memory_space<vmem>>, vector<18x128xf32>,
    %c0_51 = arith.constant 0 : index
    %c7 = arith.constant 7 : index
    %c0_52 = arith.constant 0 : index
    %42 = vector.load %arg2[%c0_51, %c7, %c0_52] : memref<1x42x128xbf16, #tpu.memory_space<vmem>>, vector<1x18x128xbf16>
    %43 = vector.shape_cast %42 : vector<1x18x128xbf16> to vector<18x128xbf16>
    %c0_53 = arith.constant 0 : index
    %c0_54 = arith.constant 0 : index
    %44 = vector.load %arg6[%c0_53, %c0_54] : memref<18x128xf32, #tpu.memory_space<vmem>>, vector<18x128xf32>
    %c5 = arith.constant 5 : index
    %c0_55 = arith.constant 0 : index
    %c0_56 = arith.constant 0 : index
    %45 = vector.load %arg3[%c5, %c0_55, %c0_56] : memref<16x128x128xbf16, #tpu.memory_space<vmem>>, vector<1x128x128xbf16>
    %46 = vector.shape_cast %45 : vector<1x128x128xbf16> to vector<128x128xbf16>
    %cst_57 = arith.constant dense<0.000000e+00> : vector<18x128xf32>
    %47 = tpu.matmul %43, %46, %cst_57 {dimension_numbers = #tpu.dot_dimension_numbers<[1], [0], [0], [1], [0, 0, 1, 1], [], []>} : vector<18x128xbf16>, vector<128x128xbf16>, vector<18x128xf32> -> vector<18x128xf32>
    %48 = arith.addf %44, %47 : vector<18x128xf32>
    %c0_58 = arith.constant 0 : index
    %c0_59 = arith.constant 0 : index
    %49 = vector.load %arg6[%c0_58, %c0_59] : memref<18x128xf32, #tpu.memory_space<vmem>>, vector<18x128xf32>
    tpu.vector_store %arg6[%c0_58, %c0_59], %48 {strides = array<i32>} : memref<18x128xf32, #tpu.memory_space<vmem>>, vector<18x128xf32>,
    %c0_60 = arith.constant 0 : index
    %c8 = arith.constant 8 : index
    %c0_61 = arith.constant 0 : index
    %50 = vector.load %arg2[%c0_60, %c8, %c0_61] : memref<1x42x128xbf16, #tpu.memory_space<vmem>>, vector<1x18x128xbf16>
    %51 = vector.shape_cast %50 : vector<1x18x128xbf16> to vector<18x128xbf16>
    %c0_62 = arith.constant 0 : index
    %c0_63 = arith.constant 0 : index
    %52 = vector.load %arg6[%c0_62, %c0_63] : memref<18x128xf32, #tpu.memory_space<vmem>>, vector<18x128xf32>
    %c6_64 = arith.constant 6 : index
    %c0_65 = arith.constant 0 : index
    %c0_66 = arith.constant 0 : index
    %53 = vector.load %arg3[%c6_64, %c0_65, %c0_66] : memref<16x128x128xbf16, #tpu.memory_space<vmem>>, vector<1x128x128xbf16>
    %54 = vector.shape_cast %53 : vector<1x128x128xbf16> to vector<128x128xbf16>
    %cst_67 = arith.constant dense<0.000000e+00> : vector<18x128xf32>
    %55 = tpu.matmul %51, %54, %cst_67 {dimension_numbers = #tpu.dot_dimension_numbers<[1], [0], [0], [1], [0, 0, 1, 1], [], []>} : vector<18x128xbf16>, vector<128x128xbf16>, vector<18x128xf32> -> vector<18x128xf32>
    %56 = arith.addf %52, %55 : vector<18x128xf32>
    %c0_68 = arith.constant 0 : index
    %c0_69 = arith.constant 0 : index
    %57 = vector.load %arg6[%c0_68, %c0_69] : memref<18x128xf32, #tpu.memory_space<vmem>>, vector<18x128xf32>
    tpu.vector_store %arg6[%c0_68, %c0_69], %56 {strides = array<i32>} : memref<18x128xf32, #tpu.memory_space<vmem>>, vector<18x128xf32>,
    %c0_70 = arith.constant 0 : index
    %c9 = arith.constant 9 : index
    %c0_71 = arith.constant 0 : index
    %58 = vector.load %arg2[%c0_70, %c9, %c0_71] : memref<1x42x128xbf16, #tpu.memory_space<vmem>>, vector<1x18x128xbf16>
    %59 = vector.shape_cast %58 : vector<1x18x128xbf16> to vector<18x128xbf16>
    %c0_72 = arith.constant 0 : index
    %c0_73 = arith.constant 0 : index
    %60 = vector.load %arg6[%c0_72, %c0_73] : memref<18x128xf32, #tpu.memory_space<vmem>>, vector<18x128xf32>
    %c7_74 = arith.constant 7 : index
    %c0_75 = arith.constant 0 : index
    %c0_76 = arith.constant 0 : index
    %61 = vector.load %arg3[%c7_74, %c0_75, %c0_76] : memref<16x128x128xbf16, #tpu.memory_space<vmem>>, vector<1x128x128xbf16>
    %62 = vector.shape_cast %61 : vector<1x128x128xbf16> to vector<128x128xbf16>
    %cst_77 = arith.constant dense<0.000000e+00> : vector<18x128xf32>
    %63 = tpu.matmul %59, %62, %cst_77 {dimension_numbers = #tpu.dot_dimension_numbers<[1], [0], [0], [1], [0, 0, 1, 1], [], []>} : vector<18x128xbf16>, vector<128x128xbf16>, vector<18x128xf32> -> vector<18x128xf32>
    %64 = arith.addf %60, %63 : vector<18x128xf32>
    %c0_78 = arith.constant 0 : index
    %c0_79 = arith.constant 0 : index
    %65 = vector.load %arg6[%c0_78, %c0_79] : memref<18x128xf32, #tpu.memory_space<vmem>>, vector<18x128xf32>
    tpu.vector_store %arg6[%c0_78, %c0_79], %64 {strides = array<i32>} : memref<18x128xf32, #tpu.memory_space<vmem>>, vector<18x128xf32>,
    %c0_80 = arith.constant 0 : index
    %c12 = arith.constant 12 : index
    %c0_81 = arith.constant 0 : index
    %66 = vector.load %arg2[%c0_80, %c12, %c0_81] : memref<1x42x128xbf16, #tpu.memory_space<vmem>>, vector<1x18x128xbf16>
    %67 = vector.shape_cast %66 : vector<1x18x128xbf16> to vector<18x128xbf16>
    %c0_82 = arith.constant 0 : index
    %c0_83 = arith.constant 0 : index
    %68 = vector.load %arg6[%c0_82, %c0_83] : memref<18x128xf32, #tpu.memory_space<vmem>>, vector<18x128xf32>
    %c8_84 = arith.constant 8 : index
    %c0_85 = arith.constant 0 : index
    %c0_86 = arith.constant 0 : index
    %69 = vector.load %arg3[%c8_84, %c0_85, %c0_86] : memref<16x128x128xbf16, #tpu.memory_space<vmem>>, vector<1x128x128xbf16>
    %70 = vector.shape_cast %69 : vector<1x128x128xbf16> to vector<128x128xbf16>
    %cst_87 = arith.constant dense<0.000000e+00> : vector<18x128xf32>
    %71 = tpu.matmul %67, %70, %cst_87 {dimension_numbers = #tpu.dot_dimension_numbers<[1], [0], [0], [1], [0, 0, 1, 1], [], []>} : vector<18x128xbf16>, vector<128x128xbf16>, vector<18x128xf32> -> vector<18x128xf32>
    %72 = arith.addf %68, %71 : vector<18x128xf32>
    %c0_88 = arith.constant 0 : index
    %c0_89 = arith.constant 0 : index
    %73 = vector.load %arg6[%c0_88, %c0_89] : memref<18x128xf32, #tpu.memory_space<vmem>>, vector<18x128xf32>
    tpu.vector_store %arg6[%c0_88, %c0_89], %72 {strides = array<i32>} : memref<18x128xf32, #tpu.memory_space<vmem>>, vector<18x128xf32>,
    %c0_90 = arith.constant 0 : index
    %c13 = arith.constant 13 : index
    %c0_91 = arith.constant 0 : index
    %74 = vector.load %arg2[%c0_90, %c13, %c0_91] : memref<1x42x128xbf16, #tpu.memory_space<vmem>>, vector<1x18x128xbf16>
    %75 = vector.shape_cast %74 : vector<1x18x128xbf16> to vector<18x128xbf16>
    %c0_92 = arith.constant 0 : index
    %c0_93 = arith.constant 0 : index
    %76 = vector.load %arg6[%c0_92, %c0_93] : memref<18x128xf32, #tpu.memory_space<vmem>>, vector<18x128xf32>
    %c9_94 = arith.constant 9 : index
    %c0_95 = arith.constant 0 : index
    %c0_96 = arith.constant 0 : index
    %77 = vector.load %arg3[%c9_94, %c0_95, %c0_96] : memref<16x128x128xbf16, #tpu.memory_space<vmem>>, vector<1x128x128xbf16>
    %78 = vector.shape_cast %77 : vector<1x128x128xbf16> to vector<128x128xbf16>
    %cst_97 = arith.constant dense<0.000000e+00> : vector<18x128xf32>
    %79 = tpu.matmul %75, %78, %cst_97 {dimension_numbers = #tpu.dot_dimension_numbers<[1], [0], [0], [1], [0, 0, 1, 1], [], []>} : vector<18x128xbf16>, vector<128x128xbf16>, vector<18x128xf32> -> vector<18x128xf32>
    %80 = arith.addf %76, %79 : vector<18x128xf32>
    %c0_98 = arith.constant 0 : index
    %c0_99 = arith.constant 0 : index
    %81 = vector.load %arg6[%c0_98, %c0_99] : memref<18x128xf32, #tpu.memory_space<vmem>>, vector<18x128xf32>
    tpu.vector_store %arg6[%c0_98, %c0_99], %80 {strides = array<i32>} : memref<18x128xf32, #tpu.memory_space<vmem>>, vector<18x128xf32>,
    %c0_100 = arith.constant 0 : index
    %c14 = arith.constant 14 : index
    %c0_101 = arith.constant 0 : index
    %82 = vector.load %arg2[%c0_100, %c14, %c0_101] : memref<1x42x128xbf16, #tpu.memory_space<vmem>>, vector<1x18x128xbf16>
    %83 = vector.shape_cast %82 : vector<1x18x128xbf16> to vector<18x128xbf16>
    %c0_102 = arith.constant 0 : index
    %c0_103 = arith.constant 0 : index
    %84 = vector.load %arg6[%c0_102, %c0_103] : memref<18x128xf32, #tpu.memory_space<vmem>>, vector<18x128xf32>
    %c10 = arith.constant 10 : index
    %c0_104 = arith.constant 0 : index
    %c0_105 = arith.constant 0 : index
    %85 = vector.load %arg3[%c10, %c0_104, %c0_105] : memref<16x128x128xbf16, #tpu.memory_space<vmem>>, vector<1x128x128xbf16>
    %86 = vector.shape_cast %85 : vector<1x128x128xbf16> to vector<128x128xbf16>
    %cst_106 = arith.constant dense<0.000000e+00> : vector<18x128xf32>
    %87 = tpu.matmul %83, %86, %cst_106 {dimension_numbers = #tpu.dot_dimension_numbers<[1], [0], [0], [1], [0, 0, 1, 1], [], []>} : vector<18x128xbf16>, vector<128x128xbf16>, vector<18x128xf32> -> vector<18x128xf32>
    %88 = arith.addf %84, %87 : vector<18x128xf32>
    %c0_107 = arith.constant 0 : index
    %c0_108 = arith.constant 0 : index
    %89 = vector.load %arg6[%c0_107, %c0_108] : memref<18x128xf32, #tpu.memory_space<vmem>>, vector<18x128xf32>
    tpu.vector_store %arg6[%c0_107, %c0_108], %88 {strides = array<i32>} : memref<18x128xf32, #tpu.memory_space<vmem>>, vector<18x128xf32>,
    %c0_109 = arith.constant 0 : index
    %c15 = arith.constant 15 : index
    %c0_110 = arith.constant 0 : index
    %90 = vector.load %arg2[%c0_109, %c15, %c0_110] : memref<1x42x128xbf16, #tpu.memory_space<vmem>>, vector<1x18x128xbf16>
    %91 = vector.shape_cast %90 : vector<1x18x128xbf16> to vector<18x128xbf16>
    %c0_111 = arith.constant 0 : index
    %c0_112 = arith.constant 0 : index
    %92 = vector.load %arg6[%c0_111, %c0_112] : memref<18x128xf32, #tpu.memory_space<vmem>>, vector<18x128xf32>
    %c11 = arith.constant 11 : index
    %c0_113 = arith.constant 0 : index
    %c0_114 = arith.constant 0 : index
    %93 = vector.load %arg3[%c11, %c0_113, %c0_114] : memref<16x128x128xbf16, #tpu.memory_space<vmem>>, vector<1x128x128xbf16>
    %94 = vector.shape_cast %93 : vector<1x128x128xbf16> to vector<128x128xbf16>
    %cst_115 = arith.constant dense<0.000000e+00> : vector<18x128xf32>
    %95 = tpu.matmul %91, %94, %cst_115 {dimension_numbers = #tpu.dot_dimension_numbers<[1], [0], [0], [1], [0, 0, 1, 1], [], []>} : vector<18x128xbf16>, vector<128x128xbf16>, vector<18x128xf32> -> vector<18x128xf32>
    %96 = arith.addf %92, %95 : vector<18x128xf32>
    %c0_116 = arith.constant 0 : index
    %c0_117 = arith.constant 0 : index
    %97 = vector.load %arg6[%c0_116, %c0_117] : memref<18x128xf32, #tpu.memory_space<vmem>>, vector<18x128xf32>
    tpu.vector_store %arg6[%c0_116, %c0_117], %96 {strides = array<i32>} : memref<18x128xf32, #tpu.memory_space<vmem>>, vector<18x128xf32>,
    %c0_118 = arith.constant 0 : index
    %c18 = arith.constant 18 : index
    %c0_119 = arith.constant 0 : index
    %98 = vector.load %arg2[%c0_118, %c18, %c0_119] : memref<1x42x128xbf16, #tpu.memory_space<vmem>>, vector<1x18x128xbf16>
    %99 = vector.shape_cast %98 : vector<1x18x128xbf16> to vector<18x128xbf16>
    %c0_120 = arith.constant 0 : index
    %c0_121 = arith.constant 0 : index
    %100 = vector.load %arg6[%c0_120, %c0_121] : memref<18x128xf32, #tpu.memory_space<vmem>>, vector<18x128xf32>
    %c12_122 = arith.constant 12 : index
    %c0_123 = arith.constant 0 : index
    %c0_124 = arith.constant 0 : index
    %101 = vector.load %arg3[%c12_122, %c0_123, %c0_124] : memref<16x128x128xbf16, #tpu.memory_space<vmem>>, vector<1x128x128xbf16>
    %102 = vector.shape_cast %101 : vector<1x128x128xbf16> to vector<128x128xbf16>
    %cst_125 = arith.constant dense<0.000000e+00> : vector<18x128xf32>
    %103 = tpu.matmul %99, %102, %cst_125 {dimension_numbers = #tpu.dot_dimension_numbers<[1], [0], [0], [1], [0, 0, 1, 1], [], []>} : vector<18x128xbf16>, vector<128x128xbf16>, vector<18x128xf32> -> vector<18x128xf32>
    %104 = arith.addf %100, %103 : vector<18x128xf32>
    %c0_126 = arith.constant 0 : index
    %c0_127 = arith.constant 0 : index
    %105 = vector.load %arg6[%c0_126, %c0_127] : memref<18x128xf32, #tpu.memory_space<vmem>>, vector<18x128xf32>
    tpu.vector_store %arg6[%c0_126, %c0_127], %104 {strides = array<i32>} : memref<18x128xf32, #tpu.memory_space<vmem>>, vector<18x128xf32>,
    %c0_128 = arith.constant 0 : index
    %c19 = arith.constant 19 : index
    %c0_129 = arith.constant 0 : index
    %106 = vector.load %arg2[%c0_128, %c19, %c0_129] : memref<1x42x128xbf16, #tpu.memory_space<vmem>>, vector<1x18x128xbf16>
    %107 = vector.shape_cast %106 : vector<1x18x128xbf16> to vector<18x128xbf16>
    %c0_130 = arith.constant 0 : index
    %c0_131 = arith.constant 0 : index
    %108 = vector.load %arg6[%c0_130, %c0_131] : memref<18x128xf32, #tpu.memory_space<vmem>>, vector<18x128xf32>
    %c13_132 = arith.constant 13 : index
    %c0_133 = arith.constant 0 : index
    %c0_134 = arith.constant 0 : index
    %109 = vector.load %arg3[%c13_132, %c0_133, %c0_134] : memref<16x128x128xbf16, #tpu.memory_space<vmem>>, vector<1x128x128xbf16>
    %110 = vector.shape_cast %109 : vector<1x128x128xbf16> to vector<128x128xbf16>
    %cst_135 = arith.constant dense<0.000000e+00> : vector<18x128xf32>
    %111 = tpu.matmul %107, %110, %cst_135 {dimension_numbers = #tpu.dot_dimension_numbers<[1], [0], [0], [1], [0, 0, 1, 1], [], []>} : vector<18x128xbf16>, vector<128x128xbf16>, vector<18x128xf32> -> vector<18x128xf32>
    %112 = arith.addf %108, %111 : vector<18x128xf32>
    %c0_136 = arith.constant 0 : index
    %c0_137 = arith.constant 0 : index
    %113 = vector.load %arg6[%c0_136, %c0_137] : memref<18x128xf32, #tpu.memory_space<vmem>>, vector<18x128xf32>
    tpu.vector_store %arg6[%c0_136, %c0_137], %112 {strides = array<i32>} : memref<18x128xf32, #tpu.memory_space<vmem>>, vector<18x128xf32>,
    %c0_138 = arith.constant 0 : index
    %c20 = arith.constant 20 : index
    %c0_139 = arith.constant 0 : index
    %114 = vector.load %arg2[%c0_138, %c20, %c0_139] : memref<1x42x128xbf16, #tpu.memory_space<vmem>>, vector<1x18x128xbf16>
    %115 = vector.shape_cast %114 : vector<1x18x128xbf16> to vector<18x128xbf16>
    %c0_140 = arith.constant 0 : index
    %c0_141 = arith.constant 0 : index
    %116 = vector.load %arg6[%c0_140, %c0_141] : memref<18x128xf32, #tpu.memory_space<vmem>>, vector<18x128xf32>
    %c14_142 = arith.constant 14 : index
    %c0_143 = arith.constant 0 : index
    %c0_144 = arith.constant 0 : index
    %117 = vector.load %arg3[%c14_142, %c0_143, %c0_144] : memref<16x128x128xbf16, #tpu.memory_space<vmem>>, vector<1x128x128xbf16>
    %118 = vector.shape_cast %117 : vector<1x128x128xbf16> to vector<128x128xbf16>
    %cst_145 = arith.constant dense<0.000000e+00> : vector<18x128xf32>
    %119 = tpu.matmul %115, %118, %cst_145 {dimension_numbers = #tpu.dot_dimension_numbers<[1], [0], [0], [1], [0, 0, 1, 1], [], []>} : vector<18x128xbf16>, vector<128x128xbf16>, vector<18x128xf32> -> vector<18x128xf32>
    %120 = arith.addf %116, %119 : vector<18x128xf32>
    %c0_146 = arith.constant 0 : index
    %c0_147 = arith.constant 0 : index
    %121 = vector.load %arg6[%c0_146, %c0_147] : memref<18x128xf32, #tpu.memory_space<vmem>>, vector<18x128xf32>
    tpu.vector_store %arg6[%c0_146, %c0_147], %120 {strides = array<i32>} : memref<18x128xf32, #tpu.memory_space<vmem>>, vector<18x128xf32>,
    %c0_148 = arith.constant 0 : index
    %c21 = arith.constant 21 : index
    %c0_149 = arith.constant 0 : index
    %122 = vector.load %arg2[%c0_148, %c21, %c0_149] : memref<1x42x128xbf16, #tpu.memory_space<vmem>>, vector<1x18x128xbf16>
    %123 = vector.shape_cast %122 : vector<1x18x128xbf16> to vector<18x128xbf16>
    %c0_150 = arith.constant 0 : index
    %c0_151 = arith.constant 0 : index
    %124 = vector.load %arg6[%c0_150, %c0_151] : memref<18x128xf32, #tpu.memory_space<vmem>>, vector<18x128xf32>
    %c15_152 = arith.constant 15 : index
    %c0_153 = arith.constant 0 : index
    %c0_154 = arith.constant 0 : index
    %125 = vector.load %arg3[%c15_152, %c0_153, %c0_154] : memref<16x128x128xbf16, #tpu.memory_space<vmem>>, vector<1x128x128xbf16>
    %126 = vector.shape_cast %125 : vector<1x128x128xbf16> to vector<128x128xbf16>
    %cst_155 = arith.constant dense<0.000000e+00> : vector<18x128xf32>
    %127 = tpu.matmul %123, %126, %cst_155 {dimension_numbers = #tpu.dot_dimension_numbers<[1], [0], [0], [1], [0, 0, 1, 1], [], []>} : vector<18x128xbf16>, vector<128x128xbf16>, vector<18x128xf32> -> vector<18x128xf32>
    %128 = arith.addf %124, %127 : vector<18x128xf32>
    %c0_156 = arith.constant 0 : index
    %c0_157 = arith.constant 0 : index
    %129 = vector.load %arg6[%c0_156, %c0_157] : memref<18x128xf32, #tpu.memory_space<vmem>>, vector<18x128xf32>
    tpu.vector_store %arg6[%c0_156, %c0_157], %128 {strides = array<i32>} : memref<18x128xf32, #tpu.memory_space<vmem>>, vector<18x128xf32>,
    %c0_158 = arith.constant 0 : index
    %c0_159 = arith.constant 0 : index
    %130 = vector.load %arg6[%c0_158, %c0_159] : memref<18x128xf32, #tpu.memory_space<vmem>>, vector<18x128xf32>
    %c0_160 = arith.constant 0 : index
    %c0_161 = arith.constant 0 : index
    %131 = vector.load %arg4[%c0_160, %c0_161] : memref<1x128xf32, #tpu.memory_space<vmem>>, vector<1x128xf32>
    %132 = vector.broadcast %131 : vector<1x128xf32> to vector<18x128xf32>
    %133 = arith.addf %130, %132 : vector<18x128xf32>
    %134 = tpu.iota {dimensions = array<i32: 0>} : vector<18x1xi32>
    %c6_i32 = arith.constant 6 : i32
    %c0_i32 = arith.constant 0 : i32
    %135 = arith.cmpi eq, %c6_i32, %c0_i32 : i32
    %c1_i32 = arith.constant 1 : i32
    %136 = arith.select %135, %c1_i32, %c6_i32 : i32
    %137 = vector.broadcast %136 : i32 to vector<18x1xi32>
    %138 = arith.remsi %134, %137 : vector<18x1xi32>
    %c0_i32_162 = arith.constant 0 : i32
    %139 = vector.broadcast %c0_i32_162 : i32 to vector<18x1xi32>
    %140 = arith.cmpi ne, %138, %139 : vector<18x1xi32>
    %c0_i32_163 = arith.constant 0 : i32
    %141 = vector.broadcast %c0_i32_163 : i32 to vector<18x1xi32>
    %142 = arith.cmpi slt, %138, %141 : vector<18x1xi32>
    %c0_i32_164 = arith.constant 0 : i32
    %143 = arith.cmpi slt, %136, %c0_i32_164 : i32
    %144 = vector.broadcast %143 : i1 to vector<18x1xi1>
    %145 = vector.broadcast %144 : vector<18x1xi1> to vector<18x1xi1>
    %146 = arith.xori %142, %145 : vector<18x1xi1>
    %147 = arith.andi %146, %140 : vector<18x1xi1>
    %148 = vector.broadcast %136 : i32 to vector<18x1xi32>
    %149 = arith.addi %138, %148 : vector<18x1xi32>
    %150 = arith.select %147, %149, %138 : vector<18x1xi1>, vector<18x1xi32>
    %c3_i32 = arith.constant 3 : i32
    %151 = vector.broadcast %c3_i32 : i32 to vector<18x1xi32>
    %152 = arith.cmpi slt, %150, %151 : vector<18x1xi32>
    %cst_165 = arith.constant 0.000000e+00 : f32
    %153 = vector.shape_cast %152 : vector<18x1xi1> to vector<18x1xi1>
    %154 = vector.broadcast %153 : vector<18x1xi1> to vector<18x128xi1>
    %155 = vector.broadcast %cst_165 : f32 to vector<18x128xf32>
    %156 = arith.select %154, %133, %155 : vector<18x128xi1>, vector<18x128xf32>
    %cst_166 = arith.constant dense<0.000000e+00> : vector<128xf32>
    %157 = vector.multi_reduction <add>, %156, %cst_166 [0] : vector<18x128xf32> to vector<128xf32>
    %158 = vector.shape_cast %157 : vector<128xf32> to vector<1x128xf32>
    %cst_167 = arith.constant 0.111111112 : f32
    %159 = vector.broadcast %cst_167 : f32 to vector<1x128xf32>
    %160 = arith.mulf %158, %159 : vector<1x128xf32>
    %161 = vector.broadcast %160 : vector<1x128xf32> to vector<18x128xf32>
    %162 = arith.subf %133, %161 : vector<18x128xf32>
    %cst_168 = arith.constant 0.000000e+00 : f32
    %163 = vector.shape_cast %152 : vector<18x1xi1> to vector<18x1xi1>
    %164 = vector.broadcast %163 : vector<18x1xi1> to vector<18x128xi1>
    %165 = vector.broadcast %cst_168 : f32 to vector<18x128xf32>
    %166 = arith.select %164, %162, %165 : vector<18x128xi1>, vector<18x128xf32>
    %167 = arith.mulf %166, %166 : vector<18x128xf32>
    %cst_169 = arith.constant dense<0.000000e+00> : vector<128xf32>
    %168 = vector.multi_reduction <add>, %167, %cst_169 [0] : vector<18x128xf32> to vector<128xf32>
    %169 = vector.shape_cast %168 : vector<128xf32> to vector<1x128xf32>
    %cst_170 = arith.constant 0.111111112 : f32
    %170 = vector.broadcast %cst_170 : f32 to vector<1x128xf32>
    %171 = arith.mulf %169, %170 : vector<1x128xf32>
    %cst_171 = arith.constant 9.99999974E-6 : f32
    %172 = vector.broadcast %cst_171 : f32 to vector<1x128xf32>
    %173 = arith.addf %171, %172 : vector<1x128xf32>
    %174 = math.rsqrt %173 : vector<1x128xf32>
    %175 = vector.broadcast %174 : vector<1x128xf32> to vector<18x128xf32>
    %176 = arith.mulf %162, %175 : vector<18x128xf32>
    %cst_172 = arith.constant 0.000000e+00 : f32
    %177 = vector.broadcast %cst_172 : f32 to vector<18x128xf32>
    %178 = arith.cmpf ogt, %176, %177 : vector<18x128xf32>
    %cst_173 = arith.constant 2.000000e-01 : f32
    %179 = vector.broadcast %cst_173 : f32 to vector<18x128xf32>
    %180 = arith.mulf %179, %176 : vector<18x128xf32>
    %181 = arith.select %178, %176, %180 : vector<18x128xi1>, vector<18x128xf32>
    %182 = arith.truncf %181 : vector<18x128xf32> to vector<18x128xbf16>
    %c0_174 = arith.constant 0 : index
    %c0_175 = arith.constant 0 : index
    %c0_176 = arith.constant 0 : index
    %183 = vector.load %arg5[%c0_174, %c0_175, %c0_176] : memref<1x18x128xbf16, #tpu.memory_space<vmem>>, vector<1x18x128xbf16>
    %184 = vector.shape_cast %183 : vector<1x18x128xbf16> to vector<18x128xbf16>
    %185 = vector.shape_cast %182 : vector<18x128xbf16> to vector<1x18x128xbf16>
    tpu.vector_store %arg5[%c0_174, %c0_175, %c0_176], %185 {strides = array<i32>} : memref<1x18x128xbf16, #tpu.memory_space<vmem>>, vector<1x18x128xbf16>,
    return
  }
  func.func @transform_0(%arg0: i32, %arg1: i32) -> (i32, i32, i32) {
    %c0_i32 = arith.constant 0 : i32
    %c0_i32_0 = arith.constant 0 : i32
    %c0_i32_1 = arith.constant 0 : i32
    return %arg0, %c0_i32, %c0_i32_0 : i32, i32, i32
  }
  func.func @transform_1(%arg0: i32, %arg1: i32) -> (i32, i32, i32) {
    %c0_i32 = arith.constant 0 : i32
    %c0_i32_0 = arith.constant 0 : i32
    %c0_i32_1 = arith.constant 0 : i32
    return %c0_i32, %c0_i32_0, %arg1 : i32, i32, i32
  }
  func.func @transform_2(%arg0: i32, %arg1: i32) -> (i32, i32) {
    %c0_i32 = arith.constant 0 : i32
    %c0_i32_0 = arith.constant 0 : i32
    return %c0_i32, %arg1 : i32, i32
  }
  func.func @transform_3(%arg0: i32, %arg1: i32) -> (i32, i32, i32) {
    %c0_i32 = arith.constant 0 : i32
    %c0_i32_0 = arith.constant 0 : i32
    return %arg0, %c0_i32, %arg1 : i32, i32, i32
  }
}

module attributes {stable_mosaic.version = 11 : i64} {
  func.func @kernel(%arg0: i32, %arg1: i32, %arg2: memref<1x30x128xbf16, #tpu.memory_space<vmem>>, %arg3: memref<16x128x128xbf16, #tpu.memory_space<vmem>>, %arg4: memref<1x128xf32, #tpu.memory_space<vmem>>, %arg5: memref<1x10x128xf32, #tpu.memory_space<vmem>>, %arg6: memref<10x128xf32, #tpu.memory_space<vmem>>) attributes {dimension_semantics = [#tpu.dimension_semantics<parallel>, #tpu.dimension_semantics<parallel>], iteration_bounds = array<i64: 2, 1>, scalar_prefetch = 0 : i64, scratch_operands = 1 : i64, tpu.core_type = #tpu.core_type<tc>, window_params = [{transform_indices = @transform_0, window_bounds = array<i64: 1, 30, 128>}, {transform_indices = @transform_1, window_bounds = array<i64: 16, 128, 128>}, {transform_indices = @transform_2, window_bounds = array<i64: 1, 128>}, {transform_indices = @transform_3, window_bounds = array<i64: 1, 10, 128>}]} {
    %cst = arith.constant 0.000000e+00 : f32
    %0 = vector.broadcast %cst : f32 to vector<10x128xf32>
    %c0 = arith.constant 0 : index
    %c0_0 = arith.constant 0 : index
    %1 = vector.load %arg6[%c0, %c0_0] : memref<10x128xf32, #tpu.memory_space<vmem>>, vector<10x128xf32>
    tpu.vector_store %arg6[%c0, %c0_0], %0 {strides = array<i32>} : memref<10x128xf32, #tpu.memory_space<vmem>>, vector<10x128xf32>,
    %c0_1 = arith.constant 0 : index
    %c0_2 = arith.constant 0 : index
    %c0_3 = arith.constant 0 : index
    %2 = vector.load %arg2[%c0_1, %c0_2, %c0_3] : memref<1x30x128xbf16, #tpu.memory_space<vmem>>, vector<1x10x128xbf16>
    %3 = vector.shape_cast %2 : vector<1x10x128xbf16> to vector<10x128xbf16>
    %c0_4 = arith.constant 0 : index
    %c0_5 = arith.constant 0 : index
    %4 = vector.load %arg6[%c0_4, %c0_5] : memref<10x128xf32, #tpu.memory_space<vmem>>, vector<10x128xf32>
    %c0_6 = arith.constant 0 : index
    %c0_7 = arith.constant 0 : index
    %c0_8 = arith.constant 0 : index
    %5 = vector.load %arg3[%c0_6, %c0_7, %c0_8] : memref<16x128x128xbf16, #tpu.memory_space<vmem>>, vector<1x128x128xbf16>
    %6 = vector.shape_cast %5 : vector<1x128x128xbf16> to vector<128x128xbf16>
    %cst_9 = arith.constant dense<0.000000e+00> : vector<10x128xf32>
    %7 = tpu.matmul %3, %6, %cst_9 {dimension_numbers = #tpu.dot_dimension_numbers<[1], [0], [0], [1], [0, 0, 1, 1], [], []>} : vector<10x128xbf16>, vector<128x128xbf16>, vector<10x128xf32> -> vector<10x128xf32>
    %8 = arith.addf %4, %7 : vector<10x128xf32>
    %c0_10 = arith.constant 0 : index
    %c0_11 = arith.constant 0 : index
    %9 = vector.load %arg6[%c0_10, %c0_11] : memref<10x128xf32, #tpu.memory_space<vmem>>, vector<10x128xf32>
    tpu.vector_store %arg6[%c0_10, %c0_11], %8 {strides = array<i32>} : memref<10x128xf32, #tpu.memory_space<vmem>>, vector<10x128xf32>,
    %c0_12 = arith.constant 0 : index
    %c1 = arith.constant 1 : index
    %c0_13 = arith.constant 0 : index
    %10 = vector.load %arg2[%c0_12, %c1, %c0_13] : memref<1x30x128xbf16, #tpu.memory_space<vmem>>, vector<1x10x128xbf16>
    %11 = vector.shape_cast %10 : vector<1x10x128xbf16> to vector<10x128xbf16>
    %c0_14 = arith.constant 0 : index
    %c0_15 = arith.constant 0 : index
    %12 = vector.load %arg6[%c0_14, %c0_15] : memref<10x128xf32, #tpu.memory_space<vmem>>, vector<10x128xf32>
    %c1_16 = arith.constant 1 : index
    %c0_17 = arith.constant 0 : index
    %c0_18 = arith.constant 0 : index
    %13 = vector.load %arg3[%c1_16, %c0_17, %c0_18] : memref<16x128x128xbf16, #tpu.memory_space<vmem>>, vector<1x128x128xbf16>
    %14 = vector.shape_cast %13 : vector<1x128x128xbf16> to vector<128x128xbf16>
    %cst_19 = arith.constant dense<0.000000e+00> : vector<10x128xf32>
    %15 = tpu.matmul %11, %14, %cst_19 {dimension_numbers = #tpu.dot_dimension_numbers<[1], [0], [0], [1], [0, 0, 1, 1], [], []>} : vector<10x128xbf16>, vector<128x128xbf16>, vector<10x128xf32> -> vector<10x128xf32>
    %16 = arith.addf %12, %15 : vector<10x128xf32>
    %c0_20 = arith.constant 0 : index
    %c0_21 = arith.constant 0 : index
    %17 = vector.load %arg6[%c0_20, %c0_21] : memref<10x128xf32, #tpu.memory_space<vmem>>, vector<10x128xf32>
    tpu.vector_store %arg6[%c0_20, %c0_21], %16 {strides = array<i32>} : memref<10x128xf32, #tpu.memory_space<vmem>>, vector<10x128xf32>,
    %c0_22 = arith.constant 0 : index
    %c2 = arith.constant 2 : index
    %c0_23 = arith.constant 0 : index
    %18 = vector.load %arg2[%c0_22, %c2, %c0_23] : memref<1x30x128xbf16, #tpu.memory_space<vmem>>, vector<1x10x128xbf16>
    %19 = vector.shape_cast %18 : vector<1x10x128xbf16> to vector<10x128xbf16>
    %c0_24 = arith.constant 0 : index
    %c0_25 = arith.constant 0 : index
    %20 = vector.load %arg6[%c0_24, %c0_25] : memref<10x128xf32, #tpu.memory_space<vmem>>, vector<10x128xf32>
    %c2_26 = arith.constant 2 : index
    %c0_27 = arith.constant 0 : index
    %c0_28 = arith.constant 0 : index
    %21 = vector.load %arg3[%c2_26, %c0_27, %c0_28] : memref<16x128x128xbf16, #tpu.memory_space<vmem>>, vector<1x128x128xbf16>
    %22 = vector.shape_cast %21 : vector<1x128x128xbf16> to vector<128x128xbf16>
    %cst_29 = arith.constant dense<0.000000e+00> : vector<10x128xf32>
    %23 = tpu.matmul %19, %22, %cst_29 {dimension_numbers = #tpu.dot_dimension_numbers<[1], [0], [0], [1], [0, 0, 1, 1], [], []>} : vector<10x128xbf16>, vector<128x128xbf16>, vector<10x128xf32> -> vector<10x128xf32>
    %24 = arith.addf %20, %23 : vector<10x128xf32>
    %c0_30 = arith.constant 0 : index
    %c0_31 = arith.constant 0 : index
    %25 = vector.load %arg6[%c0_30, %c0_31] : memref<10x128xf32, #tpu.memory_space<vmem>>, vector<10x128xf32>
    tpu.vector_store %arg6[%c0_30, %c0_31], %24 {strides = array<i32>} : memref<10x128xf32, #tpu.memory_space<vmem>>, vector<10x128xf32>,
    %c0_32 = arith.constant 0 : index
    %c3 = arith.constant 3 : index
    %c0_33 = arith.constant 0 : index
    %26 = vector.load %arg2[%c0_32, %c3, %c0_33] : memref<1x30x128xbf16, #tpu.memory_space<vmem>>, vector<1x10x128xbf16>
    %27 = vector.shape_cast %26 : vector<1x10x128xbf16> to vector<10x128xbf16>
    %c0_34 = arith.constant 0 : index
    %c0_35 = arith.constant 0 : index
    %28 = vector.load %arg6[%c0_34, %c0_35] : memref<10x128xf32, #tpu.memory_space<vmem>>, vector<10x128xf32>
    %c3_36 = arith.constant 3 : index
    %c0_37 = arith.constant 0 : index
    %c0_38 = arith.constant 0 : index
    %29 = vector.load %arg3[%c3_36, %c0_37, %c0_38] : memref<16x128x128xbf16, #tpu.memory_space<vmem>>, vector<1x128x128xbf16>
    %30 = vector.shape_cast %29 : vector<1x128x128xbf16> to vector<128x128xbf16>
    %cst_39 = arith.constant dense<0.000000e+00> : vector<10x128xf32>
    %31 = tpu.matmul %27, %30, %cst_39 {dimension_numbers = #tpu.dot_dimension_numbers<[1], [0], [0], [1], [0, 0, 1, 1], [], []>} : vector<10x128xbf16>, vector<128x128xbf16>, vector<10x128xf32> -> vector<10x128xf32>
    %32 = arith.addf %28, %31 : vector<10x128xf32>
    %c0_40 = arith.constant 0 : index
    %c0_41 = arith.constant 0 : index
    %33 = vector.load %arg6[%c0_40, %c0_41] : memref<10x128xf32, #tpu.memory_space<vmem>>, vector<10x128xf32>
    tpu.vector_store %arg6[%c0_40, %c0_41], %32 {strides = array<i32>} : memref<10x128xf32, #tpu.memory_space<vmem>>, vector<10x128xf32>,
    %c0_42 = arith.constant 0 : index
    %c5 = arith.constant 5 : index
    %c0_43 = arith.constant 0 : index
    %34 = vector.load %arg2[%c0_42, %c5, %c0_43] : memref<1x30x128xbf16, #tpu.memory_space<vmem>>, vector<1x10x128xbf16>
    %35 = vector.shape_cast %34 : vector<1x10x128xbf16> to vector<10x128xbf16>
    %c0_44 = arith.constant 0 : index
    %c0_45 = arith.constant 0 : index
    %36 = vector.load %arg6[%c0_44, %c0_45] : memref<10x128xf32, #tpu.memory_space<vmem>>, vector<10x128xf32>
    %c4 = arith.constant 4 : index
    %c0_46 = arith.constant 0 : index
    %c0_47 = arith.constant 0 : index
    %37 = vector.load %arg3[%c4, %c0_46, %c0_47] : memref<16x128x128xbf16, #tpu.memory_space<vmem>>, vector<1x128x128xbf16>
    %38 = vector.shape_cast %37 : vector<1x128x128xbf16> to vector<128x128xbf16>
    %cst_48 = arith.constant dense<0.000000e+00> : vector<10x128xf32>
    %39 = tpu.matmul %35, %38, %cst_48 {dimension_numbers = #tpu.dot_dimension_numbers<[1], [0], [0], [1], [0, 0, 1, 1], [], []>} : vector<10x128xbf16>, vector<128x128xbf16>, vector<10x128xf32> -> vector<10x128xf32>
    %40 = arith.addf %36, %39 : vector<10x128xf32>
    %c0_49 = arith.constant 0 : index
    %c0_50 = arith.constant 0 : index
    %41 = vector.load %arg6[%c0_49, %c0_50] : memref<10x128xf32, #tpu.memory_space<vmem>>, vector<10x128xf32>
    tpu.vector_store %arg6[%c0_49, %c0_50], %40 {strides = array<i32>} : memref<10x128xf32, #tpu.memory_space<vmem>>, vector<10x128xf32>,
    %c0_51 = arith.constant 0 : index
    %c6 = arith.constant 6 : index
    %c0_52 = arith.constant 0 : index
    %42 = vector.load %arg2[%c0_51, %c6, %c0_52] : memref<1x30x128xbf16, #tpu.memory_space<vmem>>, vector<1x10x128xbf16>
    %43 = vector.shape_cast %42 : vector<1x10x128xbf16> to vector<10x128xbf16>
    %c0_53 = arith.constant 0 : index
    %c0_54 = arith.constant 0 : index
    %44 = vector.load %arg6[%c0_53, %c0_54] : memref<10x128xf32, #tpu.memory_space<vmem>>, vector<10x128xf32>
    %c5_55 = arith.constant 5 : index
    %c0_56 = arith.constant 0 : index
    %c0_57 = arith.constant 0 : index
    %45 = vector.load %arg3[%c5_55, %c0_56, %c0_57] : memref<16x128x128xbf16, #tpu.memory_space<vmem>>, vector<1x128x128xbf16>
    %46 = vector.shape_cast %45 : vector<1x128x128xbf16> to vector<128x128xbf16>
    %cst_58 = arith.constant dense<0.000000e+00> : vector<10x128xf32>
    %47 = tpu.matmul %43, %46, %cst_58 {dimension_numbers = #tpu.dot_dimension_numbers<[1], [0], [0], [1], [0, 0, 1, 1], [], []>} : vector<10x128xbf16>, vector<128x128xbf16>, vector<10x128xf32> -> vector<10x128xf32>
    %48 = arith.addf %44, %47 : vector<10x128xf32>
    %c0_59 = arith.constant 0 : index
    %c0_60 = arith.constant 0 : index
    %49 = vector.load %arg6[%c0_59, %c0_60] : memref<10x128xf32, #tpu.memory_space<vmem>>, vector<10x128xf32>
    tpu.vector_store %arg6[%c0_59, %c0_60], %48 {strides = array<i32>} : memref<10x128xf32, #tpu.memory_space<vmem>>, vector<10x128xf32>,
    %c0_61 = arith.constant 0 : index
    %c7 = arith.constant 7 : index
    %c0_62 = arith.constant 0 : index
    %50 = vector.load %arg2[%c0_61, %c7, %c0_62] : memref<1x30x128xbf16, #tpu.memory_space<vmem>>, vector<1x10x128xbf16>
    %51 = vector.shape_cast %50 : vector<1x10x128xbf16> to vector<10x128xbf16>
    %c0_63 = arith.constant 0 : index
    %c0_64 = arith.constant 0 : index
    %52 = vector.load %arg6[%c0_63, %c0_64] : memref<10x128xf32, #tpu.memory_space<vmem>>, vector<10x128xf32>
    %c6_65 = arith.constant 6 : index
    %c0_66 = arith.constant 0 : index
    %c0_67 = arith.constant 0 : index
    %53 = vector.load %arg3[%c6_65, %c0_66, %c0_67] : memref<16x128x128xbf16, #tpu.memory_space<vmem>>, vector<1x128x128xbf16>
    %54 = vector.shape_cast %53 : vector<1x128x128xbf16> to vector<128x128xbf16>
    %cst_68 = arith.constant dense<0.000000e+00> : vector<10x128xf32>
    %55 = tpu.matmul %51, %54, %cst_68 {dimension_numbers = #tpu.dot_dimension_numbers<[1], [0], [0], [1], [0, 0, 1, 1], [], []>} : vector<10x128xbf16>, vector<128x128xbf16>, vector<10x128xf32> -> vector<10x128xf32>
    %56 = arith.addf %52, %55 : vector<10x128xf32>
    %c0_69 = arith.constant 0 : index
    %c0_70 = arith.constant 0 : index
    %57 = vector.load %arg6[%c0_69, %c0_70] : memref<10x128xf32, #tpu.memory_space<vmem>>, vector<10x128xf32>
    tpu.vector_store %arg6[%c0_69, %c0_70], %56 {strides = array<i32>} : memref<10x128xf32, #tpu.memory_space<vmem>>, vector<10x128xf32>,
    %c0_71 = arith.constant 0 : index
    %c8 = arith.constant 8 : index
    %c0_72 = arith.constant 0 : index
    %58 = vector.load %arg2[%c0_71, %c8, %c0_72] : memref<1x30x128xbf16, #tpu.memory_space<vmem>>, vector<1x10x128xbf16>
    %59 = vector.shape_cast %58 : vector<1x10x128xbf16> to vector<10x128xbf16>
    %c0_73 = arith.constant 0 : index
    %c0_74 = arith.constant 0 : index
    %60 = vector.load %arg6[%c0_73, %c0_74] : memref<10x128xf32, #tpu.memory_space<vmem>>, vector<10x128xf32>
    %c7_75 = arith.constant 7 : index
    %c0_76 = arith.constant 0 : index
    %c0_77 = arith.constant 0 : index
    %61 = vector.load %arg3[%c7_75, %c0_76, %c0_77] : memref<16x128x128xbf16, #tpu.memory_space<vmem>>, vector<1x128x128xbf16>
    %62 = vector.shape_cast %61 : vector<1x128x128xbf16> to vector<128x128xbf16>
    %cst_78 = arith.constant dense<0.000000e+00> : vector<10x128xf32>
    %63 = tpu.matmul %59, %62, %cst_78 {dimension_numbers = #tpu.dot_dimension_numbers<[1], [0], [0], [1], [0, 0, 1, 1], [], []>} : vector<10x128xbf16>, vector<128x128xbf16>, vector<10x128xf32> -> vector<10x128xf32>
    %64 = arith.addf %60, %63 : vector<10x128xf32>
    %c0_79 = arith.constant 0 : index
    %c0_80 = arith.constant 0 : index
    %65 = vector.load %arg6[%c0_79, %c0_80] : memref<10x128xf32, #tpu.memory_space<vmem>>, vector<10x128xf32>
    tpu.vector_store %arg6[%c0_79, %c0_80], %64 {strides = array<i32>} : memref<10x128xf32, #tpu.memory_space<vmem>>, vector<10x128xf32>,
    %c0_81 = arith.constant 0 : index
    %c10 = arith.constant 10 : index
    %c0_82 = arith.constant 0 : index
    %66 = vector.load %arg2[%c0_81, %c10, %c0_82] : memref<1x30x128xbf16, #tpu.memory_space<vmem>>, vector<1x10x128xbf16>
    %67 = vector.shape_cast %66 : vector<1x10x128xbf16> to vector<10x128xbf16>
    %c0_83 = arith.constant 0 : index
    %c0_84 = arith.constant 0 : index
    %68 = vector.load %arg6[%c0_83, %c0_84] : memref<10x128xf32, #tpu.memory_space<vmem>>, vector<10x128xf32>
    %c8_85 = arith.constant 8 : index
    %c0_86 = arith.constant 0 : index
    %c0_87 = arith.constant 0 : index
    %69 = vector.load %arg3[%c8_85, %c0_86, %c0_87] : memref<16x128x128xbf16, #tpu.memory_space<vmem>>, vector<1x128x128xbf16>
    %70 = vector.shape_cast %69 : vector<1x128x128xbf16> to vector<128x128xbf16>
    %cst_88 = arith.constant dense<0.000000e+00> : vector<10x128xf32>
    %71 = tpu.matmul %67, %70, %cst_88 {dimension_numbers = #tpu.dot_dimension_numbers<[1], [0], [0], [1], [0, 0, 1, 1], [], []>} : vector<10x128xbf16>, vector<128x128xbf16>, vector<10x128xf32> -> vector<10x128xf32>
    %72 = arith.addf %68, %71 : vector<10x128xf32>
    %c0_89 = arith.constant 0 : index
    %c0_90 = arith.constant 0 : index
    %73 = vector.load %arg6[%c0_89, %c0_90] : memref<10x128xf32, #tpu.memory_space<vmem>>, vector<10x128xf32>
    tpu.vector_store %arg6[%c0_89, %c0_90], %72 {strides = array<i32>} : memref<10x128xf32, #tpu.memory_space<vmem>>, vector<10x128xf32>,
    %c0_91 = arith.constant 0 : index
    %c11 = arith.constant 11 : index
    %c0_92 = arith.constant 0 : index
    %74 = vector.load %arg2[%c0_91, %c11, %c0_92] : memref<1x30x128xbf16, #tpu.memory_space<vmem>>, vector<1x10x128xbf16>
    %75 = vector.shape_cast %74 : vector<1x10x128xbf16> to vector<10x128xbf16>
    %c0_93 = arith.constant 0 : index
    %c0_94 = arith.constant 0 : index
    %76 = vector.load %arg6[%c0_93, %c0_94] : memref<10x128xf32, #tpu.memory_space<vmem>>, vector<10x128xf32>
    %c9 = arith.constant 9 : index
    %c0_95 = arith.constant 0 : index
    %c0_96 = arith.constant 0 : index
    %77 = vector.load %arg3[%c9, %c0_95, %c0_96] : memref<16x128x128xbf16, #tpu.memory_space<vmem>>, vector<1x128x128xbf16>
    %78 = vector.shape_cast %77 : vector<1x128x128xbf16> to vector<128x128xbf16>
    %cst_97 = arith.constant dense<0.000000e+00> : vector<10x128xf32>
    %79 = tpu.matmul %75, %78, %cst_97 {dimension_numbers = #tpu.dot_dimension_numbers<[1], [0], [0], [1], [0, 0, 1, 1], [], []>} : vector<10x128xbf16>, vector<128x128xbf16>, vector<10x128xf32> -> vector<10x128xf32>
    %80 = arith.addf %76, %79 : vector<10x128xf32>
    %c0_98 = arith.constant 0 : index
    %c0_99 = arith.constant 0 : index
    %81 = vector.load %arg6[%c0_98, %c0_99] : memref<10x128xf32, #tpu.memory_space<vmem>>, vector<10x128xf32>
    tpu.vector_store %arg6[%c0_98, %c0_99], %80 {strides = array<i32>} : memref<10x128xf32, #tpu.memory_space<vmem>>, vector<10x128xf32>,
    %c0_100 = arith.constant 0 : index
    %c12 = arith.constant 12 : index
    %c0_101 = arith.constant 0 : index
    %82 = vector.load %arg2[%c0_100, %c12, %c0_101] : memref<1x30x128xbf16, #tpu.memory_space<vmem>>, vector<1x10x128xbf16>
    %83 = vector.shape_cast %82 : vector<1x10x128xbf16> to vector<10x128xbf16>
    %c0_102 = arith.constant 0 : index
    %c0_103 = arith.constant 0 : index
    %84 = vector.load %arg6[%c0_102, %c0_103] : memref<10x128xf32, #tpu.memory_space<vmem>>, vector<10x128xf32>
    %c10_104 = arith.constant 10 : index
    %c0_105 = arith.constant 0 : index
    %c0_106 = arith.constant 0 : index
    %85 = vector.load %arg3[%c10_104, %c0_105, %c0_106] : memref<16x128x128xbf16, #tpu.memory_space<vmem>>, vector<1x128x128xbf16>
    %86 = vector.shape_cast %85 : vector<1x128x128xbf16> to vector<128x128xbf16>
    %cst_107 = arith.constant dense<0.000000e+00> : vector<10x128xf32>
    %87 = tpu.matmul %83, %86, %cst_107 {dimension_numbers = #tpu.dot_dimension_numbers<[1], [0], [0], [1], [0, 0, 1, 1], [], []>} : vector<10x128xbf16>, vector<128x128xbf16>, vector<10x128xf32> -> vector<10x128xf32>
    %88 = arith.addf %84, %87 : vector<10x128xf32>
    %c0_108 = arith.constant 0 : index
    %c0_109 = arith.constant 0 : index
    %89 = vector.load %arg6[%c0_108, %c0_109] : memref<10x128xf32, #tpu.memory_space<vmem>>, vector<10x128xf32>
    tpu.vector_store %arg6[%c0_108, %c0_109], %88 {strides = array<i32>} : memref<10x128xf32, #tpu.memory_space<vmem>>, vector<10x128xf32>,
    %c0_110 = arith.constant 0 : index
    %c13 = arith.constant 13 : index
    %c0_111 = arith.constant 0 : index
    %90 = vector.load %arg2[%c0_110, %c13, %c0_111] : memref<1x30x128xbf16, #tpu.memory_space<vmem>>, vector<1x10x128xbf16>
    %91 = vector.shape_cast %90 : vector<1x10x128xbf16> to vector<10x128xbf16>
    %c0_112 = arith.constant 0 : index
    %c0_113 = arith.constant 0 : index
    %92 = vector.load %arg6[%c0_112, %c0_113] : memref<10x128xf32, #tpu.memory_space<vmem>>, vector<10x128xf32>
    %c11_114 = arith.constant 11 : index
    %c0_115 = arith.constant 0 : index
    %c0_116 = arith.constant 0 : index
    %93 = vector.load %arg3[%c11_114, %c0_115, %c0_116] : memref<16x128x128xbf16, #tpu.memory_space<vmem>>, vector<1x128x128xbf16>
    %94 = vector.shape_cast %93 : vector<1x128x128xbf16> to vector<128x128xbf16>
    %cst_117 = arith.constant dense<0.000000e+00> : vector<10x128xf32>
    %95 = tpu.matmul %91, %94, %cst_117 {dimension_numbers = #tpu.dot_dimension_numbers<[1], [0], [0], [1], [0, 0, 1, 1], [], []>} : vector<10x128xbf16>, vector<128x128xbf16>, vector<10x128xf32> -> vector<10x128xf32>
    %96 = arith.addf %92, %95 : vector<10x128xf32>
    %c0_118 = arith.constant 0 : index
    %c0_119 = arith.constant 0 : index
    %97 = vector.load %arg6[%c0_118, %c0_119] : memref<10x128xf32, #tpu.memory_space<vmem>>, vector<10x128xf32>
    tpu.vector_store %arg6[%c0_118, %c0_119], %96 {strides = array<i32>} : memref<10x128xf32, #tpu.memory_space<vmem>>, vector<10x128xf32>,
    %c0_120 = arith.constant 0 : index
    %c15 = arith.constant 15 : index
    %c0_121 = arith.constant 0 : index
    %98 = vector.load %arg2[%c0_120, %c15, %c0_121] : memref<1x30x128xbf16, #tpu.memory_space<vmem>>, vector<1x10x128xbf16>
    %99 = vector.shape_cast %98 : vector<1x10x128xbf16> to vector<10x128xbf16>
    %c0_122 = arith.constant 0 : index
    %c0_123 = arith.constant 0 : index
    %100 = vector.load %arg6[%c0_122, %c0_123] : memref<10x128xf32, #tpu.memory_space<vmem>>, vector<10x128xf32>
    %c12_124 = arith.constant 12 : index
    %c0_125 = arith.constant 0 : index
    %c0_126 = arith.constant 0 : index
    %101 = vector.load %arg3[%c12_124, %c0_125, %c0_126] : memref<16x128x128xbf16, #tpu.memory_space<vmem>>, vector<1x128x128xbf16>
    %102 = vector.shape_cast %101 : vector<1x128x128xbf16> to vector<128x128xbf16>
    %cst_127 = arith.constant dense<0.000000e+00> : vector<10x128xf32>
    %103 = tpu.matmul %99, %102, %cst_127 {dimension_numbers = #tpu.dot_dimension_numbers<[1], [0], [0], [1], [0, 0, 1, 1], [], []>} : vector<10x128xbf16>, vector<128x128xbf16>, vector<10x128xf32> -> vector<10x128xf32>
    %104 = arith.addf %100, %103 : vector<10x128xf32>
    %c0_128 = arith.constant 0 : index
    %c0_129 = arith.constant 0 : index
    %105 = vector.load %arg6[%c0_128, %c0_129] : memref<10x128xf32, #tpu.memory_space<vmem>>, vector<10x128xf32>
    tpu.vector_store %arg6[%c0_128, %c0_129], %104 {strides = array<i32>} : memref<10x128xf32, #tpu.memory_space<vmem>>, vector<10x128xf32>,
    %c0_130 = arith.constant 0 : index
    %c16 = arith.constant 16 : index
    %c0_131 = arith.constant 0 : index
    %106 = vector.load %arg2[%c0_130, %c16, %c0_131] : memref<1x30x128xbf16, #tpu.memory_space<vmem>>, vector<1x10x128xbf16>
    %107 = vector.shape_cast %106 : vector<1x10x128xbf16> to vector<10x128xbf16>
    %c0_132 = arith.constant 0 : index
    %c0_133 = arith.constant 0 : index
    %108 = vector.load %arg6[%c0_132, %c0_133] : memref<10x128xf32, #tpu.memory_space<vmem>>, vector<10x128xf32>
    %c13_134 = arith.constant 13 : index
    %c0_135 = arith.constant 0 : index
    %c0_136 = arith.constant 0 : index
    %109 = vector.load %arg3[%c13_134, %c0_135, %c0_136] : memref<16x128x128xbf16, #tpu.memory_space<vmem>>, vector<1x128x128xbf16>
    %110 = vector.shape_cast %109 : vector<1x128x128xbf16> to vector<128x128xbf16>
    %cst_137 = arith.constant dense<0.000000e+00> : vector<10x128xf32>
    %111 = tpu.matmul %107, %110, %cst_137 {dimension_numbers = #tpu.dot_dimension_numbers<[1], [0], [0], [1], [0, 0, 1, 1], [], []>} : vector<10x128xbf16>, vector<128x128xbf16>, vector<10x128xf32> -> vector<10x128xf32>
    %112 = arith.addf %108, %111 : vector<10x128xf32>
    %c0_138 = arith.constant 0 : index
    %c0_139 = arith.constant 0 : index
    %113 = vector.load %arg6[%c0_138, %c0_139] : memref<10x128xf32, #tpu.memory_space<vmem>>, vector<10x128xf32>
    tpu.vector_store %arg6[%c0_138, %c0_139], %112 {strides = array<i32>} : memref<10x128xf32, #tpu.memory_space<vmem>>, vector<10x128xf32>,
    %c0_140 = arith.constant 0 : index
    %c17 = arith.constant 17 : index
    %c0_141 = arith.constant 0 : index
    %114 = vector.load %arg2[%c0_140, %c17, %c0_141] : memref<1x30x128xbf16, #tpu.memory_space<vmem>>, vector<1x10x128xbf16>
    %115 = vector.shape_cast %114 : vector<1x10x128xbf16> to vector<10x128xbf16>
    %c0_142 = arith.constant 0 : index
    %c0_143 = arith.constant 0 : index
    %116 = vector.load %arg6[%c0_142, %c0_143] : memref<10x128xf32, #tpu.memory_space<vmem>>, vector<10x128xf32>
    %c14 = arith.constant 14 : index
    %c0_144 = arith.constant 0 : index
    %c0_145 = arith.constant 0 : index
    %117 = vector.load %arg3[%c14, %c0_144, %c0_145] : memref<16x128x128xbf16, #tpu.memory_space<vmem>>, vector<1x128x128xbf16>
    %118 = vector.shape_cast %117 : vector<1x128x128xbf16> to vector<128x128xbf16>
    %cst_146 = arith.constant dense<0.000000e+00> : vector<10x128xf32>
    %119 = tpu.matmul %115, %118, %cst_146 {dimension_numbers = #tpu.dot_dimension_numbers<[1], [0], [0], [1], [0, 0, 1, 1], [], []>} : vector<10x128xbf16>, vector<128x128xbf16>, vector<10x128xf32> -> vector<10x128xf32>
    %120 = arith.addf %116, %119 : vector<10x128xf32>
    %c0_147 = arith.constant 0 : index
    %c0_148 = arith.constant 0 : index
    %121 = vector.load %arg6[%c0_147, %c0_148] : memref<10x128xf32, #tpu.memory_space<vmem>>, vector<10x128xf32>
    tpu.vector_store %arg6[%c0_147, %c0_148], %120 {strides = array<i32>} : memref<10x128xf32, #tpu.memory_space<vmem>>, vector<10x128xf32>,
    %c0_149 = arith.constant 0 : index
    %c18 = arith.constant 18 : index
    %c0_150 = arith.constant 0 : index
    %122 = vector.load %arg2[%c0_149, %c18, %c0_150] : memref<1x30x128xbf16, #tpu.memory_space<vmem>>, vector<1x10x128xbf16>
    %123 = vector.shape_cast %122 : vector<1x10x128xbf16> to vector<10x128xbf16>
    %c0_151 = arith.constant 0 : index
    %c0_152 = arith.constant 0 : index
    %124 = vector.load %arg6[%c0_151, %c0_152] : memref<10x128xf32, #tpu.memory_space<vmem>>, vector<10x128xf32>
    %c15_153 = arith.constant 15 : index
    %c0_154 = arith.constant 0 : index
    %c0_155 = arith.constant 0 : index
    %125 = vector.load %arg3[%c15_153, %c0_154, %c0_155] : memref<16x128x128xbf16, #tpu.memory_space<vmem>>, vector<1x128x128xbf16>
    %126 = vector.shape_cast %125 : vector<1x128x128xbf16> to vector<128x128xbf16>
    %cst_156 = arith.constant dense<0.000000e+00> : vector<10x128xf32>
    %127 = tpu.matmul %123, %126, %cst_156 {dimension_numbers = #tpu.dot_dimension_numbers<[1], [0], [0], [1], [0, 0, 1, 1], [], []>} : vector<10x128xbf16>, vector<128x128xbf16>, vector<10x128xf32> -> vector<10x128xf32>
    %128 = arith.addf %124, %127 : vector<10x128xf32>
    %c0_157 = arith.constant 0 : index
    %c0_158 = arith.constant 0 : index
    %129 = vector.load %arg6[%c0_157, %c0_158] : memref<10x128xf32, #tpu.memory_space<vmem>>, vector<10x128xf32>
    tpu.vector_store %arg6[%c0_157, %c0_158], %128 {strides = array<i32>} : memref<10x128xf32, #tpu.memory_space<vmem>>, vector<10x128xf32>,
    %c0_159 = arith.constant 0 : index
    %c0_160 = arith.constant 0 : index
    %130 = vector.load %arg6[%c0_159, %c0_160] : memref<10x128xf32, #tpu.memory_space<vmem>>, vector<10x128xf32>
    %c0_161 = arith.constant 0 : index
    %c0_162 = arith.constant 0 : index
    %131 = vector.load %arg4[%c0_161, %c0_162] : memref<1x128xf32, #tpu.memory_space<vmem>>, vector<1x128xf32>
    %132 = vector.broadcast %131 : vector<1x128xf32> to vector<10x128xf32>
    %133 = arith.addf %130, %132 : vector<10x128xf32>
    %c0_163 = arith.constant 0 : index
    %c0_164 = arith.constant 0 : index
    %c0_165 = arith.constant 0 : index
    %134 = vector.load %arg5[%c0_163, %c0_164, %c0_165] : memref<1x10x128xf32, #tpu.memory_space<vmem>>, vector<1x10x128xf32>
    %135 = vector.shape_cast %134 : vector<1x10x128xf32> to vector<10x128xf32>
    %136 = vector.shape_cast %133 : vector<10x128xf32> to vector<1x10x128xf32>
    tpu.vector_store %arg5[%c0_163, %c0_164, %c0_165], %136 {strides = array<i32>} : memref<1x10x128xf32, #tpu.memory_space<vmem>>, vector<1x10x128xf32>,
    return
  }
  func.func @transform_0(%arg0: i32, %arg1: i32) -> (i32, i32, i32) {
    %c0_i32 = arith.constant 0 : i32
    %c0_i32_0 = arith.constant 0 : i32
    %c0_i32_1 = arith.constant 0 : i32
    return %arg0, %c0_i32, %c0_i32_0 : i32, i32, i32
  }
  func.func @transform_1(%arg0: i32, %arg1: i32) -> (i32, i32, i32) {
    %c0_i32 = arith.constant 0 : i32
    %c0_i32_0 = arith.constant 0 : i32
    %c0_i32_1 = arith.constant 0 : i32
    return %c0_i32, %c0_i32_0, %arg1 : i32, i32, i32
  }
  func.func @transform_2(%arg0: i32, %arg1: i32) -> (i32, i32) {
    %c0_i32 = arith.constant 0 : i32
    %c0_i32_0 = arith.constant 0 : i32
    return %c0_i32, %arg1 : i32, i32
  }
  func.func @transform_3(%arg0: i32, %arg1: i32) -> (i32, i32, i32) {
    %c0_i32 = arith.constant 0 : i32
    %c0_i32_0 = arith.constant 0 : i32
    return %arg0, %c0_i32, %arg1 : i32, i32, i32
  }
}

</mosaic_0001>

<bundles_post_ra>
// kernel: patch_discriminator_forward.4
= control target key start
LH: loop header
LB: loop body
LE: loop exit
PB: predicated region body
PF: predicated region fallthrough
CT: control target
= control target key end

     0   :  { %s4194_s12 = smov 0   ;;  %s4196_s13 = smov 0   ;;  %s4832_s0 = inlined_call_operand.vmem [shape: bf16[8,90,8], index: 0, kind: input, shape index: {}]   ;;  %s4833_s1 = inlined_call_operand.vmem [shape: bf16[16,8,128], index: 1, kind: input, shape index: {}]   ;;  %s4834_s2 = inlined_call_operand.vmem [shape: f32[1,128], index: 2, kind: input, shape index: {}]   ;;  %s4835_s3 = inlined_call_operand.vmem [shape: bf16[2,72,128], index: 3, kind: output, shape index: {}]  }
   0x1   :  { %s4198_s14 = smov 0  }
   0x2 LB: > { %s25_s15 = sadd.s32 1, %s4166_s13  ;;  %p3252_p0 = scmp.ge.s32.totalorder %s4170_s14, 1  ;;  %s4170_s14 = sphi %s4198_s14, %s13_s14   ;;  %s4166_s13 = sphi %s4196_s13, %s4837_s13   ;;  %s4162_s12 = sphi %s4194_s12, %s4836_s12  }
   0x3   : > { %p27_p1 = scmp.ge.s32.totalorder %s25_s15, 2  ;;  %p170_p2 = scmp.lt.s32.totalorder %s4170_s14, 3 }
   0x5   : > { %s4839_s15 = smov (%p27_p1, %s25_s15), 0  ;;  %p171_p3 = pnand %p3252_p0, %p170_p2 }
   0x6   : > { %s3253_s20 = sshll.u32 (!%p171_p3), %s4162_s12, 2  ;;  %p219_p5 = scmp.lt.s32.totalorder (!%p171_p3), %s4162_s12, 1 }
   0x7   : > { %174 = sbr.rel (%p171_p3) target bundleno = 535 (0x217), region = 32  ;;  %p206_p4 = scmp.lt.s32.totalorder (!%p171_p3), %s3253_s20, 7 }
   0xc   : > { %v255_v0 = vld [vmem:[%s4833_s1] sm:$0xf]  ;;  %vm295_vm0 = vcmask 1043456   ;;  %v3275_v1 = vld [vmem:[%s4833_s1 + $0x4] sm:$0xf]  ;;  %v4172_v2 = vmov 0.0  }
   0xd   : > { %3688 = vmatprep.subr.bf16.mxu0 %v4172_v2  ;;  %v297_v3 = vsel %vm295_vm0, %v255_v0, 0  ;;  %3710 = vmatprep.subr.bf16.mxu1 %v4172_v2  ;;  %v449_v4 = vsel %vm295_vm0, %v3275_v1, 0  ;;  %vm4173_vm1 = vmmov 0   ;;  %s4841_s20 = smov (!%p206_p4, %s3253_s20), 7  ;;  %v3286_v5 = vld [vmem:[%s4833_s1 + $0x8] sm:$0xf] }
   0xe   : > { %3689 = vmatpush3.bf16.msra.mxu0 %v297_v3  ;;  %3711 = vmatpush3.bf16.msra.mxu1 %v449_v4  ;;  %s4040_s21 = smul.u32 48, %s4841_s20  ;;  %v3307_v6 = vld [vmem:[%s4833_s1 + $0xc] sm:$0xf]  ;;  %vm279_vm2 = vcmask 64512   ;;  %v643_v8 = vsel %vm295_vm0, %v3286_v5, 0  ;;  %vm2050_vm4 = vcmask 1046528  }
   0xf   : > { %3690 = vmatprep.mubr.msk.bf16.mxu0 %vm4173_vm1, %v4172_v2  ;;  %3712 = vmatprep.mubr.msk.bf16.mxu1 %vm4173_vm1, %v4172_v2  ;;  %v836_v10 = vsel %vm295_vm0, %v3307_v6, 0  ;;  %vm587_vm3 = vsmask.f32 7424  ;;  %v3327_v37 = vld [vmem:[%s4833_s1 + $0x10] sm:$0xf]  ;;  %s4843_s12 = smov (!%p219_p5, %s4162_s12), 1 }
  0x10   : > { %3732 = vmatprep.subr.bf16.mxu0 %v4172_v2  ;;  %3754 = vmatprep.subr.bf16.mxu1 %v4172_v2  ;;  %s4240_s28 = scalar_lea.vmem %s4832_s0, %s4040_s21  ;;  %v3347_v38 = vld [vmem:[%s4833_s1 + $0x14] sm:$0xf]  ;;  %v988_v43 = vsel %vm295_vm0, %v3327_v37, 0  ;;  %s4041_s5 = smul.u32 36, %s4843_s12 }
  0x11   : > { %v4068_v7 = vld [vmem:[%s4240_s28] sm:$0xff]   ;;  %v4069_v9 = vld [vmem:[%s4240_s28 + $0x30] sm:$0xff]   ;;  %v4070_v11 = vld [vmem:[%s4240_s28 + $0x8] sm:$0xff]   ;;  %v1140_v46 = vsel %vm295_vm0, %v3347_v38, 0 }
  0x12   : > { %3691 = vmatmul.mubr.msk.bf16.vlgmr.msra.gmra.mxu0 %vm279_vm2, %v4068_v7  ;;  %3713 = vmatmul.mubr.msk.bf16.vlgmr.msra.gmra.mxu1 %vm279_vm2, %v4069_v9  ;;  %v4071_v12 = vld [vmem:[%s4240_s28 + $0x38] sm:$0xff]   ;;  %v4072_v13 = vld [vmem:[%s4240_s28 + $0x10] sm:$0xff]   ;;  %v4073_v14 = vld [vmem:[%s4240_s28 + $0x40] sm:$0xff]   ;;  %s4796_s8 = scalar_lea.vmem %s4835_s3, %s4041_s5 }
  0x13   : > { %3733 = vmatpush3.bf16.msra.mxu0 %v643_v8  ;;  %3755 = vmatpush3.bf16.msra.mxu1 %v836_v10  ;;  %v4074_v15 = vld [vmem:[%s4240_s28 + $0x18] sm:$0xff]   ;;  %v4075_v16 = vld [vmem:[%s4240_s28 + $0x48] sm:$0xff]   ;;  %v4078_v17 = vld [vmem:[%s4240_s28] sm:$0xff]  }
  0x14   : > { %3694 = vmatprep.mubr.msk.bf16.mxu0 %vm4173_vm1, %v4172_v2  ;;  %3716 = vmatprep.mubr.msk.bf16.mxu1 %vm4173_vm1, %v4172_v2  ;;  %v4080_v18 = vld [vmem:[%s4240_s28 + $0x30] sm:$0xff]   ;;  %v4079_v19 = vld [vmem:[%s4240_s28 + $0x8] sm:$0xff]   ;;  %v591_v20 = vshll.u32 %v4078_v17, 16  ;;  %v4081_v21 = vld [vmem:[%s4240_s28 + $0x38] sm:$0xff]   ;;  %v589_v25 = vshrl.u32 %v4078_v17, 16 }
  0x15   : > { %3776 = vmatprep.subr.bf16.mxu0 %v4172_v2  ;;  %3798 = vmatprep.subr.bf16.mxu1 %v4172_v2  ;;  %v784_v22 = vshll.u32 %v4080_v18, 16  ;;  %v4076_v23 = vld [vmem:[%s4240_s28 + $0x20] ss:$0 sps:$4 sm:$0xff]   ;;  %v4077_v24 = vld [vmem:[%s4240_s28 + $0x50] ss:$0 sps:$4 sm:$0xff]   ;;  %v596_v26 = vshll.u32 %v4079_v19, 16 }
  0x16   : > { %v593_v27 = vrot.slane %v591_v20, 1  ;;  %v782_v28 = vshrl.u32 %v4080_v18, 16  ;;  %v789_v30 = vshll.u32 %v4081_v21, 16  ;;  %v4082_v33 = vld [vmem:[%s4240_s28 + $0x10] sm:$0xff]   ;;  %v4083_v36 = vld [vmem:[%s4240_s28 + $0x40] sm:$0xff]   ;;  %v600_v40 = vshrl.u32 %v4079_v19, 16 }
  0x17   : > { %v786_v29 = vrot.slane %v784_v22, 1  ;;  %v598_v32 = vrot.slane %v596_v26, 1  ;;  %v604_v41 = vshll.u32 %v4082_v33, 16  ;;  %v793_v44 = vshrl.u32 %v4081_v21, 16  ;;  %v4084_v49 = vld [vmem:[%s4240_s28 + $0x18] sm:$0xff]   ;;  %v4085_v50 = vld [vmem:[%s4240_s28 + $0x48] sm:$0xff]  }
  0x18   : > { %v594_v31 = vor.u32 %v593_v27, %v589_v25  ;;  %v791_v35 = vrot.slane %v789_v30, 1  ;;  %v797_v45 = vshll.u32 %v4083_v36, 16  ;;  %v608_v53 = vshrl.u32 %v4082_v33, 16  ;;  %v4086_v62 = vld [vmem:[%s4240_s28 + $0x20] sm:$0x1f]   ;;  %v4089_v21 = vld [vmem:[%s4240_s28 + $0x90] sm:$0xff]  }
  0x19   : > { %v787_v34 = vor.u32 %v786_v29, %v782_v28  ;;  %v602_v47 = vor.u32 %v600_v40, %v598_v32  ;;  %v606_v48 = vrot.slane %v604_v41, 1  ;;  %v612_v55 = vshll.u32 %v4084_v49, 16  ;;  %v4087_v0 = vld [vmem:[%s4240_s28 + $0x50] sm:$0x1f]   ;;  %v3368_v18 = vld [vmem:[%s4833_s1 + $0x18] sm:$0xf] }
  0x1a   : > { %3695 = vmatmul.mubr.msk.bf16.gmra.mxu0 %vm279_vm2, %v4070_v11  ;;  %3717 = vmatmul.mubr.msk.bf16.gmra.mxu1 %vm279_vm2, %v4071_v12  ;;  %v599_v39 = vsel %vm587_vm3, %v594_v31, %v598_v32  ;;  %v795_v51 = vor.u32 %v793_v44, %v791_v35  ;;  %v799_v52 = vrot.slane %v797_v45, 1  ;;  %v805_v56 = vshll.u32 %v4085_v50, 16  ;;  %v3389_v19 = vld [vmem:[%s4833_s1 + $0x1c] sm:$0xf]  ;;  %v4088_v20 = vld [vmem:[%s4240_s28 + $0x60] sm:$0xff]   ;;  %v4092_v26 = vld [vmem:[%s4240_s28 + $0x70] sm:$0xff]  }
  0x1b   : > { %3698 = vmatprep.mubr.msk.bf16.mxu0 %vm4173_vm1, %v4172_v2  ;;  %3720 = vmatprep.mubr.msk.bf16.mxu1 %vm4173_vm1, %v4172_v2  ;;  %v792_v42 = vsel %vm587_vm3, %v787_v34, %v791_v35  ;;  %v607_v54 = vsel %vm587_vm3, %v602_v47, %v606_v48  ;;  %v801_v58 = vshrl.u32 %v4083_v36, 16  ;;  %v610_v59 = vor.u32 %v608_v53, %v606_v48  ;;  %v4091_v25 = vld [vmem:[%s4240_s28 + $0x98] sm:$0xff]   ;;  %v4093_v27 = vld [vmem:[%s4240_s28 + $0xa0] sm:$0xff]   ;;  %v4095_v29 = vld [vmem:[%s4240_s28 + $0xa8] sm:$0xff]  }
  0x1c   : > { %v800_v57 = vsel %vm587_vm3, %v795_v51, %v799_v52  ;;  %v614_v60 = vrot.slane %v612_v55, 1  ;;  %v807_v61 = vrot.slane %v805_v56, 1  ;;  %v616_v3 = vshrl.u32 %v4084_v49, 16  ;;  %v4094_v28 = vld [vmem:[%s4240_s28 + $0x78] sm:$0xff]   ;;  %v4098_v30 = vld [vmem:[%s4240_s28 + $0x60] sm:$0xff]   ;;  %v4100_v31 = vld [vmem:[%s4240_s28 + $0x90] sm:$0xff]  }
  0x1d   : > { %v803_v63 = vor.u32 %v801_v58, %v799_v52  ;;  %v620_v4 = vshll.u32 %v4086_v62, 16  ;;  %v809_v6 = vshrl.u32 %v4085_v50, 16  ;;  %v813_v7 = vshll.u32 %v4087_v0, 16  ;;  %v4099_v32 = vld [vmem:[%s4240_s28 + $0x68] sm:$0xff]   ;;  %v4101_v34 = vld [vmem:[%s4240_s28 + $0x98] sm:$0xff]   ;;  %v4103_v49 = vld [vmem:[%s4240_s28 + $0xa0] sm:$0xff]  }
  0x1e   : > { %v615_v1 = vsel %vm587_vm3, %v610_v59, %v614_v60  ;;  %v618_v8 = vor.u32 %v616_v3, %v614_v60  ;;  %v1333_v22 = vsel %vm295_vm0, %v3368_v18, 0  ;;  %v1281_v33 = vshll.u32 %v4098_v30, 16  ;;  %v4096_v36 = vld [vmem:[%s4240_s28 + $0x80] ss:$0 sps:$4 sm:$0xff]   ;;  %v4097_v37 = vld [vmem:[%s4240_s28 + $0xb0] ss:$0 sps:$4 sm:$0xff]  }
  0x1f   : > { %v808_v5 = vsel %vm587_vm3, %v803_v63, %v807_v61  ;;  %v622_v9 = vrot.slane %v620_v4, 1  ;;  %v811_v10 = vor.u32 %v809_v6, %v807_v61  ;;  %v815_v11 = vrot.slane %v813_v7, 1  ;;  %v3400_v50 = vld [vmem:[%s4833_s1 + $0x20] sm:$0xf]  ;;  %v3421_v51 = vld [vmem:[%s4833_s1 + $0x24] sm:$0xf] }
  0x20   : > { %v1474_v35 = vshll.u32 %v4100_v31, 16  ;;  %v1279_v38 = vshrl.u32 %v4098_v30, 16  ;;  %v1286_v40 = vshll.u32 %v4099_v32, 16  ;;  %v1472_v41 = vshrl.u32 %v4100_v31, 16  ;;  %v4109_v31 = vld [vmem:[%s4240_s28 + $0xc] sm:$0xff]  }
  0x21   : > { %v623_v12 = vsel %vm587_vm3, %v618_v8, %v622_v9  ;;  %v1290_v53 = vshrl.u32 %v4099_v32, 16  ;;  %v1719_v56 = vsel %vm295_vm0, %v3400_v50, 0  ;;  %v1487_v58 = vshll.u32 %v4103_v49, 16  ;;  %v3453_v50 = vld [vmem:[%s4833_s1 + $0x2c] sm:$0xf] }
  0x22   : > { %3699 = vmatmul.mubr.msk.bf16.gmra.mxu0 %vm279_vm2, %v4072_v13  ;;  %3721 = vmatmul.mubr.msk.bf16.gmra.mxu1 %vm279_vm2, %v4073_v14  ;;  %v624_v13 = vshrl.u32 %v4086_v62, 16  ;;  %v817_v14 = vshrl.u32 %v4087_v0, 16  ;;  %v1288_v45 = vrot.slane %v1286_v40, 1  ;;  %v1912_v59 = vsel %vm295_vm0, %v3421_v51, 0  ;;  %v4104_v62 = vld [vmem:[%s4240_s28 + $0x78] sm:$0xff]  }
  0x23   : > { %3702 = vmatprep.mubr.msk.bf16.mxu0 %vm4173_vm1, %v4172_v2  ;;  %3724 = vmatprep.mubr.msk.bf16.mxu1 %vm4173_vm1, %v4172_v2  ;;  %v1489_v0 = vrot.slane %v1487_v58, 1  ;;  %v1491_v7 = vshrl.u32 %v4103_v49, 16  ;;  %v3432_v49 = vld [vmem:[%s4833_s1 + $0x28] sm:$0xf]  ;;  %v2239_v58 = vsel %vm295_vm0, %v3453_v50, 0 }
  0x24   : > { %v819_v17 = vor.u32 %v817_v14, %v815_v11  ;;  %v1292_v60 = vor.u32 %v1290_v53, %v1288_v45  ;;  %v4107_v14 = vld [vmem:[%s4240_s28 + $0xb0] sm:$0x1f]  }
  0x25   : > { %v1507_v30 = vshrl.u32 %v4107_v14, 16 }
  0x2a   : > { %3703 = vmatmul.mubr.msk.bf16.gmra.mxu0 %vm279_vm2, %v4074_v15  ;;  %3725 = vmatmul.mubr.msk.bf16.gmra.mxu1 %vm279_vm2, %v4075_v16  ;;  %v816_v15 = vsel %vm587_vm3, %v811_v10, %v815_v11  ;;  %v626_v16 = vor.u32 %v624_v13, %v622_v9  ;;  %v4106_v11 = vld [vmem:[%s4240_s28 + $0x80] sm:$0x1f]  }
  0x2b   : > { %3706 = vmatprep.mubr.msk.bf16.mxu0 %vm4173_vm1, %v4172_v2  ;;  %3728 = vmatprep.mubr.msk.bf16.mxu1 %vm4173_vm1, %v4172_v2 }
  0x32   : > { %3707 = vmatmul.mubr.msk.bf16.gmra.mxu0 %vm279_vm2, %v4076_v23  ;;  %3729 = vmatmul.mubr.msk.bf16.gmra.mxu1 %vm279_vm2, %v4077_v24  ;;  %v1526_v23 = vsel %vm295_vm0, %v3389_v19, 0  ;;  %v4090_v24 = vld [vmem:[%s4240_s28 + $0x68] sm:$0xff]  }
  0x33   : > { %3734 = vmatprep.mubr.msk.bf16.mxu0 %vm4173_vm1, %v4172_v2  ;;  %3756 = vmatprep.mubr.msk.bf16.mxu1 %vm4173_vm1, %v4172_v2 }
  0x3a   : > { %3735 = vmatmul.mubr.msk.bf16.vlgmr.msra.gmra.mxu0 %vm279_vm2, %v599_v39  ;;  %3757 = vmatmul.mubr.msk.bf16.vlgmr.msra.gmra.mxu1 %vm279_vm2, %v792_v42  ;;  %v1283_v39 = vrot.slane %v1281_v33, 1  ;;  %v1476_v42 = vrot.slane %v1474_v35, 1  ;;  %v4111_v33 = vld [vmem:[%s4240_s28 + $0x3c] sm:$0xff]  }
  0x3b   : > { %3777 = vmatpush3.bf16.msra.mxu0 %v988_v43  ;;  %3799 = vmatpush3.bf16.msra.mxu1 %v1140_v46  ;;  %v1479_v43 = vshll.u32 %v4101_v34, 16  ;;  %v4102_v46 = vld [vmem:[%s4240_s28 + $0x70] sm:$0xff]  }
  0x3c   : > { %3738 = vmatprep.mubr.msk.bf16.mxu0 %vm4173_vm1, %v4172_v2  ;;  %3760 = vmatprep.mubr.msk.bf16.mxu1 %vm4173_vm1, %v4172_v2  ;;  %v1284_v44 = vor.u32 %v1283_v39, %v1279_v38  ;;  %v1477_v47 = vor.u32 %v1476_v42, %v1472_v41  ;;  %v1298_v4 = vshrl.u32 %v4102_v46, 16  ;;  %v1672_v39 = vshll.u32 %v4109_v31, 16 }
  0x3d   : > { %3820 = vmatprep.subr.bf16.mxu0 %v4172_v2  ;;  %3842 = vmatprep.subr.bf16.mxu1 %v4172_v2  ;;  %v1481_v48 = vrot.slane %v1479_v43, 1  ;;  %v1865_v42 = vshll.u32 %v4111_v33, 16 }
  0x3e   : > { %v1289_v52 = vsel %vm587_vm3, %v1284_v44, %v1288_v45  ;;  %v1674_v44 = vrot.slane %v1672_v39, 1  ;;  %v4112_v45 = vld [vmem:[%s4240_s28 + $0x14] sm:$0xff]  }
  0x3f   : > { %v1482_v55 = vsel %vm587_vm3, %v1477_v47, %v1481_v48  ;;  %v1867_v47 = vrot.slane %v1865_v42, 1  ;;  %v1680_v53 = vshll.u32 %v4112_v45, 16 }
  0x42   : > { %3739 = vmatmul.mubr.msk.bf16.gmra.mxu0 %vm279_vm2, %v607_v54  ;;  %3761 = vmatmul.mubr.msk.bf16.gmra.mxu1 %vm279_vm2, %v800_v57  ;;  %v1294_v54 = vshll.u32 %v4102_v46, 16  ;;  %v1483_v57 = vshrl.u32 %v4101_v34, 16 }
  0x43   : > { %3742 = vmatprep.mubr.msk.bf16.mxu0 %vm4173_vm1, %v4172_v2  ;;  %3764 = vmatprep.mubr.msk.bf16.mxu1 %vm4173_vm1, %v4172_v2 }
  0x44   : > { %v1296_v61 = vrot.slane %v1294_v54, 1  ;;  %v1485_v63 = vor.u32 %v1483_v57, %v1481_v48  ;;  %v4113_v48 = vld [vmem:[%s4240_s28 + $0x44] sm:$0xff]  }
  0x45   : > { %v1873_v57 = vshll.u32 %v4113_v48, 16 }
  0x46   : > { %v1297_v3 = vsel %vm587_vm3, %v1292_v60, %v1296_v61  ;;  %v1490_v6 = vsel %vm587_vm3, %v1485_v63, %v1489_v0  ;;  %v1300_v9 = vor.u32 %v1298_v4, %v1296_v61  ;;  %v1682_v60 = vrot.slane %v1680_v53, 1  ;;  %v4114_v61 = vld [vmem:[%s4240_s28 + $0x1c] sm:$0xff]   ;;  %v4123_v53 = vld [vmem:[%s4240_s28 + $0x44] sm:$0xff]  }
  0x47   : > { %v1875_v63 = vrot.slane %v1873_v57, 1  ;;  %v1688_v4 = vshll.u32 %v4114_v61, 16 }
  0x4a   : > { %3743 = vmatmul.mubr.msk.bf16.gmra.mxu0 %vm279_vm2, %v615_v1  ;;  %3765 = vmatmul.mubr.msk.bf16.gmra.mxu1 %vm279_vm2, %v808_v5  ;;  %v4105_v1 = vld [vmem:[%s4240_s28 + $0xa8] sm:$0xff]   ;;  %v1302_v5 = vshll.u32 %v4104_v62, 16 }
  0x4b   : > { %3746 = vmatprep.mubr.msk.bf16.mxu0 %vm4173_vm1, %v4172_v2  ;;  %3768 = vmatprep.mubr.msk.bf16.mxu1 %vm4173_vm1, %v4172_v2  ;;  %v1495_v8 = vshll.u32 %v4105_v1, 16  ;;  %v1499_v19 = vshrl.u32 %v4105_v1, 16 }
  0x4c   : > { %v1304_v10 = vrot.slane %v1302_v5, 1 }
  0x4d   : > { %v1497_v13 = vrot.slane %v1495_v8, 1 }
  0x52   : > { %3747 = vmatmul.mubr.msk.bf16.gmra.mxu0 %vm279_vm2, %v623_v12  ;;  %3769 = vmatmul.mubr.msk.bf16.gmra.mxu1 %vm279_vm2, %v816_v15  ;;  %v1493_v12 = vor.u32 %v1491_v7, %v1489_v0  ;;  %v1305_v15 = vsel %vm587_vm3, %v1300_v9, %v1304_v10  ;;  %v4115_v0 = vld [vmem:[%s4240_s28 + $0x4c] sm:$0xff]   ;;  %v1690_v9 = vrot.slane %v1688_v4, 1 }
  0x53   : > { %3750 = vmatprep.mubr.msk.bf16.mxu0 %vm4173_vm1, %v4172_v2  ;;  %3772 = vmatprep.mubr.msk.bf16.mxu1 %vm4173_vm1, %v4172_v2  ;;  %v1881_v7 = vshll.u32 %v4115_v0, 16 }
  0x54   : > { %v1498_v18 = vsel %vm587_vm3, %v1493_v12, %v1497_v13 }
  0x55   : > { %v1883_v12 = vrot.slane %v1881_v7, 1  ;;  %v4125_v7 = vld [vmem:[%s4240_s28 + $0x4c] sm:$0xff]  }
  0x5a   : > { %3751 = vmatmul.mubr.msk.bf16.gmra.mxu0 %vm279_vm2, %v626_v16  ;;  %3773 = vmatmul.mubr.msk.bf16.gmra.mxu1 %vm279_vm2, %v819_v17  ;;  %v1306_v16 = vshrl.u32 %v4104_v62, 16  ;;  %v1310_v17 = vshll.u32 %v4106_v11, 16 }
  0x5b   : > { %3778 = vmatprep.mubr.msk.bf16.mxu0 %vm4173_vm1, %v4172_v2  ;;  %3800 = vmatprep.mubr.msk.bf16.mxu1 %vm4173_vm1, %v4172_v2 }
  0x62   : > { %3779 = vmatmul.mubr.msk.bf16.vlgmr.msra.gmra.mxu0 %vm279_vm2, %v4088_v20  ;;  %3801 = vmatmul.mubr.msk.bf16.vlgmr.msra.gmra.mxu1 %vm279_vm2, %v4089_v21  ;;  %v1503_v20 = vshll.u32 %v4107_v14, 16  ;;  %v1308_v21 = vor.u32 %v1306_v16, %v1304_v10  ;;  %v4116_v10 = vld [vmem:[%s4240_s28 + $0x24] sm:$0x1f]  }
  0x63   : > { %3821 = vmatpush3.bf16.msra.mxu0 %v1333_v22  ;;  %3843 = vmatpush3.bf16.msra.mxu1 %v1526_v23  ;;  %v1312_v22 = vrot.slane %v1310_v17, 1  ;;  %v1501_v23 = vor.u32 %v1499_v19, %v1497_v13  ;;  %v4117_v13 = vld [vmem:[%s4240_s28 + $0x54] sm:$0x1f]   ;;  %v1696_v16 = vshll.u32 %v4116_v10, 16 }
  0x64   : > { %3782 = vmatprep.mubr.msk.bf16.mxu0 %vm4173_vm1, %v4172_v2  ;;  %3804 = vmatprep.mubr.msk.bf16.mxu1 %vm4173_vm1, %v4172_v2  ;;  %v1889_v19 = vshll.u32 %v4117_v13, 16 }
  0x65   : > { %3864 = vmatprep.subr.bf16.mxu0 %v4172_v2  ;;  %3886 = vmatprep.subr.bf16.mxu1 %v4172_v2 }
  0x6a   : > { %3783 = vmatmul.mubr.msk.bf16.gmra.mxu0 %vm279_vm2, %v4090_v24  ;;  %3805 = vmatmul.mubr.msk.bf16.gmra.mxu1 %vm279_vm2, %v4091_v25  ;;  %v1505_v24 = vrot.slane %v1503_v20, 1  ;;  %v1313_v25 = vsel %vm587_vm3, %v1308_v21, %v1312_v22  ;;  %v1698_v21 = vrot.slane %v1696_v16, 1 }
  0x6b   : > { %3786 = vmatprep.mubr.msk.bf16.mxu0 %vm4173_vm1, %v4172_v2  ;;  %3808 = vmatprep.mubr.msk.bf16.mxu1 %vm4173_vm1, %v4172_v2 }
  0x72   : > { %3787 = vmatmul.mubr.msk.bf16.gmra.mxu0 %vm279_vm2, %v4092_v26  ;;  %3809 = vmatmul.mubr.msk.bf16.gmra.mxu1 %vm279_vm2, %v4093_v27  ;;  %v4108_v26 = vld [vmem:[%s4240_s28 + $0x4] sm:$0xff]   ;;  %v1506_v27 = vsel %vm587_vm3, %v1501_v23, %v1505_v24  ;;  %v1891_v23 = vrot.slane %v1889_v19, 1 }
  0x73   : > { %3790 = vmatprep.mubr.msk.bf16.mxu0 %vm4173_vm1, %v4172_v2  ;;  %3812 = vmatprep.mubr.msk.bf16.mxu1 %vm4173_vm1, %v4172_v2  ;;  %v1667_v32 = vshll.u32 %v4108_v26, 16  ;;  %v4126_v19 = vld [vmem:[%s4240_s28 + $0x24] sm:$0x1f]  }
  0x75   : > { %v1669_v38 = vrot.slane %v1667_v32, 1  ;;  %v4120_v32 = vld [vmem:[%s4240_s28 + $0x34] sm:$0xfe]  }
  0x7a   : > { %3791 = vmatmul.mubr.msk.bf16.gmra.mxu0 %vm279_vm2, %v4094_v28  ;;  %3813 = vmatmul.mubr.msk.bf16.gmra.mxu1 %vm279_vm2, %v4095_v29  ;;  %v4110_v28 = vld [vmem:[%s4240_s28 + $0x34] sm:$0xff]   ;;  %v1314_v29 = vshrl.u32 %v4106_v11, 16 }
  0x7b   : > { %3794 = vmatprep.mubr.msk.bf16.mxu0 %vm4173_vm1, %v4172_v2  ;;  %3816 = vmatprep.mubr.msk.bf16.mxu1 %vm4173_vm1, %v4172_v2  ;;  %v1860_v34 = vshll.u32 %v4110_v28, 16  ;;  %v1858_v40 = vshrl.u32 %v4110_v28, 16 }
  0x7c   : > { %v1316_v35 = vor.u32 %v1314_v29, %v1312_v22 }
  0x7d   : > { %v1862_v41 = vrot.slane %v1860_v34, 1 }
  0x7f   : > { %v1863_v46 = vor.u32 %v1862_v41, %v1858_v40  ;;  %v2214_v40 = vrot.slane %v4120_v32, 1 }
  0x81   : > { %v1868_v54 = vsel %vm587_vm3, %v1863_v46, %v1867_v47 }
  0x82   : > { %3795 = vmatmul.mubr.msk.bf16.gmra.mxu0 %vm279_vm2, %v4096_v36  ;;  %3817 = vmatmul.mubr.msk.bf16.gmra.mxu1 %vm279_vm2, %v4097_v37  ;;  %v1509_v36 = vor.u32 %v1507_v30, %v1505_v24  ;;  %v1665_v37 = vshrl.u32 %v4108_v26, 16  ;;  %v1700_v26 = vshrl.u32 %v4116_v10, 16  ;;  %v4118_v30 = vld [vmem:[%s4240_s28 + $0x4] sm:$0xfe]  }
  0x83   : > { %3822 = vmatprep.mubr.msk.bf16.mxu0 %vm4173_vm1, %v4172_v2  ;;  %3844 = vmatprep.mubr.msk.bf16.mxu1 %vm4173_vm1, %v4172_v2 }
  0x84   : > { %v1670_v43 = vor.u32 %v1669_v38, %v1665_v37  ;;  %v1702_v28 = vor.u32 %v1700_v26, %v1698_v21 }
  0x86   : > { %v1675_v51 = vsel %vm587_vm3, %v1670_v43, %v1674_v44  ;;  %v3474_v43 = vld [vmem:[%s4833_s1 + $0x30] sm:$0xf] }
  0x8a   : > { %3823 = vmatmul.mubr.msk.bf16.vlgmr.msra.gmra.mxu0 %vm279_vm2, %v1289_v52  ;;  %3845 = vmatmul.mubr.msk.bf16.vlgmr.msra.gmra.mxu1 %vm279_vm2, %v1482_v55  ;;  %v1676_v52 = vshrl.u32 %v4109_v31, 16  ;;  %v2076_v55 = vsel %vm295_vm0, %v3432_v49, 0  ;;  %v4119_v31 = vld [vmem:[%s4240_s28 + $0xc] sm:$0xff]  }
  0x8b   : > { %3865 = vmatpush3.bf16.msra.mxu0 %v1719_v56  ;;  %3887 = vmatpush3.bf16.msra.mxu1 %v1912_v59  ;;  %v1869_v56 = vshrl.u32 %v4111_v33, 16  ;;  %v4121_v33 = vld [vmem:[%s4240_s28 + $0x3c] sm:$0xff]   ;;  %v2052_v37 = vrot.slane %v4119_v31, 1 }
  0x8c   : > { %3826 = vmatprep.mubr.msk.bf16.mxu0 %vm4173_vm1, %v4172_v2  ;;  %3848 = vmatprep.mubr.msk.bf16.mxu1 %vm4173_vm1, %v4172_v2  ;;  %v1678_v59 = vor.u32 %v1676_v52, %v1674_v44  ;;  %v2215_v41 = vrot.slane %v4121_v33, 1  ;;  %v2432_v52 = vsel %vm295_vm0, %v3474_v43, 0 }
  0x8d   : > { %3908 = vmatprep.subr.bf16.mxu0 %v4172_v2  ;;  %3930 = vmatprep.subr.bf16.mxu1 %v4172_v2  ;;  %v1871_v62 = vor.u32 %v1869_v56, %v1867_v47 }
  0x8e   : > { %v1683_v1 = vsel %vm587_vm3, %v1678_v59, %v1682_v60 }
  0x8f   : > { %v1876_v5 = vsel %vm587_vm3, %v1871_v62, %v1875_v63 }
  0x92   : > { %3827 = vmatmul.mubr.msk.bf16.gmra.mxu0 %vm279_vm2, %v1297_v3  ;;  %3849 = vmatmul.mubr.msk.bf16.gmra.mxu1 %vm279_vm2, %v1490_v6  ;;  %v1684_v3 = vshrl.u32 %v4112_v45, 16  ;;  %v1877_v6 = vshrl.u32 %v4113_v48, 16  ;;  %v3495_v45 = vld [vmem:[%s4833_s1 + $0x34] sm:$0xf] }
  0x93   : > { %3830 = vmatprep.mubr.msk.bf16.mxu0 %vm4173_vm1, %v4172_v2  ;;  %3852 = vmatprep.mubr.msk.bf16.mxu1 %vm4173_vm1, %v4172_v2  ;;  %v4122_v48 = vld [vmem:[%s4240_s28 + $0x14] sm:$0xff]  }
  0x94   : > { %v1686_v8 = vor.u32 %v1684_v3, %v1682_v60  ;;  %v1879_v11 = vor.u32 %v1877_v6, %v1875_v63  ;;  %v4124_v3 = vld [vmem:[%s4240_s28 + $0x1c] sm:$0xff]  }
  0x96   : > { %v1691_v14 = vsel %vm587_vm3, %v1686_v8, %v1690_v9  ;;  %v1884_v17 = vsel %vm587_vm3, %v1879_v11, %v1883_v12  ;;  %v2056_v11 = vrot.slane %v4124_v3, 1 }
  0x9a   : > { %3831 = vmatmul.mubr.msk.bf16.gmra.mxu0 %vm279_vm2, %v1305_v15  ;;  %3853 = vmatmul.mubr.msk.bf16.gmra.mxu1 %vm279_vm2, %v1498_v18  ;;  %v1692_v15 = vshrl.u32 %v4114_v61, 16  ;;  %v1885_v18 = vshrl.u32 %v4115_v0, 16  ;;  %v2217_v61 = vrot.slane %v4123_v53, 1 }
  0x9b   : > { %3834 = vmatprep.mubr.msk.bf16.mxu0 %vm4173_vm1, %v4172_v2  ;;  %3856 = vmatprep.mubr.msk.bf16.mxu1 %vm4173_vm1, %v4172_v2 }
  0x9c   : > { %v1694_v20 = vor.u32 %v1692_v15, %v1690_v9  ;;  %v1887_v22 = vor.u32 %v1885_v18, %v1883_v12  ;;  %v2218_v6 = vsel %vm2050_vm4, %v2215_v41, %v2217_v61 }
  0x9e   : > { %v1699_v24 = vsel %vm587_vm3, %v1694_v20, %v1698_v21 }
  0xa2   : > { %3835 = vmatmul.mubr.msk.bf16.gmra.mxu0 %vm279_vm2, %v1313_v25  ;;  %3857 = vmatmul.mubr.msk.bf16.gmra.mxu1 %vm279_vm2, %v1506_v27  ;;  %v1892_v25 = vsel %vm587_vm3, %v1887_v22, %v1891_v23  ;;  %v1893_v27 = vshrl.u32 %v4117_v13, 16 }
  0xa3   : > { %3838 = vmatprep.mubr.msk.bf16.mxu0 %vm4173_vm1, %v4172_v2  ;;  %3860 = vmatprep.mubr.msk.bf16.mxu1 %vm4173_vm1, %v4172_v2 }
  0xa4   : > { %v1895_v29 = vor.u32 %v1893_v27, %v1891_v23  ;;  %v4127_v23 = vld [vmem:[%s4240_s28 + $0x54] sm:$0x1f]   ;;  %v2058_v27 = vrot.slane %v4126_v19, 1 }
  0xaa   : > { %3839 = vmatmul.mubr.msk.bf16.gmra.mxu0 %vm279_vm2, %v1316_v35  ;;  %3861 = vmatmul.mubr.msk.bf16.gmra.mxu1 %vm279_vm2, %v1509_v36  ;;  %v2051_v36 = vrot.slane %v4118_v30, 1  ;;  %v2221_v30 = vrot.slane %v4127_v23, 1 }
  0xab   : > { %3866 = vmatprep.mubr.msk.bf16.mxu0 %vm4173_vm1, %v4172_v2  ;;  %3888 = vmatprep.mubr.msk.bf16.mxu1 %vm4173_vm1, %v4172_v2 }
  0xac   : > { %v2053_v47 = vsel %vm2050_vm4, %v2051_v36, %v2052_v37 }
  0xb2   : > { %3867 = vmatmul.mubr.msk.bf16.vlgmr.msra.gmra.mxu0 %vm279_vm2, %v1675_v51  ;;  %3889 = vmatmul.mubr.msk.bf16.vlgmr.msra.gmra.mxu1 %vm279_vm2, %v1868_v54  ;;  %v2216_v51 = vsel %vm2050_vm4, %v2214_v40, %v2215_v41  ;;  %v4130_v40 = vld [vmem:[%s4240_s28 + $0x94] sm:$0xff]  }
  0xb3   : > { %3909 = vmatpush3.bf16.msra.mxu0 %v2076_v55  ;;  %3931 = vmatpush3.bf16.msra.mxu1 %v2239_v58  ;;  %v2625_v55 = vsel %vm295_vm0, %v3495_v45, 0  ;;  %v2054_v58 = vrot.slane %v4122_v48, 1  ;;  %v4131_v48 = vld [vmem:[%s4240_s28 + $0x9c] sm:$0xff]  }
  0xb4   : > { %3870 = vmatprep.mubr.msk.bf16.mxu0 %vm4173_vm1, %v4172_v2  ;;  %3892 = vmatprep.mubr.msk.bf16.mxu1 %vm4173_vm1, %v4172_v2 }
  0xb5   : > { %3952 = vmatprep.subr.bf16.mxu0 %v4172_v2  ;;  %3974 = vmatprep.subr.bf16.mxu1 %v4172_v2  ;;  %v2057_v18 = vsel %vm2050_vm4, %v2054_v58, %v2056_v11 }
  0xba   : > { %3871 = vmatmul.mubr.msk.bf16.gmra.mxu0 %vm279_vm2, %v1683_v1  ;;  %3893 = vmatmul.mubr.msk.bf16.gmra.mxu1 %vm279_vm2, %v1876_v5  ;;  %v2055_v1 = vsel %vm2050_vm4, %v2052_v37, %v2054_v58  ;;  %v2571_v58 = vshrl.u32 %v4130_v40, 16 }
  0xbb   : > { %3874 = vmatprep.mubr.msk.bf16.mxu0 %vm4173_vm1, %v4172_v2  ;;  %3896 = vmatprep.mubr.msk.bf16.mxu1 %vm4173_vm1, %v4172_v2 }
  0xc2   : > { %3875 = vmatmul.mubr.msk.bf16.gmra.mxu0 %vm279_vm2, %v1691_v14  ;;  %3897 = vmatmul.mubr.msk.bf16.gmra.mxu1 %vm279_vm2, %v1884_v17  ;;  %v2219_v14 = vrot.slane %v4125_v7, 1 }
  0xc3   : > { %3878 = vmatprep.mubr.msk.bf16.mxu0 %vm4173_vm1, %v4172_v2  ;;  %3900 = vmatprep.mubr.msk.bf16.mxu1 %vm4173_vm1, %v4172_v2 }
  0xc4   : > { %v2220_v22 = vsel %vm2050_vm4, %v2217_v61, %v2219_v14  ;;  %v2578_v61 = vshll.u32 %v4131_v48, 16 }
  0xca   : > { %3879 = vmatmul.mubr.msk.bf16.gmra.mxu0 %vm279_vm2, %v1699_v24  ;;  %3901 = vmatmul.mubr.msk.bf16.gmra.mxu1 %vm279_vm2, %v1892_v25 }
  0xcb   : > { %3882 = vmatprep.mubr.msk.bf16.mxu0 %vm4173_vm1, %v4172_v2  ;;  %3904 = vmatprep.mubr.msk.bf16.mxu1 %vm4173_vm1, %v4172_v2 }
  0xd2   : > { %v333_v34 = vpop.f32.mrf.mxu0  ;;  %3883 = vmatmul.mubr.msk.bf16.gmra.mxu0 %vm279_vm2, %v1702_v28  ;;  %v485_v35 = vpop.f32.mrf.mxu1  ;;  %3905 = vmatmul.mubr.msk.bf16.gmra.mxu1 %vm279_vm2, %v1895_v29 }
  0xd3   : > { %3910 = vmatprep.mubr.msk.bf16.mxu0 %vm4173_vm1, %v4172_v2  ;;  %v4512_v38 = vadd.f32 %v485_v35, %v333_v34  ;;  %3932 = vmatprep.mubr.msk.bf16.mxu1 %vm4173_vm1, %v4172_v2  ;;  %v2059_v34 = vsel %vm2050_vm4, %v2056_v11, %v2058_v27  ;;  %v4128_v35 = vld [vmem:[%s4240_s28 + $0x64] sm:$0xff]  }
  0xd4   : > { %v3692_v39 = vpop.f32.mrf.mxu0  ;;  %v3714_v42 = vpop.f32.mrf.mxu1  ;;  %v2380_v45 = vshll.u32 %v4128_v35, 16 }
  0xd5   : > { %v2222_v39 = vsel %vm2050_vm4, %v2219_v14, %v2221_v30 }
  0xd6   : > { %v336_v44 = vpop.f32.mrf.mxu0  ;;  %v488_v46 = vpop.f32.mrf.mxu1 }
  0xd7   : > { %v4524_v49 = vadd.f32 %v488_v46, %v336_v44  ;;  %v4129_v44 = vld [vmem:[%s4240_s28 + $0x6c] sm:$0xff]  }
  0xd8   : > { %v3693_v50 = vpop.f32.mrf.mxu0  ;;  %v3715_v54 = vpop.f32.mrf.mxu1  ;;  %v2389_v19 = vshrl.u32 %v4129_v44, 16 }
  0xd9   : > { %v2573_v50 = vshll.u32 %v4130_v40, 16  ;;  %v2378_v54 = vshrl.u32 %v4128_v35, 16  ;;  %v4134_v35 = vld [vmem:[%s4240_s28 + $0x7c] sm:$0xff]  }
  0xda   : > { %v341_v56 = vpop.f32.mrf.mxu0  ;;  %3911 = vmatmul.mubr.msk.bf16.vlgmr.msra.gmra.mxu0 %vm279_vm2, %v2053_v47  ;;  %v493_v57 = vpop.f32.mrf.mxu1  ;;  %3933 = vmatmul.mubr.msk.bf16.vlgmr.msra.gmra.mxu1 %vm279_vm2, %v2216_v51 }
  0xdb   : > { %3953 = vmatpush3.bf16.msra.mxu0 %v2432_v52  ;;  %v4532_v59 = vadd.f32 %v493_v57, %v341_v56  ;;  %3975 = vmatpush3.bf16.msra.mxu1 %v2625_v55  ;;  %v2382_v55 = vrot.slane %v2380_v45, 1  ;;  %v2385_v56 = vshll.u32 %v4129_v44, 16 }
  0xdc   : > { %v3696_v60 = vpop.f32.mrf.mxu0  ;;  %3914 = vmatprep.mubr.msk.bf16.mxu0 %vm4173_vm1, %v4172_v2  ;;  %v3718_v62 = vpop.f32.mrf.mxu1  ;;  %3936 = vmatprep.mubr.msk.bf16.mxu1 %vm4173_vm1, %v4172_v2 }
  0xdd   : > { %3996 = vmatprep.subr.bf16.mxu0 %v4172_v2  ;;  %4018 = vmatprep.subr.bf16.mxu1 %v4172_v2  ;;  %v2575_v60 = vrot.slane %v2573_v50, 1  ;;  %v2383_v3 = vor.u32 %v2382_v55, %v2378_v54  ;;  %v2401_v50 = vshll.u32 %v4134_v35, 16 }
  0xde   : > { %v344_v63 = vpop.f32.mrf.mxu0  ;;  %v496_v0 = vpop.f32.mrf.mxu1 }
  0xdf   : > { %v4542_v4 = vadd.f32 %v496_v0, %v344_v63 }
  0xe0   : > { %v3697_v5 = vpop.f32.mrf.mxu0  ;;  %v3719_v8 = vpop.f32.mrf.mxu1 }
  0xe1   : > { %v2387_v5 = vrot.slane %v2385_v56, 1  ;;  %v2576_v8 = vor.u32 %v2575_v60, %v2571_v58 }
  0xe2   : > { %v349_v9 = vpop.f32.mrf.mxu0  ;;  %3915 = vmatmul.mubr.msk.bf16.gmra.mxu0 %vm279_vm2, %v2055_v1  ;;  %v501_v10 = vpop.f32.mrf.mxu1  ;;  %3937 = vmatmul.mubr.msk.bf16.gmra.mxu1 %vm279_vm2, %v2218_v6  ;;  %v4132_v6 = vld [vmem:[%s4240_s28 + $0x74] sm:$0xff]  }
  0xe3   : > { %3918 = vmatprep.mubr.msk.bf16.mxu0 %vm4173_vm1, %v4172_v2  ;;  %v4550_v12 = vadd.f32 %v501_v10, %v349_v9  ;;  %3940 = vmatprep.mubr.msk.bf16.mxu1 %vm4173_vm1, %v4172_v2  ;;  %v2580_v9 = vrot.slane %v2578_v61, 1  ;;  %v4133_v10 = vld [vmem:[%s4240_s28 + $0xa4] sm:$0xff]   ;;  %v2403_v61 = vrot.slane %v2401_v50, 1 }
  0xe4   : > { %v3700_v13 = vpop.f32.mrf.mxu0  ;;  %v3722_v15 = vpop.f32.mrf.mxu1 }
  0xe5   : > { %v3537_v15 = vld [vmem:[%s4833_s1 + $0x3c] sm:$0xf]  ;;  %v2581_v23 = vsel %vm587_vm3, %v2576_v8, %v2580_v9 }
  0xe6   : > { %v352_v16 = vpop.f32.mrf.mxu0  ;;  %v504_v17 = vpop.f32.mrf.mxu1 }
  0xe7   : > { %v4556_v20 = vadd.f32 %v504_v17, %v352_v16 }
  0xe8   : > { %v3701_v21 = vpop.f32.mrf.mxu0  ;;  %v3723_v24 = vpop.f32.mrf.mxu1 }
  0xe9   : > { %v2393_v21 = vshll.u32 %v4132_v6, 16 }
  0xea   : > { %v357_v25 = vpop.f32.mrf.mxu0  ;;  %3919 = vmatmul.mubr.msk.bf16.gmra.mxu0 %vm279_vm2, %v2057_v18  ;;  %v509_v26 = vpop.f32.mrf.mxu1  ;;  %3941 = vmatmul.mubr.msk.bf16.gmra.mxu1 %vm279_vm2, %v2220_v22  ;;  %v2388_v18 = vsel %vm587_vm3, %v2383_v3, %v2387_v5  ;;  %v4137_v3 = vld [vmem:[%s4240_s28 + $0xb4] sm:$0x1f]  }
  0xeb   : > { %3922 = vmatprep.mubr.msk.bf16.mxu0 %vm4173_vm1, %v4172_v2  ;;  %v4564_v28 = vadd.f32 %v509_v26, %v357_v25  ;;  %3944 = vmatprep.mubr.msk.bf16.mxu1 %vm4173_vm1, %v4172_v2  ;;  %v2582_v25 = vshrl.u32 %v4131_v48, 16  ;;  %v2586_v26 = vshll.u32 %v4133_v10, 16  ;;  %v2397_v48 = vshrl.u32 %v4132_v6, 16 }
  0xec   : > { %v3704_v29 = vpop.f32.mrf.mxu0  ;;  %v3726_v31 = vpop.f32.mrf.mxu1 }
  0xed   : > { %v2588_v40 = vrot.slane %v2586_v26, 1 }
  0xee   : > { %v360_v32 = vpop.f32.mrf.mxu0  ;;  %v512_v33 = vpop.f32.mrf.mxu1 }
  0xef   : > { %v4570_v36 = vadd.f32 %v512_v33, %v360_v32  ;;  %v2391_v33 = vor.u32 %v2389_v19, %v2387_v5 }
  0xf0   : > { %v3705_v37 = vpop.f32.mrf.mxu0  ;;  %v3727_v41 = vpop.f32.mrf.mxu1 }
  0xf1   : > { %v4135_v41 = vld [vmem:[%s4240_s28 + $0xac] sm:$0xff]  }
  0xf2   : > { %v365_v42 = vpop.f32.mrf.mxu0  ;;  %3923 = vmatmul.mubr.msk.bf16.gmra.mxu0 %vm279_vm2, %v2059_v34  ;;  %v517_v43 = vpop.f32.mrf.mxu1  ;;  %3945 = vmatmul.mubr.msk.bf16.gmra.mxu1 %vm279_vm2, %v2222_v39  ;;  %v2395_v34 = vrot.slane %v2393_v21, 1  ;;  %v2584_v39 = vor.u32 %v2582_v25, %v2580_v9  ;;  %v2594_v54 = vshll.u32 %v4135_v41, 16 }
  0xf3   : > { %3926 = vmatprep.mubr.msk.bf16.mxu0 %vm4173_vm1, %v4172_v2  ;;  %v4579_v46 = vadd.f32 %v517_v43, %v365_v42  ;;  %3948 = vmatprep.mubr.msk.bf16.mxu1 %vm4173_vm1, %v4172_v2 }
  0xf4   : > { %v3708_v47 = vpop.f32.mrf.mxu0  ;;  %v3730_v51 = vpop.f32.mrf.mxu1  ;;  %v2399_v60 = vor.u32 %v2397_v48, %v2395_v34 }
  0xf5   : > { %v2396_v47 = vsel %vm587_vm3, %v2391_v33, %v2395_v34 }
  0xf6   : > { %v368_v52 = vpop.f32.mrf.mxu0  ;;  %v520_v53 = vpop.f32.mrf.mxu1  ;;  %v2404_v9 = vsel %vm587_vm3, %v2399_v60, %v2403_v61 }
  0xf7   : > { %v2589_v52 = vsel %vm587_vm3, %v2584_v39, %v2588_v40  ;;  %v2590_v53 = vshrl.u32 %v4133_v10, 16  ;;  %v2405_v10 = vshrl.u32 %v4134_v35, 16 }
  0xf8   : > { %v3709_v57 = vpop.f32.mrf.mxu0  ;;  %v3731_v62 = vpop.f32.mrf.mxu1 }
  0xf9   : > { %v4136_v62 = vld [vmem:[%s4240_s28 + $0x84] sm:$0x1f]  }
  0xfa   : > { %v679_v63 = vpop.f32.mrf.mxu0  ;;  %3927 = vmatmul.mubr.msk.bf16.gmra.mxu0 %vm279_vm2, %v2058_v27  ;;  %v872_v1 = vpop.f32.mrf.mxu1  ;;  %3949 = vmatmul.mubr.msk.bf16.gmra.mxu1 %vm279_vm2, %v2221_v30  ;;  %v2951_v30 = vsel %vm295_vm0, %v3537_v15, 0  ;;  %v2598_v15 = vshrl.u32 %v4135_v41, 16 }
  0xfb   : > { %v717_v0 = vadd.f32 %v679_v63, %v4512_v38  ;;  %3954 = vmatprep.mubr.msk.bf16.mxu0 %vm4173_vm1, %v4172_v2  ;;  %3976 = vmatprep.mubr.msk.bf16.mxu1 %vm4173_vm1, %v4172_v2  ;;  %v3516_v38 = vld [vmem:[%s4833_s1 + $0x38] sm:$0xf] }
  0xfc   : > { %v3736_v7 = vpop.f32.mrf.mxu0  ;;  %v3758_v13 = vpop.f32.mrf.mxu1  ;;  %v2788_v24 = vsel %vm295_vm0, %v3516_v38, 0 }
  0xfd   : > { %v4593_v11 = vadd.f32 %v872_v1, %v717_v0  ;;  %v2592_v0 = vor.u32 %v2590_v53, %v2588_v40  ;;  %v2596_v1 = vrot.slane %v2594_v54, 1  ;;  %v2409_v13 = vshll.u32 %v4136_v62, 16  ;;  %v4140_v54 = vld [vmem:[%s4240_s28 + $0x94] sm:$0xfe]  }
  0xfe   : > { %v682_v14 = vpop.f32.mrf.mxu0  ;;  %v875_v17 = vpop.f32.mrf.mxu1  ;;  %v2413_v40 = vshrl.u32 %v4136_v62, 16 }
  0xff   : > { %v718_v16 = vadd.f32 %v682_v14, %v4524_v49  ;;  %v2597_v14 = vsel %vm587_vm3, %v2592_v0, %v2596_v1  ;;  %v2600_v25 = vor.u32 %v2598_v15, %v2596_v1  ;;  %v2926_v0 = vrot.slane %v4140_v54, 1 }
 0x100   : > { %v3737_v22 = vpop.f32.mrf.mxu0  ;;  %v3759_v29 = vpop.f32.mrf.mxu1 }
 0x101   : > { %v4605_v27 = vadd.f32 %v875_v17, %v718_v16  ;;  %v2602_v16 = vshll.u32 %v4137_v3, 16 }
 0x102   : > { %v687_v49 = vpop.f32.mrf.mxu0  ;;  %3955 = vmatmul.mubr.msk.bf16.vlgmr.msra.gmra.mxu0 %vm279_vm2, %v2388_v18  ;;  %v880_v32 = vpop.f32.mrf.mxu1  ;;  %3977 = vmatmul.mubr.msk.bf16.vlgmr.msra.gmra.mxu1 %vm279_vm2, %v2581_v23  ;;  %v2411_v23 = vrot.slane %v2409_v13, 1 }
 0x103   : > { %v719_v31 = vadd.f32 %v687_v49, %v4532_v59  ;;  %3997 = vmatpush3.bf16.msra.mxu0 %v2788_v24  ;;  %4019 = vmatpush3.bf16.msra.mxu1 %v2951_v30  ;;  %v2604_v26 = vrot.slane %v2602_v16, 1 }
 0x104   : > { %v3740_v37 = vpop.f32.mrf.mxu0  ;;  %3958 = vmatprep.mubr.msk.bf16.mxu0 %vm4173_vm1, %v4172_v2  ;;  %v3762_v43 = vpop.f32.mrf.mxu1  ;;  %3980 = vmatprep.mubr.msk.bf16.mxu1 %vm4173_vm1, %v4172_v2  ;;  %v2415_v48 = vor.u32 %v2413_v40, %v2411_v23 }
 0x105   : > { %v4615_v42 = vadd.f32 %v880_v32, %v719_v31  ;;  %v2605_v34 = vsel %vm587_vm3, %v2600_v25, %v2604_v26 }
 0x106   : > { %v690_v59 = vpop.f32.mrf.mxu0  ;;  %v883_v45 = vpop.f32.mrf.mxu1 }
 0x107   : > { %v720_v44 = vadd.f32 %v690_v59, %v4542_v4 }
 0x108   : > { %v3741_v51 = vpop.f32.mrf.mxu0  ;;  %v3763_v56 = vpop.f32.mrf.mxu1 }
 0x109   : > { %v4622_v55 = vadd.f32 %v883_v45, %v720_v44  ;;  %v4138_v51 = vld [vmem:[%s4240_s28 + $0x64] sm:$0xfe]   ;;  %v4141_v56 = vld [vmem:[%s4240_s28 + $0x9c] sm:$0xff]  }
 0x10a   : > { %v695_v57 = vpop.f32.mrf.mxu0  ;;  %3959 = vmatmul.mubr.msk.bf16.gmra.mxu0 %vm279_vm2, %v2396_v47  ;;  %v888_v58 = vpop.f32.mrf.mxu1  ;;  %3981 = vmatmul.mubr.msk.bf16.gmra.mxu1 %vm279_vm2, %v2589_v52  ;;  %v4139_v52 = vld [vmem:[%s4240_s28 + $0x6c] sm:$0xff]   ;;  %v2927_v1 = vrot.slane %v4141_v56, 1 }
 0x10b   : > { %v721_v4 = vadd.f32 %v695_v57, %v4550_v12  ;;  %3962 = vmatprep.mubr.msk.bf16.mxu0 %vm4173_vm1, %v4172_v2  ;;  %3984 = vmatprep.mubr.msk.bf16.mxu1 %vm4173_vm1, %v4172_v2  ;;  %v2764_v62 = vrot.slane %v4139_v52, 1 }
 0x10c   : > { %v3744_v63 = vpop.f32.mrf.mxu0  ;;  %v3766_v6 = vpop.f32.mrf.mxu1  ;;  %v2928_v13 = vsel %vm2050_vm4, %v2926_v0, %v2927_v1 }
 0x10d   : > { %v4633_v5 = vadd.f32 %v888_v58, %v721_v4 }
 0x10e   : > { %v698_v12 = vpop.f32.mrf.mxu0  ;;  %v891_v8 = vpop.f32.mrf.mxu1 }
 0x10f   : > { %v722_v7 = vadd.f32 %v698_v12, %v4556_v20  ;;  %v2407_v20 = vor.u32 %v2405_v10, %v2403_v61  ;;  %v2763_v61 = vrot.slane %v4138_v51, 1  ;;  %v4147_v51 = vld [vmem:[%s4240_s28 + $0xb4] sm:$0x1f]  }
 0x110   : > { %v3745_v38 = vpop.f32.mrf.mxu0  ;;  %v3767_v18 = vpop.f32.mrf.mxu1 }
 0x111   : > { %v4638_v17 = vadd.f32 %v891_v8, %v722_v7  ;;  %v2412_v32 = vsel %vm587_vm3, %v2407_v20, %v2411_v23  ;;  %v2765_v8 = vsel %vm2050_vm4, %v2763_v61, %v2764_v62  ;;  %v4143_v38 = vld [vmem:[%s4240_s28 + $0xa4] sm:$0xff]  }
 0x112   : > { %v703_v19 = vpop.f32.mrf.mxu0  ;;  %3963 = vmatmul.mubr.msk.bf16.gmra.mxu0 %vm279_vm2, %v2404_v9  ;;  %v896_v22 = vpop.f32.mrf.mxu1  ;;  %3985 = vmatmul.mubr.msk.bf16.gmra.mxu1 %vm279_vm2, %v2597_v14  ;;  %v4142_v9 = vld [vmem:[%s4240_s28 + $0x74] sm:$0xff]  }
 0x113   : > { %v723_v21 = vadd.f32 %v703_v19, %v4564_v28  ;;  %3966 = vmatprep.mubr.msk.bf16.mxu0 %vm4173_vm1, %v4172_v2  ;;  %3988 = vmatprep.mubr.msk.bf16.mxu1 %vm4173_vm1, %v4172_v2 }
 0x114   : > { %v3748_v24 = vpop.f32.mrf.mxu0  ;;  %v3770_v30 = vpop.f32.mrf.mxu1 }
 0x115   : > { %v4647_v29 = vadd.f32 %v896_v22, %v723_v21  ;;  %v2929_v22 = vrot.slane %v4143_v38, 1  ;;  %v4144_v30 = vld [vmem:[%s4240_s28 + $0x7c] sm:$0xff]  }
 0x116   : > { %v706_v49 = vpop.f32.mrf.mxu0  ;;  %v899_v31 = vpop.f32.mrf.mxu1 }
 0x117   : > { %v724_v28 = vadd.f32 %v706_v49, %v4570_v36  ;;  %v2606_v36 = vshrl.u32 %v4137_v3, 16 }
 0x118   : > { %v3749_v33 = vpop.f32.mrf.mxu0  ;;  %v3771_v37 = vpop.f32.mrf.mxu1 }
 0x119   : > { %v4652_v35 = vadd.f32 %v899_v31, %v724_v28  ;;  %v2930_v28 = vsel %vm2050_vm4, %v2927_v1, %v2929_v22  ;;  %v4145_v31 = vld [vmem:[%s4240_s28 + $0xac] sm:$0xff]  }
 0x11a   : > { %v711_v39 = vpop.f32.mrf.mxu0  ;;  %3967 = vmatmul.mubr.msk.bf16.gmra.mxu0 %vm279_vm2, %v2412_v32  ;;  %v904_v43 = vpop.f32.mrf.mxu1  ;;  %3989 = vmatmul.mubr.msk.bf16.gmra.mxu1 %vm279_vm2, %v2605_v34 }
 0x11b   : > { %v725_v41 = vadd.f32 %v711_v39, %v4579_v46  ;;  %3970 = vmatprep.mubr.msk.bf16.mxu0 %vm4173_vm1, %v4172_v2  ;;  %3992 = vmatprep.mubr.msk.bf16.mxu1 %vm4173_vm1, %v4172_v2  ;;  %v2608_v46 = vor.u32 %v2606_v36, %v2604_v26 }
 0x11c   : > { %v3752_v59 = vpop.f32.mrf.mxu0  ;;  %v3774_v45 = vpop.f32.mrf.mxu1 }
 0x11d   : > { %v4661_v44 = vadd.f32 %v904_v43, %v725_v41  ;;  %v2931_v41 = vrot.slane %v4145_v31, 1 }
 0x11e   : > { %v714_v47 = vpop.f32.mrf.mxu0  ;;  %v907_v50 = vpop.f32.mrf.mxu1 }
 0x120   : > { %v3753_v53 = vpop.f32.mrf.mxu0  ;;  %v3775_v57 = vpop.f32.mrf.mxu1 }
 0x122   : > { %v1024_v4 = vpop.f32.mrf.mxu0  ;;  %3971 = vmatmul.mubr.msk.bf16.gmra.mxu0 %vm279_vm2, %v2415_v48  ;;  %v1176_v60 = vpop.f32.mrf.mxu1  ;;  %3993 = vmatmul.mubr.msk.bf16.gmra.mxu1 %vm279_vm2, %v2608_v46  ;;  %v4146_v48 = vld [vmem:[%s4240_s28 + $0x84] sm:$0x1f]   ;;  %v2932_v46 = vsel %vm2050_vm4, %v2929_v22, %v2931_v41 }
 0x123   : > { %v1062_v58 = vadd.f32 %v1024_v4, %v4593_v11  ;;  %3998 = vmatprep.mubr.msk.bf16.mxu0 %vm4173_vm1, %v4172_v2  ;;  %4020 = vmatprep.mubr.msk.bf16.mxu1 %vm4173_vm1, %v4172_v2 }
 0x124   : > { %v3780_v63 = vpop.f32.mrf.mxu0  ;;  %v3802_v6 = vpop.f32.mrf.mxu1 }
 0x125   : > { %v4674_v3 = vadd.f32 %v1176_v60, %v1062_v58  ;;  %v2933_v58 = vrot.slane %v4147_v51, 1 }
 0x126   : > { %v1027_v11 = vpop.f32.mrf.mxu0  ;;  %v1179_v7 = vpop.f32.mrf.mxu1 }
 0x127   : > { %v1063_v12 = vadd.f32 %v1027_v11, %v4605_v27  ;;  %v2766_v27 = vrot.slane %v4142_v9, 1  ;;  %v2934_v6 = vsel %vm2050_vm4, %v2931_v41, %v2933_v58 }
 0x128   : > { %v3781_v10 = vpop.f32.mrf.mxu0  ;;  %v3803_v15 = vpop.f32.mrf.mxu1 }
 0x129   : > { %v4681_v14 = vadd.f32 %v1179_v7, %v1063_v12  ;;  %v2767_v26 = vsel %vm2050_vm4, %v2764_v62, %v2766_v27 }
 0x12a   : > { %v1032_v16 = vpop.f32.mrf.mxu0  ;;  %3999 = vmatmul.mubr.msk.bf16.vlgmr.msra.gmra.mxu0 %vm279_vm2, %v2765_v8  ;;  %v1184_v19 = vpop.f32.mrf.mxu1  ;;  %4021 = vmatmul.mubr.msk.bf16.vlgmr.msra.gmra.mxu1 %vm279_vm2, %v2928_v13 }
 0x12b   : > { %v1064_v18 = vadd.f32 %v1032_v16, %v4615_v42  ;;  %4002 = vmatprep.mubr.msk.bf16.mxu0 %vm4173_vm1, %v4172_v2  ;;  %4024 = vmatprep.mubr.msk.bf16.mxu1 %vm4173_vm1, %v4172_v2 }
 0x12c   : > { %v3784_v21 = vpop.f32.mrf.mxu0  ;;  %v3806_v23 = vpop.f32.mrf.mxu1 }
 0x12d   : > { %v4690_v20 = vadd.f32 %v1184_v19, %v1064_v18 }
 0x12e   : > { %v1035_v24 = vpop.f32.mrf.mxu0  ;;  %v1187_v42 = vpop.f32.mrf.mxu1 }
 0x12f   : > { %v1065_v25 = vadd.f32 %v1035_v24, %v4622_v55  ;;  %v2768_v55 = vrot.slane %v4144_v30, 1 }
 0x130   : > { %v3785_v49 = vpop.f32.mrf.mxu0  ;;  %v3807_v33 = vpop.f32.mrf.mxu1 }
 0x131   : > { %v4697_v32 = vadd.f32 %v1187_v42, %v1065_v25  ;;  %v2769_v47 = vsel %vm2050_vm4, %v2766_v27, %v2768_v55 }
 0x132   : > { %v1040_v34 = vpop.f32.mrf.mxu0  ;;  %4003 = vmatmul.mubr.msk.bf16.gmra.mxu0 %vm279_vm2, %v2767_v26  ;;  %v1192_v39 = vpop.f32.mrf.mxu1  ;;  %4025 = vmatmul.mubr.msk.bf16.gmra.mxu1 %vm279_vm2, %v2930_v28 }
 0x133   : > { %v1066_v37 = vadd.f32 %v1040_v34, %v4633_v5  ;;  %4006 = vmatprep.mubr.msk.bf16.mxu0 %vm4173_vm1, %v4172_v2  ;;  %4028 = vmatprep.mubr.msk.bf16.mxu1 %vm4173_vm1, %v4172_v2 }
 0x134   : > { %v3788_v40 = vpop.f32.mrf.mxu0  ;;  %v3810_v36 = vpop.f32.mrf.mxu1 }
 0x135   : > { %v4706_v43 = vadd.f32 %v1192_v39, %v1066_v37 }
 0x136   : > { %v1043_v59 = vpop.f32.mrf.mxu0  ;;  %v1195_v5 = vpop.f32.mrf.mxu1 }
 0x137   : > { %v1067_v45 = vadd.f32 %v1043_v59, %v4638_v17  ;;  %v2770_v17 = vrot.slane %v4146_v48, 1 }
 0x138   : > { %v3789_v50 = vpop.f32.mrf.mxu0  ;;  %v3811_v53 = vpop.f32.mrf.mxu1 }
 0x139   : > { %v4713_v52 = vadd.f32 %v1195_v5, %v1067_v45 }
 0x13a   : > { %v1048_v54 = vpop.f32.mrf.mxu0  ;;  %4007 = vmatmul.mubr.msk.bf16.gmra.mxu0 %vm279_vm2, %v2769_v47  ;;  %v1200_v57 = vpop.f32.mrf.mxu1  ;;  %4029 = vmatmul.mubr.msk.bf16.gmra.mxu1 %vm279_vm2, %v2932_v46 }
 0x13b   : > { %v1068_v56 = vadd.f32 %v1048_v54, %v4647_v29  ;;  %4010 = vmatprep.mubr.msk.bf16.mxu0 %vm4173_vm1, %v4172_v2  ;;  %4032 = vmatprep.mubr.msk.bf16.mxu1 %vm4173_vm1, %v4172_v2  ;;  %v2771_v29 = vsel %vm2050_vm4, %v2768_v55, %v2770_v17 }
 0x13c   : > { %v3792_v4 = vpop.f32.mrf.mxu0  ;;  %v3814_v61 = vpop.f32.mrf.mxu1 }
 0x13d   : > { %v4722_v60 = vadd.f32 %v1200_v57, %v1068_v56 }
 0x13e   : > { %v1051_v62 = vpop.f32.mrf.mxu0  ;;  %v1203_v0 = vpop.f32.mrf.mxu1 }
 0x13f   : > { %v1069_v63 = vadd.f32 %v1051_v62, %v4652_v35 }
 0x140   : > { %v3793_v1 = vpop.f32.mrf.mxu0  ;;  %v3815_v12 = vpop.f32.mrf.mxu1 }
 0x141   : > { %v1221_v11 = vadd.f32 %v1203_v0, %v1069_v63 }
 0x142   : > { %v1056_v7 = vpop.f32.mrf.mxu0  ;;  %4011 = vmatmul.mubr.msk.bf16.gmra.mxu0 %vm279_vm2, %v2771_v29  ;;  %v1208_v9 = vpop.f32.mrf.mxu1  ;;  %4033 = vmatmul.mubr.msk.bf16.gmra.mxu1 %vm279_vm2, %v2934_v6 }
 0x143   : > { %v1070_v8 = vadd.f32 %v1056_v7, %v4661_v44  ;;  %4014 = vmatprep.mubr.msk.bf16.mxu0 %vm4173_vm1, %v4172_v2  ;;  %4036 = vmatprep.mubr.msk.bf16.mxu1 %vm4173_vm1, %v4172_v2 }
 0x144   : > { %v3796_v35 = vpop.f32.mrf.mxu0  ;;  %v3818_v13 = vpop.f32.mrf.mxu1 }
 0x145   : > { %v1222_v10 = vadd.f32 %v1208_v9, %v1070_v8 }
 0x146   : > { %v1059_v38 = vpop.f32.mrf.mxu0  ;;  %v1211_v15 = vpop.f32.mrf.mxu1 }
 0x148   : > { %v3797_v16 = vpop.f32.mrf.mxu0  ;;  %v3819_v18 = vpop.f32.mrf.mxu1 }
 0x14a   : > { %v1369_v19 = vpop.f32.mrf.mxu0  ;;  %4015 = vmatmul.mubr.msk.bf16.gmra.mxu0 %vm279_vm2, %v2770_v17  ;;  %v1562_v27 = vpop.f32.mrf.mxu1  ;;  %4037 = vmatmul.mubr.msk.bf16.gmra.mxu1 %vm279_vm2, %v2933_v58 }
 0x14b   : > { %v1407_v44 = vadd.f32 %v1369_v19, %v4674_v3 }
 0x14c   : > { %v3824_v21 = vpop.f32.mrf.mxu0  ;;  %v3846_v23 = vpop.f32.mrf.mxu1 }
 0x14d   : > { %v1600_v22 = vadd.f32 %v1562_v27, %v1407_v44 }
 0x14e   : > { %v1372_v24 = vpop.f32.mrf.mxu0  ;;  %v1565_v25 = vpop.f32.mrf.mxu1 }
 0x14f   : > { %v1408_v2 = vadd.f32 %v1372_v24, %v4681_v14 }
 0x150   : > { %v3825_v42 = vpop.f32.mrf.mxu0  ;;  %v3847_v30 = vpop.f32.mrf.mxu1 }
 0x151   : > { %v1601_v26 = vadd.f32 %v1565_v25, %v1408_v2 }
 0x152   : > { %v1377_v49 = vpop.f32.mrf.mxu0  ;;  %v1570_v31 = vpop.f32.mrf.mxu1 }
 0x153   : > { %v1409_v28 = vadd.f32 %v1377_v49, %v4690_v20 }
 0x154   : > { %v3828_v33 = vpop.f32.mrf.mxu0  ;;  %v3850_v3 = vpop.f32.mrf.mxu1 }
 0x155   : > { %v1602_v34 = vadd.f32 %v1570_v31, %v1409_v28 }
 0x156   : > { %v1380_v37 = vpop.f32.mrf.mxu0  ;;  %v1573_v55 = vpop.f32.mrf.mxu1 }
 0x157   : > { %v1410_v39 = vadd.f32 %v1380_v37, %v4697_v32 }
 0x158   : > { %v3829_v40 = vpop.f32.mrf.mxu0  ;;  %v3851_v36 = vpop.f32.mrf.mxu1 }
 0x159   : > { %v1603_v41 = vadd.f32 %v1573_v55, %v1410_v39 }
 0x15a   : > { %v1385_v59 = vpop.f32.mrf.mxu0  ;;  %v1578_v45 = vpop.f32.mrf.mxu1 }
 0x15b   : > { %v1411_v14 = vadd.f32 %v1385_v59, %v4706_v43 }
 0x15c   : > { %v3832_v5 = vpop.f32.mrf.mxu0  ;;  %v3854_v48 = vpop.f32.mrf.mxu1 }
 0x15d   : > { %v1604_v47 = vadd.f32 %v1578_v45, %v1411_v14 }
 0x15e   : > { %v1388_v50 = vpop.f32.mrf.mxu0  ;;  %v1581_v46 = vpop.f32.mrf.mxu1 }
 0x15f   : > { %v1412_v20 = vadd.f32 %v1388_v50, %v4713_v52 }
 0x160   : > { %v3833_v51 = vpop.f32.mrf.mxu0  ;;  %v3855_v54 = vpop.f32.mrf.mxu1 }
 0x161   : > { %v1605_v53 = vadd.f32 %v1581_v46, %v1412_v20 }
 0x162   : > { %v1393_v56 = vpop.f32.mrf.mxu0  ;;  %v1586_v57 = vpop.f32.mrf.mxu1 }
 0x163   : > { %v1413_v32 = vadd.f32 %v1393_v56, %v4722_v60 }
 0x164   : > { %v3836_v17 = vpop.f32.mrf.mxu0  ;;  %v3858_v58 = vpop.f32.mrf.mxu1 }
 0x165   : > { %v1606_v4 = vadd.f32 %v1586_v57, %v1413_v32 }
 0x166   : > { %v1396_v61 = vpop.f32.mrf.mxu0  ;;  %v1589_v62 = vpop.f32.mrf.mxu1 }
 0x167   : > { %v1414_v43 = vadd.f32 %v1396_v61, %v1221_v11 }
 0x168   : > { %v3837_v63 = vpop.f32.mrf.mxu0  ;;  %v3859_v29 = vpop.f32.mrf.mxu1 }
 0x169   : > { %v1607_v0 = vadd.f32 %v1589_v62, %v1414_v43 }
 0x16a   : > { %v1401_v1 = vpop.f32.mrf.mxu0  ;;  %v1594_v52 = vpop.f32.mrf.mxu1 }
 0x16b   : > { %v1415_v6 = vadd.f32 %v1401_v1, %v1222_v10 }
 0x16c   : > { %v3840_v12 = vpop.f32.mrf.mxu0  ;;  %v3862_v8 = vpop.f32.mrf.mxu1 }
 0x16d   : > { %v1608_v7 = vadd.f32 %v1594_v52, %v1415_v6 }
 0x16e   : > { %v1404_v9 = vpop.f32.mrf.mxu0  ;;  %v1597_v35 = vpop.f32.mrf.mxu1 }
 0x170   : > { %v3841_v13 = vpop.f32.mrf.mxu0  ;;  %v3863_v60 = vpop.f32.mrf.mxu1 }
 0x172   : > { %v1755_v38 = vpop.f32.mrf.mxu0  ;;  %v1948_v16 = vpop.f32.mrf.mxu1 }
 0x173   : > { %v1793_v15 = vadd.f32 %v1755_v38, %v1600_v22 }
 0x174   : > { %v3868_v18 = vpop.f32.mrf.mxu0  ;;  %v3890_v11 = vpop.f32.mrf.mxu1 }
 0x175   : > { %v1986_v19 = vadd.f32 %v1948_v16, %v1793_v15 }
 0x176   : > { %v1758_v44 = vpop.f32.mrf.mxu0  ;;  %v1951_v21 = vpop.f32.mrf.mxu1 }
 0x177   : > { %v1794_v27 = vadd.f32 %v1758_v44, %v1601_v26 }
 0x178   : > { %v3869_v23 = vpop.f32.mrf.mxu0  ;;  %v3891_v10 = vpop.f32.mrf.mxu1 }
 0x179   : > { %v1987_v24 = vadd.f32 %v1951_v21, %v1794_v27 }
 0x17a   : > { %v1763_v2 = vpop.f32.mrf.mxu0  ;;  %v1956_v42 = vpop.f32.mrf.mxu1 }
 0x17b   : > { %v1795_v25 = vadd.f32 %v1763_v2, %v1602_v34 }
 0x17c   : > { %v3872_v30 = vpop.f32.mrf.mxu0  ;;  %v3894_v28 = vpop.f32.mrf.mxu1 }
 0x17d   : > { %v1988_v49 = vadd.f32 %v1956_v42, %v1795_v25 }
 0x17e   : > { %v1766_v31 = vpop.f32.mrf.mxu0  ;;  %v1959_v3 = vpop.f32.mrf.mxu1 }
 0x17f   : > { %v1796_v33 = vadd.f32 %v1766_v31, %v1603_v41 }
 0x180   : > { %v3873_v22 = vpop.f32.mrf.mxu0  ;;  %v3895_v39 = vpop.f32.mrf.mxu1 }
 0x181   : > { %v1989_v37 = vadd.f32 %v1959_v3, %v1796_v33 }
 0x182   : > { %v1771_v55 = vpop.f32.mrf.mxu0  ;;  %v1964_v36 = vpop.f32.mrf.mxu1 }
 0x183   : > { %v1797_v40 = vadd.f32 %v1771_v55, %v1604_v47 }
 0x184   : > { %v3876_v26 = vpop.f32.mrf.mxu0  ;;  %v3898_v14 = vpop.f32.mrf.mxu1 }
 0x185   : > { %v1990_v59 = vadd.f32 %v1964_v36, %v1797_v40 }
 0x186   : > { %v1774_v45 = vpop.f32.mrf.mxu0  ;;  %v1967_v48 = vpop.f32.mrf.mxu1 }
 0x187   : > { %v1798_v5 = vadd.f32 %v1774_v45, %v1605_v53 }
 0x188   : > { %v3877_v34 = vpop.f32.mrf.mxu0  ;;  %v3899_v20 = vpop.f32.mrf.mxu1 }
 0x189   : > { %v1991_v50 = vadd.f32 %v1967_v48, %v1798_v5 }
 0x18a   : > { %v1779_v46 = vpop.f32.mrf.mxu0  ;;  %v1972_v54 = vpop.f32.mrf.mxu1 }
 0x18b   : > { %v1799_v51 = vadd.f32 %v1779_v46, %v1606_v4 }
 0x18c   : > { %v3880_v41 = vpop.f32.mrf.mxu0  ;;  %v3902_v32 = vpop.f32.mrf.mxu1 }
 0x18d   : > { %v1992_v56 = vadd.f32 %v1972_v54, %v1799_v51 }
 0x18e   : > { %v1782_v57 = vpop.f32.mrf.mxu0  ;;  %v1975_v58 = vpop.f32.mrf.mxu1 }
 0x18f   : > { %v1800_v17 = vadd.f32 %v1782_v57, %v1607_v0 }
 0x190   : > { %v3881_v47 = vpop.f32.mrf.mxu0  ;;  %v3903_v43 = vpop.f32.mrf.mxu1 }
 0x191   : > { %v1993_v61 = vadd.f32 %v1975_v58, %v1800_v17 }
 0x192   : > { %v1787_v62 = vpop.f32.mrf.mxu0  ;;  %v1980_v29 = vpop.f32.mrf.mxu1 }
 0x193   : > { %v1801_v63 = vadd.f32 %v1787_v62, %v1608_v7 }
 0x194   : > { %v3884_v53 = vpop.f32.mrf.mxu0  ;;  %v3906_v6 = vpop.f32.mrf.mxu1 }
 0x195   : > { %v1994_v1 = vadd.f32 %v1980_v29, %v1801_v63 }
 0x196   : > { %v1790_v52 = vpop.f32.mrf.mxu0  ;;  %v1983_v12 = vpop.f32.mrf.mxu1 }
 0x198   : > { %v3885_v8 = vpop.f32.mrf.mxu0  ;;  %v3907_v4 = vpop.f32.mrf.mxu1 }
 0x19a   : > { %v2112_v9 = vpop.f32.mrf.mxu0  ;;  %v2275_v13 = vpop.f32.mrf.mxu1 }
 0x19b   : > { %v2150_v35 = vadd.f32 %v2112_v9, %v1986_v19 }
 0x19c   : > { %v3912_v60 = vpop.f32.mrf.mxu0  ;;  %v3934_v0 = vpop.f32.mrf.mxu1 }
 0x19d   : > { %v4743_v38 = vadd.f32 %v2275_v13, %v2150_v35 }
 0x19e   : > { %v2115_v15 = vpop.f32.mrf.mxu0  ;;  %v2278_v18 = vpop.f32.mrf.mxu1 }
 0x19f   : > { %v2151_v16 = vadd.f32 %v2115_v15, %v1987_v24 }
 0x1a0   : > { %v3913_v11 = vpop.f32.mrf.mxu0  ;;  %v3935_v44 = vpop.f32.mrf.mxu1 }
 0x1a1   : > { %v4745_v7 = vadd.f32 %v2278_v18, %v2151_v16 }
 0x1a2   : > { %v2120_v27 = vpop.f32.mrf.mxu0  ;;  %v2283_v23 = vpop.f32.mrf.mxu1 }
 0x1a3   : > { %v2152_v21 = vadd.f32 %v2120_v27, %v1988_v49 }
 0x1a4   : > { %v3916_v10 = vpop.f32.mrf.mxu0  ;;  %v3938_v25 = vpop.f32.mrf.mxu1 }
 0x1a5   : > { %v4747_v2 = vadd.f32 %v2283_v23, %v2152_v21 }
 0x1a6   : > { %v2123_v19 = vpop.f32.mrf.mxu0  ;;  %v2286_v30 = vpop.f32.mrf.mxu1 }
 0x1a7   : > { %v2153_v42 = vadd.f32 %v2123_v19, %v1989_v37 }
 0x1a8   : > { %v3917_v28 = vpop.f32.mrf.mxu0  ;;  %v3939_v33 = vpop.f32.mrf.mxu1 }
 0x1a9   : > { %v4749_v31 = vadd.f32 %v2286_v30, %v2153_v42 }
 0x1aa   : > { %v2128_v24 = vpop.f32.mrf.mxu0  ;;  %v2291_v22 = vpop.f32.mrf.mxu1 }
 0x1ab   : > { %v2154_v3 = vadd.f32 %v2128_v24, %v1990_v59 }
 0x1ac   : > { %v3920_v39 = vpop.f32.mrf.mxu0  ;;  %v3942_v40 = vpop.f32.mrf.mxu1 }
 0x1ad   : > { %v4751_v55 = vadd.f32 %v2291_v22, %v2154_v3 }
 0x1ae   : > { %v2131_v49 = vpop.f32.mrf.mxu0  ;;  %v2294_v26 = vpop.f32.mrf.mxu1 }
 0x1af   : > { %v2155_v36 = vadd.f32 %v2131_v49, %v1991_v50 }
 0x1b0   : > { %v3921_v14 = vpop.f32.mrf.mxu0  ;;  %v3943_v5 = vpop.f32.mrf.mxu1 }
 0x1b1   : > { %v4753_v45 = vadd.f32 %v2294_v26, %v2155_v36 }
 0x1b2   : > { %v2136_v37 = vpop.f32.mrf.mxu0  ;;  %v2299_v34 = vpop.f32.mrf.mxu1 }
 0x1b3   : > { %v2156_v48 = vadd.f32 %v2136_v37, %v1992_v56 }
 0x1b4   : > { %v3924_v20 = vpop.f32.mrf.mxu0  ;;  %v3946_v51 = vpop.f32.mrf.mxu1 }
 0x1b5   : > { %v4755_v46 = vadd.f32 %v2299_v34, %v2156_v48 }
 0x1b6   : > { %v2139_v59 = vpop.f32.mrf.mxu0  ;;  %v2302_v41 = vpop.f32.mrf.mxu1 }
 0x1b7   : > { %v2157_v54 = vadd.f32 %v2139_v59, %v1993_v61 }
 0x1b8   : > { %v3925_v32 = vpop.f32.mrf.mxu0  ;;  %v3947_v17 = vpop.f32.mrf.mxu1 }
 0x1b9   : > { %v4757_v57 = vadd.f32 %v2302_v41, %v2157_v54 }
 0x1ba   : > { %v2144_v50 = vpop.f32.mrf.mxu0  ;;  %v2307_v47 = vpop.f32.mrf.mxu1 }
 0x1bb   : > { %v2158_v58 = vadd.f32 %v2144_v50, %v1994_v1  ;;  %v4785_v50 = vld [vmem:[%s4834_s2] ss:$0 sm:$0xff] }
 0x1bc   : > { %v3928_v43 = vpop.f32.mrf.mxu0  ;;  %v3950_v63 = vpop.f32.mrf.mxu1 }
 0x1bd   : > { %v4759_v62 = vadd.f32 %v2307_v47, %v2158_v58 }
 0x1be   : > { %v2147_v56 = vpop.f32.mrf.mxu0  ;;  %v2310_v29 = vpop.f32.mrf.mxu1 }
 0x1c0   : > { %v3929_v53 = vpop.f32.mrf.mxu0  ;;  %v3951_v6 = vpop.f32.mrf.mxu1 }
 0x1c2   : > { %v2468_v52 = vpop.f32.mrf.mxu0  ;;  %v2661_v12 = vpop.f32.mrf.mxu1 }
 0x1c3   : > { %v2506_v5 = vadd.f32 %v2468_v52, %v4743_v38 }
 0x1c4   : > { %v3956_v8 = vpop.f32.mrf.mxu0  ;;  %v3978_v61 = vpop.f32.mrf.mxu1 }
 0x1c5   : > { %v2699_v51 = vadd.f32 %v2661_v12, %v2506_v5 }
 0x1c6   : > { %v2471_v4 = vpop.f32.mrf.mxu0  ;;  %v2664_v9 = vpop.f32.mrf.mxu1 }
 0x1c7   : > { %v2507_v59 = vadd.f32 %v2471_v4, %v4745_v7 }
 0x1c8   : > { %v3957_v35 = vpop.f32.mrf.mxu0  ;;  %v3979_v13 = vpop.f32.mrf.mxu1 }
 0x1c9   : > { %v2700_v38 = vadd.f32 %v2664_v9, %v2507_v59 }
 0x1ca   : > { %v2476_v60 = vpop.f32.mrf.mxu0  ;;  %v2669_v0 = vpop.f32.mrf.mxu1 }
 0x1cb   : > { %v2508_v47 = vadd.f32 %v2476_v60, %v4747_v2 }
 0x1cc   : > { %v3960_v1 = vpop.f32.mrf.mxu0  ;;  %v3982_v15 = vpop.f32.mrf.mxu1 }
 0x1cd   : > { %v2701_v12 = vadd.f32 %v2669_v0, %v2508_v47 }
 0x1ce   : > { %v2479_v16 = vpop.f32.mrf.mxu0  ;;  %v2672_v18 = vpop.f32.mrf.mxu1 }
 0x1cf   : > { %v2509_v6 = vadd.f32 %v2479_v16, %v4749_v31 }
 0x1d0   : > { %v3961_v11 = vpop.f32.mrf.mxu0  ;;  %v3983_v44 = vpop.f32.mrf.mxu1 }
 0x1d1   : > { %v2702_v60 = vadd.f32 %v2672_v18, %v2509_v6 }
 0x1d2   : > { %v2484_v27 = vpop.f32.mrf.mxu0  ;;  %v4761_v21 = vpop.f32.mrf.mxu1 }
 0x1d3   : > { %v2510_v15 = vadd.f32 %v2484_v27, %v4751_v55 }
 0x1d4   : > { %v3964_v23 = vpop.f32.mrf.mxu0  ;;  %v3986_v10 = vpop.f32.mrf.mxu1 }
 0x1d6   : > { %v4763_v25 = vpop.f32.mrf.mxu0  ;;  %v4765_v19 = vpop.f32.mrf.mxu1 }
 0x1d7   : > { %v2511_v55 = vadd.f32 %v4763_v25, %v4753_v45 }
 0x1d8   : > { %v3965_v42 = vpop.f32.mrf.mxu0  ;;  %v3987_v30 = vpop.f32.mrf.mxu1 }
 0x1da   : > { %v4767_v28 = vpop.f32.mrf.mxu0  ;;  %v4769_v33 = vpop.f32.mrf.mxu1 }
 0x1db   : > { %v2512_v45 = vadd.f32 %v4767_v28, %v4755_v46 }
 0x1dc   : > { %v3968_v24 = vpop.f32.mrf.mxu0  ;;  %v3990_v3 = vpop.f32.mrf.mxu1 }
 0x1dd   : > { %v2703_v24 = vadd.f32 %v4761_v21, %v2510_v15 }
 0x1de   : > { %v4771_v22 = vpop.f32.mrf.mxu0  ;;  %v4773_v39 = vpop.f32.mrf.mxu1 }
 0x1e0   : > { %v3969_v40 = vpop.f32.mrf.mxu0  ;;  %v3991_v49 = vpop.f32.mrf.mxu1 }
 0x1e2   : > { %v4775_v36 = vpop.f32.mrf.mxu0  ;;  %v4777_v26 = vpop.f32.mrf.mxu1 }
 0x1e4   : > { %v3972_v14 = vpop.f32.mrf.mxu0  ;;  %v3994_v37 = vpop.f32.mrf.mxu1 }
 0x1e6   : > { %v2503_v48 = vpop.f32.mrf.mxu0  ;;  %v2696_v34 = vpop.f32.mrf.mxu1 }
 0x1e7   : > { %v2704_v34 = vadd.f32 %v4765_v19, %v2511_v55  ;;  %v2513_v19 = vadd.f32 %v4771_v22, %v4757_v57  ;;  %v2514_v57 = vadd.f32 %v4775_v36, %v4759_v62 }
 0x1e8   : > { %v3973_v20 = vpop.f32.mrf.mxu0  ;;  %v3995_v54 = vpop.f32.mrf.mxu1 }
 0x1e9   : > { %v2706_v6 = vadd.f32 %v4773_v39, %v2513_v19  ;;  %v2707_v39 = vadd.f32 %v4777_v26, %v2514_v57 }
 0x1ea   : > { %v2824_v41 = vpop.f32.mrf.mxu0  ;;  %v2987_v17 = vpop.f32.mrf.mxu1 }
 0x1eb   : > { %v2862_v32 = vadd.f32 %v2824_v41, %v2699_v51 }
 0x1ec   : > { %v4000_v58 = vpop.f32.mrf.mxu0  ;;  %v4022_v63 = vpop.f32.mrf.mxu1 }
 0x1ed   : > { %v3025_v43 = vadd.f32 %v2987_v17, %v2862_v32 }
 0x1ee   : > { %v2827_v56 = vpop.f32.mrf.mxu0  ;;  %v2990_v53 = vpop.f32.mrf.mxu1 }
 0x1ef   : > { %v3059_v29 = vadd.f32 %v4785_v50, %v3025_v43  ;;  %v2863_v7 = vadd.f32 %v2827_v56, %v2700_v38  ;;  %v2705_v43 = vadd.f32 %v4769_v33, %v2512_v45 }
 0x1f0   : > { %v4001_v52 = vpop.f32.mrf.mxu0  ;;  %v4023_v61 = vpop.f32.mrf.mxu1 }
 0x1f1   : > { %v3026_v8 = vadd.f32 %v2990_v53, %v2863_v7  ;;  %v3077_v35 = vmul.f32 0.2, %v3059_v29  ;;  %vm3068_vm5 = vcmp.gt.f32.partialorder %v3059_v29, 0.0 }
 0x1f2   : > { %v2832_v4 = vpop.f32.mrf.mxu0  ;;  %v2995_v13 = vpop.f32.mrf.mxu1 }
 0x1f3   : > { %v3060_v9 = vadd.f32 %v4785_v50, %v3026_v8  ;;  %v2864_v2 = vadd.f32 %v2832_v4, %v2701_v12  ;;  %v3086_v0 = vsel %vm3068_vm5, %v3059_v29, %v3077_v35 }
 0x1f4   : > { %v4004_v1 = vpop.f32.mrf.mxu0  ;;  %v4026_v31 = vpop.f32.mrf.mxu1 }
 0x1f5   : > { %vm3069_vm6 = vcmp.gt.f32.partialorder %v3060_v9, 0.0  ;;  %v3078_v11 = vmul.f32 0.2, %v3060_v9  ;;  %v3027_v44 = vadd.f32 %v2995_v13, %v2864_v2 }
 0x1f6   : > { %v2835_v16 = vpop.f32.mrf.mxu0  ;;  %v2998_v42 = vpop.f32.mrf.mxu1 }
 0x1f7   : > { %v3087_v23 = vsel %vm3069_vm6, %v3060_v9, %v3078_v11  ;;  %v3061_v10 = vadd.f32 %v4785_v50, %v3027_v44  ;;  %v2865_v18 = vadd.f32 %v2835_v16, %v2702_v60 }
 0x1f8   : > { %v3572_v27 = vpack.c.bf16 %v3087_v23, %v3086_v0  ;;  %v4005_v30 = vpop.f32.mrf.mxu0  ;;  %v4027_v40 = vpop.f32.mrf.mxu1 }
 0x1f9   : > { %v3028_v3 = vadd.f32 %v2998_v42, %v2865_v18  ;;  %v3079_v14 = vmul.f32 0.2, %v3061_v10  ;;  %vm3070_vm7 = vcmp.gt.f32.partialorder %v3061_v10, 0.0 }
 0x1fa   : > { %3573 = vst [vmem:[%s4796_s8] sm:$0xff] %v3572_v27   ;;  %v2840_v49 = vpop.f32.mrf.mxu0  ;;  %v3003_v48 = vpop.f32.mrf.mxu1 }
 0x1fb   : > { %v3062_v5 = vadd.f32 %v4785_v50, %v3028_v3  ;;  %v2866_v37 = vadd.f32 %v2840_v49, %v2703_v24  ;;  %v3088_v54 = vsel %vm3070_vm7, %v3061_v10, %v3079_v14 }
 0x1fc   : > { %v4008_v20 = vpop.f32.mrf.mxu0  ;;  %v4030_v51 = vpop.f32.mrf.mxu1 }
 0x1fd   : > { %vm3071_vm8 = vcmp.gt.f32.partialorder %v3062_v5, 0.0  ;;  %v3080_v25 = vmul.f32 0.2, %v3062_v5  ;;  %v3029_v21 = vadd.f32 %v3003_v48, %v2866_v37 }
 0x1fe   : > { %v2843_v59 = vpop.f32.mrf.mxu0  ;;  %v3006_v58 = vpop.f32.mrf.mxu1 }
 0x1ff   : > { %v3089_v41 = vsel %vm3071_vm8, %v3062_v5, %v3080_v25  ;;  %v3063_v32 = vadd.f32 %v4785_v50, %v3029_v21  ;;  %v2867_v17 = vadd.f32 %v2843_v59, %v2704_v34 }
 0x200   : > { %v3577_v38 = vpack.c.bf16 %v3089_v41, %v3088_v54  ;;  %v4009_v47 = vpop.f32.mrf.mxu0  ;;  %v4031_v28 = vpop.f32.mrf.mxu1 }
 0x201   : > { %v3030_v46 = vadd.f32 %v3006_v58, %v2867_v17  ;;  %v3081_v56 = vmul.f32 0.2, %v3063_v32  ;;  %vm3072_vm9 = vcmp.gt.f32.partialorder %v3063_v32, 0.0 }
 0x202   : > { %3589 = vst [vmem:[%s4796_s8 + $0x8] sm:$0xff] %v3577_v38   ;;  %v2848_v63 = vpop.f32.mrf.mxu0  ;;  %v3011_v53 = vpop.f32.mrf.mxu1 }
 0x203   : > { %v3064_v29 = vadd.f32 %v4785_v50, %v3030_v46  ;;  %v2868_v7 = vadd.f32 %v2848_v63, %v2705_v43  ;;  %v3090_v61 = vsel %vm3072_vm9, %v3063_v32, %v3081_v56 }
 0x204   : > { %v4012_v52 = vpop.f32.mrf.mxu0  ;;  %v4034_v12 = vpop.f32.mrf.mxu1 }
 0x205   : > { %vm3073_vm10 = vcmp.gt.f32.partialorder %v3064_v29, 0.0  ;;  %v3082_v22 = vmul.f32 0.2, %v3064_v29  ;;  %v3031_v33 = vadd.f32 %v3011_v53, %v2868_v7 }
 0x206   : > { %v2851_v8 = vpop.f32.mrf.mxu0  ;;  %v3014_v2 = vpop.f32.mrf.mxu1 }
 0x207   : > { %v3091_v4 = vsel %vm3073_vm10, %v3064_v29, %v3082_v22  ;;  %v3065_v35 = vadd.f32 %v4785_v50, %v3031_v33  ;;  %v2869_v9 = vadd.f32 %v2851_v8, %v2706_v6 }
 0x208   : > { %v3582_v13 = vpack.c.bf16 %v3091_v4, %v3090_v61  ;;  %v4013_v60 = vpop.f32.mrf.mxu0  ;;  %v4035_v15 = vpop.f32.mrf.mxu1 }
 0x209   : > { %v3032_v1 = vadd.f32 %v3014_v2, %v2869_v9  ;;  %v3083_v36 = vmul.f32 0.2, %v3065_v35  ;;  %vm3074_vm11 = vcmp.gt.f32.partialorder %v3065_v35, 0.0 }
 0x20a   : > { %3590 = vst [vmem:[%s4796_s8 + $0x10] sm:$0xff] %v3582_v13   ;;  %v2856_v62 = vpop.f32.mrf.mxu0  ;;  %v3019_v31 = vpop.f32.mrf.mxu1 }
 0x20b   : > { %v3066_v11 = vadd.f32 %v4785_v50, %v3032_v1  ;;  %v2870_v44 = vadd.f32 %v2856_v62, %v2707_v39  ;;  %v3092_v42 = vsel %vm3074_vm11, %v3065_v35, %v3083_v36 }
 0x20c   : > { %v4016_v16 = vpop.f32.mrf.mxu0  ;;  %v4038_v10 = vpop.f32.mrf.mxu1 }
 0x20d   : > { %vm3075_vm12 = vcmp.gt.f32.partialorder %v3066_v11, 0.0  ;;  %v3084_v0 = vmul.f32 0.2, %v3066_v11  ;;  %v3033_v23 = vadd.f32 %v3019_v31, %v2870_v44 }
 0x20e   : > { %v2859_v18 = vpop.f32.mrf.mxu0  ;;  %v3022_v27 = vpop.f32.mrf.mxu1 }
 0x20f   : > { %v3093_v26 = vsel %vm3075_vm12, %v3066_v11, %v3084_v0  ;;  %v3067_v55 = vadd.f32 %v4785_v50, %v3033_v23 }
 0x210   : > { %v3587_v30 = vpack.c.bf16 %v3093_v26, %v3092_v42  ;;  %v4017_v24 = vpop.f32.mrf.mxu0  ;;  %v4039_v40 = vpop.f32.mrf.mxu1 }
 0x211   : > { %vm3076_vm13 = vcmp.gt.f32.partialorder %v3067_v55, 0.0  ;;  %v3085_v3 = vmul.f32 0.2, %v3067_v55 }
 0x212   : > { %3591 = vst [vmem:[%s4796_s8 + $0x18] sm:$0xff] %v3587_v30  }
 0x213   : > { %v3094_v49 = vsel %vm3076_vm13, %v3067_v55, %v3085_v3 }
 0x214   : > { %v3568_v14 = vpack.c.bf16 %v3094_v49, %v3094_v49 }
 0x216   : > { %3140 = vst [vmem:[%s4796_s8 + $0x20] sm:$0xf] %v3568_v14 }
 0x217 PF: > { %s13_s14 = sadd.s32 1, %s4170_s14   ;;  %s4836_s12 = smov %s4166_s13 }
 0x218   : > { %p10_p6 = scmp.ge.s32.totalorder %s13_s14, 4   ;;  %s4837_s13 = smov %s4839_s15 }
 0x21a   :  { %12 = sbr.rel (!%p10_p6) target bundleno = 2 (0x2), region = 86 }

// kernel: patch_discriminator_forward.5
= control target key start
LH: loop header
LB: loop body
LE: loop exit
PB: predicated region body
PF: predicated region fallthrough
CT: control target
= control target key end

     0   :  { %s3989_s12 = smov 0   ;;  %s3991_s13 = smov 0   ;;  %s4569_s0 = inlined_call_operand.vmem [shape: bf16[8,30,128], index: 0, kind: input, shape index: {}]   ;;  %s4570_s1 = inlined_call_operand.vmem [shape: bf16[16,128,128], index: 1, kind: input, shape index: {}]   ;;  %s4571_s2 = inlined_call_operand.vmem [shape: f32[1,128], index: 2, kind: input, shape index: {}]   ;;  %s4572_s3 = inlined_call_operand.vmem [shape: bf16[2,20,128], index: 3, kind: output, shape index: {}]  }
   0x1   :  { %s3993_s14 = smov 0  }
   0x2 LB: > { %s25_s15 = sadd.s32 1, %s3962_s13  ;;  %p2808_p0 = scmp.ge.s32.totalorder %s3966_s14, 1  ;;  %s3966_s14 = sphi %s3993_s14, %s13_s14   ;;  %s3962_s13 = sphi %s3991_s13, %s4582_s13   ;;  %s3958_s12 = sphi %s3989_s12, %s4581_s12  }
   0x3   : > { %p27_p1 = scmp.ge.s32.totalorder %s25_s15, 2  ;;  %p170_p2 = scmp.lt.s32.totalorder %s3966_s14, 3 }
   0x5   : > { %s4584_s15 = smov (%p27_p1, %s25_s15), 0  ;;  %p171_p3 = pnand %p2808_p0, %p170_p2 }
   0x6   : > { %s2809_s18 = sshll.u32 (!%p171_p3), %s3958_s12, 2  ;;  %p219_p5 = scmp.lt.s32.totalorder (!%p171_p3), %s3958_s12, 1 }
   0x7   : > { %174 = sbr.rel (%p171_p3) target bundleno = 550 (0x226), region = 32  ;;  %p206_p4 = scmp.lt.s32.totalorder (!%p171_p3), %s2809_s18, 7 }
   0xc   : > { %v3782_v0 = vld [vmem:[%s4570_s1 + $0x38] sm:$0xff]   ;;  %v3783_v1 = vld [vmem:[%s4570_s1 + $0x30] sm:$0xff]   ;;  %v3785_v3 = vld [vmem:[%s4570_s1 + $0x28] sm:$0xff]   ;;  %s4586_s18 = smov (!%p206_p4, %s2809_s18), 7  ;;  %vm532_vm0 = vsmask.f32 7424 }
   0xd   : > { %3430 = vmatprep.subr.bf16.mxu0 %v3782_v0  ;;  %v3784_v2 = vld [vmem:[%s4570_s1 + $0x78] sm:$0xff]   ;;  %v3786_v4 = vld [vmem:[%s4570_s1 + $0x70] sm:$0xff]   ;;  %v3788_v5 = vld [vmem:[%s4570_s1 + $0x68] sm:$0xff]   ;;  %s3261_s4 = sshll.u32 %s4586_s18, 4  ;;  %vm1408_vm1 = vsmask.f32 5376 }
   0xe   : > { %3431 = vmatpush3.bf16.msra.mxu0 %v3782_v0  ;;  %3450 = vmatprep.subr.bf16.mxu1 %v3784_v2  ;;  %v3787_v6 = vld [vmem:[%s4570_s1 + $0x20] sm:$0xff]   ;;  %v3789_v8 = vld [vmem:[%s4570_s1 + $0x18] sm:$0xff]   ;;  %s4040_s11 = scalar_lea.vmem %s4569_s0, %s3261_s4  ;;  %v3791_v11 = vld [vmem:[%s4570_s1 + $0x10] sm:$0xff]   ;;  %vm1719_vm2 = vcmask 1044480   ;;  %vm2638_vm15 = vcmask 1043456   ;;  %s4588_s12 = smov (!%p219_p5, %s3958_s12), 1 }
   0xf   : > { %3432 = vmatprep.subr.bf16.mxu0 %v3783_v1  ;;  %3451 = vmatpush3.bf16.msra.mxu1 %v3784_v2  ;;  %v3790_v7 = vld [vmem:[%s4570_s1 + $0x60] sm:$0xff]   ;;  %v3792_v9 = vld [vmem:[%s4570_s1 + $0x58] sm:$0xff]   ;;  %v3794_v12 = vld [vmem:[%s4570_s1 + $0x50] sm:$0xff]   ;;  %s3750_s7 = smul.u32 12, %s4588_s12 }
  0x10   : > { %3452 = vmatprep.subr.bf16.mxu1 %v3786_v4  ;;  %v3797_v10 = vld [vmem:[%s4040_s11] sm:$0xff]   ;;  %v3801_v13 = vld [vmem:[%s4040_s11 + $0x10] sm:$0xff]   ;;  %v3793_v14 = vld [vmem:[%s4570_s1 + $0x8] sm:$0xff]  }
  0x11   : > { %3446 = vmatprep.mubr.bf16.mxu0 %v3797_v10  ;;  %3466 = vmatprep.mubr.bf16.mxu1 %v3801_v13  ;;  %v3796_v15 = vld [vmem:[%s4570_s1 + $0x48] sm:$0xff]   ;;  %v3795_v16 = vld [vmem:[%s4570_s1] sm:$0xff]   ;;  %v3800_v19 = vld [vmem:[%s4570_s1 + $0xb8] sm:$0xff]   ;;  %s226_s10 = scalar_lea.vmem %s4572_s3, %s3750_s7 }
  0x12   : > { %3433 = vmatpush3.bf16.msra.mxu0 %v3783_v1  ;;  %v3799_v17 = vld [vmem:[%s4570_s1 + $0x40] sm:$0xff]   ;;  %v3798_v18 = vld [vmem:[%s4040_s11 + $0x8] ss:$0 sps:$4 sm:$0x33]   ;;  %v3803_v20 = vld [vmem:[%s4570_s1 + $0xf8] sm:$0xff]  }
  0x13   : > { %3434 = vmatprep.subr.bf16.mxu0 %v3785_v3  ;;  %3453 = vmatpush3.bf16.msra.mxu1 %v3786_v4  ;;  %v3804_v21 = vld [vmem:[%s4040_s11 + $0x18] ss:$0 sps:$4 sm:$0x33]   ;;  %v3802_v22 = vld [vmem:[%s4570_s1 + $0xb0] sm:$0xff]   ;;  %v3817_v24 = vld [vmem:[%s4040_s11] sm:$0xff]  }
  0x14   : > { %3454 = vmatprep.subr.bf16.mxu1 %v3788_v5  ;;  %v3806_v23 = vld [vmem:[%s4570_s1 + $0xf0] sm:$0xff]   ;;  %v4081_v25 = vld [vmem:[%s4040_s11 + $0x8] ss:$0 sps:$4 sm:$0x77]   ;;  %v534_v28 = vshrl.u32 %v3817_v24, 16  ;;  %v536_v29 = vshll.u32 %v3817_v24, 16 }
  0x15   : > { %v3805_v26 = vld [vmem:[%s4570_s1 + $0xa8] sm:$0xff]   ;;  %v541_v30 = vshll.u32 %v4081_v25, 16  ;;  %v3807_v31 = vld [vmem:[%s4570_s1 + $0xa0] sm:$0xff]   ;;  %v3821_v34 = vld [vmem:[%s4040_s11 + $0x10] sm:$0xff]   ;;  %v545_v53 = vshrl.u32 %v4081_v25, 16 }
  0x16   : > { %3435 = vmatpush3.bf16.msra.mxu0 %v3785_v3  ;;  %v3808_v27 = vld [vmem:[%s4570_s1 + $0xe8] sm:$0xff]   ;;  %v538_v32 = vrot.slane %v536_v29, 1  ;;  %v3822_v35 = vld [vmem:[%s4040_s11 + $0x18] ss:$0 sps:$4 sm:$0x77]   ;;  %v3810_v37 = vld [vmem:[%s4570_s1 + $0xe0] sm:$0xff]  }
  0x17   : > { %3436 = vmatprep.subr.bf16.mxu0 %v3787_v6  ;;  %3455 = vmatpush3.bf16.msra.mxu1 %v3788_v5  ;;  %v543_v33 = vrot.slane %v541_v30, 1  ;;  %v684_v38 = vshrl.u32 %v3821_v34, 16  ;;  %v686_v39 = vshll.u32 %v3821_v34, 16  ;;  %v691_v40 = vshll.u32 %v3822_v35, 16  ;;  %v3809_v41 = vld [vmem:[%s4570_s1 + $0x98] sm:$0xff]   ;;  %v3811_v47 = vld [vmem:[%s4570_s1 + $0x90] sm:$0xff]  }
  0x18   : > { %3456 = vmatprep.subr.bf16.mxu1 %v3790_v7  ;;  %v539_v36 = vor.u32 %v538_v32, %v534_v28  ;;  %v3812_v45 = vld [vmem:[%s4570_s1 + $0xd8] sm:$0xff]   ;;  %v3814_v49 = vld [vmem:[%s4570_s1 + $0xd0] sm:$0xff]   ;;  %v3813_v50 = vld [vmem:[%s4570_s1 + $0x88] sm:$0xff]   ;;  %v695_v56 = vshrl.u32 %v3822_v35, 16  ;;  %v3968_v28 = vmov 0.0  }
  0x19   : > { %v688_v43 = vrot.slane %v686_v39, 1  ;;  %v693_v44 = vrot.slane %v691_v40, 1  ;;  %v3816_v51 = vld [vmem:[%s4570_s1 + $0xc8] sm:$0xff]   ;;  %v3815_v52 = vld [vmem:[%s4570_s1 + $0x80] sm:$0xff]   ;;  %v3820_v55 = vld [vmem:[%s4570_s1 + $0x138] sm:$0xff]   ;;  %v547_v57 = vor.u32 %v545_v53, %v543_v33 }
  0x1a   : > { %3437 = vmatpush3.bf16.msra.mxu0 %v3787_v6  ;;  %v544_v42 = vsel %vm532_vm0, %v539_v36, %v543_v33  ;;  %v3819_v54 = vld [vmem:[%s4570_s1 + $0xc0] sm:$0xff]   ;;  %v3824_v58 = vld [vmem:[%s4570_s1 + $0x178] sm:$0xff]   ;;  %v3823_v60 = vld [vmem:[%s4570_s1 + $0x130] sm:$0xff]   ;;  %230 = vst [vmem:[#allocation2 + $0x8] sm:$0xf] %v3968_v28 }
  0x1b   : > { %3438 = vmatprep.subr.bf16.mxu0 %v3789_v8  ;;  %3457 = vmatpush3.bf16.msra.mxu1 %v3790_v7  ;;  %v689_v46 = vor.u32 %v688_v43, %v684_v38  ;;  %v3837_v59 = vld [vmem:[%s4040_s11 + $0x20] sm:$0xff]   ;;  %v697_v61 = vor.u32 %v695_v56, %v693_v44  ;;  %v3841_v62 = vld [vmem:[%s4040_s11 + $0x30] sm:$0xff]   ;;  %v3825_v0 = vld [vmem:[%s4570_s1 + $0x128] sm:$0xff]  }
  0x1c   : > { %3458 = vmatprep.subr.bf16.mxu1 %v3792_v9  ;;  %v3826_v63 = vld [vmem:[%s4570_s1 + $0x170] sm:$0xff]   ;;  %v3828_v1 = vld [vmem:[%s4570_s1 + $0x168] sm:$0xff]   ;;  %v3827_v2 = vld [vmem:[%s4570_s1 + $0x120] sm:$0xff]  }
  0x1d   : > { %v694_v48 = vsel %vm532_vm0, %v689_v46, %v693_v44  ;;  %v3830_v3 = vld [vmem:[%s4570_s1 + $0x160] sm:$0xff]   ;;  %v3829_v4 = vld [vmem:[%s4570_s1 + $0x118] sm:$0xff]   ;;  %v3831_v6 = vld [vmem:[%s4570_s1 + $0x110] sm:$0xff]  }
  0x1e   : > { %3439 = vmatpush3.bf16.msra.mxu0 %v3789_v8  ;;  %v3832_v5 = vld [vmem:[%s4570_s1 + $0x158] sm:$0xff]   ;;  %v3857_v7 = vld [vmem:[%s4040_s11 + $0x20] sm:$0xff]   ;;  %v3834_v8 = vld [vmem:[%s4570_s1 + $0x150] sm:$0xff]  }
  0x1f   : > { %3440 = vmatprep.subr.bf16.mxu0 %v3791_v11  ;;  %3459 = vmatpush3.bf16.msra.mxu1 %v3792_v9  ;;  %v4165_v9 = vld [vmem:[%s4040_s11 + $0x28] ss:$0 sps:$4 sm:$0x77]   ;;  %v3861_v10 = vld [vmem:[%s4040_s11 + $0x30] sm:$0xff]   ;;  %v3840_v25 = vld [vmem:[%s4570_s1 + $0x1b8] sm:$0xff]  }
  0x20   : > { %3460 = vmatprep.subr.bf16.mxu1 %v3794_v12  ;;  %v4172_v13 = vld [vmem:[%s4040_s11 + $0x38] ss:$0 sps:$4 sm:$0x77]   ;;  %v3838_v24 = vld [vmem:[%s4040_s11 + $0x28] ss:$0 sps:$4 sm:$0x33]  }
  0x21   : > { %v3843_v29 = vld [vmem:[%s4570_s1 + $0x1f8] sm:$0xff]   ;;  %v3842_v33 = vld [vmem:[%s4570_s1 + $0x1b0] sm:$0xff]   ;;  %v3848_v38 = vld [vmem:[%s4570_s1 + $0x1e8] sm:$0xff]  }
  0x22   : > { %3441 = vmatpush3.bf16.msra.mxu0 %v3791_v11  ;;  %v3833_v11 = vld [vmem:[%s4570_s1 + $0x108] sm:$0xff]   ;;  %v3844_v30 = vld [vmem:[%s4040_s11 + $0x38] ss:$0 sps:$4 sm:$0x33]   ;;  %v3846_v35 = vld [vmem:[%s4570_s1 + $0x1f0] sm:$0xff]  }
  0x23   : > { %3442 = vmatprep.subr.bf16.mxu0 %v3793_v14  ;;  %3461 = vmatpush3.bf16.msra.mxu1 %v3794_v12  ;;  %v1108_v12 = vshll.u32 %v3857_v7, 16  ;;  %v3847_v39 = vld [vmem:[%s4570_s1 + $0x1a0] sm:$0xff]   ;;  %v3851_v43 = vld [vmem:[%s4570_s1 + $0x190] sm:$0xff]  }
  0x24   : > { %3462 = vmatprep.subr.bf16.mxu1 %v3796_v15  ;;  %v3850_v40 = vld [vmem:[%s4570_s1 + $0x1e0] sm:$0xff]   ;;  %v3854_v46 = vld [vmem:[%s4570_s1 + $0x1d0] sm:$0xff]  }
  0x25   : > { %v3877_v44 = vld [vmem:[%s4040_s11] sm:$0xfc]  }
  0x26   : > { %3443 = vmatpush3.bf16.msra.mxu0 %v3793_v14  ;;  %v3836_v14 = vld [vmem:[%s4570_s1 + $0x148] sm:$0xff]   ;;  %v3875_v28 = vld [vmem:[%s4570_s1 + $0x200] sm:$0xff]  }
  0x27   : > { %3444 = vmatprep.subr.bf16.mxu0 %v3795_v16  ;;  %3463 = vmatpush3.bf16.msra.mxu1 %v3796_v15  ;;  %v1258_v15 = vshll.u32 %v3861_v10, 16 }
  0x28   : > { %3464 = vmatprep.subr.bf16.mxu1 %v3799_v17 }
  0x2a   : > { %3445 = vmatpush3.bf16.msra.mxu0 %v3795_v16  ;;  %v3835_v16 = vld [vmem:[%s4570_s1 + $0x100] sm:$0xff]  }
  0x2b   : > { %3470 = vmatprep.subr.bf16.mxu0 %v3800_v19  ;;  %3465 = vmatpush3.bf16.msra.mxu1 %v3799_v17  ;;  %v1106_v17 = vshrl.u32 %v3857_v7, 16  ;;  %v1267_v7 = vshrl.u32 %v4172_v13, 16 }
  0x2c   : > { %3490 = vmatprep.subr.bf16.mxu1 %v3803_v20 }
  0x2d   : > { %3447 = vmatmul.mubr.bf16.vlgmr.msra.gmra.mxu0 %v3798_v18  ;;  %v1110_v18 = vrot.slane %v1108_v12, 1 }
  0x2e   : > { %3471 = vmatpush3.bf16.msra.mxu0 %v3800_v19  ;;  %3467 = vmatmul.mubr.bf16.vlgmr.msra.gmra.mxu1 %v3804_v21  ;;  %v1113_v19 = vshll.u32 %v4165_v9, 16  ;;  %v1256_v21 = vshrl.u32 %v3861_v10, 16  ;;  %v3864_v10 = vld [vmem:[%s4570_s1 + $0x278] sm:$0xff]  }
  0x2f   : > { %3472 = vmatprep.subr.bf16.mxu0 %v3802_v22  ;;  %3491 = vmatpush3.bf16.msra.mxu1 %v3803_v20  ;;  %v3839_v20 = vld [vmem:[%s4570_s1 + $0x140] sm:$0xff]  }
  0x30   : > { %3492 = vmatprep.subr.bf16.mxu1 %v3806_v23  ;;  %3486 = vmatprep.mubr.bf16.mxu0 %v544_v42  ;;  %v3852_v42 = vld [vmem:[%s4570_s1 + $0x1d8] sm:$0xff]  }
  0x31   : > { %3506 = vmatprep.mubr.bf16.mxu1 %v694_v48  ;;  %v3882_v48 = vld [vmem:[%s4040_s11 + $0x18] sm:$0x1f]  }
  0x32   : > { %3473 = vmatpush3.bf16.msra.mxu0 %v3802_v22  ;;  %v1260_v22 = vrot.slane %v1258_v15, 1 }
  0x33   : > { %3474 = vmatprep.subr.bf16.mxu0 %v3805_v26  ;;  %3493 = vmatpush3.bf16.msra.mxu1 %v3806_v23  ;;  %v1263_v23 = vshll.u32 %v4172_v13, 16  ;;  %v3863_v13 = vld [vmem:[%s4570_s1 + $0x230] sm:$0xff]  }
  0x34   : > { %3494 = vmatprep.subr.bf16.mxu1 %v3808_v27 }
  0x35   : > { %v4195_v32 = vrot.slane %v1263_v23, 1  ;;  %v3869_v23 = vld [vmem:[%s4570_s1 + $0x218] sm:$0xff]  }
  0x36   : > { %3475 = vmatpush3.bf16.msra.mxu0 %v3805_v26  ;;  %v1111_v26 = vor.u32 %v1110_v18, %v1106_v17  ;;  %v3866_v17 = vld [vmem:[%s4570_s1 + $0x270] sm:$0xff]  }
  0x37   : > { %3476 = vmatprep.subr.bf16.mxu0 %v3807_v31  ;;  %3495 = vmatpush3.bf16.msra.mxu1 %v3808_v27  ;;  %v4189_v27 = vrot.slane %v1113_v19, 1  ;;  %v1269_v15 = vor.u32 %v1267_v7, %v4195_v32  ;;  %v3865_v19 = vld [vmem:[%s4570_s1 + $0x228] sm:$0xff]  }
  0x38   : > { %3496 = vmatprep.subr.bf16.mxu1 %v3810_v37 }
  0x39   : > { %v1116_v34 = vsel %vm532_vm0, %v1111_v26, %v4189_v27  ;;  %v3874_v26 = vld [vmem:[%s4570_s1 + $0x250] sm:$0xff]  }
  0x3a   : > { %3477 = vmatpush3.bf16.msra.mxu0 %v3807_v31  ;;  %v1261_v31 = vor.u32 %v1260_v22, %v1256_v21  ;;  %v3867_v21 = vld [vmem:[%s4570_s1 + $0x220] sm:$0xff]  }
  0x3b   : > { %3478 = vmatprep.subr.bf16.mxu0 %v3809_v41  ;;  %3497 = vmatpush3.bf16.msra.mxu1 %v3810_v37  ;;  %v3845_v37 = vld [vmem:[%s4570_s1 + $0x1a8] sm:$0xff]   ;;  %v3870_v22 = vld [vmem:[%s4570_s1 + $0x260] sm:$0xff]  }
  0x3c   : > { %3498 = vmatprep.subr.bf16.mxu1 %v3812_v45  ;;  %v1266_v36 = vsel %vm532_vm0, %v1261_v31, %v4195_v32  ;;  %v3879_v31 = vld [vmem:[%s4570_s1 + $0x240] sm:$0xff]   ;;  %v4309_v32 = vld [vmem:[%s4040_s11 + $0x8] sm:$0x1f]  }
  0x3e   : > { %3479 = vmatpush3.bf16.msra.mxu0 %v3809_v41  ;;  %v3849_v41 = vld [vmem:[%s4570_s1 + $0x198] sm:$0xff]  }
  0x3f   : > { %3480 = vmatprep.subr.bf16.mxu0 %v3811_v47  ;;  %3499 = vmatpush3.bf16.msra.mxu1 %v3812_v45  ;;  %v3878_v45 = vld [vmem:[%s4040_s11 + $0x8] sm:$0x1f]  }
  0x40   : > { %3500 = vmatprep.subr.bf16.mxu1 %v3814_v49  ;;  %v1421_v53 = vshll.u32 %v3878_v45, 16 }
  0x42   : > { %3481 = vmatpush3.bf16.msra.mxu0 %v3811_v47  ;;  %v3881_v47 = vld [vmem:[%s4040_s11 + $0x10] sm:$0xfc]  }
  0x43   : > { %3482 = vmatprep.subr.bf16.mxu0 %v3813_v50  ;;  %3501 = vmatpush3.bf16.msra.mxu1 %v3814_v49  ;;  %v3853_v49 = vld [vmem:[%s4570_s1 + $0x188] sm:$0xff]   ;;  %v1568_v56 = vshll.u32 %v3881_v47, 16 }
  0x44   : > { %3502 = vmatprep.subr.bf16.mxu1 %v3816_v51 }
  0x46   : > { %3483 = vmatpush3.bf16.msra.mxu0 %v3813_v50  ;;  %v1410_v50 = vshrl.u32 %v3877_v44, 16 }
  0x47   : > { %3484 = vmatprep.subr.bf16.mxu0 %v3815_v52  ;;  %3503 = vmatpush3.bf16.msra.mxu1 %v3816_v51  ;;  %v1413_v51 = vshll.u32 %v3877_v44, 16 }
  0x48   : > { %3504 = vmatprep.subr.bf16.mxu1 %v3819_v54 }
  0x4a   : > { %3485 = vmatpush3.bf16.msra.mxu0 %v3815_v52  ;;  %v1418_v52 = vshrl.u32 %v3878_v45, 16  ;;  %v3885_v45 = vld [vmem:[%s4570_s1 + $0x2a8] sm:$0xff]  }
  0x4b   : > { %3510 = vmatprep.subr.bf16.mxu0 %v3820_v55  ;;  %3505 = vmatpush3.bf16.msra.mxu1 %v3819_v54  ;;  %v3856_v54 = vld [vmem:[%s4570_s1 + $0x1c8] sm:$0xff]  }
  0x4c   : > { %3530 = vmatprep.subr.bf16.mxu1 %v3824_v58 }
  0x4d   : > { %3487 = vmatmul.mubr.bf16.vlgmr.msra.gmra.mxu0 %v547_v57  ;;  %v1573_v57 = vshrl.u32 %v3882_v48, 16 }
  0x4e   : > { %3511 = vmatpush3.bf16.msra.mxu0 %v3820_v55  ;;  %3526 = vmatprep.mubr.bf16.mxu0 %v3837_v59  ;;  %v1565_v55 = vshrl.u32 %v3881_v47, 16  ;;  %v3855_v59 = vld [vmem:[%s4570_s1 + $0x180] sm:$0xff]  }
  0x4f   : > { %3512 = vmatprep.subr.bf16.mxu0 %v3823_v60  ;;  %3507 = vmatmul.mubr.bf16.vlgmr.msra.gmra.mxu1 %v697_v61  ;;  %v1412_v61 = vrot.slane %v1410_v50, 2  ;;  %v3887_v47 = vld [vmem:[%s4570_s1 + $0x2a0] sm:$0xff]   ;;  %v3892_v50 = vld [vmem:[%s4570_s1 + $0x2d8] sm:$0xff]  }
  0x50   : > { %3531 = vmatpush3.bf16.msra.mxu1 %v3824_v58  ;;  %3546 = vmatprep.mubr.bf16.mxu1 %v3841_v62  ;;  %v1576_v58 = vshll.u32 %v3882_v48, 16  ;;  %v1415_v62 = vrot.slane %v1413_v51, 3  ;;  %v3890_v48 = vld [vmem:[%s4570_s1 + $0x2e0] sm:$0xff]   ;;  %v3891_v51 = vld [vmem:[%s4570_s1 + $0x290] sm:$0xff]  }
  0x51   : > { %3532 = vmatprep.subr.bf16.mxu1 %v3826_v63 }
  0x52   : > { %3513 = vmatpush3.bf16.msra.mxu0 %v3823_v60  ;;  %v1117_v60 = vshrl.u32 %v4165_v9, 16 }
  0x53   : > { %3514 = vmatprep.subr.bf16.mxu0 %v3825_v0 }
  0x54   : > { %3533 = vmatpush3.bf16.msra.mxu1 %v3826_v63  ;;  %v3859_v63 = vld [vmem:[%s4570_s1 + $0x1c0] sm:$0xff]  }
  0x55   : > { %3534 = vmatprep.subr.bf16.mxu1 %v3828_v1 }
  0x56   : > { %3515 = vmatpush3.bf16.msra.mxu0 %v3825_v0  ;;  %v1420_v0 = vrot.slane %v1418_v52, 2  ;;  %v3917_v52 = vld [vmem:[%s4040_s11 + $0x20] sm:$0xfc]  }
  0x57   : > { %3516 = vmatprep.subr.bf16.mxu0 %v3827_v2 }
  0x58   : > { %3535 = vmatpush3.bf16.msra.mxu1 %v3828_v1  ;;  %v1423_v1 = vrot.slane %v1421_v53, 3  ;;  %v3918_v53 = vld [vmem:[%s4040_s11 + $0x28] sm:$0x1f]  }
  0x59   : > { %3536 = vmatprep.subr.bf16.mxu1 %v3830_v3 }
  0x5a   : > { %3517 = vmatpush3.bf16.msra.mxu0 %v3827_v2  ;;  %v1567_v2 = vrot.slane %v1565_v55, 2  ;;  %v4252_v9 = vor.u32 %v1423_v1, %v1420_v0  ;;  %v3921_v55 = vld [vmem:[%s4040_s11 + $0x30] sm:$0xfc]  }
  0x5b   : > { %3518 = vmatprep.subr.bf16.mxu0 %v3829_v4  ;;  %v2161_v0 = vshll.u32 %v3921_v55, 16 }
  0x5c   : > { %3537 = vmatpush3.bf16.msra.mxu1 %v3830_v3  ;;  %v1570_v3 = vrot.slane %v1568_v56, 3  ;;  %v3922_v56 = vld [vmem:[%s4040_s11 + $0x38] sm:$0x1f]  }
  0x5d   : > { %3538 = vmatprep.subr.bf16.mxu1 %v3832_v5  ;;  %v2166_v1 = vshrl.u32 %v3922_v56, 16 }
  0x5e   : > { %3519 = vmatpush3.bf16.msra.mxu0 %v3829_v4  ;;  %v1575_v4 = vrot.slane %v1573_v57, 2  ;;  %v1571_v12 = vor.u32 %v1570_v3, %v1567_v2  ;;  %v3893_v57 = vld [vmem:[%s4570_s1 + $0x288] sm:$0xff]   ;;  %v2169_v2 = vshll.u32 %v3922_v56, 16  ;;  %v3895_v3 = vld [vmem:[%s4570_s1 + $0x280] sm:$0xff]  }
  0x5f   : > { %3520 = vmatprep.subr.bf16.mxu0 %v3831_v6 }
  0x60   : > { %3539 = vmatpush3.bf16.msra.mxu1 %v3832_v5  ;;  %v1578_v5 = vrot.slane %v1576_v58, 3  ;;  %v2003_v58 = vshrl.u32 %v3917_v52, 16 }
  0x61   : > { %3540 = vmatprep.subr.bf16.mxu1 %v3834_v8 }
  0x62   : > { %3521 = vmatpush3.bf16.msra.mxu0 %v3831_v6  ;;  %v3860_v6 = vld [vmem:[%s4570_s1 + $0x238] sm:$0xff]  }
  0x63   : > { %3522 = vmatprep.subr.bf16.mxu0 %v3833_v11 }
  0x64   : > { %3541 = vmatpush3.bf16.msra.mxu1 %v3834_v8  ;;  %v1416_v8 = vor.u32 %v1415_v62, %v1412_v61  ;;  %v2014_v61 = vshll.u32 %v3918_v53, 16  ;;  %v3896_v62 = vld [vmem:[%s4570_s1 + $0x2c8] sm:$0xff]  }
  0x65   : > { %3542 = vmatprep.subr.bf16.mxu1 %v3836_v14 }
  0x66   : > { %3523 = vmatpush3.bf16.msra.mxu0 %v3833_v11  ;;  %v1119_v11 = vor.u32 %v1117_v60, %v4189_v27  ;;  %v3873_v27 = vld [vmem:[%s4570_s1 + $0x208] sm:$0xff]   ;;  %v2011_v60 = vshrl.u32 %v3918_v53, 16  ;;  %v2016_v7 = vrot.slane %v2014_v61, 3  ;;  %v3927_v61 = vld [vmem:[%s4570_s1 + $0x3a0] sm:$0xff]  }
  0x67   : > { %3524 = vmatprep.subr.bf16.mxu0 %v3835_v16 }
  0x68   : > { %3543 = vmatpush3.bf16.msra.mxu1 %v3836_v14  ;;  %v4258_v14 = vor.u32 %v1578_v5, %v1575_v4  ;;  %v2005_v4 = vrot.slane %v2003_v58, 2 }
  0x69   : > { %3544 = vmatprep.subr.bf16.mxu1 %v3839_v20 }
  0x6a   : > { %3525 = vmatpush3.bf16.msra.mxu0 %v3835_v16  ;;  %v1425_v16 = vsel %vm1408_vm1, %v1416_v8, %v4252_v9  ;;  %v1580_v18 = vsel %vm1408_vm1, %v1571_v12, %v4258_v14  ;;  %v3899_v8 = vld [vmem:[%s4570_s1 + $0x2c0] sm:$0xff]   ;;  %v2171_v12 = vrot.slane %v2169_v2, 3  ;;  %v3929_v2 = vld [vmem:[%s4570_s1 + $0x398] sm:$0xff]  }
  0x6b   : > { %3550 = vmatprep.subr.bf16.mxu0 %v3840_v25 }
  0x6c   : > { %3545 = vmatpush3.bf16.msra.mxu1 %v3839_v20  ;;  %v3868_v20 = vld [vmem:[%s4570_s1 + $0x268] sm:$0xff]  }
  0x6d   : > { %3527 = vmatmul.mubr.bf16.vlgmr.msra.gmra.mxu0 %v3838_v24  ;;  %3570 = vmatprep.subr.bf16.mxu1 %v3843_v29  ;;  %v3872_v24 = vld [vmem:[%s4570_s1 + $0x258] sm:$0xff]  }
  0x6e   : > { %3551 = vmatpush3.bf16.msra.mxu0 %v3840_v25  ;;  %3566 = vmatprep.mubr.bf16.mxu0 %v1116_v34  ;;  %v3871_v25 = vld [vmem:[%s4570_s1 + $0x210] sm:$0xff]   ;;  %v4313_v34 = vld [vmem:[%s4040_s11 + $0x18] sm:$0x1f]  }
  0x6f   : > { %3552 = vmatprep.subr.bf16.mxu0 %v3842_v33  ;;  %3547 = vmatmul.mubr.bf16.vlgmr.msra.gmra.mxu1 %v3844_v30  ;;  %v3897_v30 = vld [vmem:[%s4040_s11] sm:$0xf8]  }
  0x70   : > { %3571 = vmatpush3.bf16.msra.mxu1 %v3843_v29  ;;  %3586 = vmatprep.mubr.bf16.mxu1 %v1266_v36  ;;  %v3876_v29 = vld [vmem:[%s4570_s1 + $0x248] sm:$0xff]   ;;  %v1720_v36 = vrot.slane %v3897_v30, 3  ;;  %v3914_v30 = vld [vmem:[%s4570_s1 + $0x350] sm:$0xff]  }
  0x71   : > { %3572 = vmatprep.subr.bf16.mxu1 %v3846_v35 }
  0x72   : > { %3553 = vmatpush3.bf16.msra.mxu0 %v3842_v33  ;;  %v3901_v33 = vld [vmem:[%s4040_s11 + $0x10] sm:$0xf8]  }
  0x73   : > { %3554 = vmatprep.subr.bf16.mxu0 %v3845_v37 }
  0x74   : > { %3573 = vmatpush3.bf16.msra.mxu1 %v3846_v35  ;;  %v3880_v35 = vld [vmem:[%s4570_s1 + $0x2b8] sm:$0xff]  }
  0x75   : > { %3574 = vmatprep.subr.bf16.mxu1 %v3848_v38 }
  0x76   : > { %3555 = vmatpush3.bf16.msra.mxu0 %v3845_v37  ;;  %v1721_v37 = vrot.slane %v4309_v32, 3  ;;  %v3916_v32 = vld [vmem:[%s4570_s1 + $0x348] sm:$0xff]  }
  0x77   : > { %3556 = vmatprep.subr.bf16.mxu0 %v3847_v39 }
  0x78   : > { %3575 = vmatpush3.bf16.msra.mxu1 %v3848_v38  ;;  %v3884_v38 = vld [vmem:[%s4570_s1 + $0x2f8] sm:$0xff]  }
  0x79   : > { %3576 = vmatprep.subr.bf16.mxu1 %v3850_v40 }
  0x7a   : > { %3557 = vmatpush3.bf16.msra.mxu0 %v3847_v39  ;;  %v1861_v39 = vrot.slane %v3901_v33, 3  ;;  %v3915_v33 = vld [vmem:[%s4570_s1 + $0x300] sm:$0xff]  }
  0x7b   : > { %3558 = vmatprep.subr.bf16.mxu0 %v3849_v41 }
  0x7c   : > { %3577 = vmatpush3.bf16.msra.mxu1 %v3850_v40  ;;  %v1862_v40 = vrot.slane %v4313_v34, 3  ;;  %v3937_v34 = vld [vmem:[%s4040_s11 + $0x20] sm:$0xf8]  }
  0x7d   : > { %3578 = vmatprep.subr.bf16.mxu1 %v3852_v42 }
  0x7e   : > { %3559 = vmatpush3.bf16.msra.mxu0 %v3849_v41  ;;  %v3883_v41 = vld [vmem:[%s4570_s1 + $0x2b0] sm:$0xff]   ;;  %v1863_v44 = vsel %vm1719_vm2, %v1861_v39, %v1862_v40  ;;  %v3920_v39 = vld [vmem:[%s4570_s1 + $0x3b8] sm:$0xff]  }
  0x7f   : > { %3560 = vmatprep.subr.bf16.mxu0 %v3851_v43 }
  0x80   : > { %3579 = vmatpush3.bf16.msra.mxu1 %v3852_v42  ;;  %v1722_v42 = vsel %vm1719_vm2, %v1720_v36, %v1721_v37  ;;  %v3919_v36 = vld [vmem:[%s4570_s1 + $0x340] sm:$0xff]  }
  0x81   : > { %3580 = vmatprep.subr.bf16.mxu1 %v3854_v46 }
  0x82   : > { %3561 = vmatpush3.bf16.msra.mxu0 %v3851_v43  ;;  %v3886_v43 = vld [vmem:[%s4570_s1 + $0x2f0] sm:$0xff]  }
  0x83   : > { %3562 = vmatprep.subr.bf16.mxu0 %v3853_v49 }
  0x84   : > { %3581 = vmatpush3.bf16.msra.mxu1 %v3854_v46  ;;  %v3888_v46 = vld [vmem:[%s4570_s1 + $0x2e8] sm:$0xff]  }
  0x85   : > { %3582 = vmatprep.subr.bf16.mxu1 %v3856_v54 }
  0x86   : > { %3563 = vmatpush3.bf16.msra.mxu0 %v3853_v49  ;;  %v3889_v49 = vld [vmem:[%s4570_s1 + $0x298] sm:$0xff]  }
  0x87   : > { %3564 = vmatprep.subr.bf16.mxu0 %v3855_v59 }
  0x88   : > { %3583 = vmatpush3.bf16.msra.mxu1 %v3856_v54  ;;  %v3894_v54 = vld [vmem:[%s4570_s1 + $0x2d0] sm:$0xff]  }
  0x89   : > { %3584 = vmatprep.subr.bf16.mxu1 %v3859_v63 }
  0x8a   : > { %3565 = vmatpush3.bf16.msra.mxu0 %v3855_v59  ;;  %v2006_v59 = vshll.u32 %v3917_v52, 16 }
  0x8b   : > { %3590 = vmatprep.subr.bf16.mxu0 %v3860_v6 }
  0x8c   : > { %3585 = vmatpush3.bf16.msra.mxu1 %v3859_v63  ;;  %v2158_v63 = vshrl.u32 %v3921_v55, 16  ;;  %v2008_v5 = vrot.slane %v2006_v59, 3 }
  0x8d   : > { %3567 = vmatmul.mubr.bf16.vlgmr.msra.gmra.mxu0 %v1119_v11  ;;  %3610 = vmatprep.subr.bf16.mxu1 %v3864_v10  ;;  %v2168_v11 = vrot.slane %v2166_v1, 2 }
  0x8e   : > { %3591 = vmatpush3.bf16.msra.mxu0 %v3860_v6  ;;  %3606 = vmatprep.mubr.bf16.mxu0 %v1425_v16  ;;  %v2013_v6 = vrot.slane %v2011_v60, 2  ;;  %v3904_v16 = vld [vmem:[%s4570_s1 + $0x378] sm:$0xff]  }
  0x8f   : > { %3592 = vmatprep.subr.bf16.mxu0 %v3863_v13  ;;  %3587 = vmatmul.mubr.bf16.vlgmr.msra.gmra.mxu1 %v1269_v15 }
  0x90   : > { %3611 = vmatpush3.bf16.msra.mxu1 %v3864_v10  ;;  %3626 = vmatprep.mubr.bf16.mxu1 %v1580_v18  ;;  %v2163_v10 = vrot.slane %v2161_v0, 3  ;;  %v4380_v15 = vor.u32 %v2016_v7, %v2013_v6  ;;  %v4385_v18 = vor.u32 %v2171_v12, %v2168_v11  ;;  %v3934_v6 = vld [vmem:[%s4570_s1 + $0x3d0] sm:$0xff]   ;;  %v3933_v7 = vld [vmem:[%s4570_s1 + $0x388] sm:$0xff]  }
  0x91   : > { %3612 = vmatprep.subr.bf16.mxu1 %v3866_v17 }
  0x92   : > { %3593 = vmatpush3.bf16.msra.mxu0 %v3863_v13  ;;  %v2009_v13 = vor.u32 %v2008_v5, %v2005_v4  ;;  %v3932_v4 = vld [vmem:[%s4570_s1 + $0x3d8] sm:$0xff]   ;;  %v3931_v5 = vld [vmem:[%s4570_s1 + $0x390] sm:$0xff]  }
  0x93   : > { %3594 = vmatprep.subr.bf16.mxu0 %v3865_v19 }
  0x94   : > { %3613 = vmatpush3.bf16.msra.mxu1 %v3866_v17 }
  0x95   : > { %3614 = vmatprep.subr.bf16.mxu1 %v3868_v20 }
  0x96   : > { %3595 = vmatpush3.bf16.msra.mxu0 %v3865_v19  ;;  %v3903_v19 = vld [vmem:[%s4570_s1 + $0x330] sm:$0xff]  }
  0x97   : > { %3596 = vmatprep.subr.bf16.mxu0 %v3867_v21 }
  0x98   : > { %3615 = vmatpush3.bf16.msra.mxu1 %v3868_v20  ;;  %v2018_v20 = vsel %vm1408_vm1, %v2009_v13, %v4380_v15 }
  0x99   : > { %3616 = vmatprep.subr.bf16.mxu1 %v3870_v22 }
  0x9a   : > { %3597 = vmatpush3.bf16.msra.mxu0 %v3867_v21  ;;  %v3906_v21 = vld [vmem:[%s4570_s1 + $0x370] sm:$0xff]  }
  0x9b   : > { %3598 = vmatprep.subr.bf16.mxu0 %v3869_v23 }
  0x9c   : > { %3617 = vmatpush3.bf16.msra.mxu1 %v3870_v22 }
  0x9d   : > { %3618 = vmatprep.subr.bf16.mxu1 %v3872_v24 }
  0x9e   : > { %3599 = vmatpush3.bf16.msra.mxu0 %v3869_v23  ;;  %v3905_v23 = vld [vmem:[%s4570_s1 + $0x328] sm:$0xff]  }
  0x9f   : > { %3600 = vmatprep.subr.bf16.mxu0 %v3871_v25 }
  0xa0   : > { %3619 = vmatpush3.bf16.msra.mxu1 %v3872_v24  ;;  %v3908_v24 = vld [vmem:[%s4570_s1 + $0x368] sm:$0xff]  }
  0xa1   : > { %3620 = vmatprep.subr.bf16.mxu1 %v3874_v26 }
  0xa2   : > { %3601 = vmatpush3.bf16.msra.mxu0 %v3871_v25  ;;  %v3907_v25 = vld [vmem:[%s4570_s1 + $0x320] sm:$0xff]  }
  0xa3   : > { %3602 = vmatprep.subr.bf16.mxu0 %v3873_v27 }
  0xa4   : > { %3621 = vmatpush3.bf16.msra.mxu1 %v3874_v26  ;;  %v3910_v26 = vld [vmem:[%s4570_s1 + $0x360] sm:$0xff]  }
  0xa5   : > { %3622 = vmatprep.subr.bf16.mxu1 %v3876_v29 }
  0xa6   : > { %3603 = vmatpush3.bf16.msra.mxu0 %v3873_v27  ;;  %v3909_v27 = vld [vmem:[%s4570_s1 + $0x318] sm:$0xff]  }
  0xa7   : > { %3604 = vmatprep.subr.bf16.mxu0 %v3875_v28 }
  0xa8   : > { %3623 = vmatpush3.bf16.msra.mxu1 %v3876_v29  ;;  %v3911_v29 = vld [vmem:[%s4570_s1 + $0x310] sm:$0xff]  }
  0xa9   : > { %3624 = vmatprep.subr.bf16.mxu1 %v3879_v31 }
  0xaa   : > { %3605 = vmatpush3.bf16.msra.mxu0 %v3875_v28  ;;  %v3912_v28 = vld [vmem:[%s4570_s1 + $0x358] sm:$0xff]  }
  0xab   : > { %3630 = vmatprep.subr.bf16.mxu0 %v3880_v35 }
  0xac   : > { %3625 = vmatpush3.bf16.msra.mxu1 %v3879_v31  ;;  %v3913_v31 = vld [vmem:[%s4570_s1 + $0x308] sm:$0xff]  }
  0xad   : > { %3607 = vmatmul.mubr.bf16.vlgmr.msra.gmra.mxu0 %v4252_v9  ;;  %3650 = vmatprep.subr.bf16.mxu1 %v3884_v38  ;;  %v2160_v9 = vrot.slane %v2158_v63, 2  ;;  %v3930_v63 = vld [vmem:[%s4570_s1 + $0x3e0] sm:$0xff]  }
  0xae   : > { %3631 = vmatpush3.bf16.msra.mxu0 %v3880_v35  ;;  %3646 = vmatprep.mubr.bf16.mxu0 %v1722_v42  ;;  %v4436_v35 = vld [vmem:[%s4040_s11 + $0x28] sm:$0x1f]   ;;  %v3924_v42 = vld [vmem:[%s4570_s1 + $0x3f8] sm:$0xff]  }
  0xaf   : > { %3632 = vmatprep.subr.bf16.mxu0 %v3883_v41  ;;  %3627 = vmatmul.mubr.bf16.vlgmr.msra.gmra.mxu1 %v4258_v14  ;;  %v3900_v14 = vld [vmem:[%s4570_s1 + $0x338] sm:$0xff]   ;;  %v2164_v17 = vor.u32 %v2163_v10, %v2160_v9  ;;  %v3935_v9 = vld [vmem:[%s4570_s1 + $0x380] sm:$0xff]  }
  0xb0   : > { %3651 = vmatpush3.bf16.msra.mxu1 %v3884_v38  ;;  %3666 = vmatprep.mubr.bf16.mxu1 %v1863_v44  ;;  %v4443_v38 = vld [vmem:[%s4040_s11 + $0x38] sm:$0x1f]   ;;  %v3939_v10 = vld [vmem:[%s4570_s1 + $0x3c0] sm:$0xff]  }
  0xb1   : > { %3652 = vmatprep.subr.bf16.mxu1 %v3886_v43  ;;  %v2173_v22 = vsel %vm1408_vm1, %v2164_v17, %v4385_v18  ;;  %v2454_v44 = vrot.slane %v4443_v38, 3 }
  0xb2   : > { %3633 = vmatpush3.bf16.msra.mxu0 %v3883_v41  ;;  %v2313_v41 = vrot.slane %v4436_v35, 3 }
  0xb3   : > { %3634 = vmatprep.subr.bf16.mxu0 %v3885_v45 }
  0xb4   : > { %3653 = vmatpush3.bf16.msra.mxu1 %v3886_v43 }
  0xb5   : > { %3654 = vmatprep.subr.bf16.mxu1 %v3888_v46 }
  0xb6   : > { %3635 = vmatpush3.bf16.msra.mxu0 %v3885_v45  ;;  %v236_v45 = vld [vmem:[#allocation2 + $0x8] sm:$0xf] }
  0xb7   : > { %3636 = vmatprep.subr.bf16.mxu0 %v3887_v47 }
  0xb8   : > { %3655 = vmatpush3.bf16.msra.mxu1 %v3888_v46  ;;  %v3923_v46 = vld [vmem:[%s4570_s1 + $0x3b0] sm:$0xff]  }
  0xb9   : > { %3656 = vmatprep.subr.bf16.mxu1 %v3890_v48 }
  0xba   : > { %3637 = vmatpush3.bf16.msra.mxu0 %v3887_v47 }
  0xbb   : > { %3638 = vmatprep.subr.bf16.mxu0 %v3889_v49 }
  0xbc   : > { %3657 = vmatpush3.bf16.msra.mxu1 %v3890_v48 }
  0xbd   : > { %3658 = vmatprep.subr.bf16.mxu1 %v3892_v50 }
  0xbe   : > { %3639 = vmatpush3.bf16.msra.mxu0 %v3889_v49  ;;  %v3926_v49 = vld [vmem:[%s4570_s1 + $0x3f0] sm:$0xff]  }
  0xbf   : > { %3640 = vmatprep.subr.bf16.mxu0 %v3891_v51 }
  0xc0   : > { %3659 = vmatpush3.bf16.msra.mxu1 %v3892_v50 }
  0xc1   : > { %3660 = vmatprep.subr.bf16.mxu1 %v3894_v54 }
  0xc2   : > { %3641 = vmatpush3.bf16.msra.mxu0 %v3891_v51 }
  0xc3   : > { %3642 = vmatprep.subr.bf16.mxu0 %v3893_v57 }
  0xc4   : > { %3661 = vmatpush3.bf16.msra.mxu1 %v3894_v54  ;;  %v3925_v54 = vld [vmem:[%s4570_s1 + $0x3a8] sm:$0xff]  }
  0xc5   : > { %3662 = vmatprep.subr.bf16.mxu1 %v3896_v62 }
  0xc6   : > { %3643 = vmatpush3.bf16.msra.mxu0 %v3893_v57  ;;  %v3928_v57 = vld [vmem:[%s4570_s1 + $0x3e8] sm:$0xff]  }
  0xc7   : > { %3644 = vmatprep.subr.bf16.mxu0 %v3895_v3 }
  0xc8   : > { %3663 = vmatpush3.bf16.msra.mxu1 %v3896_v62 }
  0xc9   : > { %3664 = vmatprep.subr.bf16.mxu1 %v3899_v8 }
  0xca   : > { %3645 = vmatpush3.bf16.msra.mxu0 %v3895_v3 }
  0xcb   : > { %3670 = vmatprep.subr.bf16.mxu0 %v3900_v14 }
  0xcc   : > { %3665 = vmatpush3.bf16.msra.mxu1 %v3899_v8  ;;  %v3936_v8 = vld [vmem:[%s4570_s1 + $0x3c8] sm:$0xff]  }
  0xcd   : > { %3647 = vmatmul.mubr.bf16.vlgmr.msra.gmra.mxu0 %v1721_v37  ;;  %3690 = vmatprep.subr.bf16.mxu1 %v3904_v16  ;;  %v3940_v37 = vld [vmem:[%s4040_s11 + $0x30] sm:$0xf8]  }
  0xce   : > { %3671 = vmatpush3.bf16.msra.mxu0 %v3900_v14  ;;  %3686 = vmatprep.mubr.bf16.mxu0 %v2018_v20  ;;  %v2453_v43 = vrot.slane %v3940_v37, 3 }
  0xcf   : > { %3672 = vmatprep.subr.bf16.mxu0 %v3903_v19  ;;  %3667 = vmatmul.mubr.bf16.vlgmr.msra.gmra.mxu1 %v1862_v40  ;;  %v2312_v40 = vrot.slane %v3937_v34, 3 }
  0xd0   : > { %3691 = vmatpush3.bf16.msra.mxu1 %v3904_v16  ;;  %3706 = vmatprep.mubr.bf16.mxu1 %v2173_v22  ;;  %v2455_v50 = vsel %vm1719_vm2, %v2453_v43, %v2454_v44 }
  0xd1   : > { %3692 = vmatprep.subr.bf16.mxu1 %v3906_v21  ;;  %v2314_v47 = vsel %vm1719_vm2, %v2312_v40, %v2313_v41 }
  0xd2   : > { %3673 = vmatpush3.bf16.msra.mxu0 %v3903_v19 }
  0xd3   : > { %3674 = vmatprep.subr.bf16.mxu0 %v3905_v23 }
  0xd4   : > { %3693 = vmatpush3.bf16.msra.mxu1 %v3906_v21 }
  0xd5   : > { %3694 = vmatprep.subr.bf16.mxu1 %v3908_v24 }
  0xd6   : > { %3675 = vmatpush3.bf16.msra.mxu0 %v3905_v23 }
  0xd7   : > { %3676 = vmatprep.subr.bf16.mxu0 %v3907_v25 }
  0xd8   : > { %3695 = vmatpush3.bf16.msra.mxu1 %v3908_v24 }
  0xd9   : > { %3696 = vmatprep.subr.bf16.mxu1 %v3910_v26 }
  0xda   : > { %3677 = vmatpush3.bf16.msra.mxu0 %v3907_v25 }
  0xdb   : > { %3678 = vmatprep.subr.bf16.mxu0 %v3909_v27 }
  0xdc   : > { %3697 = vmatpush3.bf16.msra.mxu1 %v3910_v26 }
  0xdd   : > { %3698 = vmatprep.subr.bf16.mxu1 %v3912_v28 }
  0xde   : > { %3679 = vmatpush3.bf16.msra.mxu0 %v3909_v27 }
  0xdf   : > { %3680 = vmatprep.subr.bf16.mxu0 %v3911_v29 }
  0xe0   : > { %3699 = vmatpush3.bf16.msra.mxu1 %v3912_v28 }
  0xe1   : > { %3700 = vmatprep.subr.bf16.mxu1 %v3914_v30 }
  0xe2   : > { %3681 = vmatpush3.bf16.msra.mxu0 %v3911_v29 }
  0xe3   : > { %3682 = vmatprep.subr.bf16.mxu0 %v3913_v31 }
  0xe4   : > { %3701 = vmatpush3.bf16.msra.mxu1 %v3914_v30 }
  0xe5   : > { %3702 = vmatprep.subr.bf16.mxu1 %v3916_v32 }
  0xe6   : > { %3683 = vmatpush3.bf16.msra.mxu0 %v3913_v31 }
  0xe7   : > { %3684 = vmatprep.subr.bf16.mxu0 %v3915_v33 }
  0xe8   : > { %3703 = vmatpush3.bf16.msra.mxu1 %v3916_v32 }
  0xe9   : > { %3704 = vmatprep.subr.bf16.mxu1 %v3919_v36 }
  0xea   : > { %3685 = vmatpush3.bf16.msra.mxu0 %v3915_v33 }
  0xeb   : > { %3710 = vmatprep.subr.bf16.mxu0 %v3920_v39 }
  0xec   : > { %3705 = vmatpush3.bf16.msra.mxu1 %v3919_v36 }
  0xed   : > { %v3448_v48 = vpop.f32.mrf.mxu0  ;;  %3687 = vmatmul.mubr.bf16.vlgmr.msra.gmra.mxu0 %v4380_v15  ;;  %3730 = vmatprep.subr.bf16.mxu1 %v3924_v42 }
  0xee   : > { %v361_v51 = vadd.f32 %v3448_v48, %v236_v45  ;;  %3711 = vmatpush3.bf16.msra.mxu0 %v3920_v39  ;;  %3726 = vmatprep.mubr.bf16.mxu0 %v2314_v47  ;;  %v3468_v53 = vpop.f32.mrf.mxu1 }
  0xef   : > { %v345_v52 = vpop.f32.mrf.mxu0  ;;  %3712 = vmatprep.subr.bf16.mxu0 %v3923_v46  ;;  %3707 = vmatmul.mubr.bf16.vlgmr.msra.gmra.mxu1 %v4385_v18 }
  0xf0   : > { %364 = vst [vmem:[#allocation2 + $0x8] sm:$0xf] %v361_v51  ;;  %3731 = vmatpush3.bf16.msra.mxu1 %v3924_v42  ;;  %3746 = vmatprep.mubr.bf16.mxu1 %v2455_v50  ;;  %v481_v56 = vpop.f32.mrf.mxu1 }
  0xf1   : > { %v3449_v55 = vpop.f32.mrf.mxu0  ;;  %3732 = vmatprep.subr.bf16.mxu1 %v3926_v49  ;;  %v495_v58 = vadd.f32 %v481_v56, %v345_v52 }
  0xf2   : > { %3713 = vmatpush3.bf16.msra.mxu0 %v3923_v46  ;;  %v3469_v60 = vpop.f32.mrf.mxu1 }
  0xf3   : > { %v348_v59 = vpop.f32.mrf.mxu0  ;;  %3714 = vmatprep.subr.bf16.mxu0 %v3925_v54 }
  0xf4   : > { %3733 = vmatpush3.bf16.msra.mxu1 %v3926_v49  ;;  %v484_v62 = vpop.f32.mrf.mxu1 }
  0xf5   : > { %3734 = vmatprep.subr.bf16.mxu1 %v3928_v57  ;;  %v496_v0 = vadd.f32 %v484_v62, %v348_v59 }
  0xf6   : > { %3715 = vmatpush3.bf16.msra.mxu0 %v3925_v54 }
  0xf7   : > { %v371_v1 = vld [vmem:[#allocation2 + $0x8] sm:$0xf]  ;;  %3716 = vmatprep.subr.bf16.mxu0 %v3927_v61 }
  0xf8   : > { %v497_v3 = vadd.f32 %v3468_v53, %v371_v1  ;;  %3735 = vmatpush3.bf16.msra.mxu1 %v3928_v57 }
  0xf9   : > { %3736 = vmatprep.subr.bf16.mxu1 %v3930_v63 }
  0xfa   : > { %500 = vst [vmem:[#allocation2 + $0x8] sm:$0xf] %v497_v3  ;;  %3717 = vmatpush3.bf16.msra.mxu0 %v3927_v61 }
  0xfb   : > { %3718 = vmatprep.subr.bf16.mxu0 %v3929_v2 }
  0xfc   : > { %3737 = vmatpush3.bf16.msra.mxu1 %v3930_v63 }
  0xfd   : > { %3738 = vmatprep.subr.bf16.mxu1 %v3932_v4 }
  0xfe   : > { %3719 = vmatpush3.bf16.msra.mxu0 %v3929_v2 }
  0xff   : > { %3720 = vmatprep.subr.bf16.mxu0 %v3931_v5 }
 0x100   : > { %3739 = vmatpush3.bf16.msra.mxu1 %v3932_v4 }
 0x101   : > { %3740 = vmatprep.subr.bf16.mxu1 %v3934_v6  ;;  %v506_v11 = vld [vmem:[#allocation2 + $0x8] sm:$0xf] }
 0x102   : > { %3721 = vmatpush3.bf16.msra.mxu0 %v3931_v5 }
 0x103   : > { %3722 = vmatprep.subr.bf16.mxu0 %v3933_v7 }
 0x104   : > { %3741 = vmatpush3.bf16.msra.mxu1 %v3934_v6 }
 0x105   : > { %3742 = vmatprep.subr.bf16.mxu1 %v3936_v8 }
 0x106   : > { %3723 = vmatpush3.bf16.msra.mxu0 %v3933_v7 }
 0x107   : > { %3724 = vmatprep.subr.bf16.mxu0 %v3935_v9 }
 0x108   : > { %3743 = vmatpush3.bf16.msra.mxu1 %v3936_v8 }
 0x109   : > { %3744 = vmatprep.subr.bf16.mxu1 %v3939_v10 }
 0x10a   : > { %3725 = vmatpush3.bf16.msra.mxu0 %v3935_v9 }
 0x10c   : > { %3745 = vmatpush3.bf16.msra.mxu1 %v3939_v10 }
 0x10d   : > { %v3488_v12 = vpop.f32.mrf.mxu0  ;;  %3727 = vmatmul.mubr.bf16.vlgmr.msra.gmra.mxu0 %v2313_v41 }
 0x10e   : > { %v648_v14 = vadd.f32 %v3488_v12, %v506_v11 }
 0x10f   : > { %v632_v13 = vpop.f32.mrf.mxu0  ;;  %3747 = vmatmul.mubr.bf16.vlgmr.msra.gmra.mxu1 %v2454_v44  ;;  %v3508_v15 = vpop.f32.mrf.mxu1 }
 0x110   : > { %651 = vst [vmem:[#allocation2 + $0x8] sm:$0xf] %v648_v14  ;;  %v646_v16 = vadd.f32 %v632_v13, %v495_v58 }
 0x111   : > { %v3489_v17 = vpop.f32.mrf.mxu0  ;;  %v782_v18 = vpop.f32.mrf.mxu1 }
 0x112   : > { %v796_v19 = vadd.f32 %v782_v18, %v646_v16 }
 0x113   : > { %v635_v20 = vpop.f32.mrf.mxu0  ;;  %v3509_v21 = vpop.f32.mrf.mxu1 }
 0x114   : > { %v647_v22 = vadd.f32 %v635_v20, %v496_v0 }
 0x115   : > { %v785_v23 = vpop.f32.mrf.mxu1 }
 0x116   : > { %v797_v24 = vadd.f32 %v785_v23, %v647_v22 }
 0x117   : > { %v657_v25 = vld [vmem:[#allocation2 + $0x8] sm:$0xf] }
 0x118   : > { %v798_v26 = vadd.f32 %v3508_v15, %v657_v25 }
 0x11a   : > { %801 = vst [vmem:[#allocation2 + $0x8] sm:$0xf] %v798_v26  ;;  %v2573_v26 = vlaneseq }
 0x121   : > { %v808_v27 = vld [vmem:[#allocation2 + $0x8] sm:$0xf] }
 0x12d   : > { %v3528_v28 = vpop.f32.mrf.mxu0 }
 0x12e   : > { %v934_v29 = vadd.f32 %v3528_v28, %v808_v27 }
 0x12f   : > { %v918_v30 = vpop.f32.mrf.mxu0  ;;  %v3548_v31 = vpop.f32.mrf.mxu1 }
 0x130   : > { %937 = vst [vmem:[#allocation2 + $0x8] sm:$0xf] %v934_v29  ;;  %v932_v32 = vadd.f32 %v918_v30, %v796_v19  ;;  %v2574_v30 = vshrl.u32 %v2573_v26, 7 }
 0x131   : > { %v3529_v33 = vpop.f32.mrf.mxu0  ;;  %v1054_v34 = vpop.f32.mrf.mxu1 }
 0x132   : > { %v1068_v35 = vadd.f32 %v1054_v34, %v932_v32 }
 0x133   : > { %v921_v36 = vpop.f32.mrf.mxu0  ;;  %v3549_v37 = vpop.f32.mrf.mxu1 }
 0x134   : > { %v933_v38 = vadd.f32 %v921_v36, %v797_v24 }
 0x135   : > { %v1057_v39 = vpop.f32.mrf.mxu1 }
 0x136   : > { %v1069_v40 = vadd.f32 %v1057_v39, %v933_v38  ;;  %v2576_v38 = vadd.s32 16, %v2574_v30 }
 0x137   : > { %v944_v41 = vld [vmem:[#allocation2 + $0x8] sm:$0xf] }
 0x138   : > { %v1070_v42 = vadd.f32 %v3548_v31, %v944_v41  ;;  %v2575_v31 = vadd.s32 8, %v2574_v30 }
 0x13a   : > { %1073 = vst [vmem:[#allocation2 + $0x8] sm:$0xf] %v1070_v42  ;;  %v4510_v36 = vmul.u32.u64.low 3435973837, %v2575_v31  ;;  %v4511_v37 = vmul.u32.u64.high 3435973837, %v2575_v31, %v4510_v36 }
 0x141   : > { %v1079_v43 = vld [vmem:[#allocation2 + $0x8] sm:$0xf] }
 0x14d   : > { %v3568_v44 = vpop.f32.mrf.mxu0 }
 0x14e   : > { %v1220_v45 = vadd.f32 %v3568_v44, %v1079_v43  ;;  %v4515_v43 = vmul.u32.u64.low 3435973837, %v2576_v38  ;;  %v4516_v44 = vmul.u32.u64.high 3435973837, %v2576_v38, %v4515_v43 }
 0x14f   : > { %v1204_v46 = vpop.f32.mrf.mxu0  ;;  %v3588_v47 = vpop.f32.mrf.mxu1 }
 0x150   : > { %1223 = vst [vmem:[#allocation2 + $0x8] sm:$0xf] %v1220_v45  ;;  %v1218_v48 = vadd.f32 %v1204_v46, %v1068_v35  ;;  %v4507_v34 = vmul.u32.u64.low 3435973837, %v2574_v30  ;;  %v4508_v35 = vmul.u32.u64.high 3435973837, %v2574_v30, %v4507_v34 }
 0x151   : > { %v3569_v49 = vpop.f32.mrf.mxu0  ;;  %v1354_v50 = vpop.f32.mrf.mxu1 }
 0x152   : > { %v1368_v51 = vadd.f32 %v1354_v50, %v1218_v48  ;;  %v2583_v39 = vshrl.u32 %v4508_v35, 2 }
 0x153   : > { %v1207_v52 = vpop.f32.mrf.mxu0  ;;  %v3589_v53 = vpop.f32.mrf.mxu1 }
 0x154   : > { %v1219_v54 = vadd.f32 %v1207_v52, %v1069_v40  ;;  %v2594_v40 = vshrl.u32 %v4511_v37, 2  ;;  %v2584_v45 = vmul.u32 5, %v2583_v39 }
 0x155   : > { %v1357_v55 = vpop.f32.mrf.mxu1 }
 0x156   : > { %v1369_v56 = vadd.f32 %v1357_v55, %v1219_v54  ;;  %v2595_v46 = vmul.u32 5, %v2594_v40  ;;  %v2585_v50 = vsub.s32 %v2574_v30, %v2584_v45  ;;  %v2605_v55 = vshrl.u32 %v4516_v44, 2 }
 0x157   : > { %v1229_v57 = vld [vmem:[#allocation2 + $0x8] sm:$0xf] }
 0x158   : > { %v1370_v58 = vadd.f32 %v3588_v47, %v1229_v57  ;;  %vm2610_vm3 = vcmp.ne.s32.totalorder %v2585_v50, 0  ;;  %vm2613_vm4 = vcmp.lt.s32.totalorder %v2585_v50, 0 }
 0x159   : > { %vm4519_vm7 = vmand %vm2613_vm4, %vm2610_vm3 }
 0x15a   : > { %1373 = vst [vmem:[#allocation2 + $0x8] sm:$0xf] %v1370_v58 }
 0x161   : > { %v1380_v59 = vld [vmem:[#allocation2 + $0x8] sm:$0xf] }
 0x16d   : > { %v3608_v60 = vpop.f32.mrf.mxu0 }
 0x16e   : > { %v1526_v61 = vadd.f32 %v3608_v60, %v1380_v59 }
 0x16f   : > { %v1510_v62 = vpop.f32.mrf.mxu0  ;;  %v3628_v63 = vpop.f32.mrf.mxu1 }
 0x170   : > { %1529 = vst [vmem:[#allocation2 + $0x8] sm:$0xf] %v1526_v61  ;;  %v1524_v0 = vadd.f32 %v1510_v62, %v1368_v51  ;;  %v2596_v51 = vsub.s32 %v2575_v31, %v2595_v46 }
 0x171   : > { %v3609_v1 = vpop.f32.mrf.mxu0  ;;  %v1665_v2 = vpop.f32.mrf.mxu1 }
 0x172   : > { %v1679_v3 = vadd.f32 %v1665_v2, %v1524_v0  ;;  %vm2611_vm5 = vcmp.ne.s32.totalorder %v2596_v51, 0  ;;  %vm2614_vm6 = vcmp.lt.s32.totalorder %v2596_v51, 0  ;;  %v2606_v1 = vmul.u32 5, %v2605_v55 }
 0x173   : > { %v3629_v4 = vpop.f32.mrf.mxu1  ;;  %v1513_v7 = vpop.f32.mrf.mxu0  ;;  %vm2617_vm8 = vmand %vm2614_vm6, %vm2611_vm5 }
 0x174   : > { %v1525_v41 = vadd.f32 %v1513_v7, %v1369_v56  ;;  %v2620_v4 = vadd.s32 5, %v2596_v51 }
 0x175   : > { %v1668_v8 = vpop.f32.mrf.mxu1 }
 0x176   : > { %v1680_v47 = vadd.f32 %v1668_v8, %v1525_v41 }
 0x177   : > { %v1536_v5 = vld [vmem:[#allocation2 + $0x8] sm:$0xf] }
 0x178   : > { %v1681_v6 = vadd.f32 %v3628_v63, %v1536_v5 }
 0x17a   : > { %1684 = vst [vmem:[#allocation2 + $0x8] sm:$0xf] %v1681_v6 }
 0x181   : > { %v1691_v9 = vld [vmem:[#allocation2 + $0x8] sm:$0xf] }
 0x18d   : > { %v3648_v10 = vpop.f32.mrf.mxu0 }
 0x18e   : > { %v1823_v11 = vadd.f32 %v3648_v10, %v1691_v9  ;;  %v3255_v10 = vld [vmem:[%s4571_s2] ss:$0 sm:$0xff] }
 0x18f   : > { %v1807_v12 = vpop.f32.mrf.mxu0  ;;  %v3668_v14 = vpop.f32.mrf.mxu1 }
 0x190   : > { %1826 = vst [vmem:[#allocation2 + $0x8] sm:$0xf] %v1823_v11  ;;  %v1821_v42 = vadd.f32 %v1807_v12, %v1679_v3  ;;  %v2619_v3 = vadd.s32 5, %v2585_v50 }
 0x191   : > { %v3649_v13 = vpop.f32.mrf.mxu0  ;;  %v1948_v15 = vpop.f32.mrf.mxu1 }
 0x192   : > { %v1962_v49 = vadd.f32 %v1948_v15, %v1821_v42  ;;  %v2622_v13 = vsel %vm4519_vm7, %v2619_v3, %v2585_v50  ;;  %v2623_v15 = vsel %vm2617_vm8, %v2620_v4, %v2596_v51 }
 0x193   : > { %v3669_v16 = vpop.f32.mrf.mxu1  ;;  %v1810_v19 = vpop.f32.mrf.mxu0  ;;  %vm4529_vm9 = vcmp.lt.s32.totalorder %v2622_v13, 4  ;;  %vm4533_vm10 = vcmp.lt.s32.totalorder %v2623_v15, 4 }
 0x194   : > { %v1822_v48 = vadd.f32 %v1810_v19, %v1680_v47 }
 0x195   : > { %v1951_v20 = vpop.f32.mrf.mxu1 }
 0x196   : > { %v1963_v54 = vadd.f32 %v1951_v20, %v1822_v48 }
 0x197   : > { %v1833_v17 = vld [vmem:[#allocation2 + $0x8] sm:$0xf] }
 0x198   : > { %v1964_v18 = vadd.f32 %v3668_v14, %v1833_v17  ;;  %v2607_v14 = vsub.s32 %v2576_v38, %v2606_v1 }
 0x19a   : > { %1967 = vst [vmem:[#allocation2 + $0x8] sm:$0xf] %v1964_v18  ;;  %vm2612_vm11 = vcmp.ne.s32.totalorder %v2607_v14, 0  ;;  %vm2615_vm12 = vcmp.lt.s32.totalorder %v2607_v14, 0 }
 0x19b   : > { %vm2618_vm13 = vmand %vm2615_vm12, %vm2612_vm11 }
 0x1a1   : > { %v1974_v21 = vld [vmem:[#allocation2 + $0x8] sm:$0xf] }
 0x1ad   : > { %v3688_v22 = vpop.f32.mrf.mxu0 }
 0x1ae   : > { %v2119_v23 = vadd.f32 %v3688_v22, %v1974_v21 }
 0x1af   : > { %v2103_v24 = vpop.f32.mrf.mxu0  ;;  %v3708_v25 = vpop.f32.mrf.mxu1 }
 0x1b0   : > { %2122 = vst [vmem:[#allocation2 + $0x8] sm:$0xf] %v2119_v23  ;;  %v2117_v52 = vadd.f32 %v2103_v24, %v1962_v49  ;;  %v2621_v24 = vadd.s32 5, %v2607_v14 }
 0x1b1   : > { %v3689_v27 = vpop.f32.mrf.mxu0  ;;  %v2258_v28 = vpop.f32.mrf.mxu1 }
 0x1b2   : > { %v2272_v60 = vadd.f32 %v2258_v28, %v2117_v52  ;;  %v2624_v28 = vsel %vm2618_vm13, %v2621_v24, %v2607_v14 }
 0x1b3   : > { %v3709_v29 = vpop.f32.mrf.mxu1  ;;  %v2106_v53 = vpop.f32.mrf.mxu0  ;;  %vm4541_vm14 = vcmp.lt.s32.totalorder %v2624_v28, 4 }
 0x1b4   : > { %v2118_v56 = vadd.f32 %v2106_v53, %v1963_v54 }
 0x1b5   : > { %v2261_v57 = vpop.f32.mrf.mxu1 }
 0x1b6   : > { %v2273_v7 = vadd.f32 %v2261_v57, %v2118_v56 }
 0x1b7   : > { %v2129_v32 = vld [vmem:[#allocation2 + $0x8] sm:$0xf] }
 0x1b8   : > { %v2274_v33 = vadd.f32 %v3708_v25, %v2129_v32 }
 0x1ba   : > { %2277 = vst [vmem:[#allocation2 + $0x8] sm:$0xf] %v2274_v33 }
 0x1c1   : > { %v2284_v58 = vld [vmem:[#allocation2 + $0x8] sm:$0xf] }
 0x1cd   : > { %v3728_v59 = vpop.f32.mrf.mxu0 }
 0x1ce   : > { %v2415_v61 = vadd.f32 %v3728_v59, %v2284_v58 }
 0x1cf   : > { %v2399_v62 = vpop.f32.mrf.mxu0  ;;  %v3748_v63 = vpop.f32.mrf.mxu1 }
 0x1d0   : > { %2418 = vst [vmem:[#allocation2 + $0x8] sm:$0xf] %v2415_v61  ;;  %v2413_v0 = vadd.f32 %v2399_v62, %v2272_v60 }
 0x1d1   : > { %v3729_v5 = vpop.f32.mrf.mxu0  ;;  %v2540_v6 = vpop.f32.mrf.mxu1 }
 0x1d2   : > { %v2554_v8 = vadd.f32 %v2540_v6, %v2413_v0 }
 0x1d3   : > { %v2402_v9 = vpop.f32.mrf.mxu0  ;;  %v3749_v11 = vpop.f32.mrf.mxu1 }
 0x1d4   : > { %v2414_v12 = vadd.f32 %v2402_v9, %v2273_v7  ;;  %v2570_v17 = vadd.f32 %v3255_v10, %v2554_v8 }
 0x1d5   : > { %v2543_v16 = vpop.f32.mrf.mxu1 }
 0x1d6   : > { %v2555_v18 = vadd.f32 %v2543_v16, %v2414_v12  ;;  %v2634_v25 = vsel %vm4529_vm9, %v2570_v17, 0.0 }
 0x1d7   : > { %v2425_v19 = vld [vmem:[#allocation2 + $0x8] sm:$0xf] }
 0x1d8   : > { %v2556_v22 = vadd.f32 %v3748_v63, %v2425_v19  ;;  %v2571_v23 = vadd.f32 %v3255_v10, %v2555_v18 }
 0x1da   : > { %2559 = vst [vmem:[#allocation2 + $0x8] sm:$0xf] %v2556_v22  ;;  %v2635_v26 = vsel %vm4533_vm10, %v2571_v23, 0.0 }
 0x1db   : > { %v2637_v27 = vadd.f32 %v2635_v26, %v2634_v25 }
 0x1e1   : > { %v2562_v29 = vld [vmem:[#allocation2 + $0x8] sm:$0xf] }
 0x1e2   : > { %v2572_v31 = vadd.f32 %v3255_v10, %v2562_v29 }
 0x1e4   : > { %v2636_v32 = vsel %vm4541_vm14, %v2572_v31, 0.0 }
 0x1e5   : > { %v2639_v33 = vsel %vm2638_vm15, %v2636_v32, 0.0 }
 0x1e6   : > { %v2640_v34 = vadd.f32 %v2639_v33, %v2637_v27 }
 0x1e8   : > { %v2641_v35 = vrot.slane %v2640_v34, 4 }
 0x1ea   : > { %v2642_v36 = vadd.f32 %v2641_v35, %v2640_v34 }
 0x1ec   : > { %v2643_v37 = vrot.slane %v2642_v36, 2 }
 0x1ee   : > { %v2644_v38 = vadd.f32 %v2643_v37, %v2642_v36 }
 0x1f0   : > { %v2645_v39 = vrot.slane %v2644_v38, 1 }
 0x1f2   : > { %v2646_v40 = vadd.f32 %v2645_v39, %v2644_v38 }
 0x1f4   : > { %v2647_v41 = vmul.f32 0.0625, %v2646_v40 }
 0x1f6   : > { %v2648_v42 = vsub.f32 %v2570_v17, %v2647_v41  ;;  %v2649_v43 = vsub.f32 %v2571_v23, %v2647_v41  ;;  %v2650_v44 = vsub.f32 %v2572_v31, %v2647_v41 }
 0x1f8   : > { %v2651_v45 = vsel %vm4529_vm9, %v2648_v42, 0.0  ;;  %v2652_v46 = vsel %vm4533_vm10, %v2649_v43, 0.0  ;;  %v2653_v47 = vsel %vm4541_vm14, %v2650_v44, 0.0 }
 0x1f9   : > { %v2654_v48 = vmul.f32 %v2651_v45, %v2651_v45  ;;  %v2655_v49 = vmul.f32 %v2652_v46, %v2652_v46  ;;  %v2656_v50 = vmul.f32 %v2653_v47, %v2653_v47 }
 0x1fb   : > { %v2657_v51 = vadd.f32 %v2655_v49, %v2654_v48  ;;  %v2658_v52 = vsel %vm2638_vm15, %v2656_v50, 0.0 }
 0x1fd   : > { %v2659_v53 = vadd.f32 %v2658_v52, %v2657_v51 }
 0x1ff   : > { %v2660_v54 = vrot.slane %v2659_v53, 4 }
 0x201   : > { %v2661_v55 = vadd.f32 %v2660_v54, %v2659_v53 }
 0x203   : > { %v2662_v57 = vrot.slane %v2661_v55, 2 }
 0x205   : > { %v2663_v58 = vadd.f32 %v2662_v57, %v2661_v55 }
 0x207   : > { %v2664_v59 = vrot.slane %v2663_v58, 1 }
 0x209   : > { %v2665_v56 = vadd.f32 %v2664_v59, %v2663_v58 }
 0x20b   : > { %v2666_v60 = vmul.f32 0.0625, %v2665_v56 }
 0x20d   : > { %v2667_v61 = vadd.f32 1e-05, %v2666_v60 }
 0x20f   : > { %3942 = vrsqrt.f32 %v2667_v61 }
 0x21c   : > { %v3943_v62 = vpop.eup %3942 }
 0x21d   : > { %v2669_v63 = vmul.f32 %v3943_v62, %v2648_v42  ;;  %v2670_v0 = vmul.f32 %v3943_v62, %v2649_v43  ;;  %v2671_v1 = vmul.f32 %v3943_v62, %v2650_v44 }
 0x21f   : > { %vm2672_vm0 = vcmp.gt.f32.partialorder %v2669_v63, 0.0  ;;  %vm2673_vm1 = vcmp.gt.f32.partialorder %v2670_v0, 0.0  ;;  %vm2674_vm2 = vcmp.gt.f32.partialorder %v2671_v1, 0.0  ;;  %v2675_v2 = vmul.f32 0.2, %v2669_v63 }
 0x220   : > { %v2676_v3 = vmul.f32 0.2, %v2670_v0  ;;  %v2677_v4 = vmul.f32 0.2, %v2671_v1 }
 0x221   : > { %v2678_v5 = vsel %vm2672_vm0, %v2669_v63, %v2675_v2 }
 0x222   : > { %v2679_v6 = vsel %vm2673_vm1, %v2670_v0, %v2676_v3  ;;  %v2680_v7 = vsel %vm2674_vm2, %v2671_v1, %v2677_v4 }
 0x223   : > { %v3264_v8 = vpack.c.bf16 %v2680_v7, %v2680_v7  ;;  %v3268_v9 = vpack.c.bf16 %v2679_v6, %v2678_v5 }
 0x225   : > { %3269 = vst [vmem:[%s226_s10] sm:$0xff] %v3268_v9   ;;  %2696 = vst [vmem:[%s226_s10 + $0x8] sm:$0x3] %v3264_v8 }
 0x226 PF: > { %s13_s14 = sadd.s32 1, %s3966_s14   ;;  %s4581_s12 = smov %s3962_s13 }
 0x227   : > { %p10_p6 = scmp.ge.s32.totalorder %s13_s14, 4   ;;  %s4582_s13 = smov %s4584_s15 }
 0x229   :  { %12 = sbr.rel (!%p10_p6) target bundleno = 2 (0x2), region = 86 }

// kernel: patch_discriminator_forward.6
= control target key start
LH: loop header
LB: loop body
LE: loop exit
PB: predicated region body
PF: predicated region fallthrough
CT: control target
= control target key end

     0   :  { %s3933_s12 = smov 0   ;;  %s3935_s13 = smov 0   ;;  %s4520_s0 = inlined_call_operand.vmem [shape: bf16[2,42,128], index: 0, kind: input, shape index: {}]   ;;  %s4521_s1 = inlined_call_operand.vmem [shape: bf16[16,128,128], index: 1, kind: input, shape index: {}]   ;;  %s4522_s2 = inlined_call_operand.vmem [shape: f32[1,128], index: 2, kind: input, shape index: {}]   ;;  %s4523_s3 = inlined_call_operand.vmem [shape: bf16[2,18,128], index: 3, kind: output, shape index: {}]  }
   0x1   :  { %s3937_s14 = smov 0  }
   0x2 LB: > { %s25_s15 = sadd.s32 1, %s3906_s13  ;;  %p2796_p0 = scmp.ge.s32.totalorder %s3910_s14, 1  ;;  %s3910_s14 = sphi %s3937_s14, %s13_s14   ;;  %s3906_s13 = sphi %s3935_s13, %s4533_s13   ;;  %s3902_s12 = sphi %s3933_s12, %s4532_s12  }
   0x3   : > { %p27_p1 = scmp.ge.s32.totalorder %s25_s15, 2  ;;  %p168_p2 = scmp.lt.s32.totalorder %s3910_s14, 3 }
   0x5   : > { %s4535_s15 = smov (%p27_p1, %s25_s15), 0  ;;  %p169_p3 = pnand %p2796_p0, %p168_p2 }
   0x6   : > { %p202_p4 = scmp.lt.s32.totalorder (!%p169_p3), %s3902_s12, 1 }
   0x7   : > { %172 = sbr.rel (%p169_p3) target bundleno = 550 (0x226), region = 32 }
   0xc   : > { %v3726_v0 = vld [vmem:[%s4521_s1 + $0x38] sm:$0xff]   ;;  %v3727_v1 = vld [vmem:[%s4521_s1 + $0x30] sm:$0xff]   ;;  %v3729_v3 = vld [vmem:[%s4521_s1 + $0x28] sm:$0xff]   ;;  %s4537_s12 = smov (!%p202_p4, %s3902_s12), 1  ;;  %vm391_vm0 = vsmask.f32 7424 }
   0xd   : > { %3373 = vmatprep.subr.bf16.mxu0 %v3726_v0  ;;  %v3728_v2 = vld [vmem:[%s4521_s1 + $0x78] sm:$0xff]   ;;  %v3730_v4 = vld [vmem:[%s4521_s1 + $0x70] sm:$0xff]   ;;  %v3732_v5 = vld [vmem:[%s4521_s1 + $0x68] sm:$0xff]   ;;  %s3693_s5 = smul.u32 24, %s4537_s12  ;;  %vm542_vm1 = vcmask 1046528   ;;  %vm834_vm3 = vcmask 1044480  }
   0xe   : > { %3374 = vmatpush3.bf16.msra.mxu0 %v3726_v0  ;;  %3393 = vmatprep.subr.bf16.mxu1 %v3728_v2  ;;  %v3731_v6 = vld [vmem:[%s4521_s1 + $0x20] sm:$0xff]   ;;  %v3733_v8 = vld [vmem:[%s4521_s1 + $0x18] sm:$0xff]   ;;  %v3735_v11 = vld [vmem:[%s4521_s1 + $0x10] sm:$0xff]   ;;  %vm681_vm2 = vsmask.f32 6400  ;;  %vm1414_vm5 = vcmask 1045504  }
   0xf   : > { %3375 = vmatprep.subr.bf16.mxu0 %v3727_v1  ;;  %3394 = vmatpush3.bf16.msra.mxu1 %v3728_v2  ;;  %v3734_v7 = vld [vmem:[%s4521_s1 + $0x60] sm:$0xff]   ;;  %v3736_v9 = vld [vmem:[%s4521_s1 + $0x58] sm:$0xff]   ;;  %s3987_s16 = scalar_lea.vmem %s4520_s0, %s3693_s5  ;;  %v3738_v12 = vld [vmem:[%s4521_s1 + $0x50] sm:$0xff]   ;;  %vm976_vm4 = vsmask.f32 4352  ;;  %s3694_s6 = smul.u32 12, %s4537_s12 }
  0x10   : > { %3395 = vmatprep.subr.bf16.mxu1 %v3730_v4  ;;  %v3741_v10 = vld [vmem:[%s3987_s16] sm:$0xff]   ;;  %v3737_v14 = vld [vmem:[%s4521_s1 + $0x8] sm:$0xff]   ;;  %v3744_v27 = vld [vmem:[%s4521_s1 + $0xb8] sm:$0xff]   ;;  %vm1553_vm6 = vsmask.f32 5376 }
  0x11   : > { %3389 = vmatprep.mubr.bf16.mxu0 %v3741_v10  ;;  %v3745_v13 = vld [vmem:[%s3987_s16] sm:$0xff]   ;;  %v3746_v15 = vld [vmem:[%s3987_s16 + $0x8] ss:$0 sps:$4 sm:$0x33]   ;;  %v3748_v29 = vld [vmem:[%s4521_s1 + $0xf8] sm:$0xff]   ;;  %s221_s9 = scalar_lea.vmem %s4523_s3, %s3694_s6 }
  0x12   : > { %3376 = vmatpush3.bf16.msra.mxu0 %v3727_v1  ;;  %v393_v16 = vshrl.u32 %v3745_v13, 16  ;;  %v395_v17 = vshll.u32 %v3745_v13, 16  ;;  %v3740_v18 = vld [vmem:[%s4521_s1 + $0x48] sm:$0xff]   ;;  %v400_v19 = vshll.u32 %v3746_v15, 16  ;;  %v3739_v21 = vld [vmem:[%s4521_s1] sm:$0xff]   ;;  %v404_v28 = vshrl.u32 %v3746_v15, 16 }
  0x13   : > { %3377 = vmatprep.subr.bf16.mxu0 %v3729_v3  ;;  %3396 = vmatpush3.bf16.msra.mxu1 %v3730_v4  ;;  %v3743_v24 = vld [vmem:[%s4521_s1 + $0x40] sm:$0xff]   ;;  %v3742_v26 = vld [vmem:[%s3987_s16 + $0x8] ss:$0 sps:$4 sm:$0x11]   ;;  %v3747_v30 = vld [vmem:[%s4521_s1 + $0xb0] sm:$0xff]  }
  0x14   : > { %3397 = vmatprep.subr.bf16.mxu1 %v3732_v5  ;;  %v397_v20 = vrot.slane %v395_v17, 1  ;;  %v402_v22 = vrot.slane %v400_v19, 1  ;;  %v3750_v32 = vld [vmem:[%s4521_s1 + $0xf0] sm:$0xff]   ;;  %v3749_v33 = vld [vmem:[%s4521_s1 + $0xa8] sm:$0xff]   ;;  %v3761_v34 = vld [vmem:[%s3987_s16] sm:$0xfe]  }
  0x15   : > { %v4029_v35 = vld [vmem:[%s3987_s16 + $0x8] ss:$0 sps:$4 sm:$0x33]   ;;  %v543_v37 = vrot.slane %v3761_v34, 1  ;;  %v3751_v39 = vld [vmem:[%s4521_s1 + $0xa0] sm:$0xff]   ;;  %v3753_v48 = vld [vmem:[%s4521_s1 + $0x98] sm:$0xff]  }
  0x16   : > { %3378 = vmatpush3.bf16.msra.mxu0 %v3729_v3  ;;  %v398_v23 = vor.u32 %v397_v20, %v393_v16  ;;  %v406_v31 = vor.u32 %v404_v28, %v402_v22  ;;  %v3752_v36 = vld [vmem:[%s4521_s1 + $0xe8] sm:$0xff]   ;;  %v544_v38 = vrot.slane %v4029_v35, 1  ;;  %v3765_v40 = vld [vmem:[%s3987_s16] sm:$0xfe]   ;;  %v3756_v49 = vld [vmem:[%s4521_s1 + $0xd8] sm:$0xff]  }
  0x17   : > { %3379 = vmatprep.subr.bf16.mxu0 %v3731_v6  ;;  %3398 = vmatpush3.bf16.msra.mxu1 %v3732_v5  ;;  %v3754_v41 = vld [vmem:[%s4521_s1 + $0xe0] sm:$0xff]   ;;  %v3766_v43 = vld [vmem:[%s3987_s16 + $0x8] ss:$0 sps:$4 sm:$0x77]   ;;  %v683_v44 = vshrl.u32 %v3765_v40, 16  ;;  %v686_v45 = vshll.u32 %v3765_v40, 16 }
  0x18   : > { %3399 = vmatprep.subr.bf16.mxu1 %v3734_v7  ;;  %v403_v25 = vsel %vm391_vm0, %v398_v23, %v402_v22  ;;  %v545_v42 = vsel %vm542_vm1, %v543_v37, %v544_v38  ;;  %v691_v46 = vshrl.u32 %v3766_v43, 16  ;;  %v694_v47 = vshll.u32 %v3766_v43, 16  ;;  %v3755_v56 = vld [vmem:[%s4521_s1 + $0x90] sm:$0xff]   ;;  %v3757_v59 = vld [vmem:[%s4521_s1 + $0x88] sm:$0xff]   ;;  %v3759_v61 = vld [vmem:[%s4521_s1 + $0x80] sm:$0xff]  }
  0x19   : > { %3409 = vmatprep.mubr.bf16.mxu1 %v403_v25  ;;  %v685_v50 = vrot.slane %v683_v44, 1  ;;  %v688_v51 = vrot.slane %v686_v45, 2  ;;  %v3758_v58 = vld [vmem:[%s4521_s1 + $0xd0] sm:$0xff]   ;;  %v3760_v60 = vld [vmem:[%s4521_s1 + $0xc8] sm:$0xff]   ;;  %v3781_v62 = vld [vmem:[%s3987_s16] sm:$0xf8]  }
  0x1a   : > { %3380 = vmatpush3.bf16.msra.mxu0 %v3731_v6  ;;  %v693_v52 = vrot.slane %v691_v46, 1  ;;  %v696_v53 = vrot.slane %v694_v47, 2  ;;  %v4070_v63 = vld [vmem:[%s3987_s16 + $0x8] ss:$0 sps:$4 sm:$0xff]   ;;  %v3763_v0 = vld [vmem:[%s4521_s1 + $0xc0] sm:$0xff]   ;;  %v3764_v1 = vld [vmem:[%s4521_s1 + $0x138] sm:$0xff]  }
  0x1b   : > { %3381 = vmatprep.subr.bf16.mxu0 %v3733_v8  ;;  %3400 = vmatpush3.bf16.msra.mxu1 %v3734_v7  ;;  %v689_v54 = vor.u32 %v688_v51, %v685_v50  ;;  %v835_v2 = vrot.slane %v3781_v62, 3  ;;  %v836_v3 = vrot.slane %v4070_v63, 3  ;;  %v3785_v4 = vld [vmem:[%s3987_s16] sm:$0xf8]   ;;  %v3786_v5 = vld [vmem:[%s3987_s16 + $0x8] sm:$0x1f]  }
  0x1c   : > { %3401 = vmatprep.subr.bf16.mxu1 %v3736_v9  ;;  %v697_v55 = vor.u32 %v696_v53, %v693_v52  ;;  %v3767_v6 = vld [vmem:[%s4521_s1 + $0x130] sm:$0xff]   ;;  %v3768_v7 = vld [vmem:[%s4521_s1 + $0x178] sm:$0xff]   ;;  %v986_v10 = vshrl.u32 %v3786_v5, 16  ;;  %v3769_v20 = vld [vmem:[%s4521_s1 + $0x128] sm:$0xff]   ;;  %v3912_v40 = vmov 0.0  }
  0x1d   : > { %v837_v13 = vsel %vm834_vm3, %v835_v2, %v836_v3  ;;  %v3772_v22 = vld [vmem:[%s4521_s1 + $0x168] sm:$0xff]   ;;  %v3771_v23 = vld [vmem:[%s4521_s1 + $0x120] sm:$0xff]   ;;  %v3773_v25 = vld [vmem:[%s4521_s1 + $0x118] sm:$0xff]   ;;  %225 = vst [vmem:[#allocation2 + $0x8] sm:$0x3] %v3912_v40 }
  0x1e   : > { %3382 = vmatpush3.bf16.msra.mxu0 %v3733_v8  ;;  %v698_v57 = vsel %vm681_vm2, %v689_v54, %v697_v55  ;;  %v978_v8 = vshrl.u32 %v3785_v4, 16  ;;  %v988_v16 = vrot.slane %v986_v10, 3  ;;  %v3778_v28 = vld [vmem:[%s4521_s1 + $0x150] sm:$0xff]   ;;  %v3779_v34 = vld [vmem:[%s4521_s1 + $0x100] sm:$0xff]   ;;  %v3793_v52 = vld [vmem:[%s4521_s1 + $0x198] sm:$0xff]  }
  0x1f   : > { %3383 = vmatprep.subr.bf16.mxu0 %v3735_v11  ;;  %3402 = vmatpush3.bf16.msra.mxu1 %v3736_v9  ;;  %v981_v9 = vshll.u32 %v3785_v4, 16  ;;  %v3783_v35 = vld [vmem:[%s4521_s1 + $0x140] sm:$0xff]   ;;  %v3787_v45 = vld [vmem:[%s4521_s1 + $0x1b0] sm:$0xff]   ;;  %v3796_v53 = vld [vmem:[%s4521_s1 + $0x1d8] sm:$0xff]  }
  0x20   : > { %3403 = vmatprep.subr.bf16.mxu1 %v3738_v12  ;;  %v3801_v44 = vld [vmem:[%s3987_s16 + $0x4] sm:$0xff]   ;;  %v3790_v46 = vld [vmem:[%s4521_s1 + $0x1f0] sm:$0xff]   ;;  %v4265_v40 = vld [vmem:[%s3987_s16 + $0xc] ss:$0 sps:$4 sm:$0xff]  }
  0x21   : > { %v983_v15 = vrot.slane %v981_v9, 4  ;;  %v3791_v50 = vld [vmem:[%s4521_s1 + $0x1a0] sm:$0xff]   ;;  %v3795_v54 = vld [vmem:[%s4521_s1 + $0x190] sm:$0xff]  }
  0x22   : > { %3384 = vmatpush3.bf16.msra.mxu0 %v3735_v11  ;;  %v989_v11 = vshll.u32 %v3786_v5, 16  ;;  %v3794_v51 = vld [vmem:[%s4521_s1 + $0x1e0] sm:$0xff]  }
  0x23   : > { %3385 = vmatprep.subr.bf16.mxu0 %v3737_v14  ;;  %3404 = vmatpush3.bf16.msra.mxu1 %v3738_v12  ;;  %v3770_v12 = vld [vmem:[%s4521_s1 + $0x170] sm:$0xff]   ;;  %v3803_v2 = vld [vmem:[%s4521_s1 + $0x1c0] sm:$0xff]  }
  0x24   : > { %3405 = vmatprep.subr.bf16.mxu1 %v3740_v18  ;;  %v991_v17 = vrot.slane %v989_v11, 4 }
  0x26   : > { %3386 = vmatpush3.bf16.msra.mxu0 %v3737_v14  ;;  %v980_v14 = vrot.slane %v978_v8, 3  ;;  %v4095_v19 = vor.u32 %v991_v17, %v988_v16  ;;  %v3804_v8 = vld [vmem:[%s4521_s1 + $0x238] sm:$0xff]   ;;  %v3807_v16 = vld [vmem:[%s4521_s1 + $0x230] sm:$0xff]  }
  0x27   : > { %3387 = vmatprep.subr.bf16.mxu0 %v3739_v21  ;;  %3406 = vmatpush3.bf16.msra.mxu1 %v3740_v18 }
  0x28   : > { %3407 = vmatprep.subr.bf16.mxu1 %v3743_v24  ;;  %v984_v18 = vor.u32 %v983_v15, %v980_v14 }
  0x2a   : > { %3388 = vmatpush3.bf16.msra.mxu0 %v3739_v21  ;;  %v993_v21 = vsel %vm976_vm4, %v984_v18, %v4095_v19 }
  0x2b   : > { %3413 = vmatprep.subr.bf16.mxu0 %v3744_v27  ;;  %3408 = vmatpush3.bf16.msra.mxu1 %v3743_v24  ;;  %v3774_v24 = vld [vmem:[%s4521_s1 + $0x160] sm:$0xff]  }
  0x2c   : > { %3433 = vmatprep.subr.bf16.mxu1 %v3748_v29 }
  0x2d   : > { %3390 = vmatmul.mubr.bf16.vlgmr.msra.gmra.mxu0 %v3742_v26  ;;  %v3776_v26 = vld [vmem:[%s4521_s1 + $0x158] sm:$0xff]  }
  0x2e   : > { %3414 = vmatpush3.bf16.msra.mxu0 %v3744_v27  ;;  %3410 = vmatmul.mubr.bf16.vlgmr.msra.gmra.mxu1 %v406_v31  ;;  %v3775_v27 = vld [vmem:[%s4521_s1 + $0x110] sm:$0xff]   ;;  %v4128_v31 = vld [vmem:[%s3987_s16 + $0xc] ss:$0 sps:$4 sm:$0x33]  }
  0x2f   : > { %3415 = vmatprep.subr.bf16.mxu0 %v3747_v30  ;;  %3434 = vmatpush3.bf16.msra.mxu1 %v3748_v29  ;;  %v3805_v29 = vld [vmem:[%s3987_s16 + $0x4] sm:$0xff]   ;;  %v1276_v9 = vshrl.u32 %v4128_v31, 16 }
  0x30   : > { %3435 = vmatprep.subr.bf16.mxu1 %v3750_v32  ;;  %3429 = vmatprep.mubr.bf16.mxu0 %v545_v42 }
  0x31   : > { %3449 = vmatprep.mubr.bf16.mxu1 %v698_v57  ;;  %v3826_v57 = vld [vmem:[%s3987_s16 + $0xc] ss:$0 sps:$4 sm:$0xff]  }
  0x32   : > { %3416 = vmatpush3.bf16.msra.mxu0 %v3747_v30  ;;  %v3777_v30 = vld [vmem:[%s4521_s1 + $0x108] sm:$0xff]   ;;  %v1563_v62 = vshrl.u32 %v3826_v57, 16  ;;  %v1566_v63 = vshll.u32 %v3826_v57, 16  ;;  %v3831_v57 = vld [vmem:[%s4521_s1 + $0x2a0] sm:$0xff]  }
  0x33   : > { %3417 = vmatprep.subr.bf16.mxu0 %v3749_v33  ;;  %3436 = vmatpush3.bf16.msra.mxu1 %v3750_v32  ;;  %v3780_v32 = vld [vmem:[%s4521_s1 + $0x148] sm:$0xff]  }
  0x34   : > { %3437 = vmatprep.subr.bf16.mxu1 %v3752_v36 }
  0x36   : > { %3418 = vmatpush3.bf16.msra.mxu0 %v3749_v33  ;;  %v1267_v33 = vshll.u32 %v3805_v29, 16 }
  0x37   : > { %3419 = vmatprep.subr.bf16.mxu0 %v3751_v39  ;;  %3438 = vmatpush3.bf16.msra.mxu1 %v3752_v36  ;;  %v1265_v36 = vshrl.u32 %v3805_v29, 16  ;;  %v3846_v29 = vld [vmem:[%s3987_s16 + $0xc] sm:$0x1f]  }
  0x38   : > { %3439 = vmatprep.subr.bf16.mxu1 %v3754_v41  ;;  %v1269_v37 = vrot.slane %v1267_v33, 1 }
  0x3a   : > { %3420 = vmatpush3.bf16.msra.mxu0 %v3751_v39  ;;  %v3784_v39 = vld [vmem:[%s4521_s1 + $0x1b8] sm:$0xff]   ;;  %v1270_v42 = vor.u32 %v1269_v37, %v1265_v36  ;;  %v1859_v36 = vshll.u32 %v3846_v29, 16  ;;  %v3819_v37 = vld [vmem:[%s4521_s1 + $0x200] sm:$0xff]  }
  0x3b   : > { %3421 = vmatprep.subr.bf16.mxu0 %v3753_v48  ;;  %3440 = vmatpush3.bf16.msra.mxu1 %v3754_v41  ;;  %v3788_v41 = vld [vmem:[%s4521_s1 + $0x1f8] sm:$0xff]  }
  0x3c   : > { %3441 = vmatprep.subr.bf16.mxu1 %v3756_v49 }
  0x3e   : > { %3422 = vmatpush3.bf16.msra.mxu0 %v3753_v48  ;;  %v3789_v48 = vld [vmem:[%s4521_s1 + $0x1a8] sm:$0xff]  }
  0x3f   : > { %3423 = vmatprep.subr.bf16.mxu0 %v3755_v56  ;;  %3442 = vmatpush3.bf16.msra.mxu1 %v3756_v49  ;;  %v3792_v49 = vld [vmem:[%s4521_s1 + $0x1e8] sm:$0xff]  }
  0x40   : > { %3443 = vmatprep.subr.bf16.mxu1 %v3758_v58 }
  0x42   : > { %3424 = vmatpush3.bf16.msra.mxu0 %v3755_v56  ;;  %v3825_v56 = vld [vmem:[%s3987_s16 + $0x4] sm:$0xfc]  }
  0x43   : > { %3425 = vmatprep.subr.bf16.mxu0 %v3757_v59  ;;  %3444 = vmatpush3.bf16.msra.mxu1 %v3758_v58  ;;  %v3797_v58 = vld [vmem:[%s4521_s1 + $0x188] sm:$0xff]  }
  0x44   : > { %3445 = vmatprep.subr.bf16.mxu1 %v3760_v60 }
  0x46   : > { %3426 = vmatpush3.bf16.msra.mxu0 %v3757_v59  ;;  %v3800_v59 = vld [vmem:[%s4521_s1 + $0x1c8] sm:$0xff]  }
  0x47   : > { %3427 = vmatprep.subr.bf16.mxu0 %v3759_v61  ;;  %3446 = vmatpush3.bf16.msra.mxu1 %v3760_v60  ;;  %v1555_v60 = vshrl.u32 %v3825_v56, 16 }
  0x48   : > { %3447 = vmatprep.subr.bf16.mxu1 %v3763_v0 }
  0x49   : > { %v1557_v4 = vrot.slane %v1555_v60, 2  ;;  %v3836_v60 = vld [vmem:[%s4521_s1 + $0x2d8] sm:$0xff]  }
  0x4a   : > { %3428 = vmatpush3.bf16.msra.mxu0 %v3759_v61  ;;  %v1558_v61 = vshll.u32 %v3825_v56, 16  ;;  %v3832_v56 = vld [vmem:[%s4521_s1 + $0x2e8] sm:$0xff]  }
  0x4b   : > { %3453 = vmatprep.subr.bf16.mxu0 %v3764_v1  ;;  %3448 = vmatpush3.bf16.msra.mxu1 %v3763_v0  ;;  %v3799_v0 = vld [vmem:[%s4521_s1 + $0x180] sm:$0xff]  }
  0x4c   : > { %3473 = vmatprep.subr.bf16.mxu1 %v3768_v7  ;;  %v1560_v5 = vrot.slane %v1558_v61, 3  ;;  %v3835_v61 = vld [vmem:[%s4521_s1 + $0x290] sm:$0xff]  }
  0x4d   : > { %3430 = vmatmul.mubr.bf16.vlgmr.msra.gmra.mxu0 %v544_v38  ;;  %v1272_v38 = vshll.u32 %v4128_v31, 16  ;;  %v3817_v31 = vld [vmem:[%s4521_s1 + $0x208] sm:$0xff]  }
  0x4e   : > { %3454 = vmatpush3.bf16.msra.mxu0 %v3764_v1  ;;  %3469 = vmatprep.mubr.bf16.mxu0 %v837_v13  ;;  %v4196_v1 = vld [vmem:[%s3987_s16 + $0xc] ss:$0 sps:$4 sm:$0x77]   ;;  %v3808_v13 = vld [vmem:[%s4521_s1 + $0x278] sm:$0xff]   ;;  %v1561_v14 = vor.u32 %v1560_v5, %v1557_v4 }
  0x4f   : > { %3455 = vmatprep.subr.bf16.mxu0 %v3767_v6  ;;  %3450 = vmatmul.mubr.bf16.vlgmr.msra.gmra.mxu1 %v697_v55  ;;  %v4146_v43 = vrot.slane %v1272_v38, 1  ;;  %v3798_v55 = vld [vmem:[%s4521_s1 + $0x1d0] sm:$0xff]   ;;  %v1416_v11 = vrot.slane %v4196_v1, 2  ;;  %v3841_v38 = vld [vmem:[%s3987_s16 + $0x4] sm:$0xf8]  }
  0x50   : > { %3474 = vmatpush3.bf16.msra.mxu1 %v3768_v7  ;;  %3489 = vmatprep.mubr.bf16.mxu1 %v993_v21  ;;  %v1568_v7 = vrot.slane %v1566_v63, 3  ;;  %v3809_v21 = vld [vmem:[%s4521_s1 + $0x228] sm:$0xff]  }
  0x51   : > { %3475 = vmatprep.subr.bf16.mxu1 %v3770_v12  ;;  %v1275_v47 = vsel %vm391_vm0, %v1270_v42, %v4146_v43  ;;  %v1278_v17 = vor.u32 %v1276_v9, %v4146_v43  ;;  %v3865_v63 = vld [vmem:[%s3987_s16 + $0x8] sm:$0xfe]   ;;  %v4327_v9 = vld [vmem:[%s3987_s16 + $0x10] ss:$0 sps:$4 sm:$0x33]  }
  0x52   : > { %3456 = vmatpush3.bf16.msra.mxu0 %v3767_v6  ;;  %v1565_v6 = vrot.slane %v1563_v62, 2  ;;  %v3838_v62 = vld [vmem:[%s4521_s1 + $0x2d0] sm:$0xff]   ;;  %v3837_v1 = vld [vmem:[%s4521_s1 + $0x288] sm:$0xff]   ;;  %v2141_v4 = vshll.u32 %v3865_v63, 16 }
  0x53   : > { %3457 = vmatprep.subr.bf16.mxu0 %v3769_v20 }
  0x54   : > { %3476 = vmatpush3.bf16.msra.mxu1 %v3770_v12  ;;  %v3802_v12 = vld [vmem:[%s3987_s16 + $0xc] ss:$0 sps:$4 sm:$0x11]   ;;  %v4211_v15 = vor.u32 %v1568_v7, %v1565_v6  ;;  %v3839_v7 = vld [vmem:[%s4521_s1 + $0x280] sm:$0xff]  }
  0x55   : > { %3477 = vmatprep.subr.bf16.mxu1 %v3772_v22 }
  0x56   : > { %3458 = vmatpush3.bf16.msra.mxu0 %v3769_v20  ;;  %v1570_v20 = vsel %vm1553_vm6, %v1561_v14, %v4211_v15 }
  0x57   : > { %3459 = vmatprep.subr.bf16.mxu0 %v3771_v23 }
  0x58   : > { %3478 = vmatpush3.bf16.msra.mxu1 %v3772_v22  ;;  %v3812_v22 = vld [vmem:[%s4521_s1 + $0x268] sm:$0xff]  }
  0x59   : > { %3479 = vmatprep.subr.bf16.mxu1 %v3774_v24 }
  0x5a   : > { %3460 = vmatpush3.bf16.msra.mxu0 %v3771_v23  ;;  %v3811_v23 = vld [vmem:[%s4521_s1 + $0x220] sm:$0xff]  }
  0x5b   : > { %3461 = vmatprep.subr.bf16.mxu0 %v3773_v25 }
  0x5c   : > { %3480 = vmatpush3.bf16.msra.mxu1 %v3774_v24  ;;  %v3814_v24 = vld [vmem:[%s4521_s1 + $0x260] sm:$0xff]  }
  0x5d   : > { %3481 = vmatprep.subr.bf16.mxu1 %v3776_v26 }
  0x5e   : > { %3462 = vmatpush3.bf16.msra.mxu0 %v3773_v25  ;;  %v3813_v25 = vld [vmem:[%s4521_s1 + $0x218] sm:$0xff]  }
  0x5f   : > { %3463 = vmatprep.subr.bf16.mxu0 %v3775_v27 }
  0x60   : > { %3482 = vmatpush3.bf16.msra.mxu1 %v3776_v26  ;;  %v3816_v26 = vld [vmem:[%s4521_s1 + $0x258] sm:$0xff]  }
  0x61   : > { %3483 = vmatprep.subr.bf16.mxu1 %v3778_v28 }
  0x62   : > { %3464 = vmatpush3.bf16.msra.mxu0 %v3775_v27  ;;  %v3815_v27 = vld [vmem:[%s4521_s1 + $0x210] sm:$0xff]  }
  0x63   : > { %3465 = vmatprep.subr.bf16.mxu0 %v3777_v30 }
  0x64   : > { %3484 = vmatpush3.bf16.msra.mxu1 %v3778_v28  ;;  %v3845_v28 = vld [vmem:[%s3987_s16 + $0x4] sm:$0xf8]  }
  0x65   : > { %3485 = vmatprep.subr.bf16.mxu1 %v3780_v32  ;;  %v1848_v33 = vshrl.u32 %v3845_v28, 16 }
  0x66   : > { %3466 = vmatpush3.bf16.msra.mxu0 %v3777_v30  ;;  %v3818_v30 = vld [vmem:[%s4521_s1 + $0x250] sm:$0xff]  }
  0x67   : > { %3467 = vmatprep.subr.bf16.mxu0 %v3779_v34 }
  0x68   : > { %3486 = vmatpush3.bf16.msra.mxu1 %v3780_v32  ;;  %v3820_v32 = vld [vmem:[%s4521_s1 + $0x248] sm:$0xff]  }
  0x69   : > { %3487 = vmatprep.subr.bf16.mxu1 %v3783_v35 }
  0x6a   : > { %3468 = vmatpush3.bf16.msra.mxu0 %v3779_v34  ;;  %v1851_v34 = vshll.u32 %v3845_v28, 16  ;;  %v3854_v28 = vld [vmem:[%s4521_s1 + $0x360] sm:$0xff]  }
  0x6b   : > { %3493 = vmatprep.subr.bf16.mxu0 %v3784_v39 }
  0x6c   : > { %3488 = vmatpush3.bf16.msra.mxu1 %v3783_v35  ;;  %v1856_v35 = vshrl.u32 %v3846_v29, 16  ;;  %v1853_v42 = vrot.slane %v1851_v34, 4  ;;  %v3853_v29 = vld [vmem:[%s4521_s1 + $0x318] sm:$0xff]   ;;  %v3885_v34 = vld [vmem:[%s3987_s16 + $0x10] ss:$0 sps:$4 sm:$0xff]  }
  0x6d   : > { %3470 = vmatmul.mubr.bf16.vlgmr.msra.gmra.mxu0 %v836_v3  ;;  %3513 = vmatprep.subr.bf16.mxu1 %v3788_v41  ;;  %v3821_v3 = vld [vmem:[%s3987_s16 + $0x4] sm:$0xfc]  }
  0x6e   : > { %3494 = vmatpush3.bf16.msra.mxu0 %v3784_v39  ;;  %3509 = vmatprep.mubr.bf16.mxu0 %v3801_v44  ;;  %v1415_v10 = vrot.slane %v3821_v3, 2  ;;  %v3823_v39 = vld [vmem:[%s4521_s1 + $0x240] sm:$0xff]   ;;  %v1858_v43 = vrot.slane %v1856_v35, 3  ;;  %v1861_v44 = vrot.slane %v1859_v36, 4  ;;  %v2138_v3 = vshrl.u32 %v3865_v63, 16  ;;  %v3857_v35 = vld [vmem:[%s4521_s1 + $0x308] sm:$0xff]  }
  0x6f   : > { %3495 = vmatprep.subr.bf16.mxu0 %v3787_v45  ;;  %3490 = vmatmul.mubr.bf16.vlgmr.msra.gmra.mxu1 %v4095_v19  ;;  %v3810_v19 = vld [vmem:[%s4521_s1 + $0x270] sm:$0xff]   ;;  %v3860_v36 = vld [vmem:[%s4521_s1 + $0x348] sm:$0xff]  }
  0x70   : > { %3514 = vmatpush3.bf16.msra.mxu1 %v3788_v41  ;;  %3529 = vmatprep.mubr.bf16.mxu1 %v1275_v47  ;;  %v1417_v18 = vsel %vm1414_vm5, %v1415_v10, %v1416_v11  ;;  %v1850_v41 = vrot.slane %v1848_v33, 3  ;;  %v1707_v47 = vrot.slane %v4265_v40, 3  ;;  %v3843_v10 = vld [vmem:[%s4521_s1 + $0x2c0] sm:$0xff]   ;;  %v3884_v33 = vld [vmem:[%s3987_s16 + $0x8] sm:$0xfc]   ;;  %v2439_v40 = vshll.u32 %v3885_v34, 16 }
  0x71   : > { %3515 = vmatprep.subr.bf16.mxu1 %v3790_v46 }
  0x72   : > { %3496 = vmatpush3.bf16.msra.mxu0 %v3787_v45  ;;  %v3824_v45 = vld [vmem:[%s4521_s1 + $0x2b8] sm:$0xff]  }
  0x73   : > { %3497 = vmatprep.subr.bf16.mxu0 %v3789_v48 }
  0x74   : > { %3516 = vmatpush3.bf16.msra.mxu1 %v3790_v46  ;;  %v1706_v46 = vrot.slane %v3841_v38, 3  ;;  %v2431_v38 = vshll.u32 %v3884_v33, 16 }
  0x75   : > { %3517 = vmatprep.subr.bf16.mxu1 %v3792_v49 }
  0x76   : > { %3498 = vmatpush3.bf16.msra.mxu0 %v3789_v48  ;;  %v3828_v48 = vld [vmem:[%s4521_s1 + $0x2f8] sm:$0xff]  }
  0x77   : > { %3499 = vmatprep.subr.bf16.mxu0 %v3791_v50 }
  0x78   : > { %3518 = vmatpush3.bf16.msra.mxu1 %v3792_v49  ;;  %v1854_v49 = vor.u32 %v1853_v42, %v1850_v41  ;;  %v3859_v41 = vld [vmem:[%s4521_s1 + $0x300] sm:$0xff]   ;;  %v3881_v42 = vld [vmem:[%s3987_s16 + $0x8] sm:$0xfc]  }
  0x79   : > { %3519 = vmatprep.subr.bf16.mxu1 %v3794_v51 }
  0x7a   : > { %3500 = vmatpush3.bf16.msra.mxu0 %v3791_v50  ;;  %v4274_v50 = vor.u32 %v1861_v44, %v1858_v43  ;;  %v4392_v43 = vld [vmem:[%s3987_s16 + $0x10] ss:$0 sps:$4 sm:$0x77]   ;;  %v3863_v44 = vld [vmem:[%s4521_s1 + $0x340] sm:$0xff]  }
  0x7b   : > { %3501 = vmatprep.subr.bf16.mxu0 %v3793_v52 }
  0x7c   : > { %3520 = vmatpush3.bf16.msra.mxu1 %v3794_v51  ;;  %v3827_v51 = vld [vmem:[%s4521_s1 + $0x2b0] sm:$0xff]  }
  0x7d   : > { %3521 = vmatprep.subr.bf16.mxu1 %v3796_v53 }
  0x7e   : > { %3502 = vmatpush3.bf16.msra.mxu0 %v3793_v52  ;;  %v1708_v52 = vsel %vm834_vm3, %v1706_v46, %v1707_v47  ;;  %v2433_v46 = vrot.slane %v2431_v38, 3  ;;  %vm2626_vm3 = vcmask 1041408  }
  0x7f   : > { %3503 = vmatprep.subr.bf16.mxu0 %v3795_v54 }
  0x80   : > { %3522 = vmatpush3.bf16.msra.mxu1 %v3796_v53  ;;  %v3830_v53 = vld [vmem:[%s4521_s1 + $0x2f0] sm:$0xff]  }
  0x81   : > { %3523 = vmatprep.subr.bf16.mxu1 %v3798_v55 }
  0x82   : > { %3504 = vmatpush3.bf16.msra.mxu0 %v3795_v54  ;;  %v1863_v54 = vsel %vm976_vm4, %v1854_v49, %v4274_v50  ;;  %v3864_v49 = vld [vmem:[%s4521_s1 + $0x3b8] sm:$0xff]  }
  0x83   : > { %3505 = vmatprep.subr.bf16.mxu0 %v3797_v58 }
  0x84   : > { %3524 = vmatpush3.bf16.msra.mxu1 %v3798_v55  ;;  %v3829_v55 = vld [vmem:[%s4521_s1 + $0x2a8] sm:$0xff]  }
  0x85   : > { %3525 = vmatprep.subr.bf16.mxu1 %v3800_v59 }
  0x86   : > { %3506 = vmatpush3.bf16.msra.mxu0 %v3797_v58  ;;  %v3834_v58 = vld [vmem:[%s4521_s1 + $0x2e0] sm:$0xff]  }
  0x87   : > { %3507 = vmatprep.subr.bf16.mxu0 %v3799_v0 }
  0x88   : > { %3526 = vmatpush3.bf16.msra.mxu1 %v3800_v59  ;;  %v3833_v59 = vld [vmem:[%s4521_s1 + $0x298] sm:$0xff]  }
  0x89   : > { %3527 = vmatprep.subr.bf16.mxu1 %v3803_v2 }
  0x8a   : > { %3508 = vmatpush3.bf16.msra.mxu0 %v3799_v0  ;;  %v3866_v0 = vld [vmem:[%s3987_s16 + $0x10] ss:$0 sps:$4 sm:$0x77]  }
  0x8b   : > { %3533 = vmatprep.subr.bf16.mxu0 %v3804_v8  ;;  %v2146_v5 = vshrl.u32 %v3866_v0, 16  ;;  %v2149_v6 = vshll.u32 %v3866_v0, 16  ;;  %v3869_v0 = vld [vmem:[%s4521_s1 + $0x3a8] sm:$0xff]  }
  0x8c   : > { %3528 = vmatpush3.bf16.msra.mxu1 %v3803_v2  ;;  %v3840_v2 = vld [vmem:[%s4521_s1 + $0x2c8] sm:$0xff]  }
  0x8d   : > { %3510 = vmatmul.mubr.bf16.vlgmr.msra.gmra.mxu0 %v3802_v12  ;;  %3553 = vmatprep.subr.bf16.mxu1 %v3808_v13  ;;  %v2143_v12 = vrot.slane %v2141_v4, 2  ;;  %v2151_v14 = vrot.slane %v2149_v6, 2 }
  0x8e   : > { %3534 = vmatpush3.bf16.msra.mxu0 %v3804_v8  ;;  %3549 = vmatprep.mubr.bf16.mxu0 %v1417_v18  ;;  %v3861_v8 = vld [vmem:[%s3987_s16 + $0x8] sm:$0xfe]   ;;  %v3848_v18 = vld [vmem:[%s4521_s1 + $0x378] sm:$0xff]  }
  0x8f   : > { %3535 = vmatprep.subr.bf16.mxu0 %v3807_v16  ;;  %3530 = vmatmul.mubr.bf16.vlgmr.msra.gmra.mxu1 %v1278_v17  ;;  %v2000_v17 = vrot.slane %v4327_v9, 1  ;;  %v3874_v9 = vld [vmem:[%s4521_s1 + $0x3e0] sm:$0xff]  }
  0x90   : > { %3554 = vmatpush3.bf16.msra.mxu1 %v3808_v13  ;;  %3569 = vmatprep.mubr.bf16.mxu1 %v1570_v20  ;;  %v2148_v13 = vrot.slane %v2146_v5, 1 }
  0x91   : > { %3555 = vmatprep.subr.bf16.mxu1 %v3810_v19 }
  0x92   : > { %3536 = vmatpush3.bf16.msra.mxu0 %v3807_v16  ;;  %v1999_v16 = vrot.slane %v3861_v8, 1  ;;  %v4339_v20 = vor.u32 %v2151_v14, %v2148_v13  ;;  %v3876_v14 = vld [vmem:[%s4521_s1 + $0x3d8] sm:$0xff]  }
  0x93   : > { %3537 = vmatprep.subr.bf16.mxu0 %v3809_v21 }
  0x94   : > { %3556 = vmatpush3.bf16.msra.mxu1 %v3810_v19 }
  0x95   : > { %3557 = vmatprep.subr.bf16.mxu1 %v3812_v22 }
  0x96   : > { %3538 = vmatpush3.bf16.msra.mxu0 %v3809_v21  ;;  %v3847_v21 = vld [vmem:[%s4521_s1 + $0x330] sm:$0xff]  }
  0x97   : > { %3539 = vmatprep.subr.bf16.mxu0 %v3811_v23 }
  0x98   : > { %3558 = vmatpush3.bf16.msra.mxu1 %v3812_v22  ;;  %v2001_v22 = vsel %vm542_vm1, %v1999_v16, %v2000_v17  ;;  %v3878_v16 = vld [vmem:[%s4521_s1 + $0x3d0] sm:$0xff]  }
  0x99   : > { %3559 = vmatprep.subr.bf16.mxu1 %v3814_v24 }
  0x9a   : > { %3540 = vmatpush3.bf16.msra.mxu0 %v3811_v23  ;;  %v3850_v23 = vld [vmem:[%s4521_s1 + $0x370] sm:$0xff]  }
  0x9b   : > { %3541 = vmatprep.subr.bf16.mxu0 %v3813_v25 }
  0x9c   : > { %3560 = vmatpush3.bf16.msra.mxu1 %v3814_v24 }
  0x9d   : > { %3561 = vmatprep.subr.bf16.mxu1 %v3816_v26 }
  0x9e   : > { %3542 = vmatpush3.bf16.msra.mxu0 %v3813_v25  ;;  %v3849_v25 = vld [vmem:[%s4521_s1 + $0x328] sm:$0xff]  }
  0x9f   : > { %3543 = vmatprep.subr.bf16.mxu0 %v3815_v27 }
  0xa0   : > { %3562 = vmatpush3.bf16.msra.mxu1 %v3816_v26  ;;  %v3852_v26 = vld [vmem:[%s4521_s1 + $0x368] sm:$0xff]  }
  0xa1   : > { %3563 = vmatprep.subr.bf16.mxu1 %v3818_v30 }
  0xa2   : > { %3544 = vmatpush3.bf16.msra.mxu0 %v3815_v27  ;;  %v3851_v27 = vld [vmem:[%s4521_s1 + $0x320] sm:$0xff]  }
  0xa3   : > { %3545 = vmatprep.subr.bf16.mxu0 %v3817_v31 }
  0xa4   : > { %3564 = vmatpush3.bf16.msra.mxu1 %v3818_v30  ;;  %v3856_v30 = vld [vmem:[%s4521_s1 + $0x358] sm:$0xff]  }
  0xa5   : > { %3565 = vmatprep.subr.bf16.mxu1 %v3820_v32 }
  0xa6   : > { %3546 = vmatpush3.bf16.msra.mxu0 %v3817_v31  ;;  %v3855_v31 = vld [vmem:[%s4521_s1 + $0x310] sm:$0xff]  }
  0xa7   : > { %3547 = vmatprep.subr.bf16.mxu0 %v3819_v37 }
  0xa8   : > { %3566 = vmatpush3.bf16.msra.mxu1 %v3820_v32  ;;  %v3858_v32 = vld [vmem:[%s4521_s1 + $0x350] sm:$0xff]  }
  0xa9   : > { %3567 = vmatprep.subr.bf16.mxu1 %v3823_v39 }
  0xaa   : > { %3548 = vmatpush3.bf16.msra.mxu0 %v3819_v37  ;;  %v2428_v37 = vshrl.u32 %v3884_v33, 16 }
  0xab   : > { %3573 = vmatprep.subr.bf16.mxu0 %v3824_v45 }
  0xac   : > { %3568 = vmatpush3.bf16.msra.mxu1 %v3823_v39  ;;  %v2436_v39 = vshrl.u32 %v3885_v34, 16 }
  0xad   : > { %3550 = vmatmul.mubr.bf16.vlgmr.msra.gmra.mxu0 %v1416_v11  ;;  %3593 = vmatprep.subr.bf16.mxu1 %v3828_v48  ;;  %v2140_v11 = vrot.slane %v2138_v3, 1  ;;  %v3872_v3 = vld [vmem:[%s4521_s1 + $0x3e8] sm:$0xff]  }
  0xae   : > { %3574 = vmatpush3.bf16.msra.mxu0 %v3824_v45  ;;  %3589 = vmatprep.mubr.bf16.mxu0 %v1708_v52  ;;  %v2430_v45 = vrot.slane %v2428_v37, 2  ;;  %v3868_v52 = vld [vmem:[%s4521_s1 + $0x3f8] sm:$0xff]  }
  0xaf   : > { %3575 = vmatprep.subr.bf16.mxu0 %v3827_v51  ;;  %3570 = vmatmul.mubr.bf16.vlgmr.msra.gmra.mxu1 %v4211_v15  ;;  %v3844_v15 = vld [vmem:[%s4521_s1 + $0x338] sm:$0xff]   ;;  %v2144_v19 = vor.u32 %v2143_v12, %v2140_v11 }
  0xb0   : > { %3594 = vmatpush3.bf16.msra.mxu1 %v3828_v48  ;;  %3609 = vmatprep.mubr.bf16.mxu1 %v1863_v54  ;;  %v2441_v48 = vrot.slane %v2439_v40, 3  ;;  %v3873_v12 = vld [vmem:[%s4521_s1 + $0x398] sm:$0xff]  }
  0xb1   : > { %3595 = vmatprep.subr.bf16.mxu1 %v3830_v53  ;;  %v2153_v24 = vsel %vm681_vm2, %v2144_v19, %v4339_v20  ;;  %v3879_v19 = vld [vmem:[%s4521_s1 + $0x380] sm:$0xff]  }
  0xb2   : > { %3576 = vmatpush3.bf16.msra.mxu0 %v3827_v51  ;;  %v2290_v51 = vrot.slane %v4392_v43, 2 }
  0xb3   : > { %3577 = vmatprep.subr.bf16.mxu0 %v3829_v55 }
  0xb4   : > { %3596 = vmatpush3.bf16.msra.mxu1 %v3830_v53  ;;  %v2434_v53 = vor.u32 %v2433_v46, %v2430_v45 }
  0xb5   : > { %3597 = vmatprep.subr.bf16.mxu1 %v3832_v56 }
  0xb6   : > { %3578 = vmatpush3.bf16.msra.mxu0 %v3829_v55  ;;  %v231_v55 = vld [vmem:[#allocation2 + $0x8] sm:$0x3] }
  0xb7   : > { %3579 = vmatprep.subr.bf16.mxu0 %v3831_v57 }
  0xb8   : > { %3598 = vmatpush3.bf16.msra.mxu1 %v3832_v56  ;;  %v3867_v56 = vld [vmem:[%s4521_s1 + $0x3b0] sm:$0xff]  }
  0xb9   : > { %3599 = vmatprep.subr.bf16.mxu1 %v3834_v58 }
  0xba   : > { %3580 = vmatpush3.bf16.msra.mxu0 %v3831_v57 }
  0xbb   : > { %3581 = vmatprep.subr.bf16.mxu0 %v3833_v59 }
  0xbc   : > { %3600 = vmatpush3.bf16.msra.mxu1 %v3834_v58 }
  0xbd   : > { %3601 = vmatprep.subr.bf16.mxu1 %v3836_v60 }
  0xbe   : > { %3582 = vmatpush3.bf16.msra.mxu0 %v3833_v59  ;;  %v3870_v59 = vld [vmem:[%s4521_s1 + $0x3f0] sm:$0xff]  }
  0xbf   : > { %3583 = vmatprep.subr.bf16.mxu0 %v3835_v61 }
  0xc0   : > { %3602 = vmatpush3.bf16.msra.mxu1 %v3836_v60 }
  0xc1   : > { %3603 = vmatprep.subr.bf16.mxu1 %v3838_v62 }
  0xc2   : > { %3584 = vmatpush3.bf16.msra.mxu0 %v3835_v61 }
  0xc3   : > { %3585 = vmatprep.subr.bf16.mxu0 %v3837_v1 }
  0xc4   : > { %3604 = vmatpush3.bf16.msra.mxu1 %v3838_v62 }
  0xc5   : > { %3605 = vmatprep.subr.bf16.mxu1 %v3840_v2 }
  0xc6   : > { %3586 = vmatpush3.bf16.msra.mxu0 %v3837_v1 }
  0xc7   : > { %3587 = vmatprep.subr.bf16.mxu0 %v3839_v7 }
  0xc8   : > { %3606 = vmatpush3.bf16.msra.mxu1 %v3840_v2 }
  0xc9   : > { %3607 = vmatprep.subr.bf16.mxu1 %v3843_v10 }
  0xca   : > { %3588 = vmatpush3.bf16.msra.mxu0 %v3839_v7  ;;  %v3871_v7 = vld [vmem:[%s4521_s1 + $0x3a0] sm:$0xff]  }
  0xcb   : > { %3613 = vmatprep.subr.bf16.mxu0 %v3844_v15 }
  0xcc   : > { %3608 = vmatpush3.bf16.msra.mxu1 %v3843_v10 }
  0xcd   : > { %3590 = vmatmul.mubr.bf16.vlgmr.msra.gmra.mxu0 %v1707_v47  ;;  %3633 = vmatprep.subr.bf16.mxu1 %v3848_v18  ;;  %v2438_v47 = vrot.slane %v2436_v39, 2 }
  0xce   : > { %3614 = vmatpush3.bf16.msra.mxu0 %v3844_v15  ;;  %3629 = vmatprep.mubr.bf16.mxu0 %v2001_v22  ;;  %v3875_v15 = vld [vmem:[%s4521_s1 + $0x390] sm:$0xff]  }
  0xcf   : > { %3615 = vmatprep.subr.bf16.mxu0 %v3847_v21  ;;  %3610 = vmatmul.mubr.bf16.vlgmr.msra.gmra.mxu1 %v4274_v50  ;;  %v2289_v50 = vrot.slane %v3881_v42, 2  ;;  %v4404_v54 = vor.u32 %v2441_v48, %v2438_v47 }
  0xd0   : > { %3634 = vmatpush3.bf16.msra.mxu1 %v3848_v18  ;;  %3649 = vmatprep.mubr.bf16.mxu1 %v2153_v24  ;;  %v3880_v18 = vld [vmem:[%s4521_s1 + $0x3c8] sm:$0xff]  }
  0xd1   : > { %3635 = vmatprep.subr.bf16.mxu1 %v3850_v23  ;;  %v2291_v57 = vsel %vm1414_vm5, %v2289_v50, %v2290_v51  ;;  %v2443_v60 = vsel %vm1553_vm6, %v2434_v53, %v4404_v54 }
  0xd2   : > { %3616 = vmatpush3.bf16.msra.mxu0 %v3847_v21 }
  0xd3   : > { %3617 = vmatprep.subr.bf16.mxu0 %v3849_v25 }
  0xd4   : > { %3636 = vmatpush3.bf16.msra.mxu1 %v3850_v23 }
  0xd5   : > { %3637 = vmatprep.subr.bf16.mxu1 %v3852_v26 }
  0xd6   : > { %3618 = vmatpush3.bf16.msra.mxu0 %v3849_v25 }
  0xd7   : > { %3619 = vmatprep.subr.bf16.mxu0 %v3851_v27 }
  0xd8   : > { %3638 = vmatpush3.bf16.msra.mxu1 %v3852_v26 }
  0xd9   : > { %3639 = vmatprep.subr.bf16.mxu1 %v3854_v28 }
  0xda   : > { %3620 = vmatpush3.bf16.msra.mxu0 %v3851_v27 }
  0xdb   : > { %3621 = vmatprep.subr.bf16.mxu0 %v3853_v29 }
  0xdc   : > { %3640 = vmatpush3.bf16.msra.mxu1 %v3854_v28 }
  0xdd   : > { %3641 = vmatprep.subr.bf16.mxu1 %v3856_v30 }
  0xde   : > { %3622 = vmatpush3.bf16.msra.mxu0 %v3853_v29 }
  0xdf   : > { %3623 = vmatprep.subr.bf16.mxu0 %v3855_v31 }
  0xe0   : > { %3642 = vmatpush3.bf16.msra.mxu1 %v3856_v30 }
  0xe1   : > { %3643 = vmatprep.subr.bf16.mxu1 %v3858_v32 }
  0xe2   : > { %3624 = vmatpush3.bf16.msra.mxu0 %v3855_v31 }
  0xe3   : > { %3625 = vmatprep.subr.bf16.mxu0 %v3857_v35 }
  0xe4   : > { %3644 = vmatpush3.bf16.msra.mxu1 %v3858_v32 }
  0xe5   : > { %3645 = vmatprep.subr.bf16.mxu1 %v3860_v36 }
  0xe6   : > { %3626 = vmatpush3.bf16.msra.mxu0 %v3857_v35 }
  0xe7   : > { %3627 = vmatprep.subr.bf16.mxu0 %v3859_v41 }
  0xe8   : > { %3646 = vmatpush3.bf16.msra.mxu1 %v3860_v36 }
  0xe9   : > { %3647 = vmatprep.subr.bf16.mxu1 %v3863_v44 }
  0xea   : > { %3628 = vmatpush3.bf16.msra.mxu0 %v3859_v41 }
  0xeb   : > { %3653 = vmatprep.subr.bf16.mxu0 %v3864_v49 }
  0xec   : > { %3648 = vmatpush3.bf16.msra.mxu1 %v3863_v44 }
  0xed   : > { %v3391_v58 = vpop.f32.mrf.mxu0  ;;  %3630 = vmatmul.mubr.bf16.vlgmr.msra.gmra.mxu0 %v2000_v17  ;;  %3673 = vmatprep.subr.bf16.mxu1 %v3868_v52  ;;  %v3877_v17 = vld [vmem:[%s4521_s1 + $0x388] sm:$0xff]  }
  0xee   : > { %v356_v61 = vadd.f32 %v3391_v58, %v231_v55  ;;  %3654 = vmatpush3.bf16.msra.mxu0 %v3864_v49  ;;  %3669 = vmatprep.mubr.bf16.mxu0 %v2291_v57  ;;  %v3411_v63 = vpop.f32.mrf.mxu1 }
  0xef   : > { %v340_v62 = vpop.f32.mrf.mxu0  ;;  %3655 = vmatprep.subr.bf16.mxu0 %v3867_v56  ;;  %3650 = vmatmul.mubr.bf16.vlgmr.msra.gmra.mxu1 %v4339_v20  ;;  %v3883_v20 = vld [vmem:[%s4521_s1 + $0x3c0] sm:$0xff]  }
  0xf0   : > { %359 = vst [vmem:[#allocation2 + $0x8] sm:$0x3] %v356_v61  ;;  %3674 = vmatpush3.bf16.msra.mxu1 %v3868_v52  ;;  %3689 = vmatprep.mubr.bf16.mxu1 %v2443_v60  ;;  %v491_v2 = vpop.f32.mrf.mxu1 }
  0xf1   : > { %v3392_v1 = vpop.f32.mrf.mxu0  ;;  %3675 = vmatprep.subr.bf16.mxu1 %v3870_v59  ;;  %v505_v4 = vadd.f32 %v491_v2, %v340_v62 }
  0xf2   : > { %3656 = vmatpush3.bf16.msra.mxu0 %v3867_v56  ;;  %v3412_v6 = vpop.f32.mrf.mxu1 }
  0xf3   : > { %v343_v5 = vpop.f32.mrf.mxu0  ;;  %3657 = vmatprep.subr.bf16.mxu0 %v3869_v0 }
  0xf4   : > { %3676 = vmatpush3.bf16.msra.mxu1 %v3870_v59  ;;  %v494_v8 = vpop.f32.mrf.mxu1 }
  0xf5   : > { %3677 = vmatprep.subr.bf16.mxu1 %v3872_v3  ;;  %v506_v10 = vadd.f32 %v494_v8, %v343_v5 }
  0xf6   : > { %3658 = vmatpush3.bf16.msra.mxu0 %v3869_v0 }
  0xf7   : > { %v365_v11 = vld [vmem:[#allocation2 + $0x8] sm:$0x3]  ;;  %3659 = vmatprep.subr.bf16.mxu0 %v3871_v7 }
  0xf8   : > { %v507_v13 = vadd.f32 %v3411_v63, %v365_v11  ;;  %3678 = vmatpush3.bf16.msra.mxu1 %v3872_v3 }
  0xf9   : > { %3679 = vmatprep.subr.bf16.mxu1 %v3874_v9 }
  0xfa   : > { %510 = vst [vmem:[#allocation2 + $0x8] sm:$0x3] %v507_v13  ;;  %3660 = vmatpush3.bf16.msra.mxu0 %v3871_v7 }
  0xfb   : > { %3661 = vmatprep.subr.bf16.mxu0 %v3873_v12 }
  0xfc   : > { %3680 = vmatpush3.bf16.msra.mxu1 %v3874_v9 }
  0xfd   : > { %3681 = vmatprep.subr.bf16.mxu1 %v3876_v14 }
  0xfe   : > { %3662 = vmatpush3.bf16.msra.mxu0 %v3873_v12 }
  0xff   : > { %3663 = vmatprep.subr.bf16.mxu0 %v3875_v15 }
 0x100   : > { %3682 = vmatpush3.bf16.msra.mxu1 %v3876_v14 }
 0x101   : > { %3683 = vmatprep.subr.bf16.mxu1 %v3878_v16  ;;  %v516_v21 = vld [vmem:[#allocation2 + $0x8] sm:$0x3] }
 0x102   : > { %3664 = vmatpush3.bf16.msra.mxu0 %v3875_v15 }
 0x103   : > { %3665 = vmatprep.subr.bf16.mxu0 %v3877_v17 }
 0x104   : > { %3684 = vmatpush3.bf16.msra.mxu1 %v3878_v16 }
 0x105   : > { %3685 = vmatprep.subr.bf16.mxu1 %v3880_v18 }
 0x106   : > { %3666 = vmatpush3.bf16.msra.mxu0 %v3877_v17 }
 0x107   : > { %3667 = vmatprep.subr.bf16.mxu0 %v3879_v19 }
 0x108   : > { %3686 = vmatpush3.bf16.msra.mxu1 %v3880_v18 }
 0x109   : > { %3687 = vmatprep.subr.bf16.mxu1 %v3883_v20 }
 0x10a   : > { %3668 = vmatpush3.bf16.msra.mxu0 %v3879_v19 }
 0x10c   : > { %3688 = vmatpush3.bf16.msra.mxu1 %v3883_v20 }
 0x10d   : > { %v3431_v22 = vpop.f32.mrf.mxu0  ;;  %3670 = vmatmul.mubr.bf16.vlgmr.msra.gmra.mxu0 %v2290_v51 }
 0x10e   : > { %v646_v23 = vadd.f32 %v3431_v22, %v516_v21 }
 0x10f   : > { %v630_v24 = vpop.f32.mrf.mxu0  ;;  %3690 = vmatmul.mubr.bf16.vlgmr.msra.gmra.mxu1 %v4404_v54  ;;  %v3451_v25 = vpop.f32.mrf.mxu1 }
 0x110   : > { %649 = vst [vmem:[#allocation2 + $0x8] sm:$0x3] %v646_v23  ;;  %v644_v26 = vadd.f32 %v630_v24, %v505_v4 }
 0x111   : > { %v3432_v27 = vpop.f32.mrf.mxu0  ;;  %v783_v28 = vpop.f32.mrf.mxu1 }
 0x112   : > { %v797_v29 = vadd.f32 %v783_v28, %v644_v26 }
 0x113   : > { %v633_v30 = vpop.f32.mrf.mxu0  ;;  %v3452_v31 = vpop.f32.mrf.mxu1 }
 0x114   : > { %v645_v32 = vadd.f32 %v633_v30, %v506_v10 }
 0x115   : > { %v786_v33 = vpop.f32.mrf.mxu1 }
 0x116   : > { %v798_v34 = vadd.f32 %v786_v33, %v645_v32 }
 0x117   : > { %v655_v35 = vld [vmem:[#allocation2 + $0x8] sm:$0x3] }
 0x118   : > { %v799_v36 = vadd.f32 %v3451_v25, %v655_v35 }
 0x11a   : > { %802 = vst [vmem:[#allocation2 + $0x8] sm:$0x3] %v799_v36  ;;  %v2561_v36 = vlaneseq }
 0x121   : > { %v808_v37 = vld [vmem:[#allocation2 + $0x8] sm:$0x3] }
 0x12d   : > { %v3471_v38 = vpop.f32.mrf.mxu0 }
 0x12e   : > { %v938_v39 = vadd.f32 %v3471_v38, %v808_v37 }
 0x12f   : > { %v922_v40 = vpop.f32.mrf.mxu0  ;;  %v3491_v41 = vpop.f32.mrf.mxu1 }
 0x130   : > { %941 = vst [vmem:[#allocation2 + $0x8] sm:$0x3] %v938_v39  ;;  %v936_v42 = vadd.f32 %v922_v40, %v797_v29  ;;  %v2562_v40 = vshrl.u32 %v2561_v36, 7 }
 0x131   : > { %v3472_v43 = vpop.f32.mrf.mxu0  ;;  %v1078_v44 = vpop.f32.mrf.mxu1 }
 0x132   : > { %v1092_v45 = vadd.f32 %v1078_v44, %v936_v42 }
 0x133   : > { %v925_v46 = vpop.f32.mrf.mxu0  ;;  %v3492_v47 = vpop.f32.mrf.mxu1 }
 0x134   : > { %v937_v48 = vadd.f32 %v925_v46, %v798_v34 }
 0x135   : > { %v1081_v49 = vpop.f32.mrf.mxu1 }
 0x136   : > { %v1093_v50 = vadd.f32 %v1081_v49, %v937_v48  ;;  %v2564_v48 = vadd.s32 16, %v2562_v40 }
 0x137   : > { %v948_v51 = vld [vmem:[#allocation2 + $0x8] sm:$0x3] }
 0x138   : > { %v1094_v52 = vadd.f32 %v3491_v41, %v948_v51  ;;  %v2563_v41 = vadd.s32 8, %v2562_v40 }
 0x13a   : > { %1097 = vst [vmem:[#allocation2 + $0x8] sm:$0x3] %v1094_v52  ;;  %v4462_v46 = vmul.u32.u64.low 2863311531, %v2563_v41  ;;  %v4463_v47 = vmul.u32.u64.high 2863311531, %v2563_v41, %v4462_v46 }
 0x141   : > { %v1103_v53 = vld [vmem:[#allocation2 + $0x8] sm:$0x3] }
 0x14d   : > { %v3511_v54 = vpop.f32.mrf.mxu0 }
 0x14e   : > { %v1229_v55 = vadd.f32 %v3511_v54, %v1103_v53  ;;  %v4467_v53 = vmul.u32.u64.low 2863311531, %v2564_v48  ;;  %v4468_v54 = vmul.u32.u64.high 2863311531, %v2564_v48, %v4467_v53 }
 0x14f   : > { %v1213_v56 = vpop.f32.mrf.mxu0  ;;  %v3531_v57 = vpop.f32.mrf.mxu1 }
 0x150   : > { %1232 = vst [vmem:[#allocation2 + $0x8] sm:$0x3] %v1229_v55  ;;  %v1227_v58 = vadd.f32 %v1213_v56, %v1092_v45  ;;  %v4459_v44 = vmul.u32.u64.low 2863311531, %v2562_v40  ;;  %v4460_v45 = vmul.u32.u64.high 2863311531, %v2562_v40, %v4459_v44 }
 0x151   : > { %v3512_v59 = vpop.f32.mrf.mxu0  ;;  %v1363_v60 = vpop.f32.mrf.mxu1 }
 0x152   : > { %v1377_v61 = vadd.f32 %v1363_v60, %v1227_v58  ;;  %v2571_v49 = vshrl.u32 %v4460_v45, 2 }
 0x153   : > { %v1216_v62 = vpop.f32.mrf.mxu0  ;;  %v3532_v63 = vpop.f32.mrf.mxu1 }
 0x154   : > { %v1228_v0 = vadd.f32 %v1216_v62, %v1093_v50  ;;  %v2582_v50 = vshrl.u32 %v4463_v47, 2  ;;  %v2572_v55 = vmul.u32 6, %v2571_v49 }
 0x155   : > { %v1366_v1 = vpop.f32.mrf.mxu1 }
 0x156   : > { %v1378_v2 = vadd.f32 %v1366_v1, %v1228_v0  ;;  %v2583_v56 = vmul.u32 6, %v2582_v50  ;;  %v2573_v60 = vsub.s32 %v2562_v40, %v2572_v55  ;;  %v2593_v1 = vshrl.u32 %v4468_v54, 2 }
 0x157   : > { %v1238_v3 = vld [vmem:[#allocation2 + $0x8] sm:$0x3] }
 0x158   : > { %v1379_v4 = vadd.f32 %v3531_v57, %v1238_v3  ;;  %vm2598_vm7 = vcmp.ne.s32.totalorder %v2573_v60, 0  ;;  %vm2601_vm8 = vcmp.lt.s32.totalorder %v2573_v60, 0 }
 0x159   : > { %vm4471_vm11 = vmand %vm2601_vm8, %vm2598_vm7 }
 0x15a   : > { %1382 = vst [vmem:[#allocation2 + $0x8] sm:$0x3] %v1379_v4 }
 0x161   : > { %v1388_v5 = vld [vmem:[#allocation2 + $0x8] sm:$0x3] }
 0x16d   : > { %v3551_v6 = vpop.f32.mrf.mxu0 }
 0x16e   : > { %v1518_v7 = vadd.f32 %v3551_v6, %v1388_v5 }
 0x16f   : > { %v1502_v8 = vpop.f32.mrf.mxu0  ;;  %v3571_v9 = vpop.f32.mrf.mxu1 }
 0x170   : > { %1521 = vst [vmem:[#allocation2 + $0x8] sm:$0x3] %v1518_v7  ;;  %v1516_v10 = vadd.f32 %v1502_v8, %v1377_v61  ;;  %v2584_v61 = vsub.s32 %v2563_v41, %v2583_v56 }
 0x171   : > { %v3552_v11 = vpop.f32.mrf.mxu0  ;;  %v1655_v12 = vpop.f32.mrf.mxu1 }
 0x172   : > { %v1669_v13 = vadd.f32 %v1655_v12, %v1516_v10  ;;  %vm2599_vm9 = vcmp.ne.s32.totalorder %v2584_v61, 0  ;;  %vm2602_vm10 = vcmp.lt.s32.totalorder %v2584_v61, 0  ;;  %v2594_v11 = vmul.u32 6, %v2593_v1 }
 0x173   : > { %v3572_v14 = vpop.f32.mrf.mxu1  ;;  %v1505_v17 = vpop.f32.mrf.mxu0  ;;  %vm2605_vm12 = vmand %vm2602_vm10, %vm2599_vm9 }
 0x174   : > { %v1517_v51 = vadd.f32 %v1505_v17, %v1378_v2  ;;  %v2608_v14 = vadd.s32 6, %v2584_v61 }
 0x175   : > { %v1658_v18 = vpop.f32.mrf.mxu1 }
 0x176   : > { %v1670_v57 = vadd.f32 %v1658_v18, %v1517_v51 }
 0x177   : > { %v1527_v15 = vld [vmem:[#allocation2 + $0x8] sm:$0x3] }
 0x178   : > { %v1671_v16 = vadd.f32 %v3571_v9, %v1527_v15 }
 0x17a   : > { %1674 = vst [vmem:[#allocation2 + $0x8] sm:$0x3] %v1671_v16 }
 0x181   : > { %v1680_v19 = vld [vmem:[#allocation2 + $0x8] sm:$0x3] }
 0x18d   : > { %v3591_v20 = vpop.f32.mrf.mxu0 }
 0x18e   : > { %v1809_v21 = vadd.f32 %v3591_v20, %v1680_v19  ;;  %v3199_v20 = vld [vmem:[%s4522_s2] ss:$0 sm:$0xff] }
 0x18f   : > { %v1793_v22 = vpop.f32.mrf.mxu0  ;;  %v3611_v23 = vpop.f32.mrf.mxu1 }
 0x190   : > { %1812 = vst [vmem:[#allocation2 + $0x8] sm:$0x3] %v1809_v21  ;;  %v1807_v52 = vadd.f32 %v1793_v22, %v1669_v13  ;;  %v2607_v13 = vadd.s32 6, %v2573_v60 }
 0x191   : > { %v3592_v24 = vpop.f32.mrf.mxu0  ;;  %v1948_v25 = vpop.f32.mrf.mxu1 }
 0x192   : > { %v1962_v59 = vadd.f32 %v1948_v25, %v1807_v52  ;;  %v2610_v24 = vsel %vm4471_vm11, %v2607_v13, %v2573_v60  ;;  %v2611_v25 = vsel %vm2605_vm12, %v2608_v14, %v2584_v61 }
 0x193   : > { %v3612_v26 = vpop.f32.mrf.mxu1  ;;  %v1796_v29 = vpop.f32.mrf.mxu0  ;;  %vm4481_vm13 = vcmp.lt.s32.totalorder %v2610_v24, 3  ;;  %vm4485_vm14 = vcmp.lt.s32.totalorder %v2611_v25, 3 }
 0x194   : > { %v1808_v58 = vadd.f32 %v1796_v29, %v1670_v57 }
 0x195   : > { %v1951_v30 = vpop.f32.mrf.mxu1 }
 0x196   : > { %v1963_v0 = vadd.f32 %v1951_v30, %v1808_v58 }
 0x197   : > { %v1819_v27 = vld [vmem:[#allocation2 + $0x8] sm:$0x3] }
 0x198   : > { %v1964_v28 = vadd.f32 %v3611_v23, %v1819_v27  ;;  %v2595_v23 = vsub.s32 %v2564_v48, %v2594_v11 }
 0x19a   : > { %1967 = vst [vmem:[#allocation2 + $0x8] sm:$0x3] %v1964_v28  ;;  %vm2600_vm15 = vcmp.ne.s32.totalorder %v2595_v23, 0  ;;  %vm2603_vm0 = vcmp.lt.s32.totalorder %v2595_v23, 0 }
 0x19b   : > { %vm2606_vm1 = vmand %vm2603_vm0, %vm2600_vm15 }
 0x1a1   : > { %v1973_v31 = vld [vmem:[#allocation2 + $0x8] sm:$0x3] }
 0x1ad   : > { %v3631_v32 = vpop.f32.mrf.mxu0 }
 0x1ae   : > { %v2102_v33 = vadd.f32 %v3631_v32, %v1973_v31 }
 0x1af   : > { %v2086_v34 = vpop.f32.mrf.mxu0  ;;  %v3651_v35 = vpop.f32.mrf.mxu1 }
 0x1b0   : > { %2105 = vst [vmem:[#allocation2 + $0x8] sm:$0x3] %v2102_v33  ;;  %v2100_v62 = vadd.f32 %v2086_v34, %v1962_v59  ;;  %v2609_v34 = vadd.s32 6, %v2595_v23 }
 0x1b1   : > { %v3632_v37 = vpop.f32.mrf.mxu0  ;;  %v2238_v38 = vpop.f32.mrf.mxu1 }
 0x1b2   : > { %v2252_v6 = vadd.f32 %v2238_v38, %v2100_v62  ;;  %v2612_v38 = vsel %vm2606_vm1, %v2609_v34, %v2595_v23 }
 0x1b3   : > { %v3652_v39 = vpop.f32.mrf.mxu1  ;;  %v2089_v63 = vpop.f32.mrf.mxu0  ;;  %vm4493_vm2 = vcmp.lt.s32.totalorder %v2612_v38, 3 }
 0x1b4   : > { %v2101_v2 = vadd.f32 %v2089_v63, %v1963_v0 }
 0x1b5   : > { %v2241_v3 = vpop.f32.mrf.mxu1 }
 0x1b6   : > { %v2253_v17 = vadd.f32 %v2241_v3, %v2101_v2 }
 0x1b7   : > { %v2111_v42 = vld [vmem:[#allocation2 + $0x8] sm:$0x3] }
 0x1b8   : > { %v2254_v43 = vadd.f32 %v3651_v35, %v2111_v42 }
 0x1ba   : > { %2257 = vst [vmem:[#allocation2 + $0x8] sm:$0x3] %v2254_v43 }
 0x1c1   : > { %v2263_v4 = vld [vmem:[#allocation2 + $0x8] sm:$0x3] }
 0x1cd   : > { %v3671_v5 = vpop.f32.mrf.mxu0 }
 0x1ce   : > { %v2392_v7 = vadd.f32 %v3671_v5, %v2263_v4 }
 0x1cf   : > { %v2376_v8 = vpop.f32.mrf.mxu0  ;;  %v3691_v9 = vpop.f32.mrf.mxu1 }
 0x1d0   : > { %2395 = vst [vmem:[#allocation2 + $0x8] sm:$0x3] %v2392_v7  ;;  %v2390_v10 = vadd.f32 %v2376_v8, %v2252_v6 }
 0x1d1   : > { %v3672_v15 = vpop.f32.mrf.mxu0  ;;  %v2528_v16 = vpop.f32.mrf.mxu1 }
 0x1d2   : > { %v2542_v18 = vadd.f32 %v2528_v16, %v2390_v10 }
 0x1d3   : > { %v2379_v19 = vpop.f32.mrf.mxu0  ;;  %v3692_v21 = vpop.f32.mrf.mxu1 }
 0x1d4   : > { %v2391_v22 = vadd.f32 %v2379_v19, %v2253_v17  ;;  %v2558_v27 = vadd.f32 %v3199_v20, %v2542_v18 }
 0x1d5   : > { %v2531_v26 = vpop.f32.mrf.mxu1 }
 0x1d6   : > { %v2543_v28 = vadd.f32 %v2531_v26, %v2391_v22  ;;  %v2622_v35 = vsel %vm4481_vm13, %v2558_v27, 0.0 }
 0x1d7   : > { %v2401_v29 = vld [vmem:[#allocation2 + $0x8] sm:$0x3] }
 0x1d8   : > { %v2544_v32 = vadd.f32 %v3691_v9, %v2401_v29  ;;  %v2559_v33 = vadd.f32 %v3199_v20, %v2543_v28 }
 0x1da   : > { %2547 = vst [vmem:[#allocation2 + $0x8] sm:$0x3] %v2544_v32  ;;  %v2623_v36 = vsel %vm4485_vm14, %v2559_v33, 0.0 }
 0x1db   : > { %v2625_v37 = vadd.f32 %v2623_v36, %v2622_v35 }
 0x1e1   : > { %v2550_v39 = vld [vmem:[#allocation2 + $0x8] sm:$0x3] }
 0x1e2   : > { %v2560_v41 = vadd.f32 %v3199_v20, %v2550_v39 }
 0x1e4   : > { %v2624_v42 = vsel %vm4493_vm2, %v2560_v41, 0.0 }
 0x1e5   : > { %v2627_v43 = vsel %vm2626_vm3, %v2624_v42, 0.0 }
 0x1e6   : > { %v2628_v44 = vadd.f32 %v2627_v43, %v2625_v37 }
 0x1e8   : > { %v2629_v45 = vrot.slane %v2628_v44, 4 }
 0x1ea   : > { %v2630_v46 = vadd.f32 %v2629_v45, %v2628_v44 }
 0x1ec   : > { %v2631_v47 = vrot.slane %v2630_v46, 2 }
 0x1ee   : > { %v2632_v48 = vadd.f32 %v2631_v47, %v2630_v46 }
 0x1f0   : > { %v2633_v49 = vrot.slane %v2632_v48, 1 }
 0x1f2   : > { %v2634_v50 = vadd.f32 %v2633_v49, %v2632_v48 }
 0x1f4   : > { %v2635_v51 = vmul.f32 0.11111111, %v2634_v50 }
 0x1f6   : > { %v2636_v52 = vsub.f32 %v2558_v27, %v2635_v51  ;;  %v2637_v53 = vsub.f32 %v2559_v33, %v2635_v51  ;;  %v2638_v54 = vsub.f32 %v2560_v41, %v2635_v51 }
 0x1f8   : > { %v2639_v55 = vsel %vm4481_vm13, %v2636_v52, 0.0  ;;  %v2640_v56 = vsel %vm4485_vm14, %v2637_v53, 0.0  ;;  %v2641_v57 = vsel %vm4493_vm2, %v2638_v54, 0.0 }
 0x1f9   : > { %v2642_v58 = vmul.f32 %v2639_v55, %v2639_v55  ;;  %v2643_v59 = vmul.f32 %v2640_v56, %v2640_v56  ;;  %v2644_v60 = vmul.f32 %v2641_v57, %v2641_v57 }
 0x1fb   : > { %v2645_v61 = vadd.f32 %v2643_v59, %v2642_v58  ;;  %v2646_v62 = vsel %vm2626_vm3, %v2644_v60, 0.0 }
 0x1fd   : > { %v2647_v63 = vadd.f32 %v2646_v62, %v2645_v61 }
 0x1ff   : > { %v2648_v0 = vrot.slane %v2647_v63, 4 }
 0x201   : > { %v2649_v1 = vadd.f32 %v2648_v0, %v2647_v63 }
 0x203   : > { %v2650_v3 = vrot.slane %v2649_v1, 2 }
 0x205   : > { %v2651_v4 = vadd.f32 %v2650_v3, %v2649_v1 }
 0x207   : > { %v2652_v5 = vrot.slane %v2651_v4, 1 }
 0x209   : > { %v2653_v2 = vadd.f32 %v2652_v5, %v2651_v4 }
 0x20b   : > { %v2654_v6 = vmul.f32 0.11111111, %v2653_v2 }
 0x20d   : > { %v2655_v7 = vadd.f32 1e-05, %v2654_v6 }
 0x20f   : > { %3886 = vrsqrt.f32 %v2655_v7 }
 0x21c   : > { %v3887_v8 = vpop.eup %3886 }
 0x21d   : > { %v2657_v9 = vmul.f32 %v3887_v8, %v2636_v52  ;;  %v2658_v10 = vmul.f32 %v3887_v8, %v2637_v53  ;;  %v2659_v11 = vmul.f32 %v3887_v8, %v2638_v54 }
 0x21f   : > { %vm2660_vm4 = vcmp.gt.f32.partialorder %v2657_v9, 0.0  ;;  %vm2661_vm5 = vcmp.gt.f32.partialorder %v2658_v10, 0.0  ;;  %vm2662_vm6 = vcmp.gt.f32.partialorder %v2659_v11, 0.0  ;;  %v2663_v12 = vmul.f32 0.2, %v2657_v9 }
 0x220   : > { %v2664_v13 = vmul.f32 0.2, %v2658_v10  ;;  %v2665_v14 = vmul.f32 0.2, %v2659_v11 }
 0x221   : > { %v2666_v15 = vsel %vm2660_vm4, %v2657_v9, %v2663_v12 }
 0x222   : > { %v2667_v16 = vsel %vm2661_vm5, %v2658_v10, %v2664_v13  ;;  %v2668_v17 = vsel %vm2662_vm6, %v2659_v11, %v2665_v14 }
 0x223   : > { %v3207_v18 = vpack.c.bf16 %v2668_v17, %v2668_v17  ;;  %v3211_v19 = vpack.c.bf16 %v2667_v16, %v2666_v15 }
 0x225   : > { %3212 = vst [vmem:[%s221_s9] sm:$0xff] %v3211_v19   ;;  %2684 = vst [vmem:[%s221_s9 + $0x8] sm:$0x1] %v3207_v18 }
 0x226 PF: > { %s13_s14 = sadd.s32 1, %s3910_s14   ;;  %s4532_s12 = smov %s3906_s13 }
 0x227   : > { %p10_p5 = scmp.ge.s32.totalorder %s13_s14, 4   ;;  %s4533_s13 = smov %s4535_s15 }
 0x229   :  { %12 = sbr.rel (!%p10_p5) target bundleno = 2 (0x2), region = 83 }

// kernel: patch_discriminator_forward.7
= control target key start
LH: loop header
LB: loop body
LE: loop exit
PB: predicated region body
PF: predicated region fallthrough
CT: control target
= control target key end

     0   :  { %s3432_s12 = smov 0   ;;  %s3434_s13 = smov 0   ;;  %s4042_s0 = inlined_call_operand.vmem [shape: bf16[2,30,128], index: 0, kind: input, shape index: {}]   ;;  %s4043_s1 = inlined_call_operand.vmem [shape: bf16[16,128,128], index: 1, kind: input, shape index: {}]   ;;  %s4044_s2 = inlined_call_operand.vmem [shape: f32[1,128], index: 2, kind: input, shape index: {}]   ;;  %s4045_s3 = inlined_call_operand.vmem [shape: f32[2,10,128], index: 3, kind: output, shape index: {}]  }
   0x1   :  { %s3436_s14 = smov 0  }
   0x2 LB: > { %s25_s15 = sadd.s32 1, %s3404_s13  ;;  %p2354_p0 = scmp.ge.s32.totalorder %s3408_s14, 1  ;;  %s3408_s14 = sphi %s3436_s14, %s13_s14   ;;  %s3404_s13 = sphi %s3434_s13, %s4047_s13   ;;  %s3400_s12 = sphi %s3432_s12, %s4046_s12  }
   0x3   : > { %p27_p1 = scmp.ge.s32.totalorder %s25_s15, 2  ;;  %p168_p2 = scmp.lt.s32.totalorder %s3408_s14, 3 }
   0x5   : > { %s4049_s15 = smov (%p27_p1, %s25_s15), 0  ;;  %p169_p3 = pnand %p2354_p0, %p168_p2 }
   0x6   : > { %p202_p4 = scmp.lt.s32.totalorder (!%p169_p3), %s3400_s12, 1 }
   0x7   : > { %172 = sbr.rel (%p169_p3) target bundleno = 489 (0x1e9), region = 32 }
   0xc   : > { %v3240_v0 = vld [vmem:[%s4043_s1 + $0x38] sm:$0xff]   ;;  %v3410_v1 = vmov 0.0   ;;  %v3241_v2 = vld [vmem:[%s4043_s1 + $0x30] sm:$0xff]   ;;  %vm3411_vm0 = vmmov 0   ;;  %v3243_v5 = vld [vmem:[%s4043_s1 + $0x28] sm:$0xff]   ;;  %s4051_s12 = smov (!%p202_p4, %s3400_s12), 1 }
   0xd   : > { %2894 = vmatprep.subr.bf16.mxu0 %v3410_v1  ;;  %224 = vst [vmem:[#allocation2 + $0x8] sm:$0x3] %v3410_v1  ;;  %2914 = vmatprep.subr.bf16.mxu1 %v3410_v1  ;;  %v3242_v3 = vld [vmem:[%s4043_s1 + $0x78] sm:$0xff]   ;;  %v3244_v4 = vld [vmem:[%s4043_s1 + $0x70] sm:$0xff]   ;;  %v3246_v6 = vld [vmem:[%s4043_s1 + $0x68] sm:$0xff]   ;;  %s2748_s30 = sshll.u32 %s4051_s12, 4 }
   0xe   : > { %2895 = vmatpush3.bf16.msra.mxu0 %v3240_v0  ;;  %2910 = vmatprep.mubr.msk.bf16.mxu0 %vm3411_vm0, %v3410_v1  ;;  %v3245_v7 = vld [vmem:[%s4043_s1 + $0x20] sm:$0xff]   ;;  %v3247_v9 = vld [vmem:[%s4043_s1 + $0x18] sm:$0xff]   ;;  %s3498_s10 = scalar_lea.vmem %s4042_s0, %s2748_s30  ;;  %v3249_v11 = vld [vmem:[%s4043_s1 + $0x10] sm:$0xff]   ;;  %vm999_vm1 = vsmask.f32 4352  ;;  %s221_s25 = scalar_lea.vmem %s4045_s3, %s2748_s30 }
   0xf   : > { %2896 = vmatprep.subr.bf16.mxu0 %v3410_v1  ;;  %2930 = vmatprep.mubr.msk.bf16.mxu1 %vm3411_vm0, %v3410_v1  ;;  %v3248_v8 = vld [vmem:[%s4043_s1 + $0x60] sm:$0xff]   ;;  %v3250_v10 = vld [vmem:[%s4043_s1 + $0x58] sm:$0xff]   ;;  %v3252_v13 = vld [vmem:[%s4043_s1 + $0x50] sm:$0xff]  }
  0x10   : > { %2915 = vmatpush3.bf16.msra.mxu1 %v3242_v3  ;;  %v3258_v12 = vld [vmem:[%s3498_s10] sm:$0x3f]   ;;  %v3251_v14 = vld [vmem:[%s4043_s1 + $0x8] sm:$0xff]   ;;  %v3257_v22 = vld [vmem:[%s4043_s1 + $0xb8] sm:$0xff]  }
  0x11   : > { %2916 = vmatprep.subr.bf16.mxu1 %v3410_v1  ;;  %v373_v15 = vshll.u32 %v3258_v12, 16  ;;  %v3254_v16 = vld [vmem:[%s4043_s1 + $0x48] sm:$0xff]   ;;  %v3253_v17 = vld [vmem:[%s4043_s1] sm:$0xff]   ;;  %v371_v18 = vshrl.u32 %v3258_v12, 16  ;;  %v3260_v24 = vld [vmem:[%s4043_s1 + $0xf8] sm:$0xff]  }
  0x12   : > { %2897 = vmatpush3.bf16.msra.mxu0 %v3241_v2  ;;  %v3256_v20 = vld [vmem:[%s4043_s1 + $0x40] sm:$0xff]   ;;  %v3259_v25 = vld [vmem:[%s4043_s1 + $0xb0] sm:$0xff]   ;;  %v3261_v27 = vld [vmem:[%s4043_s1 + $0xa8] sm:$0xff]  }
  0x13   : > { %2898 = vmatprep.subr.bf16.mxu0 %v3410_v1  ;;  %v375_v19 = vrot.slane %v373_v15, 1  ;;  %v3255_v21 = vld [vmem:[%s3498_s10] sm:$0x1f]   ;;  %v3262_v26 = vld [vmem:[%s4043_s1 + $0xf0] sm:$0xff]   ;;  %v3264_v28 = vld [vmem:[%s4043_s1 + $0xe8] sm:$0xff]  }
  0x14   : > { %2917 = vmatpush3.bf16.msra.mxu1 %v3244_v4  ;;  %v3263_v29 = vld [vmem:[%s4043_s1 + $0xa0] sm:$0xff]   ;;  %v3265_v31 = vld [vmem:[%s4043_s1 + $0x98] sm:$0xff]   ;;  %v3267_v33 = vld [vmem:[%s4043_s1 + $0x90] sm:$0xff]  }
  0x15   : > { %2918 = vmatprep.subr.bf16.mxu1 %v3410_v1  ;;  %v376_v23 = vor.u32 %v375_v19, %v371_v18  ;;  %v3266_v30 = vld [vmem:[%s4043_s1 + $0xe0] sm:$0xff]   ;;  %v3268_v32 = vld [vmem:[%s4043_s1 + $0xd8] sm:$0xff]   ;;  %v3270_v35 = vld [vmem:[%s4043_s1 + $0xd0] sm:$0xff]  }
  0x16   : > { %2899 = vmatpush3.bf16.msra.mxu0 %v3243_v5  ;;  %v3276_v34 = vld [vmem:[%s3498_s10] sm:$0x7e]   ;;  %v3269_v36 = vld [vmem:[%s4043_s1 + $0x88] sm:$0xff]   ;;  %v3275_v46 = vld [vmem:[%s4043_s1 + $0x138] sm:$0xff]  }
  0x17   : > { %2900 = vmatprep.subr.bf16.mxu0 %v3410_v1  ;;  %v619_v37 = vshrl.u32 %v3276_v34, 16  ;;  %v622_v38 = vshll.u32 %v3276_v34, 16  ;;  %v3272_v39 = vld [vmem:[%s4043_s1 + $0xc8] sm:$0xff]   ;;  %v3273_v40 = vld [vmem:[%s3498_s10] sm:$0x3e]   ;;  %v3278_v48 = vld [vmem:[%s4043_s1 + $0x178] sm:$0xff]  }
  0x18   : > { %2919 = vmatpush3.bf16.msra.mxu1 %v3246_v6  ;;  %v3271_v41 = vld [vmem:[%s4043_s1 + $0x80] sm:$0xff]   ;;  %v497_v45 = vrot.slane %v3273_v40, 1  ;;  %v3277_v49 = vld [vmem:[%s4043_s1 + $0x130] sm:$0xff]   ;;  %v3279_v51 = vld [vmem:[%s4043_s1 + $0x128] sm:$0xff]  }
  0x19   : > { %2920 = vmatprep.subr.bf16.mxu1 %v3410_v1  ;;  %v621_v42 = vrot.slane %v619_v37, 1  ;;  %v624_v43 = vrot.slane %v622_v38, 2  ;;  %v3274_v44 = vld [vmem:[%s4043_s1 + $0xc0] sm:$0xff]   ;;  %v3280_v50 = vld [vmem:[%s4043_s1 + $0x170] sm:$0xff]   ;;  %v3282_v52 = vld [vmem:[%s4043_s1 + $0x168] sm:$0xff]  }
  0x1a   : > { %2901 = vmatpush3.bf16.msra.mxu0 %v3245_v7  ;;  %v3281_v53 = vld [vmem:[%s4043_s1 + $0x120] sm:$0xff]   ;;  %v3283_v55 = vld [vmem:[%s4043_s1 + $0x118] sm:$0xff]   ;;  %v3285_v58 = vld [vmem:[%s4043_s1 + $0x110] sm:$0xff]  }
  0x1b   : > { %2902 = vmatprep.subr.bf16.mxu0 %v3410_v1  ;;  %v625_v47 = vor.u32 %v624_v43, %v621_v42  ;;  %v3284_v54 = vld [vmem:[%s4043_s1 + $0x160] sm:$0xff]   ;;  %v3286_v56 = vld [vmem:[%s4043_s1 + $0x158] sm:$0xff]   ;;  %v3288_v59 = vld [vmem:[%s4043_s1 + $0x150] sm:$0xff]  }
  0x1c   : > { %2921 = vmatpush3.bf16.msra.mxu1 %v3248_v8  ;;  %v3291_v57 = vld [vmem:[%s3498_s10] sm:$0xfc]   ;;  %v3287_v62 = vld [vmem:[%s4043_s1 + $0x108] sm:$0xff]   ;;  %v3293_v7 = vld [vmem:[%s4043_s1 + $0x1b8] sm:$0xff]  }
  0x1d   : > { %2922 = vmatprep.subr.bf16.mxu1 %v3410_v1  ;;  %v747_v60 = vshrl.u32 %v3291_v57, 16  ;;  %v750_v61 = vshll.u32 %v3291_v57, 16  ;;  %v3290_v63 = vld [vmem:[%s4043_s1 + $0x148] sm:$0xff]   ;;  %v3289_v3 = vld [vmem:[%s4043_s1 + $0x100] sm:$0xff]   ;;  %v3304_v19 = vld [vmem:[%s4043_s1 + $0x1d8] sm:$0xff]  }
  0x1e   : > { %2903 = vmatpush3.bf16.msra.mxu0 %v3247_v9  ;;  %v3294_v4 = vld [vmem:[%s3498_s10] sm:$0xf8]   ;;  %v3296_v9 = vld [vmem:[%s4043_s1 + $0x1f8] sm:$0xff]   ;;  %v3297_v12 = vld [vmem:[%s4043_s1 + $0x1a8] sm:$0xff]  }
  0x1f   : > { %2904 = vmatprep.subr.bf16.mxu0 %v3410_v1  ;;  %v749_v0 = vrot.slane %v747_v60, 2  ;;  %v752_v2 = vrot.slane %v750_v61, 3  ;;  %v3292_v5 = vld [vmem:[%s4043_s1 + $0x140] sm:$0xff]   ;;  %v874_v8 = vrot.slane %v3294_v4, 3  ;;  %v3312_v34 = vld [vmem:[%s4043_s1 + $0x238] sm:$0xff]   ;;  %v3314_v37 = vld [vmem:[%s4043_s1 + $0x230] sm:$0xff]  }
  0x20   : > { %2923 = vmatpush3.bf16.msra.mxu1 %v3250_v10  ;;  %v3295_v10 = vld [vmem:[%s4043_s1 + $0x1b0] sm:$0xff]   ;;  %v3302_v15 = vld [vmem:[%s4043_s1 + $0x1e0] sm:$0xff]   ;;  %v3310_v18 = vld [vmem:[%s3498_s10 + $0x8] ss:$0 sps:$4 sm:$0x11]  }
  0x21   : > { %2924 = vmatprep.subr.bf16.mxu1 %v3410_v1  ;;  %v753_v6 = vor.u32 %v752_v2, %v749_v0  ;;  %v3317_v38 = vld [vmem:[%s4043_s1 + $0x270] sm:$0xff]   ;;  %v3319_v40 = vld [vmem:[%s4043_s1 + $0x268] sm:$0xff]   ;;  %v3321_v42 = vld [vmem:[%s4043_s1 + $0x260] sm:$0xff]  }
  0x22   : > { %2905 = vmatpush3.bf16.msra.mxu0 %v3249_v11  ;;  %v3298_v11 = vld [vmem:[%s4043_s1 + $0x1f0] sm:$0xff]   ;;  %v3320_v43 = vld [vmem:[%s4043_s1 + $0x218] sm:$0xff]   ;;  %v3337_v0 = vld [vmem:[%s4043_s1 + $0x2e8] sm:$0xff]  }
  0x23   : > { %2906 = vmatprep.subr.bf16.mxu0 %v3410_v1  ;;  %v3333_v60 = vld [vmem:[%s4043_s1 + $0x2f8] sm:$0xff]   ;;  %v3332_v61 = vld [vmem:[%s4043_s1 + $0x2b0] sm:$0xff]   ;;  %v3336_v2 = vld [vmem:[%s4043_s1 + $0x2a0] sm:$0xff]  }
  0x24   : > { %2925 = vmatpush3.bf16.msra.mxu1 %v3252_v13  ;;  %v3300_v13 = vld [vmem:[%s4043_s1 + $0x1e8] sm:$0xff]   ;;  %v3338_v4 = vld [vmem:[%s4043_s1 + $0x298] sm:$0xff]  }
  0x25   : > { %2926 = vmatprep.subr.bf16.mxu1 %v3410_v1 }
  0x26   : > { %2907 = vmatpush3.bf16.msra.mxu0 %v3251_v14  ;;  %v3299_v14 = vld [vmem:[%s4043_s1 + $0x1a0] sm:$0xff]  }
  0x27   : > { %2908 = vmatprep.subr.bf16.mxu0 %v3410_v1 }
  0x28   : > { %2927 = vmatpush3.bf16.msra.mxu1 %v3254_v16  ;;  %v3309_v16 = vld [vmem:[%s3498_s10] sm:$0xf8]  }
  0x29   : > { %2928 = vmatprep.subr.bf16.mxu1 %v3410_v1 }
  0x2a   : > { %2909 = vmatpush3.bf16.msra.mxu0 %v3253_v17  ;;  %v3301_v17 = vld [vmem:[%s4043_s1 + $0x198] sm:$0xff]  }
  0x2b   : > { %2934 = vmatprep.subr.bf16.mxu0 %v3410_v1 }
  0x2c   : > { %2929 = vmatpush3.bf16.msra.mxu1 %v3256_v20  ;;  %v3303_v20 = vld [vmem:[%s4043_s1 + $0x190] sm:$0xff]  }
  0x2d   : > { %2911 = vmatmul.mubr.bf16.vlgmr.msra.gmra.mxu0 %v3255_v21  ;;  %2954 = vmatprep.subr.bf16.mxu1 %v3410_v1  ;;  %v1001_v21 = vshrl.u32 %v3309_v16, 16 }
  0x2e   : > { %2935 = vmatpush3.bf16.msra.mxu0 %v3257_v22  ;;  %2950 = vmatprep.mubr.msk.bf16.mxu0 %vm3411_vm0, %v3410_v1  ;;  %v1004_v22 = vshll.u32 %v3309_v16, 16 }
  0x2f   : > { %2936 = vmatprep.subr.bf16.mxu0 %v3410_v1  ;;  %2931 = vmatmul.mubr.bf16.vlgmr.msra.gmra.mxu1 %v376_v23  ;;  %v3306_v23 = vld [vmem:[%s4043_s1 + $0x1d0] sm:$0xff]  }
  0x30   : > { %2955 = vmatpush3.bf16.msra.mxu1 %v3260_v24  ;;  %2970 = vmatprep.mubr.msk.bf16.mxu1 %vm3411_vm0, %v3410_v1  ;;  %v3305_v24 = vld [vmem:[%s4043_s1 + $0x188] sm:$0xff]  }
  0x31   : > { %2956 = vmatprep.subr.bf16.mxu1 %v3410_v1 }
  0x32   : > { %2937 = vmatpush3.bf16.msra.mxu0 %v3259_v25  ;;  %v1009_v25 = vshll.u32 %v3310_v18, 16 }
  0x33   : > { %2938 = vmatprep.subr.bf16.mxu0 %v3410_v1 }
  0x34   : > { %2957 = vmatpush3.bf16.msra.mxu1 %v3262_v26  ;;  %v1003_v26 = vrot.slane %v1001_v21, 3  ;;  %v3351_v21 = vld [vmem:[%s4043_s1 + $0x378] sm:$0xff]  }
  0x35   : > { %2958 = vmatprep.subr.bf16.mxu1 %v3410_v1 }
  0x36   : > { %2939 = vmatpush3.bf16.msra.mxu0 %v3261_v27  ;;  %v1006_v27 = vrot.slane %v1004_v22, 4  ;;  %v3350_v22 = vld [vmem:[%s4043_s1 + $0x330] sm:$0xff]  }
  0x37   : > { %2940 = vmatprep.subr.bf16.mxu0 %v3410_v1 }
  0x38   : > { %2959 = vmatpush3.bf16.msra.mxu1 %v3264_v28  ;;  %v3308_v28 = vld [vmem:[%s4043_s1 + $0x1c8] sm:$0xff]  }
  0x39   : > { %2960 = vmatprep.subr.bf16.mxu1 %v3410_v1 }
  0x3a   : > { %2941 = vmatpush3.bf16.msra.mxu0 %v3263_v29  ;;  %v3307_v29 = vld [vmem:[%s4043_s1 + $0x180] sm:$0xff]  }
  0x3b   : > { %2942 = vmatprep.subr.bf16.mxu0 %v3410_v1 }
  0x3c   : > { %2961 = vmatpush3.bf16.msra.mxu1 %v3266_v30  ;;  %v1007_v30 = vor.u32 %v1006_v27, %v1003_v26  ;;  %v3354_v26 = vld [vmem:[%s4043_s1 + $0x320] sm:$0xff]  }
  0x3d   : > { %2962 = vmatprep.subr.bf16.mxu1 %v3410_v1  ;;  %v3357_v27 = vld [vmem:[%s4043_s1 + $0x360] sm:$0xff]  }
  0x3e   : > { %2943 = vmatpush3.bf16.msra.mxu0 %v3265_v31  ;;  %v1011_v31 = vrot.slane %v1009_v25, 4  ;;  %v3355_v25 = vld [vmem:[%s4043_s1 + $0x368] sm:$0xff]  }
  0x3f   : > { %2944 = vmatprep.subr.bf16.mxu0 %v3410_v1 }
  0x40   : > { %2963 = vmatpush3.bf16.msra.mxu1 %v3268_v32  ;;  %v3311_v32 = vld [vmem:[%s4043_s1 + $0x1c0] sm:$0xff]  }
  0x41   : > { %2964 = vmatprep.subr.bf16.mxu1 %v3410_v1 }
  0x42   : > { %2945 = vmatpush3.bf16.msra.mxu0 %v3267_v33  ;;  %v1012_v33 = vsel %vm999_vm1, %v1007_v30, %v1011_v31  ;;  %v3359_v30 = vld [vmem:[%s4043_s1 + $0x358] sm:$0xff]   ;;  %v3358_v31 = vld [vmem:[%s4043_s1 + $0x310] sm:$0xff]  }
  0x43   : > { %2946 = vmatprep.subr.bf16.mxu0 %v3410_v1 }
  0x44   : > { %2965 = vmatpush3.bf16.msra.mxu1 %v3270_v35  ;;  %v3313_v35 = vld [vmem:[%s3498_s10 + $0x4] sm:$0x1f]  }
  0x45   : > { %2966 = vmatprep.subr.bf16.mxu1 %v3410_v1 }
  0x46   : > { %2947 = vmatpush3.bf16.msra.mxu0 %v3269_v36  ;;  %v3315_v36 = vld [vmem:[%s4043_s1 + $0x278] sm:$0xff]  }
  0x47   : > { %2948 = vmatprep.subr.bf16.mxu0 %v3410_v1 }
  0x48   : > { %2967 = vmatpush3.bf16.msra.mxu1 %v3272_v39  ;;  %v3316_v39 = vld [vmem:[%s4043_s1 + $0x228] sm:$0xff]  }
  0x49   : > { %2968 = vmatprep.subr.bf16.mxu1 %v3410_v1 }
  0x4a   : > { %2949 = vmatpush3.bf16.msra.mxu0 %v3271_v41  ;;  %v3318_v41 = vld [vmem:[%s4043_s1 + $0x220] sm:$0xff]  }
  0x4b   : > { %2974 = vmatprep.subr.bf16.mxu0 %v3410_v1 }
  0x4c   : > { %2969 = vmatpush3.bf16.msra.mxu1 %v3274_v44  ;;  %v3323_v44 = vld [vmem:[%s4043_s1 + $0x258] sm:$0xff]  }
  0x4d   : > { %2951 = vmatmul.mubr.bf16.vlgmr.msra.gmra.mxu0 %v497_v45  ;;  %2994 = vmatprep.subr.bf16.mxu1 %v3410_v1  ;;  %v3322_v45 = vld [vmem:[%s4043_s1 + $0x210] sm:$0xff]  }
  0x4e   : > { %2975 = vmatpush3.bf16.msra.mxu0 %v3275_v46  ;;  %2990 = vmatprep.mubr.msk.bf16.mxu0 %vm3411_vm0, %v3410_v1  ;;  %v3331_v46 = vld [vmem:[%s3498_s10 + $0x4] sm:$0x7e]  }
  0x4f   : > { %2976 = vmatprep.subr.bf16.mxu0 %v3410_v1  ;;  %2971 = vmatmul.mubr.bf16.vlgmr.msra.gmra.mxu1 %v625_v47  ;;  %v3325_v47 = vld [vmem:[%s4043_s1 + $0x250] sm:$0xff]  }
  0x50   : > { %2995 = vmatpush3.bf16.msra.mxu1 %v3278_v48  ;;  %3010 = vmatprep.mubr.msk.bf16.mxu1 %vm3411_vm0, %v3410_v1  ;;  %v3324_v48 = vld [vmem:[%s4043_s1 + $0x208] sm:$0xff]  }
  0x51   : > { %2996 = vmatprep.subr.bf16.mxu1 %v3410_v1 }
  0x52   : > { %2977 = vmatpush3.bf16.msra.mxu0 %v3277_v49  ;;  %v1375_v49 = vshrl.u32 %v3331_v46, 16 }
  0x53   : > { %2978 = vmatprep.subr.bf16.mxu0 %v3410_v1 }
  0x54   : > { %2997 = vmatpush3.bf16.msra.mxu1 %v3280_v50  ;;  %v1378_v50 = vshll.u32 %v3331_v46, 16  ;;  %v3367_v46 = vld [vmem:[%s4043_s1 + $0x3b8] sm:$0xff]  }
  0x55   : > { %2998 = vmatprep.subr.bf16.mxu1 %v3410_v1 }
  0x56   : > { %2979 = vmatpush3.bf16.msra.mxu0 %v3279_v51  ;;  %v3327_v51 = vld [vmem:[%s4043_s1 + $0x248] sm:$0xff]  }
  0x57   : > { %2980 = vmatprep.subr.bf16.mxu0 %v3410_v1 }
  0x58   : > { %2999 = vmatpush3.bf16.msra.mxu1 %v3282_v52  ;;  %v3328_v52 = vld [vmem:[%s3498_s10 + $0x4] sm:$0x3e]  }
  0x59   : > { %3000 = vmatprep.subr.bf16.mxu1 %v3410_v1  ;;  %v1253_v57 = vrot.slane %v3328_v52, 1  ;;  %v228_v52 = vld [vmem:[#allocation2 + $0x8] sm:$0x3] }
  0x5a   : > { %2981 = vmatpush3.bf16.msra.mxu0 %v3281_v53  ;;  %v3326_v53 = vld [vmem:[%s4043_s1 + $0x200] sm:$0xff]  }
  0x5b   : > { %2982 = vmatprep.subr.bf16.mxu0 %v3410_v1 }
  0x5c   : > { %3001 = vmatpush3.bf16.msra.mxu1 %v3284_v54  ;;  %v1377_v54 = vrot.slane %v1375_v49, 1 }
  0x5d   : > { %3002 = vmatprep.subr.bf16.mxu1 %v3410_v1 }
  0x5e   : > { %2983 = vmatpush3.bf16.msra.mxu0 %v3283_v55  ;;  %v1380_v55 = vrot.slane %v1378_v50, 2  ;;  %v3369_v50 = vld [vmem:[%s4043_s1 + $0x3b0] sm:$0xff]  }
  0x5f   : > { %2984 = vmatprep.subr.bf16.mxu0 %v3410_v1 }
  0x60   : > { %3003 = vmatpush3.bf16.msra.mxu1 %v3286_v56  ;;  %v3329_v56 = vld [vmem:[%s4043_s1 + $0x240] sm:$0xff]  }
  0x61   : > { %3004 = vmatprep.subr.bf16.mxu1 %v3410_v1 }
  0x62   : > { %2985 = vmatpush3.bf16.msra.mxu0 %v3285_v58  ;;  %v3330_v58 = vld [vmem:[%s4043_s1 + $0x2b8] sm:$0xff]  }
  0x63   : > { %2986 = vmatprep.subr.bf16.mxu0 %v3410_v1 }
  0x64   : > { %3005 = vmatpush3.bf16.msra.mxu1 %v3288_v59  ;;  %v1381_v59 = vor.u32 %v1380_v55, %v1377_v54  ;;  %v3372_v55 = vld [vmem:[%s4043_s1 + $0x3f0] sm:$0xff]  }
  0x65   : > { %3006 = vmatprep.subr.bf16.mxu1 %v3410_v1 }
  0x66   : > { %2987 = vmatpush3.bf16.msra.mxu0 %v3287_v62  ;;  %v3335_v62 = vld [vmem:[%s4043_s1 + $0x2f0] sm:$0xff]  }
  0x67   : > { %2988 = vmatprep.subr.bf16.mxu0 %v3410_v1 }
  0x68   : > { %3007 = vmatpush3.bf16.msra.mxu1 %v3290_v63  ;;  %v3334_v63 = vld [vmem:[%s4043_s1 + $0x2a8] sm:$0xff]  }
  0x69   : > { %3008 = vmatprep.subr.bf16.mxu1 %v3410_v1 }
  0x6a   : > { %2989 = vmatpush3.bf16.msra.mxu0 %v3289_v3  ;;  %v3339_v3 = vld [vmem:[%s4043_s1 + $0x2e0] sm:$0xff]  }
  0x6b   : > { %3014 = vmatprep.subr.bf16.mxu0 %v3410_v1 }
  0x6c   : > { %3009 = vmatpush3.bf16.msra.mxu1 %v3292_v5  ;;  %v3341_v5 = vld [vmem:[%s4043_s1 + $0x2d8] sm:$0xff]  }
  0x6d   : > { %2991 = vmatmul.mubr.bf16.vlgmr.msra.gmra.mxu0 %v753_v6  ;;  %3034 = vmatprep.subr.bf16.mxu1 %v3410_v1  ;;  %v3340_v6 = vld [vmem:[%s4043_s1 + $0x290] sm:$0xff]  }
  0x6e   : > { %3015 = vmatpush3.bf16.msra.mxu0 %v3293_v7  ;;  %3030 = vmatprep.mubr.msk.bf16.mxu0 %vm3411_vm0, %v3410_v1  ;;  %v3349_v7 = vld [vmem:[%s3498_s10 + $0x4] sm:$0xfc]  }
  0x6f   : > { %3016 = vmatprep.subr.bf16.mxu0 %v3410_v1  ;;  %3011 = vmatmul.mubr.bf16.vlgmr.msra.gmra.mxu1 %v874_v8  ;;  %v3343_v8 = vld [vmem:[%s4043_s1 + $0x2d0] sm:$0xff]  }
  0x70   : > { %3035 = vmatpush3.bf16.msra.mxu1 %v3296_v9  ;;  %3050 = vmatprep.mubr.msk.bf16.mxu1 %vm3411_vm0, %v3410_v1  ;;  %v3342_v9 = vld [vmem:[%s4043_s1 + $0x288] sm:$0xff]  }
  0x71   : > { %3036 = vmatprep.subr.bf16.mxu1 %v3410_v1 }
  0x72   : > { %3017 = vmatpush3.bf16.msra.mxu0 %v3295_v10  ;;  %v1624_v10 = vshrl.u32 %v3349_v7, 16 }
  0x73   : > { %3018 = vmatprep.subr.bf16.mxu0 %v3410_v1 }
  0x74   : > { %3037 = vmatpush3.bf16.msra.mxu1 %v3298_v11  ;;  %v1627_v11 = vshll.u32 %v3349_v7, 16  ;;  %v3383_v7 = vld [vmem:[%s3498_s10 + $0x8] sm:$0x3f]  }
  0x75   : > { %3038 = vmatprep.subr.bf16.mxu1 %v3410_v1 }
  0x76   : > { %3019 = vmatpush3.bf16.msra.mxu0 %v3297_v12  ;;  %v3345_v12 = vld [vmem:[%s4043_s1 + $0x2c8] sm:$0xff]   ;;  %v1629_v16 = vrot.slane %v1627_v11, 3 }
  0x77   : > { %3020 = vmatprep.subr.bf16.mxu0 %v3410_v1  ;;  %v3379_v11 = vld [vmem:[%s4043_s1 + $0x388] sm:$0xff]  }
  0x78   : > { %3039 = vmatpush3.bf16.msra.mxu1 %v3300_v13  ;;  %v3346_v13 = vld [vmem:[%s3498_s10 + $0x4] sm:$0x7c]  }
  0x79   : > { %3040 = vmatprep.subr.bf16.mxu1 %v3410_v1  ;;  %v1502_v18 = vrot.slane %v3346_v13, 2  ;;  %v2009_v13 = vshrl.u32 %v3383_v7, 16 }
  0x7a   : > { %3021 = vmatpush3.bf16.msra.mxu0 %v3299_v14  ;;  %v3344_v14 = vld [vmem:[%s4043_s1 + $0x280] sm:$0xff]  }
  0x7b   : > { %3022 = vmatprep.subr.bf16.mxu0 %v3410_v1 }
  0x7c   : > { %3041 = vmatpush3.bf16.msra.mxu1 %v3302_v15  ;;  %v1626_v15 = vrot.slane %v1624_v10, 2  ;;  %v2011_v10 = vshll.u32 %v3383_v7, 16 }
  0x7d   : > { %3042 = vmatprep.subr.bf16.mxu1 %v3410_v1 }
  0x7e   : > { %3023 = vmatpush3.bf16.msra.mxu0 %v3301_v17  ;;  %v3347_v17 = vld [vmem:[%s4043_s1 + $0x2c0] sm:$0xff]  }
  0x7f   : > { %3024 = vmatprep.subr.bf16.mxu0 %v3410_v1 }
  0x80   : > { %3043 = vmatpush3.bf16.msra.mxu1 %v3304_v19  ;;  %v3348_v19 = vld [vmem:[%s4043_s1 + $0x338] sm:$0xff]  }
  0x81   : > { %3044 = vmatprep.subr.bf16.mxu1 %v3410_v1 }
  0x82   : > { %3025 = vmatpush3.bf16.msra.mxu0 %v3303_v20  ;;  %v1630_v20 = vor.u32 %v1629_v16, %v1626_v15  ;;  %v3381_v15 = vld [vmem:[%s4043_s1 + $0x380] sm:$0xff]   ;;  %v3385_v16 = vld [vmem:[%s3498_s10 + $0x8] sm:$0x3e]  }
  0x83   : > { %3026 = vmatprep.subr.bf16.mxu0 %v3410_v1 }
  0x84   : > { %3045 = vmatpush3.bf16.msra.mxu1 %v3306_v23  ;;  %v3353_v23 = vld [vmem:[%s4043_s1 + $0x370] sm:$0xff]  }
  0x85   : > { %3046 = vmatprep.subr.bf16.mxu1 %v3410_v1 }
  0x86   : > { %3027 = vmatpush3.bf16.msra.mxu0 %v3305_v24  ;;  %v3352_v24 = vld [vmem:[%s4043_s1 + $0x328] sm:$0xff]  }
  0x87   : > { %3028 = vmatprep.subr.bf16.mxu0 %v3410_v1 }
  0x88   : > { %3047 = vmatpush3.bf16.msra.mxu1 %v3308_v28  ;;  %v3356_v28 = vld [vmem:[%s4043_s1 + $0x318] sm:$0xff]  }
  0x89   : > { %3048 = vmatprep.subr.bf16.mxu1 %v3410_v1 }
  0x8a   : > { %3029 = vmatpush3.bf16.msra.mxu0 %v3307_v29  ;;  %v3364_v29 = vld [vmem:[%s3498_s10 + $0x4] sm:$0xf8]  }
  0x8b   : > { %3054 = vmatprep.subr.bf16.mxu0 %v3410_v1 }
  0x8c   : > { %3049 = vmatpush3.bf16.msra.mxu1 %v3311_v32  ;;  %v3365_v32 = vld [vmem:[%s3498_s10 + $0xc] ss:$0 sps:$4 sm:$0x11]  }
  0x8d   : > { %3031 = vmatmul.mubr.bf16.vlgmr.msra.gmra.mxu0 %v1012_v33  ;;  %3074 = vmatprep.subr.bf16.mxu1 %v3410_v1  ;;  %v1756_v33 = vshrl.u32 %v3364_v29, 16 }
  0x8e   : > { %3055 = vmatpush3.bf16.msra.mxu0 %v3312_v34  ;;  %3070 = vmatprep.mubr.msk.bf16.mxu0 %vm3411_vm0, %v3410_v1  ;;  %v1759_v34 = vshll.u32 %v3364_v29, 16 }
  0x8f   : > { %3056 = vmatprep.subr.bf16.mxu0 %v3410_v1  ;;  %3051 = vmatmul.mubr.bf16.vlgmr.msra.gmra.mxu1 %v3313_v35  ;;  %v3361_v35 = vld [vmem:[%s4043_s1 + $0x350] sm:$0xff]  }
  0x90   : > { %3075 = vmatpush3.bf16.msra.mxu1 %v3315_v36  ;;  %3090 = vmatprep.mubr.msk.bf16.mxu1 %vm3411_vm0, %v3410_v1  ;;  %v3360_v36 = vld [vmem:[%s4043_s1 + $0x308] sm:$0xff]  }
  0x91   : > { %3076 = vmatprep.subr.bf16.mxu1 %v3410_v1 }
  0x92   : > { %3057 = vmatpush3.bf16.msra.mxu0 %v3314_v37  ;;  %v1758_v37 = vrot.slane %v1756_v33, 3 }
  0x93   : > { %3058 = vmatprep.subr.bf16.mxu0 %v3410_v1 }
  0x94   : > { %3077 = vmatpush3.bf16.msra.mxu1 %v3317_v38  ;;  %v1761_v38 = vrot.slane %v1759_v34, 4 }
  0x95   : > { %3078 = vmatprep.subr.bf16.mxu1 %v3410_v1 }
  0x96   : > { %3059 = vmatpush3.bf16.msra.mxu0 %v3316_v39  ;;  %v1764_v39 = vshll.u32 %v3365_v32, 16 }
  0x97   : > { %3060 = vmatprep.subr.bf16.mxu0 %v3410_v1 }
  0x98   : > { %3079 = vmatpush3.bf16.msra.mxu1 %v3319_v40  ;;  %v3363_v40 = vld [vmem:[%s4043_s1 + $0x348] sm:$0xff]  }
  0x99   : > { %3080 = vmatprep.subr.bf16.mxu1 %v3410_v1 }
  0x9a   : > { %3061 = vmatpush3.bf16.msra.mxu0 %v3318_v41  ;;  %v3362_v41 = vld [vmem:[%s4043_s1 + $0x300] sm:$0xff]  }
  0x9b   : > { %3062 = vmatprep.subr.bf16.mxu0 %v3410_v1 }
  0x9c   : > { %3081 = vmatpush3.bf16.msra.mxu1 %v3321_v42  ;;  %v1762_v42 = vor.u32 %v1761_v38, %v1758_v37 }
  0x9d   : > { %3082 = vmatprep.subr.bf16.mxu1 %v3410_v1 }
  0x9e   : > { %3063 = vmatpush3.bf16.msra.mxu0 %v3320_v43  ;;  %v1766_v43 = vrot.slane %v1764_v39, 4 }
  0x9f   : > { %3064 = vmatprep.subr.bf16.mxu0 %v3410_v1 }
  0xa0   : > { %3083 = vmatpush3.bf16.msra.mxu1 %v3323_v44  ;;  %v3366_v44 = vld [vmem:[%s4043_s1 + $0x340] sm:$0xff]  }
  0xa1   : > { %3084 = vmatprep.subr.bf16.mxu1 %v3410_v1 }
  0xa2   : > { %3065 = vmatpush3.bf16.msra.mxu0 %v3322_v45  ;;  %v1767_v45 = vsel %vm999_vm1, %v1762_v42, %v1766_v43 }
  0xa3   : > { %3066 = vmatprep.subr.bf16.mxu0 %v3410_v1 }
  0xa4   : > { %3085 = vmatpush3.bf16.msra.mxu1 %v3325_v47  ;;  %v3368_v47 = vld [vmem:[%s3498_s10 + $0x8] sm:$0x1f]  }
  0xa5   : > { %3086 = vmatprep.subr.bf16.mxu1 %v3410_v1 }
  0xa6   : > { %3067 = vmatpush3.bf16.msra.mxu0 %v3324_v48  ;;  %v3370_v48 = vld [vmem:[%s4043_s1 + $0x3f8] sm:$0xff]  }
  0xa7   : > { %3068 = vmatprep.subr.bf16.mxu0 %v3410_v1 }
  0xa8   : > { %3087 = vmatpush3.bf16.msra.mxu1 %v3327_v51 }
  0xa9   : > { %3088 = vmatprep.subr.bf16.mxu1 %v3410_v1 }
  0xaa   : > { %3069 = vmatpush3.bf16.msra.mxu0 %v3326_v53 }
  0xab   : > { %3094 = vmatprep.subr.bf16.mxu0 %v3410_v1 }
  0xac   : > { %3089 = vmatpush3.bf16.msra.mxu1 %v3329_v56 }
  0xad   : > { %3071 = vmatmul.mubr.bf16.vlgmr.msra.gmra.mxu0 %v1253_v57  ;;  %3114 = vmatprep.subr.bf16.mxu1 %v3410_v1 }
  0xae   : > { %3095 = vmatpush3.bf16.msra.mxu0 %v3330_v58  ;;  %3110 = vmatprep.mubr.msk.bf16.mxu0 %vm3411_vm0, %v3410_v1 }
  0xaf   : > { %3096 = vmatprep.subr.bf16.mxu0 %v3410_v1  ;;  %3091 = vmatmul.mubr.bf16.vlgmr.msra.gmra.mxu1 %v1381_v59  ;;  %v3371_v59 = vld [vmem:[%s4043_s1 + $0x3a8] sm:$0xff]  }
  0xb0   : > { %3115 = vmatpush3.bf16.msra.mxu1 %v3333_v60  ;;  %3130 = vmatprep.mubr.msk.bf16.mxu1 %vm3411_vm0, %v3410_v1 }
  0xb1   : > { %3116 = vmatprep.subr.bf16.mxu1 %v3410_v1 }
  0xb2   : > { %3097 = vmatpush3.bf16.msra.mxu0 %v3332_v61 }
  0xb3   : > { %3098 = vmatprep.subr.bf16.mxu0 %v3410_v1 }
  0xb4   : > { %3117 = vmatpush3.bf16.msra.mxu1 %v3335_v62  ;;  %v3374_v62 = vld [vmem:[%s4043_s1 + $0x3e8] sm:$0xff]  }
  0xb5   : > { %3118 = vmatprep.subr.bf16.mxu1 %v3410_v1 }
  0xb6   : > { %3099 = vmatpush3.bf16.msra.mxu0 %v3334_v63 }
  0xb7   : > { %3100 = vmatprep.subr.bf16.mxu0 %v3410_v1 }
  0xb8   : > { %3119 = vmatpush3.bf16.msra.mxu1 %v3337_v0  ;;  %v3373_v0 = vld [vmem:[%s4043_s1 + $0x3a0] sm:$0xff]  }
  0xb9   : > { %3120 = vmatprep.subr.bf16.mxu1 %v3410_v1 }
  0xba   : > { %3101 = vmatpush3.bf16.msra.mxu0 %v3336_v2  ;;  %v3376_v2 = vld [vmem:[%s4043_s1 + $0x3e0] sm:$0xff]  }
  0xbb   : > { %3102 = vmatprep.subr.bf16.mxu0 %v3410_v1 }
  0xbc   : > { %3121 = vmatpush3.bf16.msra.mxu1 %v3339_v3  ;;  %v3375_v3 = vld [vmem:[%s4043_s1 + $0x398] sm:$0xff]  }
  0xbd   : > { %3122 = vmatprep.subr.bf16.mxu1 %v3410_v1 }
  0xbe   : > { %3103 = vmatpush3.bf16.msra.mxu0 %v3338_v4 }
  0xbf   : > { %3104 = vmatprep.subr.bf16.mxu0 %v3410_v1 }
  0xc0   : > { %3123 = vmatpush3.bf16.msra.mxu1 %v3341_v5 }
  0xc1   : > { %3124 = vmatprep.subr.bf16.mxu1 %v3410_v1 }
  0xc2   : > { %3105 = vmatpush3.bf16.msra.mxu0 %v3340_v6  ;;  %v3378_v6 = vld [vmem:[%s4043_s1 + $0x3d8] sm:$0xff]  }
  0xc3   : > { %3106 = vmatprep.subr.bf16.mxu0 %v3410_v1 }
  0xc4   : > { %3125 = vmatpush3.bf16.msra.mxu1 %v3343_v8  ;;  %v3377_v8 = vld [vmem:[%s4043_s1 + $0x390] sm:$0xff]  }
  0xc5   : > { %3126 = vmatprep.subr.bf16.mxu1 %v3410_v1 }
  0xc6   : > { %3107 = vmatpush3.bf16.msra.mxu0 %v3342_v9  ;;  %v3380_v9 = vld [vmem:[%s4043_s1 + $0x3d0] sm:$0xff]  }
  0xc7   : > { %3108 = vmatprep.subr.bf16.mxu0 %v3410_v1 }
  0xc8   : > { %3127 = vmatpush3.bf16.msra.mxu1 %v3345_v12  ;;  %v3382_v12 = vld [vmem:[%s4043_s1 + $0x3c8] sm:$0xff]  }
  0xc9   : > { %3128 = vmatprep.subr.bf16.mxu1 %v3410_v1 }
  0xca   : > { %3109 = vmatpush3.bf16.msra.mxu0 %v3344_v14  ;;  %v2013_v14 = vrot.slane %v2011_v10, 1 }
  0xcb   : > { %3134 = vmatprep.subr.bf16.mxu0 %v3410_v1 }
  0xcc   : > { %3129 = vmatpush3.bf16.msra.mxu1 %v3347_v17  ;;  %v3384_v17 = vld [vmem:[%s4043_s1 + $0x3c0] sm:$0xff]  }
  0xcd   : > { %3111 = vmatmul.mubr.bf16.vlgmr.msra.gmra.mxu0 %v1502_v18  ;;  %3154 = vmatprep.subr.bf16.mxu1 %v3410_v1  ;;  %v2014_v18 = vor.u32 %v2013_v14, %v2009_v13 }
  0xce   : > { %3135 = vmatpush3.bf16.msra.mxu0 %v3348_v19  ;;  %3150 = vmatprep.mubr.msk.bf16.mxu0 %vm3411_vm0, %v3410_v1  ;;  %v2135_v19 = vrot.slane %v3385_v16, 1 }
  0xcf   : > { %3136 = vmatprep.subr.bf16.mxu0 %v3410_v1  ;;  %3131 = vmatmul.mubr.bf16.vlgmr.msra.gmra.mxu1 %v1630_v20 }
  0xd0   : > { %3155 = vmatpush3.bf16.msra.mxu1 %v3351_v21  ;;  %3170 = vmatprep.mubr.msk.bf16.mxu1 %vm3411_vm0, %v3410_v1 }
  0xd1   : > { %3156 = vmatprep.subr.bf16.mxu1 %v3410_v1 }
  0xd2   : > { %3137 = vmatpush3.bf16.msra.mxu0 %v3350_v22 }
  0xd3   : > { %3138 = vmatprep.subr.bf16.mxu0 %v3410_v1 }
  0xd4   : > { %3157 = vmatpush3.bf16.msra.mxu1 %v3353_v23 }
  0xd5   : > { %3158 = vmatprep.subr.bf16.mxu1 %v3410_v1 }
  0xd6   : > { %3139 = vmatpush3.bf16.msra.mxu0 %v3352_v24 }
  0xd7   : > { %3140 = vmatprep.subr.bf16.mxu0 %v3410_v1 }
  0xd8   : > { %3159 = vmatpush3.bf16.msra.mxu1 %v3355_v25 }
  0xd9   : > { %3160 = vmatprep.subr.bf16.mxu1 %v3410_v1 }
  0xda   : > { %3141 = vmatpush3.bf16.msra.mxu0 %v3354_v26 }
  0xdb   : > { %3142 = vmatprep.subr.bf16.mxu0 %v3410_v1 }
  0xdc   : > { %3161 = vmatpush3.bf16.msra.mxu1 %v3357_v27 }
  0xdd   : > { %3162 = vmatprep.subr.bf16.mxu1 %v3410_v1 }
  0xde   : > { %3143 = vmatpush3.bf16.msra.mxu0 %v3356_v28 }
  0xdf   : > { %3144 = vmatprep.subr.bf16.mxu0 %v3410_v1 }
  0xe0   : > { %3163 = vmatpush3.bf16.msra.mxu1 %v3359_v30 }
  0xe1   : > { %3164 = vmatprep.subr.bf16.mxu1 %v3410_v1 }
  0xe2   : > { %3145 = vmatpush3.bf16.msra.mxu0 %v3358_v31 }
  0xe3   : > { %3146 = vmatprep.subr.bf16.mxu0 %v3410_v1 }
  0xe4   : > { %3165 = vmatpush3.bf16.msra.mxu1 %v3361_v35 }
  0xe5   : > { %3166 = vmatprep.subr.bf16.mxu1 %v3410_v1 }
  0xe6   : > { %3147 = vmatpush3.bf16.msra.mxu0 %v3360_v36 }
  0xe7   : > { %3148 = vmatprep.subr.bf16.mxu0 %v3410_v1 }
  0xe8   : > { %3167 = vmatpush3.bf16.msra.mxu1 %v3363_v40 }
  0xe9   : > { %3168 = vmatprep.subr.bf16.mxu1 %v3410_v1 }
  0xea   : > { %3149 = vmatpush3.bf16.msra.mxu0 %v3362_v41 }
  0xeb   : > { %3174 = vmatprep.subr.bf16.mxu0 %v3410_v1 }
  0xec   : > { %3169 = vmatpush3.bf16.msra.mxu1 %v3366_v44 }
  0xed   : > { %v333_v49 = vpop.f32.mrf.mxu0  ;;  %3151 = vmatmul.mubr.bf16.vlgmr.msra.gmra.mxu0 %v1767_v45  ;;  %3194 = vmatprep.subr.bf16.mxu1 %v3410_v1 }
  0xee   : > { %3175 = vmatpush3.bf16.msra.mxu0 %v3367_v46  ;;  %3190 = vmatprep.mubr.msk.bf16.mxu0 %vm3411_vm0, %v3410_v1 }
  0xef   : > { %v2912_v51 = vpop.f32.mrf.mxu0  ;;  %3176 = vmatprep.subr.bf16.mxu0 %v3410_v1  ;;  %v460_v53 = vpop.f32.mrf.mxu1  ;;  %3171 = vmatmul.mubr.bf16.vlgmr.msra.gmra.mxu1 %v3368_v47 }
  0xf0   : > { %v467_v54 = vadd.f32 %v460_v53, %v333_v49  ;;  %3195 = vmatpush3.bf16.msra.mxu1 %v3370_v48  ;;  %3210 = vmatprep.mubr.msk.bf16.mxu1 %vm3411_vm0, %v3410_v1 }
  0xf1   : > { %v336_v56 = vpop.f32.mrf.mxu0  ;;  %v2932_v57 = vpop.f32.mrf.mxu1  ;;  %3196 = vmatprep.subr.bf16.mxu1 %v3410_v1 }
  0xf2   : > { %v341_v58 = vadd.f32 %v336_v56, %v228_v52  ;;  %3177 = vmatpush3.bf16.msra.mxu0 %v3369_v50 }
  0xf3   : > { %v2913_v60 = vpop.f32.mrf.mxu0  ;;  %3178 = vmatprep.subr.bf16.mxu0 %v3410_v1  ;;  %v463_v61 = vpop.f32.mrf.mxu1 }
  0xf4   : > { %343 = vst [vmem:[#allocation2 + $0x8] sm:$0x3] %v341_v58  ;;  %3197 = vmatpush3.bf16.msra.mxu1 %v3372_v55 }
  0xf5   : > { %v2933_v63 = vpop.f32.mrf.mxu1  ;;  %3198 = vmatprep.subr.bf16.mxu1 %v3410_v1 }
  0xf6   : > { %3179 = vmatpush3.bf16.msra.mxu0 %v3371_v59 }
  0xf7   : > { %3180 = vmatprep.subr.bf16.mxu0 %v3410_v1 }
  0xf8   : > { %3199 = vmatpush3.bf16.msra.mxu1 %v3374_v62 }
  0xf9   : > { %3200 = vmatprep.subr.bf16.mxu1 %v3410_v1 }
  0xfa   : > { %3181 = vmatpush3.bf16.msra.mxu0 %v3373_v0 }
  0xfb   : > { %v347_v4 = vld [vmem:[#allocation2 + $0x8] sm:$0x3]  ;;  %3182 = vmatprep.subr.bf16.mxu0 %v3410_v1 }
  0xfc   : > { %v468_v5 = vadd.f32 %v463_v61, %v347_v4  ;;  %3201 = vmatpush3.bf16.msra.mxu1 %v3376_v2 }
  0xfd   : > { %3202 = vmatprep.subr.bf16.mxu1 %v3410_v1 }
  0xfe   : > { %470 = vst [vmem:[#allocation2 + $0x8] sm:$0x3] %v468_v5  ;;  %3183 = vmatpush3.bf16.msra.mxu0 %v3375_v3 }
  0xff   : > { %3184 = vmatprep.subr.bf16.mxu0 %v3410_v1 }
 0x100   : > { %3203 = vmatpush3.bf16.msra.mxu1 %v3378_v6 }
 0x101   : > { %3204 = vmatprep.subr.bf16.mxu1 %v3410_v1 }
 0x102   : > { %3185 = vmatpush3.bf16.msra.mxu0 %v3377_v8 }
 0x103   : > { %3186 = vmatprep.subr.bf16.mxu0 %v3410_v1 }
 0x104   : > { %3205 = vmatpush3.bf16.msra.mxu1 %v3380_v9 }
 0x105   : > { %3206 = vmatprep.subr.bf16.mxu1 %v3410_v1  ;;  %v474_v25 = vld [vmem:[#allocation2 + $0x8] sm:$0x3] }
 0x106   : > { %3187 = vmatpush3.bf16.msra.mxu0 %v3379_v11 }
 0x107   : > { %3188 = vmatprep.subr.bf16.mxu0 %v3410_v1 }
 0x108   : > { %3207 = vmatpush3.bf16.msra.mxu1 %v3382_v12 }
 0x109   : > { %3208 = vmatprep.subr.bf16.mxu1 %v3410_v1 }
 0x10a   : > { %3189 = vmatpush3.bf16.msra.mxu0 %v3381_v15 }
 0x10c   : > { %3209 = vmatpush3.bf16.msra.mxu1 %v3384_v17 }
 0x10d   : > { %v581_v20 = vpop.f32.mrf.mxu0  ;;  %3191 = vmatmul.mubr.bf16.vlgmr.msra.gmra.mxu0 %v2014_v18 }
 0x10e   : > { %v588_v21 = vadd.f32 %v581_v20, %v467_v54 }
 0x10f   : > { %v2952_v22 = vpop.f32.mrf.mxu0  ;;  %3211 = vmatmul.mubr.bf16.vlgmr.msra.gmra.mxu1 %v2135_v19  ;;  %v709_v23 = vpop.f32.mrf.mxu1 }
 0x110   : > { %v716_v24 = vadd.f32 %v709_v23, %v588_v21 }
 0x111   : > { %v584_v26 = vpop.f32.mrf.mxu0  ;;  %v2972_v27 = vpop.f32.mrf.mxu1 }
 0x112   : > { %v589_v28 = vadd.f32 %v584_v26, %v474_v25 }
 0x113   : > { %v2953_v29 = vpop.f32.mrf.mxu0  ;;  %v712_v30 = vpop.f32.mrf.mxu1 }
 0x114   : > { %591 = vst [vmem:[#allocation2 + $0x8] sm:$0x3] %v589_v28 }
 0x115   : > { %v2973_v31 = vpop.f32.mrf.mxu1 }
 0x11b   : > { %v595_v32 = vld [vmem:[#allocation2 + $0x8] sm:$0x3] }
 0x11c   : > { %v717_v1 = vadd.f32 %v712_v30, %v595_v32 }
 0x11e   : > { %719 = vst [vmem:[#allocation2 + $0x8] sm:$0x3] %v717_v1 }
 0x125   : > { %v723_v38 = vld [vmem:[#allocation2 + $0x8] sm:$0x3] }
 0x12d   : > { %v837_v33 = vpop.f32.mrf.mxu0 }
 0x12e   : > { %v844_v34 = vadd.f32 %v837_v33, %v716_v24 }
 0x12f   : > { %v2992_v35 = vpop.f32.mrf.mxu0  ;;  %v958_v36 = vpop.f32.mrf.mxu1 }
 0x130   : > { %v965_v37 = vadd.f32 %v958_v36, %v844_v34 }
 0x131   : > { %v840_v39 = vpop.f32.mrf.mxu0  ;;  %v3012_v40 = vpop.f32.mrf.mxu1 }
 0x132   : > { %v845_v41 = vadd.f32 %v840_v39, %v723_v38 }
 0x133   : > { %v2993_v42 = vpop.f32.mrf.mxu0  ;;  %v961_v43 = vpop.f32.mrf.mxu1 }
 0x134   : > { %847 = vst [vmem:[#allocation2 + $0x8] sm:$0x3] %v845_v41 }
 0x135   : > { %v3013_v44 = vpop.f32.mrf.mxu1 }
 0x13b   : > { %v851_v45 = vld [vmem:[#allocation2 + $0x8] sm:$0x3] }
 0x13c   : > { %v966_v46 = vadd.f32 %v961_v43, %v851_v45  ;;  %v2745_v43 = vld [vmem:[%s4044_s2] ss:$0 sm:$0xff] }
 0x13e   : > { %968 = vst [vmem:[#allocation2 + $0x8] sm:$0x3] %v966_v46 }
 0x145   : > { %v973_v52 = vld [vmem:[#allocation2 + $0x8] sm:$0x3] }
 0x14d   : > { %v1096_v47 = vpop.f32.mrf.mxu0 }
 0x14e   : > { %v1103_v48 = vadd.f32 %v1096_v47, %v965_v37 }
 0x14f   : > { %v3032_v49 = vpop.f32.mrf.mxu0  ;;  %v1216_v50 = vpop.f32.mrf.mxu1 }
 0x150   : > { %v1223_v51 = vadd.f32 %v1216_v50, %v1103_v48 }
 0x151   : > { %v1099_v53 = vpop.f32.mrf.mxu0  ;;  %v3052_v54 = vpop.f32.mrf.mxu1 }
 0x152   : > { %v1104_v55 = vadd.f32 %v1099_v53, %v973_v52 }
 0x153   : > { %v3033_v56 = vpop.f32.mrf.mxu0  ;;  %v1219_v57 = vpop.f32.mrf.mxu1 }
 0x154   : > { %1106 = vst [vmem:[#allocation2 + $0x8] sm:$0x3] %v1104_v55 }
 0x155   : > { %v3053_v58 = vpop.f32.mrf.mxu1 }
 0x15b   : > { %v1110_v59 = vld [vmem:[#allocation2 + $0x8] sm:$0x3] }
 0x15c   : > { %v1224_v60 = vadd.f32 %v1219_v57, %v1110_v59 }
 0x15e   : > { %1226 = vst [vmem:[#allocation2 + $0x8] sm:$0x3] %v1224_v60 }
 0x165   : > { %v1230_v3 = vld [vmem:[#allocation2 + $0x8] sm:$0x3] }
 0x16d   : > { %v1337_v61 = vpop.f32.mrf.mxu0 }
 0x16e   : > { %v1344_v62 = vadd.f32 %v1337_v61, %v1223_v51 }
 0x16f   : > { %v3072_v63 = vpop.f32.mrf.mxu0  ;;  %v1465_v0 = vpop.f32.mrf.mxu1 }
 0x170   : > { %v1472_v2 = vadd.f32 %v1465_v0, %v1344_v62 }
 0x171   : > { %v1340_v4 = vpop.f32.mrf.mxu0  ;;  %v3092_v5 = vpop.f32.mrf.mxu1 }
 0x172   : > { %v1345_v6 = vadd.f32 %v1340_v4, %v1230_v3 }
 0x173   : > { %v3073_v7 = vpop.f32.mrf.mxu0  ;;  %v1468_v8 = vpop.f32.mrf.mxu1 }
 0x174   : > { %1347 = vst [vmem:[#allocation2 + $0x8] sm:$0x3] %v1345_v6 }
 0x175   : > { %v3093_v9 = vpop.f32.mrf.mxu1 }
 0x17b   : > { %v1351_v10 = vld [vmem:[#allocation2 + $0x8] sm:$0x3] }
 0x17c   : > { %v1473_v11 = vadd.f32 %v1468_v8, %v1351_v10 }
 0x17e   : > { %1475 = vst [vmem:[#allocation2 + $0x8] sm:$0x3] %v1473_v11 }
 0x185   : > { %v1479_v15 = vld [vmem:[#allocation2 + $0x8] sm:$0x3] }
 0x18d   : > { %v1586_v12 = vpop.f32.mrf.mxu0 }
 0x18e   : > { %v1593_v35 = vadd.f32 %v1586_v12, %v1472_v2 }
 0x18f   : > { %v3112_v13 = vpop.f32.mrf.mxu0  ;;  %v1714_v14 = vpop.f32.mrf.mxu1 }
 0x190   : > { %v1721_v36 = vadd.f32 %v1714_v14, %v1593_v35 }
 0x191   : > { %v1589_v16 = vpop.f32.mrf.mxu0  ;;  %v3132_v17 = vpop.f32.mrf.mxu1 }
 0x192   : > { %v1594_v18 = vadd.f32 %v1589_v16, %v1479_v15 }
 0x193   : > { %v3113_v19 = vpop.f32.mrf.mxu0  ;;  %v1717_v20 = vpop.f32.mrf.mxu1 }
 0x194   : > { %1596 = vst [vmem:[#allocation2 + $0x8] sm:$0x3] %v1594_v18 }
 0x195   : > { %v3133_v21 = vpop.f32.mrf.mxu1 }
 0x19b   : > { %v1600_v22 = vld [vmem:[#allocation2 + $0x8] sm:$0x3] }
 0x19c   : > { %v1722_v23 = vadd.f32 %v1717_v20, %v1600_v22 }
 0x19e   : > { %1724 = vst [vmem:[#allocation2 + $0x8] sm:$0x3] %v1722_v23 }
 0x1a5   : > { %v1729_v27 = vld [vmem:[#allocation2 + $0x8] sm:$0x3] }
 0x1ad   : > { %v1851_v24 = vpop.f32.mrf.mxu0 }
 0x1ae   : > { %v1858_v37 = vadd.f32 %v1851_v24, %v1721_v36 }
 0x1af   : > { %v3152_v25 = vpop.f32.mrf.mxu0  ;;  %v1971_v26 = vpop.f32.mrf.mxu1 }
 0x1b0   : > { %v1978_v38 = vadd.f32 %v1971_v26, %v1858_v37 }
 0x1b1   : > { %v1854_v28 = vpop.f32.mrf.mxu0  ;;  %v3172_v29 = vpop.f32.mrf.mxu1 }
 0x1b2   : > { %v1859_v30 = vadd.f32 %v1854_v28, %v1729_v27 }
 0x1b3   : > { %v3153_v31 = vpop.f32.mrf.mxu0  ;;  %v1974_v32 = vpop.f32.mrf.mxu1 }
 0x1b4   : > { %1861 = vst [vmem:[#allocation2 + $0x8] sm:$0x3] %v1859_v30 }
 0x1b5   : > { %v3173_v1 = vpop.f32.mrf.mxu1 }
 0x1bb   : > { %v1865_v33 = vld [vmem:[#allocation2 + $0x8] sm:$0x3] }
 0x1bc   : > { %v1979_v34 = vadd.f32 %v1974_v32, %v1865_v33 }
 0x1be   : > { %1981 = vst [vmem:[#allocation2 + $0x8] sm:$0x3] %v1979_v34 }
 0x1c5   : > { %v1985_v45 = vld [vmem:[#allocation2 + $0x8] sm:$0x3] }
 0x1cd   : > { %v2098_v39 = vpop.f32.mrf.mxu0 }
 0x1ce   : > { %v2105_v40 = vadd.f32 %v2098_v39, %v1978_v38 }
 0x1cf   : > { %v3192_v41 = vpop.f32.mrf.mxu0  ;;  %v2219_v42 = vpop.f32.mrf.mxu1 }
 0x1d0   : > { %v2226_v44 = vadd.f32 %v2219_v42, %v2105_v40 }
 0x1d1   : > { %v2101_v46 = vpop.f32.mrf.mxu0  ;;  %v3212_v47 = vpop.f32.mrf.mxu1 }
 0x1d2   : > { %v2106_v48 = vadd.f32 %v2101_v46, %v1985_v45  ;;  %v2239_v49 = vadd.f32 %v2745_v43, %v2226_v44 }
 0x1d3   : > { %v3193_v50 = vpop.f32.mrf.mxu0  ;;  %v2222_v51 = vpop.f32.mrf.mxu1 }
 0x1d4   : > { %2108 = vst [vmem:[#allocation2 + $0x8] sm:$0x3] %v2106_v48  ;;  %2241 = vst [vmem:[%s221_s25] sm:$0xff] %v2239_v49 }
 0x1d5   : > { %v3213_v52 = vpop.f32.mrf.mxu1 }
 0x1db   : > { %v2112_v53 = vld [vmem:[#allocation2 + $0x8] sm:$0x3] }
 0x1dc   : > { %v2227_v54 = vadd.f32 %v2222_v51, %v2112_v53 }
 0x1de   : > { %2229 = vst [vmem:[#allocation2 + $0x8] sm:$0x3] %v2227_v54 }
 0x1e5   : > { %v2231_v55 = vld [vmem:[#allocation2 + $0x8] sm:$0x3] }
 0x1e6   : > { %v2240_v56 = vadd.f32 %v2745_v43, %v2231_v55 }
 0x1e8   : > { %2242 = vst [vmem:[%s221_s25 + $0x8] sm:$0x3] %v2240_v56 }
 0x1e9 PF: > { %s13_s14 = sadd.s32 1, %s3408_s14   ;;  %s4046_s12 = smov %s3404_s13 }
 0x1ea   : > { %p10_p5 = scmp.ge.s32.totalorder %s13_s14, 4   ;;  %s4047_s13 = smov %s4049_s15 }
 0x1ec   :  { %12 = sbr.rel (!%p10_p5) target bundleno = 2 (0x2), region = 83 }

</bundles_post_ra>
